<compile_context>
chip_gen: v7x
topology: tpu7x:2x2x1
jax: 0.10.0
libtpu: 0.0.40
codegen_flags: <defaults>
</compile_context>

<pallas_src>
import functools

import jax
import jax.numpy as jnp
from jax.experimental import pallas as pl
from jax.experimental.pallas import tpu as pltpu


# ----------------------------------------------------------------------------
# In-kernel fused GRU cell (PyTorch gate order r, z, n) -- one MXU matmul.
# ----------------------------------------------------------------------------

def _gru_cell(x, h, w_ref, b_ref):
    """One GRU step as a single [x || h] @ W_fused matmul.

    w_ref: (in+H, 4H) = [[Wx_rz, Wx_n, 0   ],
                         [Wh_rz, 0,    Wh_n]]
    b_ref: (bs_p, 4H) = broadcast([bih_rz + bhh_rz, bih_n, bhh_n])
    so g[:, :2H]   = x@Wx_rz + h@Wh_rz + b_rz
       g[:, 2H:3H] = x@Wx_n  + bih_n
       g[:, 3H:]   = h@Wh_n  + bhh_n
    """
    H = h.shape[-1]
    g = jnp.dot(jnp.concatenate([x, h], axis=-1), w_ref[...],
                preferred_element_type=jnp.float32) + b_ref[...]
    rz = jax.nn.sigmoid(g[:, :2 * H])
    r = rz[:, :H]
    z = rz[:, H:]
    n = jnp.tanh(g[:, 2 * H:3 * H] + r * g[:, 3 * H:])
    return (1.0 - z) * n + z * h


# ----------------------------------------------------------------------------
# Single fused kernel: full bidirectional encoder + full greedy-decode loop.
# ----------------------------------------------------------------------------

def _seq2seq_kernel(x_ref,
                    we0f_ref, be0f_ref, we0b_ref, be0b_ref,
                    we1f_ref, be1f_ref, we1b_ref, be1b_ref,
                    wd0_ref, bd0_ref, wd1_ref, bd1_ref,
                    wout_ref, bout_ref,
                    logp_ref):
    sl, bs_p, _ = x_ref.shape
    nh = be0f_ref.shape[-1] // 4
    H2 = bd0_ref.shape[-1] // 4
    v_emb = wd0_ref.shape[0] - H2
    v_pad = wout_ref.shape[-1]
    out_sl = logp_ref.shape[0]

    # ---- Encoder: 2 layers x 2 directions, time loop statically unrolled. ----
    xs0 = [x_ref[t] for t in range(sl)]

    def run_direction(xs, w_ref, b_ref, reverse):
        h = jnp.zeros((bs_p, nh), jnp.float32)           # initHidden = zeros
        outs = [None] * sl
        for t in (range(sl - 1, -1, -1) if reverse else range(sl)):
            h = _gru_cell(xs[t], h, w_ref, b_ref)
            outs[t] = h
        return outs, h                                    # per-t hidden, final h

    of0, hf0 = run_direction(xs0, we0f_ref, be0f_ref, reverse=False)
    ob0, hb0 = run_direction(xs0, we0b_ref, be0b_ref, reverse=True)
    xs1 = [jnp.concatenate([of0[t], ob0[t]], axis=-1) for t in range(sl)]
    _, hf1 = run_direction(xs1, we1f_ref, be1f_ref, reverse=False)
    _, hb1 = run_direction(xs1, we1b_ref, be1b_ref, reverse=True)
    # TODO(synk): on v7x the independent fwd/bwd recurrences could run on the
    #             two TensorCores (pl.core_map); single-core here.

    # h_n.view(nl,2,bs,nh).permute(0,2,1,3).view(nl,bs,2nh) == concat(fwd, bwd).
    h0 = jnp.concatenate([hf0, hb0], axis=-1)             # decoder layer-0 state
    h1 = jnp.concatenate([hf1, hb1], axis=-1)             # decoder layer-1 state

    # ---- Greedy decoder: out_sl steps, statically unrolled, 3 matmuls/step. ----
    # TODO(synk): the PyTorch early break when all argmax tokens == 1 is not
    #             replicated; a fixed number of out_sl steps is always run.
    col = jax.lax.broadcasted_iota(jnp.int32, (bs_p, v_emb), 1).astype(jnp.float32)
    lane = jax.lax.broadcasted_iota(jnp.int32, (bs_p, v_pad), 1).astype(jnp.float32)
    tok = jnp.zeros((bs_p, 1), jnp.float32)               # dec_inp = zeros

    for i in range(out_sl):
        onehot = (col == tok).astype(jnp.float32)         # (bs_p, v_emb)
        # Embedding lookup + layer-0 input projection folded into wd0 (E @ Wx0).
        h0 = _gru_cell(onehot, h0, wd0_ref, bd0_ref)
        h1 = _gru_cell(h0, h1, wd1_ref, bd1_ref)
        # Output linear + log_softmax; vocab padded to 128 lanes with -1e30
        # bias columns so the store is lane-dense and pads never win argmax.
        logits = jnp.dot(h1, wout_ref[...],
                         preferred_element_type=jnp.float32) + bout_ref[...]
        m = jnp.max(logits, axis=-1, keepdims=True)
        s = logits - m
        lse = jnp.log(jnp.sum(jnp.exp(s), axis=-1, keepdims=True))
        logp_ref[i] = s - lse
        # Greedy next token = argmax (first-max tie-break).
        tok = jnp.min(jnp.where(logits == m, lane, float(v_pad)),
                      axis=-1, keepdims=True)


# ----------------------------------------------------------------------------
# Parameters (PyTorch GRU layout, weights stored pre-transposed)
# ----------------------------------------------------------------------------

def _uniform(key, shape, scale):
    return jax.random.uniform(key, shape, jnp.float32, minval=-scale, maxval=scale)


def init_gru_layer(key, in_sz, H):
    """wih_t (in_sz, 3H), whh_t (H, 3H), bih/bhh (1, 3H). Gate order r, z, n."""
    k = 1.0 / jnp.sqrt(H)
    k1, k2, k3, k4 = jax.random.split(key, 4)
    return (_uniform(k1, (in_sz, 3 * H), k), _uniform(k2, (H, 3 * H), k),
            _uniform(k3, (1, 3 * H), k), _uniform(k4, (1, 3 * H), k))


def init_params(key, vocab_en, vocab_spql, em_sz, nh, nl=2):
    keys = jax.random.split(key, 16)
    params = {}

    # Embeddings (padding_idx=1 -> zero row, as nn.Embedding(padding_idx=1)).
    emb_enc = jax.random.normal(keys[0], (vocab_en, em_sz), jnp.float32)
    params["emb_enc"] = emb_enc.at[1].set(0.0)
    emb_dec = jax.random.normal(keys[1], (vocab_spql, em_sz), jnp.float32)
    params["emb_dec"] = emb_dec.at[1].set(0.0)

    # Encoder: bidirectional, nl layers, hidden nh (layer0 in em_sz, layer1 in 2nh).
    params["enc"] = []
    for layer in range(nl):
        in_sz = em_sz if layer == 0 else 2 * nh
        fwd = init_gru_layer(keys[2 + 2 * layer], in_sz, nh)
        bwd = init_gru_layer(keys[3 + 2 * layer], in_sz, nh)
        params["enc"].append((fwd, bwd))

    # Decoder: unidirectional, nl layers, hidden 2*nh.
    params["dec"] = []
    for layer in range(nl):
        in_sz = em_sz if layer == 0 else 2 * nh
        params["dec"].append(init_gru_layer(keys[6 + layer], in_sz, 2 * nh))

    # Output linear (stored transposed).
    k = 1.0 / jnp.sqrt(2 * nh)
    params["w_out_t"] = _uniform(keys[8], (2 * nh, vocab_spql), k)
    params["b_out"] = _uniform(keys[9], (1, vocab_spql), k)
    return params


def fuse_gru(wih_t, whh_t, bih, bhh, bs_p):
    """Pack a PyTorch-layout GRU cell for the single-matmul kernel cell.

    Returns
      w: (in+H, 4H) = [[Wx_rz, Wx_n, 0], [Wh_rz, 0, Wh_n]]
      b: (bs_p, 4H) = broadcast([bih_rz + bhh_rz, bih_n, bhh_n])
    """
    in_sz = wih_t.shape[0]
    H = whh_t.shape[0]
    w = jnp.zeros((in_sz + H, 4 * H), jnp.float32)
    w = w.at[:in_sz, :2 * H].set(wih_t[:, :2 * H])
    w = w.at[:in_sz, 2 * H:3 * H].set(wih_t[:, 2 * H:])
    w = w.at[in_sz:, :2 * H].set(whh_t[:, :2 * H])
    w = w.at[in_sz:, 3 * H:].set(whh_t[:, 2 * H:])
    b = jnp.concatenate([bih[:, :2 * H] + bhh[:, :2 * H],
                         bih[:, 2 * H:], bhh[:, 2 * H:]], axis=-1)
    return w, jnp.broadcast_to(b, (bs_p, 4 * H))


# ----------------------------------------------------------------------------
# Forward pass (wrapper: embedding gather, weight packing, one pallas_call)
# ----------------------------------------------------------------------------

def seq2seq_forward(params, inp, *, em_sz, nh, nl, out_sl, vocab_spql):
    assert nl == 2, "kernel is written for nl == 2 (module default)"
    assert params["emb_enc"].shape[1] == em_sz
    sl, bs = inp.shape
    bs_p = max(8, ((bs + 7) // 8) * 8)                 # pad batch to f32 sublanes
    H2 = 2 * nh
    v_pad = ((vocab_spql + 127) // 128) * 128          # lane-dense logit width
    v_emb = ((vocab_spql + 7) // 8) * 8                # aligned one-hot K dim

    # Encoder embedding (dropout = identity in eval); pad batch with zeros.
    emb_in = jnp.take(params["emb_enc"], inp, axis=0)            # (sl, bs, em_sz)
    x = jnp.pad(emb_in, ((0, 0), (0, bs_p - bs), (0, 0)))        # (sl, bs_p, em_sz)

    # Fused encoder weights (one matmul per cell).
    (e0f, e0b), (e1f, e1b) = params["enc"]
    we0f, be0f = fuse_gru(*e0f, bs_p)
    we0b, be0b = fuse_gru(*e0b, bs_p)
    we1f, be1f = fuse_gru(*e1f, bs_p)
    we1b, be1b = fuse_gru(*e1b, bs_p)

    # Decoder layer 0: fold the embedding table into the input projection so
    # the in-kernel step is onehot @ (E @ Wx0) -- one matmul instead of three.
    emb_dec_pad = jnp.pad(params["emb_dec"], ((0, v_emb - vocab_spql), (0, 0)))
    d0_wih, d0_whh, d0_bih, d0_bhh = params["dec"][0]
    ew0 = emb_dec_pad @ d0_wih                                   # (v_emb, 3*H2)
    wd0, bd0 = fuse_gru(ew0, d0_whh, d0_bih, d0_bhh, bs_p)
    wd1, bd1 = fuse_gru(*params["dec"][1], bs_p)

    # Output linear: lane-dense (vocab padded to 128) with -1e30 bias columns.
    w_out_pad = jnp.pad(params["w_out_t"], ((0, 0), (0, v_pad - vocab_spql)))
    b_out_pad = jnp.pad(params["b_out"], ((0, 0), (0, v_pad - vocab_spql)),
                        constant_values=-1e30)
    b_out_bcast = jnp.broadcast_to(b_out_pad, (bs_p, v_pad))

    args = (x, we0f, be0f, we0b, be0b, we1f, be1f, we1b, be1b,
            wd0, bd0, wd1, bd1, w_out_pad, b_out_bcast)

    # Entire forward pass (encoder + greedy decode) in ONE gridless kernel:
    # whole arrays live in VMEM, the only HBM write is the final log-prob slab.
    logp = pl.pallas_call(
        _seq2seq_kernel,
        out_shape=jax.ShapeDtypeStruct((out_sl, bs_p, v_pad), jnp.float32),
        in_specs=[pl.BlockSpec(memory_space=pltpu.MemorySpace.VMEM)] * len(args),
        out_specs=pl.BlockSpec(memory_space=pltpu.MemorySpace.VMEM),
    )(*args)
    return logp[:, :bs, :vocab_spql]


# ----------------------------------------------------------------------------
# Pure-JAX reference (mirrors the PyTorch module math exactly)
# ----------------------------------------------------------------------------

def _ref_gru_cell(x, h, wih_t, whh_t, bih, bhh):
    H = h.shape[-1]
    gi = x @ wih_t + bih
    gh = h @ whh_t + bhh
    r = jax.nn.sigmoid(gi[:, :H] + gh[:, :H])
    z = jax.nn.sigmoid(gi[:, H:2 * H] + gh[:, H:2 * H])
    n = jnp.tanh(gi[:, 2 * H:] + r * gh[:, 2 * H:])
    return (1.0 - z) * n + z * h


def _ref_run_dir(xs, h0, p, reverse):
    if reverse:
        xs = xs[::-1]
    def step(h, x):
        h = _ref_gru_cell(x, h, *p)
        return h, h
    h_last, outs = jax.lax.scan(step, h0, xs)
    if reverse:
        outs = outs[::-1]
    return outs, h_last


def reference_forward(params, inp, *, em_sz, nh, nl, out_sl, vocab_spql):
    sl, bs = inp.shape
    x = jnp.take(params["emb_enc"], inp, axis=0)
    h_fin = []
    for layer in range(nl):
        fwd_p, bwd_p = params["enc"][layer]
        h0 = jnp.zeros((bs, nh), jnp.float32)
        of, hf = _ref_run_dir(x, h0, fwd_p, False)
        ob, hb = _ref_run_dir(x, h0, bwd_p, True)
        x = jnp.concatenate([of, ob], axis=-1)
        h_fin.append(jnp.concatenate([hf, hb], axis=-1))

    dec_l0, dec_l1 = params["dec"]

    def dec_step(carry, _):
        tok, h0, h1 = carry
        emb = jnp.take(params["emb_dec"], tok, axis=0)
        h0 = _ref_gru_cell(emb, h0, *dec_l0)
        h1 = _ref_gru_cell(h0, h1, *dec_l1)
        logits = h1 @ params["w_out_t"] + params["b_out"]
        logp = jax.nn.log_softmax(logits, axis=-1)
        tok = jnp.argmax(logp, axis=-1).astype(jnp.int32)
        return (tok, h0, h1), logp

    (_, _, _), res = jax.lax.scan(
        dec_step, (jnp.zeros((bs,), jnp.int32), h_fin[0], h_fin[1]),
        None, length=out_sl)
    return res


# ----------------------------------------------------------------------------
# Main
# ----------------------------------------------------------------------------

if __name__ == "__main__":
    SL, BS = 8, 4
    EM_SZ, NH, NL = 16, 32, 2
    VOCAB_EN, VOCAB_SPQL = 20, 12
    OUT_SL = 8

    key = jax.random.PRNGKey(0)
    k_param, k_inp = jax.random.split(key)

    params = init_params(k_param, VOCAB_EN, VOCAB_SPQL, EM_SZ, NH, NL)
    inp = jax.random.randint(k_inp, (SL, BS), 0, VOCAB_EN, dtype=jnp.int32)

    fwd = jax.jit(functools.partial(
        seq2seq_forward, em_sz=EM_SZ, nh=NH, nl=NL,
        out_sl=OUT_SL, vocab_spql=VOCAB_SPQL))
    out = jax.block_until_ready(fwd(params, inp))

    assert out.shape == (OUT_SL, BS, VOCAB_SPQL)
    assert out.dtype == jnp.float32
    # log_softmax rows must sum to ~1 after exp.
    assert bool(jnp.allclose(jnp.sum(jnp.exp(out), axis=-1), 1.0, atol=1e-4))

    # Numerical check against a pure-JAX reference of the PyTorch forward.
    ref = jax.jit(functools.partial(
        reference_forward, em_sz=EM_SZ, nh=NH, nl=NL,
        out_sl=OUT_SL, vocab_spql=VOCAB_SPQL))(params, inp)
    ref = jax.block_until_ready(ref)
    assert bool(jnp.allclose(out, ref, atol=1e-3, rtol=1e-3)), \
        float(jnp.max(jnp.abs(out - ref)))

    print("KERNEL_OK")
</pallas_src>

<mosaic_0001>
module attributes {stable_mosaic.version = 11 : i64} {
  func.func @_seq2seq_kernel(%arg0: memref<8x8x16xf32, #tpu.memory_space<vmem>>, %arg1: memref<48x128xf32, #tpu.memory_space<vmem>>, %arg2: memref<8x128xf32, #tpu.memory_space<vmem>>, %arg3: memref<48x128xf32, #tpu.memory_space<vmem>>, %arg4: memref<8x128xf32, #tpu.memory_space<vmem>>, %arg5: memref<96x128xf32, #tpu.memory_space<vmem>>, %arg6: memref<8x128xf32, #tpu.memory_space<vmem>>, %arg7: memref<96x128xf32, #tpu.memory_space<vmem>>, %arg8: memref<8x128xf32, #tpu.memory_space<vmem>>, %arg9: memref<80x256xf32, #tpu.memory_space<vmem>>, %arg10: memref<8x256xf32, #tpu.memory_space<vmem>>, %arg11: memref<128x256xf32, #tpu.memory_space<vmem>>, %arg12: memref<8x256xf32, #tpu.memory_space<vmem>>, %arg13: memref<64x128xf32, #tpu.memory_space<vmem>>, %arg14: memref<8x128xf32, #tpu.memory_space<vmem>>, %arg15: memref<8x8x128xf32, #tpu.memory_space<vmem>>) attributes {dimension_semantics = [], scalar_prefetch = 0 : i64, scratch_operands = 0 : i64, tpu.core_type = #tpu.core_type<tc>} {
    %c0 = arith.constant 0 : index
    %c0_0 = arith.constant 0 : index
    %c0_1 = arith.constant 0 : index
    %0 = vector.load %arg0[%c0, %c0_0, %c0_1] : memref<8x8x16xf32, #tpu.memory_space<vmem>>, vector<1x8x16xf32>
    %1 = vector.shape_cast %0 : vector<1x8x16xf32> to vector<8x16xf32>
    %c1 = arith.constant 1 : index
    %c0_2 = arith.constant 0 : index
    %c0_3 = arith.constant 0 : index
    %2 = vector.load %arg0[%c1, %c0_2, %c0_3] : memref<8x8x16xf32, #tpu.memory_space<vmem>>, vector<1x8x16xf32>
    %3 = vector.shape_cast %2 : vector<1x8x16xf32> to vector<8x16xf32>
    %c2 = arith.constant 2 : index
    %c0_4 = arith.constant 0 : index
    %c0_5 = arith.constant 0 : index
    %4 = vector.load %arg0[%c2, %c0_4, %c0_5] : memref<8x8x16xf32, #tpu.memory_space<vmem>>, vector<1x8x16xf32>
    %5 = vector.shape_cast %4 : vector<1x8x16xf32> to vector<8x16xf32>
    %c3 = arith.constant 3 : index
    %c0_6 = arith.constant 0 : index
    %c0_7 = arith.constant 0 : index
    %6 = vector.load %arg0[%c3, %c0_6, %c0_7] : memref<8x8x16xf32, #tpu.memory_space<vmem>>, vector<1x8x16xf32>
    %7 = vector.shape_cast %6 : vector<1x8x16xf32> to vector<8x16xf32>
    %c4 = arith.constant 4 : index
    %c0_8 = arith.constant 0 : index
    %c0_9 = arith.constant 0 : index
    %8 = vector.load %arg0[%c4, %c0_8, %c0_9] : memref<8x8x16xf32, #tpu.memory_space<vmem>>, vector<1x8x16xf32>
    %9 = vector.shape_cast %8 : vector<1x8x16xf32> to vector<8x16xf32>
    %c5 = arith.constant 5 : index
    %c0_10 = arith.constant 0 : index
    %c0_11 = arith.constant 0 : index
    %10 = vector.load %arg0[%c5, %c0_10, %c0_11] : memref<8x8x16xf32, #tpu.memory_space<vmem>>, vector<1x8x16xf32>
    %11 = vector.shape_cast %10 : vector<1x8x16xf32> to vector<8x16xf32>
    %c6 = arith.constant 6 : index
    %c0_12 = arith.constant 0 : index
    %c0_13 = arith.constant 0 : index
    %12 = vector.load %arg0[%c6, %c0_12, %c0_13] : memref<8x8x16xf32, #tpu.memory_space<vmem>>, vector<1x8x16xf32>
    %13 = vector.shape_cast %12 : vector<1x8x16xf32> to vector<8x16xf32>
    %c7 = arith.constant 7 : index
    %c0_14 = arith.constant 0 : index
    %c0_15 = arith.constant 0 : index
    %14 = vector.load %arg0[%c7, %c0_14, %c0_15] : memref<8x8x16xf32, #tpu.memory_space<vmem>>, vector<1x8x16xf32>
    %15 = vector.shape_cast %14 : vector<1x8x16xf32> to vector<8x16xf32>
    %cst = arith.constant 0.000000e+00 : f32
    %16 = vector.broadcast %cst : f32 to vector<8x32xf32>
    %17 = tpu.concatenate %1, %16 in 1 : vector<8x16xf32>, vector<8x32xf32> -> vector<8x48xf32>
    %c0_16 = arith.constant 0 : index
    %c0_17 = arith.constant 0 : index
    %18 = vector.load %arg1[%c0_16, %c0_17] : memref<48x128xf32, #tpu.memory_space<vmem>>, vector<48x128xf32>
    %cst_18 = arith.constant dense<0.000000e+00> : vector<8x128xf32>
    %19 = tpu.matmul %17, %18, %cst_18 {dimension_numbers = #tpu.dot_dimension_numbers<[1], [0], [0], [1], [0, 0, 1, 1], [], []>} : vector<8x48xf32>, vector<48x128xf32>, vector<8x128xf32> -> vector<8x128xf32>
    %c0_19 = arith.constant 0 : index
    %c0_20 = arith.constant 0 : index
    %20 = vector.load %arg2[%c0_19, %c0_20] : memref<8x128xf32, #tpu.memory_space<vmem>>, vector<8x128xf32>
    %21 = arith.addf %19, %20 : vector<8x128xf32>
    %22 = vector.extract_strided_slice %21 {offsets = [0, 0], sizes = [8, 64], strides = [1, 1]} : vector<8x128xf32> to vector<8x64xf32>
    %23 = arith.negf %22 : vector<8x64xf32>
    %24 = math.exp %23 : vector<8x64xf32>
    %cst_21 = arith.constant 1.000000e+00 : f32
    %25 = vector.broadcast %cst_21 : f32 to vector<8x64xf32>
    %26 = arith.addf %25, %24 : vector<8x64xf32>
    %27 = arith.divf %25, %26 : vector<8x64xf32>
    %28 = vector.extract_strided_slice %27 {offsets = [0, 0], sizes = [8, 32], strides = [1, 1]} : vector<8x64xf32> to vector<8x32xf32>
    %29 = vector.extract_strided_slice %27 {offsets = [0, 32], sizes = [8, 32], strides = [1, 1]} : vector<8x64xf32> to vector<8x32xf32>
    %30 = vector.extract_strided_slice %21 {offsets = [0, 64], sizes = [8, 32], strides = [1, 1]} : vector<8x128xf32> to vector<8x32xf32>
    %31 = vector.extract_strided_slice %21 {offsets = [0, 96], sizes = [8, 32], strides = [1, 1]} : vector<8x128xf32> to vector<8x32xf32>
    %32 = arith.mulf %28, %31 : vector<8x32xf32>
    %33 = arith.addf %30, %32 : vector<8x32xf32>
    %34 = math.tanh %33 : vector<8x32xf32>
    %cst_22 = arith.constant 1.000000e+00 : f32
    %35 = vector.broadcast %cst_22 : f32 to vector<8x32xf32>
    %36 = arith.subf %35, %29 : vector<8x32xf32>
    %37 = arith.mulf %36, %34 : vector<8x32xf32>
    %38 = arith.mulf %29, %16 : vector<8x32xf32>
    %39 = arith.addf %37, %38 : vector<8x32xf32>
    %40 = tpu.concatenate %3, %39 in 1 : vector<8x16xf32>, vector<8x32xf32> -> vector<8x48xf32>
    %c0_23 = arith.constant 0 : index
    %c0_24 = arith.constant 0 : index
    %41 = vector.load %arg1[%c0_23, %c0_24] : memref<48x128xf32, #tpu.memory_space<vmem>>, vector<48x128xf32>
    %cst_25 = arith.constant dense<0.000000e+00> : vector<8x128xf32>
    %42 = tpu.matmul %40, %41, %cst_25 {dimension_numbers = #tpu.dot_dimension_numbers<[1], [0], [0], [1], [0, 0, 1, 1], [], []>} : vector<8x48xf32>, vector<48x128xf32>, vector<8x128xf32> -> vector<8x128xf32>
    %c0_26 = arith.constant 0 : index
    %c0_27 = arith.constant 0 : index
    %43 = vector.load %arg2[%c0_26, %c0_27] : memref<8x128xf32, #tpu.memory_space<vmem>>, vector<8x128xf32>
    %44 = arith.addf %42, %43 : vector<8x128xf32>
    %45 = vector.extract_strided_slice %44 {offsets = [0, 0], sizes = [8, 64], strides = [1, 1]} : vector<8x128xf32> to vector<8x64xf32>
    %46 = arith.negf %45 : vector<8x64xf32>
    %47 = math.exp %46 : vector<8x64xf32>
    %cst_28 = arith.constant 1.000000e+00 : f32
    %48 = vector.broadcast %cst_28 : f32 to vector<8x64xf32>
    %49 = arith.addf %48, %47 : vector<8x64xf32>
    %50 = arith.divf %48, %49 : vector<8x64xf32>
    %51 = vector.extract_strided_slice %50 {offsets = [0, 0], sizes = [8, 32], strides = [1, 1]} : vector<8x64xf32> to vector<8x32xf32>
    %52 = vector.extract_strided_slice %50 {offsets = [0, 32], sizes = [8, 32], strides = [1, 1]} : vector<8x64xf32> to vector<8x32xf32>
    %53 = vector.extract_strided_slice %44 {offsets = [0, 64], sizes = [8, 32], strides = [1, 1]} : vector<8x128xf32> to vector<8x32xf32>
    %54 = vector.extract_strided_slice %44 {offsets = [0, 96], sizes = [8, 32], strides = [1, 1]} : vector<8x128xf32> to vector<8x32xf32>
    %55 = arith.mulf %51, %54 : vector<8x32xf32>
    %56 = arith.addf %53, %55 : vector<8x32xf32>
    %57 = math.tanh %56 : vector<8x32xf32>
    %cst_29 = arith.constant 1.000000e+00 : f32
    %58 = vector.broadcast %cst_29 : f32 to vector<8x32xf32>
    %59 = arith.subf %58, %52 : vector<8x32xf32>
    %60 = arith.mulf %59, %57 : vector<8x32xf32>
    %61 = arith.mulf %52, %39 : vector<8x32xf32>
    %62 = arith.addf %60, %61 : vector<8x32xf32>
    %63 = tpu.concatenate %5, %62 in 1 : vector<8x16xf32>, vector<8x32xf32> -> vector<8x48xf32>
    %c0_30 = arith.constant 0 : index
    %c0_31 = arith.constant 0 : index
    %64 = vector.load %arg1[%c0_30, %c0_31] : memref<48x128xf32, #tpu.memory_space<vmem>>, vector<48x128xf32>
    %cst_32 = arith.constant dense<0.000000e+00> : vector<8x128xf32>
    %65 = tpu.matmul %63, %64, %cst_32 {dimension_numbers = #tpu.dot_dimension_numbers<[1], [0], [0], [1], [0, 0, 1, 1], [], []>} : vector<8x48xf32>, vector<48x128xf32>, vector<8x128xf32> -> vector<8x128xf32>
    %c0_33 = arith.constant 0 : index
    %c0_34 = arith.constant 0 : index
    %66 = vector.load %arg2[%c0_33, %c0_34] : memref<8x128xf32, #tpu.memory_space<vmem>>, vector<8x128xf32>
    %67 = arith.addf %65, %66 : vector<8x128xf32>
    %68 = vector.extract_strided_slice %67 {offsets = [0, 0], sizes = [8, 64], strides = [1, 1]} : vector<8x128xf32> to vector<8x64xf32>
    %69 = arith.negf %68 : vector<8x64xf32>
    %70 = math.exp %69 : vector<8x64xf32>
    %cst_35 = arith.constant 1.000000e+00 : f32
    %71 = vector.broadcast %cst_35 : f32 to vector<8x64xf32>
    %72 = arith.addf %71, %70 : vector<8x64xf32>
    %73 = arith.divf %71, %72 : vector<8x64xf32>
    %74 = vector.extract_strided_slice %73 {offsets = [0, 0], sizes = [8, 32], strides = [1, 1]} : vector<8x64xf32> to vector<8x32xf32>
    %75 = vector.extract_strided_slice %73 {offsets = [0, 32], sizes = [8, 32], strides = [1, 1]} : vector<8x64xf32> to vector<8x32xf32>
    %76 = vector.extract_strided_slice %67 {offsets = [0, 64], sizes = [8, 32], strides = [1, 1]} : vector<8x128xf32> to vector<8x32xf32>
    %77 = vector.extract_strided_slice %67 {offsets = [0, 96], sizes = [8, 32], strides = [1, 1]} : vector<8x128xf32> to vector<8x32xf32>
    %78 = arith.mulf %74, %77 : vector<8x32xf32>
    %79 = arith.addf %76, %78 : vector<8x32xf32>
    %80 = math.tanh %79 : vector<8x32xf32>
    %cst_36 = arith.constant 1.000000e+00 : f32
    %81 = vector.broadcast %cst_36 : f32 to vector<8x32xf32>
    %82 = arith.subf %81, %75 : vector<8x32xf32>
    %83 = arith.mulf %82, %80 : vector<8x32xf32>
    %84 = arith.mulf %75, %62 : vector<8x32xf32>
    %85 = arith.addf %83, %84 : vector<8x32xf32>
    %86 = tpu.concatenate %7, %85 in 1 : vector<8x16xf32>, vector<8x32xf32> -> vector<8x48xf32>
    %c0_37 = arith.constant 0 : index
    %c0_38 = arith.constant 0 : index
    %87 = vector.load %arg1[%c0_37, %c0_38] : memref<48x128xf32, #tpu.memory_space<vmem>>, vector<48x128xf32>
    %cst_39 = arith.constant dense<0.000000e+00> : vector<8x128xf32>
    %88 = tpu.matmul %86, %87, %cst_39 {dimension_numbers = #tpu.dot_dimension_numbers<[1], [0], [0], [1], [0, 0, 1, 1], [], []>} : vector<8x48xf32>, vector<48x128xf32>, vector<8x128xf32> -> vector<8x128xf32>
    %c0_40 = arith.constant 0 : index
    %c0_41 = arith.constant 0 : index
    %89 = vector.load %arg2[%c0_40, %c0_41] : memref<8x128xf32, #tpu.memory_space<vmem>>, vector<8x128xf32>
    %90 = arith.addf %88, %89 : vector<8x128xf32>
    %91 = vector.extract_strided_slice %90 {offsets = [0, 0], sizes = [8, 64], strides = [1, 1]} : vector<8x128xf32> to vector<8x64xf32>
    %92 = arith.negf %91 : vector<8x64xf32>
    %93 = math.exp %92 : vector<8x64xf32>
    %cst_42 = arith.constant 1.000000e+00 : f32
    %94 = vector.broadcast %cst_42 : f32 to vector<8x64xf32>
    %95 = arith.addf %94, %93 : vector<8x64xf32>
    %96 = arith.divf %94, %95 : vector<8x64xf32>
    %97 = vector.extract_strided_slice %96 {offsets = [0, 0], sizes = [8, 32], strides = [1, 1]} : vector<8x64xf32> to vector<8x32xf32>
    %98 = vector.extract_strided_slice %96 {offsets = [0, 32], sizes = [8, 32], strides = [1, 1]} : vector<8x64xf32> to vector<8x32xf32>
    %99 = vector.extract_strided_slice %90 {offsets = [0, 64], sizes = [8, 32], strides = [1, 1]} : vector<8x128xf32> to vector<8x32xf32>
    %100 = vector.extract_strided_slice %90 {offsets = [0, 96], sizes = [8, 32], strides = [1, 1]} : vector<8x128xf32> to vector<8x32xf32>
    %101 = arith.mulf %97, %100 : vector<8x32xf32>
    %102 = arith.addf %99, %101 : vector<8x32xf32>
    %103 = math.tanh %102 : vector<8x32xf32>
    %cst_43 = arith.constant 1.000000e+00 : f32
    %104 = vector.broadcast %cst_43 : f32 to vector<8x32xf32>
    %105 = arith.subf %104, %98 : vector<8x32xf32>
    %106 = arith.mulf %105, %103 : vector<8x32xf32>
    %107 = arith.mulf %98, %85 : vector<8x32xf32>
    %108 = arith.addf %106, %107 : vector<8x32xf32>
    %109 = tpu.concatenate %9, %108 in 1 : vector<8x16xf32>, vector<8x32xf32> -> vector<8x48xf32>
    %c0_44 = arith.constant 0 : index
    %c0_45 = arith.constant 0 : index
    %110 = vector.load %arg1[%c0_44, %c0_45] : memref<48x128xf32, #tpu.memory_space<vmem>>, vector<48x128xf32>
    %cst_46 = arith.constant dense<0.000000e+00> : vector<8x128xf32>
    %111 = tpu.matmul %109, %110, %cst_46 {dimension_numbers = #tpu.dot_dimension_numbers<[1], [0], [0], [1], [0, 0, 1, 1], [], []>} : vector<8x48xf32>, vector<48x128xf32>, vector<8x128xf32> -> vector<8x128xf32>
    %c0_47 = arith.constant 0 : index
    %c0_48 = arith.constant 0 : index
    %112 = vector.load %arg2[%c0_47, %c0_48] : memref<8x128xf32, #tpu.memory_space<vmem>>, vector<8x128xf32>
    %113 = arith.addf %111, %112 : vector<8x128xf32>
    %114 = vector.extract_strided_slice %113 {offsets = [0, 0], sizes = [8, 64], strides = [1, 1]} : vector<8x128xf32> to vector<8x64xf32>
    %115 = arith.negf %114 : vector<8x64xf32>
    %116 = math.exp %115 : vector<8x64xf32>
    %cst_49 = arith.constant 1.000000e+00 : f32
    %117 = vector.broadcast %cst_49 : f32 to vector<8x64xf32>
    %118 = arith.addf %117, %116 : vector<8x64xf32>
    %119 = arith.divf %117, %118 : vector<8x64xf32>
    %120 = vector.extract_strided_slice %119 {offsets = [0, 0], sizes = [8, 32], strides = [1, 1]} : vector<8x64xf32> to vector<8x32xf32>
    %121 = vector.extract_strided_slice %119 {offsets = [0, 32], sizes = [8, 32], strides = [1, 1]} : vector<8x64xf32> to vector<8x32xf32>
    %122 = vector.extract_strided_slice %113 {offsets = [0, 64], sizes = [8, 32], strides = [1, 1]} : vector<8x128xf32> to vector<8x32xf32>
    %123 = vector.extract_strided_slice %113 {offsets = [0, 96], sizes = [8, 32], strides = [1, 1]} : vector<8x128xf32> to vector<8x32xf32>
    %124 = arith.mulf %120, %123 : vector<8x32xf32>
    %125 = arith.addf %122, %124 : vector<8x32xf32>
    %126 = math.tanh %125 : vector<8x32xf32>
    %cst_50 = arith.constant 1.000000e+00 : f32
    %127 = vector.broadcast %cst_50 : f32 to vector<8x32xf32>
    %128 = arith.subf %127, %121 : vector<8x32xf32>
    %129 = arith.mulf %128, %126 : vector<8x32xf32>
    %130 = arith.mulf %121, %108 : vector<8x32xf32>
    %131 = arith.addf %129, %130 : vector<8x32xf32>
    %132 = tpu.concatenate %11, %131 in 1 : vector<8x16xf32>, vector<8x32xf32> -> vector<8x48xf32>
    %c0_51 = arith.constant 0 : index
    %c0_52 = arith.constant 0 : index
    %133 = vector.load %arg1[%c0_51, %c0_52] : memref<48x128xf32, #tpu.memory_space<vmem>>, vector<48x128xf32>
    %cst_53 = arith.constant dense<0.000000e+00> : vector<8x128xf32>
    %134 = tpu.matmul %132, %133, %cst_53 {dimension_numbers = #tpu.dot_dimension_numbers<[1], [0], [0], [1], [0, 0, 1, 1], [], []>} : vector<8x48xf32>, vector<48x128xf32>, vector<8x128xf32> -> vector<8x128xf32>
    %c0_54 = arith.constant 0 : index
    %c0_55 = arith.constant 0 : index
    %135 = vector.load %arg2[%c0_54, %c0_55] : memref<8x128xf32, #tpu.memory_space<vmem>>, vector<8x128xf32>
    %136 = arith.addf %134, %135 : vector<8x128xf32>
    %137 = vector.extract_strided_slice %136 {offsets = [0, 0], sizes = [8, 64], strides = [1, 1]} : vector<8x128xf32> to vector<8x64xf32>
    %138 = arith.negf %137 : vector<8x64xf32>
    %139 = math.exp %138 : vector<8x64xf32>
    %cst_56 = arith.constant 1.000000e+00 : f32
    %140 = vector.broadcast %cst_56 : f32 to vector<8x64xf32>
    %141 = arith.addf %140, %139 : vector<8x64xf32>
    %142 = arith.divf %140, %141 : vector<8x64xf32>
    %143 = vector.extract_strided_slice %142 {offsets = [0, 0], sizes = [8, 32], strides = [1, 1]} : vector<8x64xf32> to vector<8x32xf32>
    %144 = vector.extract_strided_slice %142 {offsets = [0, 32], sizes = [8, 32], strides = [1, 1]} : vector<8x64xf32> to vector<8x32xf32>
    %145 = vector.extract_strided_slice %136 {offsets = [0, 64], sizes = [8, 32], strides = [1, 1]} : vector<8x128xf32> to vector<8x32xf32>
    %146 = vector.extract_strided_slice %136 {offsets = [0, 96], sizes = [8, 32], strides = [1, 1]} : vector<8x128xf32> to vector<8x32xf32>
    %147 = arith.mulf %143, %146 : vector<8x32xf32>
    %148 = arith.addf %145, %147 : vector<8x32xf32>
    %149 = math.tanh %148 : vector<8x32xf32>
    %cst_57 = arith.constant 1.000000e+00 : f32
    %150 = vector.broadcast %cst_57 : f32 to vector<8x32xf32>
    %151 = arith.subf %150, %144 : vector<8x32xf32>
    %152 = arith.mulf %151, %149 : vector<8x32xf32>
    %153 = arith.mulf %144, %131 : vector<8x32xf32>
    %154 = arith.addf %152, %153 : vector<8x32xf32>
    %155 = tpu.concatenate %13, %154 in 1 : vector<8x16xf32>, vector<8x32xf32> -> vector<8x48xf32>
    %c0_58 = arith.constant 0 : index
    %c0_59 = arith.constant 0 : index
    %156 = vector.load %arg1[%c0_58, %c0_59] : memref<48x128xf32, #tpu.memory_space<vmem>>, vector<48x128xf32>
    %cst_60 = arith.constant dense<0.000000e+00> : vector<8x128xf32>
    %157 = tpu.matmul %155, %156, %cst_60 {dimension_numbers = #tpu.dot_dimension_numbers<[1], [0], [0], [1], [0, 0, 1, 1], [], []>} : vector<8x48xf32>, vector<48x128xf32>, vector<8x128xf32> -> vector<8x128xf32>
    %c0_61 = arith.constant 0 : index
    %c0_62 = arith.constant 0 : index
    %158 = vector.load %arg2[%c0_61, %c0_62] : memref<8x128xf32, #tpu.memory_space<vmem>>, vector<8x128xf32>
    %159 = arith.addf %157, %158 : vector<8x128xf32>
    %160 = vector.extract_strided_slice %159 {offsets = [0, 0], sizes = [8, 64], strides = [1, 1]} : vector<8x128xf32> to vector<8x64xf32>
    %161 = arith.negf %160 : vector<8x64xf32>
    %162 = math.exp %161 : vector<8x64xf32>
    %cst_63 = arith.constant 1.000000e+00 : f32
    %163 = vector.broadcast %cst_63 : f32 to vector<8x64xf32>
    %164 = arith.addf %163, %162 : vector<8x64xf32>
    %165 = arith.divf %163, %164 : vector<8x64xf32>
    %166 = vector.extract_strided_slice %165 {offsets = [0, 0], sizes = [8, 32], strides = [1, 1]} : vector<8x64xf32> to vector<8x32xf32>
    %167 = vector.extract_strided_slice %165 {offsets = [0, 32], sizes = [8, 32], strides = [1, 1]} : vector<8x64xf32> to vector<8x32xf32>
    %168 = vector.extract_strided_slice %159 {offsets = [0, 64], sizes = [8, 32], strides = [1, 1]} : vector<8x128xf32> to vector<8x32xf32>
    %169 = vector.extract_strided_slice %159 {offsets = [0, 96], sizes = [8, 32], strides = [1, 1]} : vector<8x128xf32> to vector<8x32xf32>
    %170 = arith.mulf %166, %169 : vector<8x32xf32>
    %171 = arith.addf %168, %170 : vector<8x32xf32>
    %172 = math.tanh %171 : vector<8x32xf32>
    %cst_64 = arith.constant 1.000000e+00 : f32
    %173 = vector.broadcast %cst_64 : f32 to vector<8x32xf32>
    %174 = arith.subf %173, %167 : vector<8x32xf32>
    %175 = arith.mulf %174, %172 : vector<8x32xf32>
    %176 = arith.mulf %167, %154 : vector<8x32xf32>
    %177 = arith.addf %175, %176 : vector<8x32xf32>
    %178 = tpu.concatenate %15, %177 in 1 : vector<8x16xf32>, vector<8x32xf32> -> vector<8x48xf32>
    %c0_65 = arith.constant 0 : index
    %c0_66 = arith.constant 0 : index
    %179 = vector.load %arg1[%c0_65, %c0_66] : memref<48x128xf32, #tpu.memory_space<vmem>>, vector<48x128xf32>
    %cst_67 = arith.constant dense<0.000000e+00> : vector<8x128xf32>
    %180 = tpu.matmul %178, %179, %cst_67 {dimension_numbers = #tpu.dot_dimension_numbers<[1], [0], [0], [1], [0, 0, 1, 1], [], []>} : vector<8x48xf32>, vector<48x128xf32>, vector<8x128xf32> -> vector<8x128xf32>
    %c0_68 = arith.constant 0 : index
    %c0_69 = arith.constant 0 : index
    %181 = vector.load %arg2[%c0_68, %c0_69] : memref<8x128xf32, #tpu.memory_space<vmem>>, vector<8x128xf32>
    %182 = arith.addf %180, %181 : vector<8x128xf32>
    %183 = vector.extract_strided_slice %182 {offsets = [0, 0], sizes = [8, 64], strides = [1, 1]} : vector<8x128xf32> to vector<8x64xf32>
    %184 = arith.negf %183 : vector<8x64xf32>
    %185 = math.exp %184 : vector<8x64xf32>
    %cst_70 = arith.constant 1.000000e+00 : f32
    %186 = vector.broadcast %cst_70 : f32 to vector<8x64xf32>
    %187 = arith.addf %186, %185 : vector<8x64xf32>
    %188 = arith.divf %186, %187 : vector<8x64xf32>
    %189 = vector.extract_strided_slice %188 {offsets = [0, 0], sizes = [8, 32], strides = [1, 1]} : vector<8x64xf32> to vector<8x32xf32>
    %190 = vector.extract_strided_slice %188 {offsets = [0, 32], sizes = [8, 32], strides = [1, 1]} : vector<8x64xf32> to vector<8x32xf32>
    %191 = vector.extract_strided_slice %182 {offsets = [0, 64], sizes = [8, 32], strides = [1, 1]} : vector<8x128xf32> to vector<8x32xf32>
    %192 = vector.extract_strided_slice %182 {offsets = [0, 96], sizes = [8, 32], strides = [1, 1]} : vector<8x128xf32> to vector<8x32xf32>
    %193 = arith.mulf %189, %192 : vector<8x32xf32>
    %194 = arith.addf %191, %193 : vector<8x32xf32>
    %195 = math.tanh %194 : vector<8x32xf32>
    %cst_71 = arith.constant 1.000000e+00 : f32
    %196 = vector.broadcast %cst_71 : f32 to vector<8x32xf32>
    %197 = arith.subf %196, %190 : vector<8x32xf32>
    %198 = arith.mulf %197, %195 : vector<8x32xf32>
    %199 = arith.mulf %190, %177 : vector<8x32xf32>
    %200 = arith.addf %198, %199 : vector<8x32xf32>
    %cst_72 = arith.constant 0.000000e+00 : f32
    %201 = vector.broadcast %cst_72 : f32 to vector<8x32xf32>
    %202 = tpu.concatenate %15, %201 in 1 : vector<8x16xf32>, vector<8x32xf32> -> vector<8x48xf32>
    %c0_73 = arith.constant 0 : index
    %c0_74 = arith.constant 0 : index
    %203 = vector.load %arg3[%c0_73, %c0_74] : memref<48x128xf32, #tpu.memory_space<vmem>>, vector<48x128xf32>
    %cst_75 = arith.constant dense<0.000000e+00> : vector<8x128xf32>
    %204 = tpu.matmul %202, %203, %cst_75 {dimension_numbers = #tpu.dot_dimension_numbers<[1], [0], [0], [1], [0, 0, 1, 1], [], []>} : vector<8x48xf32>, vector<48x128xf32>, vector<8x128xf32> -> vector<8x128xf32>
    %c0_76 = arith.constant 0 : index
    %c0_77 = arith.constant 0 : index
    %205 = vector.load %arg4[%c0_76, %c0_77] : memref<8x128xf32, #tpu.memory_space<vmem>>, vector<8x128xf32>
    %206 = arith.addf %204, %205 : vector<8x128xf32>
    %207 = vector.extract_strided_slice %206 {offsets = [0, 0], sizes = [8, 64], strides = [1, 1]} : vector<8x128xf32> to vector<8x64xf32>
    %208 = arith.negf %207 : vector<8x64xf32>
    %209 = math.exp %208 : vector<8x64xf32>
    %cst_78 = arith.constant 1.000000e+00 : f32
    %210 = vector.broadcast %cst_78 : f32 to vector<8x64xf32>
    %211 = arith.addf %210, %209 : vector<8x64xf32>
    %212 = arith.divf %210, %211 : vector<8x64xf32>
    %213 = vector.extract_strided_slice %212 {offsets = [0, 0], sizes = [8, 32], strides = [1, 1]} : vector<8x64xf32> to vector<8x32xf32>
    %214 = vector.extract_strided_slice %212 {offsets = [0, 32], sizes = [8, 32], strides = [1, 1]} : vector<8x64xf32> to vector<8x32xf32>
    %215 = vector.extract_strided_slice %206 {offsets = [0, 64], sizes = [8, 32], strides = [1, 1]} : vector<8x128xf32> to vector<8x32xf32>
    %216 = vector.extract_strided_slice %206 {offsets = [0, 96], sizes = [8, 32], strides = [1, 1]} : vector<8x128xf32> to vector<8x32xf32>
    %217 = arith.mulf %213, %216 : vector<8x32xf32>
    %218 = arith.addf %215, %217 : vector<8x32xf32>
    %219 = math.tanh %218 : vector<8x32xf32>
    %cst_79 = arith.constant 1.000000e+00 : f32
    %220 = vector.broadcast %cst_79 : f32 to vector<8x32xf32>
    %221 = arith.subf %220, %214 : vector<8x32xf32>
    %222 = arith.mulf %221, %219 : vector<8x32xf32>
    %223 = arith.mulf %214, %201 : vector<8x32xf32>
    %224 = arith.addf %222, %223 : vector<8x32xf32>
    %225 = tpu.concatenate %13, %224 in 1 : vector<8x16xf32>, vector<8x32xf32> -> vector<8x48xf32>
    %c0_80 = arith.constant 0 : index
    %c0_81 = arith.constant 0 : index
    %226 = vector.load %arg3[%c0_80, %c0_81] : memref<48x128xf32, #tpu.memory_space<vmem>>, vector<48x128xf32>
    %cst_82 = arith.constant dense<0.000000e+00> : vector<8x128xf32>
    %227 = tpu.matmul %225, %226, %cst_82 {dimension_numbers = #tpu.dot_dimension_numbers<[1], [0], [0], [1], [0, 0, 1, 1], [], []>} : vector<8x48xf32>, vector<48x128xf32>, vector<8x128xf32> -> vector<8x128xf32>
    %c0_83 = arith.constant 0 : index
    %c0_84 = arith.constant 0 : index
    %228 = vector.load %arg4[%c0_83, %c0_84] : memref<8x128xf32, #tpu.memory_space<vmem>>, vector<8x128xf32>
    %229 = arith.addf %227, %228 : vector<8x128xf32>
    %230 = vector.extract_strided_slice %229 {offsets = [0, 0], sizes = [8, 64], strides = [1, 1]} : vector<8x128xf32> to vector<8x64xf32>
    %231 = arith.negf %230 : vector<8x64xf32>
    %232 = math.exp %231 : vector<8x64xf32>
    %cst_85 = arith.constant 1.000000e+00 : f32
    %233 = vector.broadcast %cst_85 : f32 to vector<8x64xf32>
    %234 = arith.addf %233, %232 : vector<8x64xf32>
    %235 = arith.divf %233, %234 : vector<8x64xf32>
    %236 = vector.extract_strided_slice %235 {offsets = [0, 0], sizes = [8, 32], strides = [1, 1]} : vector<8x64xf32> to vector<8x32xf32>
    %237 = vector.extract_strided_slice %235 {offsets = [0, 32], sizes = [8, 32], strides = [1, 1]} : vector<8x64xf32> to vector<8x32xf32>
    %238 = vector.extract_strided_slice %229 {offsets = [0, 64], sizes = [8, 32], strides = [1, 1]} : vector<8x128xf32> to vector<8x32xf32>
    %239 = vector.extract_strided_slice %229 {offsets = [0, 96], sizes = [8, 32], strides = [1, 1]} : vector<8x128xf32> to vector<8x32xf32>
    %240 = arith.mulf %236, %239 : vector<8x32xf32>
    %241 = arith.addf %238, %240 : vector<8x32xf32>
    %242 = math.tanh %241 : vector<8x32xf32>
    %cst_86 = arith.constant 1.000000e+00 : f32
    %243 = vector.broadcast %cst_86 : f32 to vector<8x32xf32>
    %244 = arith.subf %243, %237 : vector<8x32xf32>
    %245 = arith.mulf %244, %242 : vector<8x32xf32>
    %246 = arith.mulf %237, %224 : vector<8x32xf32>
    %247 = arith.addf %245, %246 : vector<8x32xf32>
    %248 = tpu.concatenate %11, %247 in 1 : vector<8x16xf32>, vector<8x32xf32> -> vector<8x48xf32>
    %c0_87 = arith.constant 0 : index
    %c0_88 = arith.constant 0 : index
    %249 = vector.load %arg3[%c0_87, %c0_88] : memref<48x128xf32, #tpu.memory_space<vmem>>, vector<48x128xf32>
    %cst_89 = arith.constant dense<0.000000e+00> : vector<8x128xf32>
    %250 = tpu.matmul %248, %249, %cst_89 {dimension_numbers = #tpu.dot_dimension_numbers<[1], [0], [0], [1], [0, 0, 1, 1], [], []>} : vector<8x48xf32>, vector<48x128xf32>, vector<8x128xf32> -> vector<8x128xf32>
    %c0_90 = arith.constant 0 : index
    %c0_91 = arith.constant 0 : index
    %251 = vector.load %arg4[%c0_90, %c0_91] : memref<8x128xf32, #tpu.memory_space<vmem>>, vector<8x128xf32>
    %252 = arith.addf %250, %251 : vector<8x128xf32>
    %253 = vector.extract_strided_slice %252 {offsets = [0, 0], sizes = [8, 64], strides = [1, 1]} : vector<8x128xf32> to vector<8x64xf32>
    %254 = arith.negf %253 : vector<8x64xf32>
    %255 = math.exp %254 : vector<8x64xf32>
    %cst_92 = arith.constant 1.000000e+00 : f32
    %256 = vector.broadcast %cst_92 : f32 to vector<8x64xf32>
    %257 = arith.addf %256, %255 : vector<8x64xf32>
    %258 = arith.divf %256, %257 : vector<8x64xf32>
    %259 = vector.extract_strided_slice %258 {offsets = [0, 0], sizes = [8, 32], strides = [1, 1]} : vector<8x64xf32> to vector<8x32xf32>
    %260 = vector.extract_strided_slice %258 {offsets = [0, 32], sizes = [8, 32], strides = [1, 1]} : vector<8x64xf32> to vector<8x32xf32>
    %261 = vector.extract_strided_slice %252 {offsets = [0, 64], sizes = [8, 32], strides = [1, 1]} : vector<8x128xf32> to vector<8x32xf32>
    %262 = vector.extract_strided_slice %252 {offsets = [0, 96], sizes = [8, 32], strides = [1, 1]} : vector<8x128xf32> to vector<8x32xf32>
    %263 = arith.mulf %259, %262 : vector<8x32xf32>
    %264 = arith.addf %261, %263 : vector<8x32xf32>
    %265 = math.tanh %264 : vector<8x32xf32>
    %cst_93 = arith.constant 1.000000e+00 : f32
    %266 = vector.broadcast %cst_93 : f32 to vector<8x32xf32>
    %267 = arith.subf %266, %260 : vector<8x32xf32>
    %268 = arith.mulf %267, %265 : vector<8x32xf32>
    %269 = arith.mulf %260, %247 : vector<8x32xf32>
    %270 = arith.addf %268, %269 : vector<8x32xf32>
    %271 = tpu.concatenate %9, %270 in 1 : vector<8x16xf32>, vector<8x32xf32> -> vector<8x48xf32>
    %c0_94 = arith.constant 0 : index
    %c0_95 = arith.constant 0 : index
    %272 = vector.load %arg3[%c0_94, %c0_95] : memref<48x128xf32, #tpu.memory_space<vmem>>, vector<48x128xf32>
    %cst_96 = arith.constant dense<0.000000e+00> : vector<8x128xf32>
    %273 = tpu.matmul %271, %272, %cst_96 {dimension_numbers = #tpu.dot_dimension_numbers<[1], [0], [0], [1], [0, 0, 1, 1], [], []>} : vector<8x48xf32>, vector<48x128xf32>, vector<8x128xf32> -> vector<8x128xf32>
    %c0_97 = arith.constant 0 : index
    %c0_98 = arith.constant 0 : index
    %274 = vector.load %arg4[%c0_97, %c0_98] : memref<8x128xf32, #tpu.memory_space<vmem>>, vector<8x128xf32>
    %275 = arith.addf %273, %274 : vector<8x128xf32>
    %276 = vector.extract_strided_slice %275 {offsets = [0, 0], sizes = [8, 64], strides = [1, 1]} : vector<8x128xf32> to vector<8x64xf32>
    %277 = arith.negf %276 : vector<8x64xf32>
    %278 = math.exp %277 : vector<8x64xf32>
    %cst_99 = arith.constant 1.000000e+00 : f32
    %279 = vector.broadcast %cst_99 : f32 to vector<8x64xf32>
    %280 = arith.addf %279, %278 : vector<8x64xf32>
    %281 = arith.divf %279, %280 : vector<8x64xf32>
    %282 = vector.extract_strided_slice %281 {offsets = [0, 0], sizes = [8, 32], strides = [1, 1]} : vector<8x64xf32> to vector<8x32xf32>
    %283 = vector.extract_strided_slice %281 {offsets = [0, 32], sizes = [8, 32], strides = [1, 1]} : vector<8x64xf32> to vector<8x32xf32>
    %284 = vector.extract_strided_slice %275 {offsets = [0, 64], sizes = [8, 32], strides = [1, 1]} : vector<8x128xf32> to vector<8x32xf32>
    %285 = vector.extract_strided_slice %275 {offsets = [0, 96], sizes = [8, 32], strides = [1, 1]} : vector<8x128xf32> to vector<8x32xf32>
    %286 = arith.mulf %282, %285 : vector<8x32xf32>
    %287 = arith.addf %284, %286 : vector<8x32xf32>
    %288 = math.tanh %287 : vector<8x32xf32>
    %cst_100 = arith.constant 1.000000e+00 : f32
    %289 = vector.broadcast %cst_100 : f32 to vector<8x32xf32>
    %290 = arith.subf %289, %283 : vector<8x32xf32>
    %291 = arith.mulf %290, %288 : vector<8x32xf32>
    %292 = arith.mulf %283, %270 : vector<8x32xf32>
    %293 = arith.addf %291, %292 : vector<8x32xf32>
    %294 = tpu.concatenate %7, %293 in 1 : vector<8x16xf32>, vector<8x32xf32> -> vector<8x48xf32>
    %c0_101 = arith.constant 0 : index
    %c0_102 = arith.constant 0 : index
    %295 = vector.load %arg3[%c0_101, %c0_102] : memref<48x128xf32, #tpu.memory_space<vmem>>, vector<48x128xf32>
    %cst_103 = arith.constant dense<0.000000e+00> : vector<8x128xf32>
    %296 = tpu.matmul %294, %295, %cst_103 {dimension_numbers = #tpu.dot_dimension_numbers<[1], [0], [0], [1], [0, 0, 1, 1], [], []>} : vector<8x48xf32>, vector<48x128xf32>, vector<8x128xf32> -> vector<8x128xf32>
    %c0_104 = arith.constant 0 : index
    %c0_105 = arith.constant 0 : index
    %297 = vector.load %arg4[%c0_104, %c0_105] : memref<8x128xf32, #tpu.memory_space<vmem>>, vector<8x128xf32>
    %298 = arith.addf %296, %297 : vector<8x128xf32>
    %299 = vector.extract_strided_slice %298 {offsets = [0, 0], sizes = [8, 64], strides = [1, 1]} : vector<8x128xf32> to vector<8x64xf32>
    %300 = arith.negf %299 : vector<8x64xf32>
    %301 = math.exp %300 : vector<8x64xf32>
    %cst_106 = arith.constant 1.000000e+00 : f32
    %302 = vector.broadcast %cst_106 : f32 to vector<8x64xf32>
    %303 = arith.addf %302, %301 : vector<8x64xf32>
    %304 = arith.divf %302, %303 : vector<8x64xf32>
    %305 = vector.extract_strided_slice %304 {offsets = [0, 0], sizes = [8, 32], strides = [1, 1]} : vector<8x64xf32> to vector<8x32xf32>
    %306 = vector.extract_strided_slice %304 {offsets = [0, 32], sizes = [8, 32], strides = [1, 1]} : vector<8x64xf32> to vector<8x32xf32>
    %307 = vector.extract_strided_slice %298 {offsets = [0, 64], sizes = [8, 32], strides = [1, 1]} : vector<8x128xf32> to vector<8x32xf32>
    %308 = vector.extract_strided_slice %298 {offsets = [0, 96], sizes = [8, 32], strides = [1, 1]} : vector<8x128xf32> to vector<8x32xf32>
    %309 = arith.mulf %305, %308 : vector<8x32xf32>
    %310 = arith.addf %307, %309 : vector<8x32xf32>
    %311 = math.tanh %310 : vector<8x32xf32>
    %cst_107 = arith.constant 1.000000e+00 : f32
    %312 = vector.broadcast %cst_107 : f32 to vector<8x32xf32>
    %313 = arith.subf %312, %306 : vector<8x32xf32>
    %314 = arith.mulf %313, %311 : vector<8x32xf32>
    %315 = arith.mulf %306, %293 : vector<8x32xf32>
    %316 = arith.addf %314, %315 : vector<8x32xf32>
    %317 = tpu.concatenate %5, %316 in 1 : vector<8x16xf32>, vector<8x32xf32> -> vector<8x48xf32>
    %c0_108 = arith.constant 0 : index
    %c0_109 = arith.constant 0 : index
    %318 = vector.load %arg3[%c0_108, %c0_109] : memref<48x128xf32, #tpu.memory_space<vmem>>, vector<48x128xf32>
    %cst_110 = arith.constant dense<0.000000e+00> : vector<8x128xf32>
    %319 = tpu.matmul %317, %318, %cst_110 {dimension_numbers = #tpu.dot_dimension_numbers<[1], [0], [0], [1], [0, 0, 1, 1], [], []>} : vector<8x48xf32>, vector<48x128xf32>, vector<8x128xf32> -> vector<8x128xf32>
    %c0_111 = arith.constant 0 : index
    %c0_112 = arith.constant 0 : index
    %320 = vector.load %arg4[%c0_111, %c0_112] : memref<8x128xf32, #tpu.memory_space<vmem>>, vector<8x128xf32>
    %321 = arith.addf %319, %320 : vector<8x128xf32>
    %322 = vector.extract_strided_slice %321 {offsets = [0, 0], sizes = [8, 64], strides = [1, 1]} : vector<8x128xf32> to vector<8x64xf32>
    %323 = arith.negf %322 : vector<8x64xf32>
    %324 = math.exp %323 : vector<8x64xf32>
    %cst_113 = arith.constant 1.000000e+00 : f32
    %325 = vector.broadcast %cst_113 : f32 to vector<8x64xf32>
    %326 = arith.addf %325, %324 : vector<8x64xf32>
    %327 = arith.divf %325, %326 : vector<8x64xf32>
    %328 = vector.extract_strided_slice %327 {offsets = [0, 0], sizes = [8, 32], strides = [1, 1]} : vector<8x64xf32> to vector<8x32xf32>
    %329 = vector.extract_strided_slice %327 {offsets = [0, 32], sizes = [8, 32], strides = [1, 1]} : vector<8x64xf32> to vector<8x32xf32>
    %330 = vector.extract_strided_slice %321 {offsets = [0, 64], sizes = [8, 32], strides = [1, 1]} : vector<8x128xf32> to vector<8x32xf32>
    %331 = vector.extract_strided_slice %321 {offsets = [0, 96], sizes = [8, 32], strides = [1, 1]} : vector<8x128xf32> to vector<8x32xf32>
    %332 = arith.mulf %328, %331 : vector<8x32xf32>
    %333 = arith.addf %330, %332 : vector<8x32xf32>
    %334 = math.tanh %333 : vector<8x32xf32>
    %cst_114 = arith.constant 1.000000e+00 : f32
    %335 = vector.broadcast %cst_114 : f32 to vector<8x32xf32>
    %336 = arith.subf %335, %329 : vector<8x32xf32>
    %337 = arith.mulf %336, %334 : vector<8x32xf32>
    %338 = arith.mulf %329, %316 : vector<8x32xf32>
    %339 = arith.addf %337, %338 : vector<8x32xf32>
    %340 = tpu.concatenate %3, %339 in 1 : vector<8x16xf32>, vector<8x32xf32> -> vector<8x48xf32>
    %c0_115 = arith.constant 0 : index
    %c0_116 = arith.constant 0 : index
    %341 = vector.load %arg3[%c0_115, %c0_116] : memref<48x128xf32, #tpu.memory_space<vmem>>, vector<48x128xf32>
    %cst_117 = arith.constant dense<0.000000e+00> : vector<8x128xf32>
    %342 = tpu.matmul %340, %341, %cst_117 {dimension_numbers = #tpu.dot_dimension_numbers<[1], [0], [0], [1], [0, 0, 1, 1], [], []>} : vector<8x48xf32>, vector<48x128xf32>, vector<8x128xf32> -> vector<8x128xf32>
    %c0_118 = arith.constant 0 : index
    %c0_119 = arith.constant 0 : index
    %343 = vector.load %arg4[%c0_118, %c0_119] : memref<8x128xf32, #tpu.memory_space<vmem>>, vector<8x128xf32>
    %344 = arith.addf %342, %343 : vector<8x128xf32>
    %345 = vector.extract_strided_slice %344 {offsets = [0, 0], sizes = [8, 64], strides = [1, 1]} : vector<8x128xf32> to vector<8x64xf32>
    %346 = arith.negf %345 : vector<8x64xf32>
    %347 = math.exp %346 : vector<8x64xf32>
    %cst_120 = arith.constant 1.000000e+00 : f32
    %348 = vector.broadcast %cst_120 : f32 to vector<8x64xf32>
    %349 = arith.addf %348, %347 : vector<8x64xf32>
    %350 = arith.divf %348, %349 : vector<8x64xf32>
    %351 = vector.extract_strided_slice %350 {offsets = [0, 0], sizes = [8, 32], strides = [1, 1]} : vector<8x64xf32> to vector<8x32xf32>
    %352 = vector.extract_strided_slice %350 {offsets = [0, 32], sizes = [8, 32], strides = [1, 1]} : vector<8x64xf32> to vector<8x32xf32>
    %353 = vector.extract_strided_slice %344 {offsets = [0, 64], sizes = [8, 32], strides = [1, 1]} : vector<8x128xf32> to vector<8x32xf32>
    %354 = vector.extract_strided_slice %344 {offsets = [0, 96], sizes = [8, 32], strides = [1, 1]} : vector<8x128xf32> to vector<8x32xf32>
    %355 = arith.mulf %351, %354 : vector<8x32xf32>
    %356 = arith.addf %353, %355 : vector<8x32xf32>
    %357 = math.tanh %356 : vector<8x32xf32>
    %cst_121 = arith.constant 1.000000e+00 : f32
    %358 = vector.broadcast %cst_121 : f32 to vector<8x32xf32>
    %359 = arith.subf %358, %352 : vector<8x32xf32>
    %360 = arith.mulf %359, %357 : vector<8x32xf32>
    %361 = arith.mulf %352, %339 : vector<8x32xf32>
    %362 = arith.addf %360, %361 : vector<8x32xf32>
    %363 = tpu.concatenate %1, %362 in 1 : vector<8x16xf32>, vector<8x32xf32> -> vector<8x48xf32>
    %c0_122 = arith.constant 0 : index
    %c0_123 = arith.constant 0 : index
    %364 = vector.load %arg3[%c0_122, %c0_123] : memref<48x128xf32, #tpu.memory_space<vmem>>, vector<48x128xf32>
    %cst_124 = arith.constant dense<0.000000e+00> : vector<8x128xf32>
    %365 = tpu.matmul %363, %364, %cst_124 {dimension_numbers = #tpu.dot_dimension_numbers<[1], [0], [0], [1], [0, 0, 1, 1], [], []>} : vector<8x48xf32>, vector<48x128xf32>, vector<8x128xf32> -> vector<8x128xf32>
    %c0_125 = arith.constant 0 : index
    %c0_126 = arith.constant 0 : index
    %366 = vector.load %arg4[%c0_125, %c0_126] : memref<8x128xf32, #tpu.memory_space<vmem>>, vector<8x128xf32>
    %367 = arith.addf %365, %366 : vector<8x128xf32>
    %368 = vector.extract_strided_slice %367 {offsets = [0, 0], sizes = [8, 64], strides = [1, 1]} : vector<8x128xf32> to vector<8x64xf32>
    %369 = arith.negf %368 : vector<8x64xf32>
    %370 = math.exp %369 : vector<8x64xf32>
    %cst_127 = arith.constant 1.000000e+00 : f32
    %371 = vector.broadcast %cst_127 : f32 to vector<8x64xf32>
    %372 = arith.addf %371, %370 : vector<8x64xf32>
    %373 = arith.divf %371, %372 : vector<8x64xf32>
    %374 = vector.extract_strided_slice %373 {offsets = [0, 0], sizes = [8, 32], strides = [1, 1]} : vector<8x64xf32> to vector<8x32xf32>
    %375 = vector.extract_strided_slice %373 {offsets = [0, 32], sizes = [8, 32], strides = [1, 1]} : vector<8x64xf32> to vector<8x32xf32>
    %376 = vector.extract_strided_slice %367 {offsets = [0, 64], sizes = [8, 32], strides = [1, 1]} : vector<8x128xf32> to vector<8x32xf32>
    %377 = vector.extract_strided_slice %367 {offsets = [0, 96], sizes = [8, 32], strides = [1, 1]} : vector<8x128xf32> to vector<8x32xf32>
    %378 = arith.mulf %374, %377 : vector<8x32xf32>
    %379 = arith.addf %376, %378 : vector<8x32xf32>
    %380 = math.tanh %379 : vector<8x32xf32>
    %cst_128 = arith.constant 1.000000e+00 : f32
    %381 = vector.broadcast %cst_128 : f32 to vector<8x32xf32>
    %382 = arith.subf %381, %375 : vector<8x32xf32>
    %383 = arith.mulf %382, %380 : vector<8x32xf32>
    %384 = arith.mulf %375, %362 : vector<8x32xf32>
    %385 = arith.addf %383, %384 : vector<8x32xf32>
    %386 = tpu.concatenate %39, %385 in 1 : vector<8x32xf32>, vector<8x32xf32> -> vector<8x64xf32>
    %387 = tpu.concatenate %62, %362 in 1 : vector<8x32xf32>, vector<8x32xf32> -> vector<8x64xf32>
    %388 = tpu.concatenate %85, %339 in 1 : vector<8x32xf32>, vector<8x32xf32> -> vector<8x64xf32>
    %389 = tpu.concatenate %108, %316 in 1 : vector<8x32xf32>, vector<8x32xf32> -> vector<8x64xf32>
    %390 = tpu.concatenate %131, %293 in 1 : vector<8x32xf32>, vector<8x32xf32> -> vector<8x64xf32>
    %391 = tpu.concatenate %154, %270 in 1 : vector<8x32xf32>, vector<8x32xf32> -> vector<8x64xf32>
    %392 = tpu.concatenate %177, %247 in 1 : vector<8x32xf32>, vector<8x32xf32> -> vector<8x64xf32>
    %393 = tpu.concatenate %200, %224 in 1 : vector<8x32xf32>, vector<8x32xf32> -> vector<8x64xf32>
    %cst_129 = arith.constant 0.000000e+00 : f32
    %394 = vector.broadcast %cst_129 : f32 to vector<8x32xf32>
    %395 = tpu.concatenate %386, %394 in 1 : vector<8x64xf32>, vector<8x32xf32> -> vector<8x96xf32>
    %c0_130 = arith.constant 0 : index
    %c0_131 = arith.constant 0 : index
    %396 = vector.load %arg5[%c0_130, %c0_131] : memref<96x128xf32, #tpu.memory_space<vmem>>, vector<96x128xf32>
    %cst_132 = arith.constant dense<0.000000e+00> : vector<8x128xf32>
    %397 = tpu.matmul %395, %396, %cst_132 {dimension_numbers = #tpu.dot_dimension_numbers<[1], [0], [0], [1], [0, 0, 1, 1], [], []>} : vector<8x96xf32>, vector<96x128xf32>, vector<8x128xf32> -> vector<8x128xf32>
    %c0_133 = arith.constant 0 : index
    %c0_134 = arith.constant 0 : index
    %398 = vector.load %arg6[%c0_133, %c0_134] : memref<8x128xf32, #tpu.memory_space<vmem>>, vector<8x128xf32>
    %399 = arith.addf %397, %398 : vector<8x128xf32>
    %400 = vector.extract_strided_slice %399 {offsets = [0, 0], sizes = [8, 64], strides = [1, 1]} : vector<8x128xf32> to vector<8x64xf32>
    %401 = arith.negf %400 : vector<8x64xf32>
    %402 = math.exp %401 : vector<8x64xf32>
    %cst_135 = arith.constant 1.000000e+00 : f32
    %403 = vector.broadcast %cst_135 : f32 to vector<8x64xf32>
    %404 = arith.addf %403, %402 : vector<8x64xf32>
    %405 = arith.divf %403, %404 : vector<8x64xf32>
    %406 = vector.extract_strided_slice %405 {offsets = [0, 0], sizes = [8, 32], strides = [1, 1]} : vector<8x64xf32> to vector<8x32xf32>
    %407 = vector.extract_strided_slice %405 {offsets = [0, 32], sizes = [8, 32], strides = [1, 1]} : vector<8x64xf32> to vector<8x32xf32>
    %408 = vector.extract_strided_slice %399 {offsets = [0, 64], sizes = [8, 32], strides = [1, 1]} : vector<8x128xf32> to vector<8x32xf32>
    %409 = vector.extract_strided_slice %399 {offsets = [0, 96], sizes = [8, 32], strides = [1, 1]} : vector<8x128xf32> to vector<8x32xf32>
    %410 = arith.mulf %406, %409 : vector<8x32xf32>
    %411 = arith.addf %408, %410 : vector<8x32xf32>
    %412 = math.tanh %411 : vector<8x32xf32>
    %cst_136 = arith.constant 1.000000e+00 : f32
    %413 = vector.broadcast %cst_136 : f32 to vector<8x32xf32>
    %414 = arith.subf %413, %407 : vector<8x32xf32>
    %415 = arith.mulf %414, %412 : vector<8x32xf32>
    %416 = arith.mulf %407, %394 : vector<8x32xf32>
    %417 = arith.addf %415, %416 : vector<8x32xf32>
    %418 = tpu.concatenate %387, %417 in 1 : vector<8x64xf32>, vector<8x32xf32> -> vector<8x96xf32>
    %c0_137 = arith.constant 0 : index
    %c0_138 = arith.constant 0 : index
    %419 = vector.load %arg5[%c0_137, %c0_138] : memref<96x128xf32, #tpu.memory_space<vmem>>, vector<96x128xf32>
    %cst_139 = arith.constant dense<0.000000e+00> : vector<8x128xf32>
    %420 = tpu.matmul %418, %419, %cst_139 {dimension_numbers = #tpu.dot_dimension_numbers<[1], [0], [0], [1], [0, 0, 1, 1], [], []>} : vector<8x96xf32>, vector<96x128xf32>, vector<8x128xf32> -> vector<8x128xf32>
    %c0_140 = arith.constant 0 : index
    %c0_141 = arith.constant 0 : index
    %421 = vector.load %arg6[%c0_140, %c0_141] : memref<8x128xf32, #tpu.memory_space<vmem>>, vector<8x128xf32>
    %422 = arith.addf %420, %421 : vector<8x128xf32>
    %423 = vector.extract_strided_slice %422 {offsets = [0, 0], sizes = [8, 64], strides = [1, 1]} : vector<8x128xf32> to vector<8x64xf32>
    %424 = arith.negf %423 : vector<8x64xf32>
    %425 = math.exp %424 : vector<8x64xf32>
    %cst_142 = arith.constant 1.000000e+00 : f32
    %426 = vector.broadcast %cst_142 : f32 to vector<8x64xf32>
    %427 = arith.addf %426, %425 : vector<8x64xf32>
    %428 = arith.divf %426, %427 : vector<8x64xf32>
    %429 = vector.extract_strided_slice %428 {offsets = [0, 0], sizes = [8, 32], strides = [1, 1]} : vector<8x64xf32> to vector<8x32xf32>
    %430 = vector.extract_strided_slice %428 {offsets = [0, 32], sizes = [8, 32], strides = [1, 1]} : vector<8x64xf32> to vector<8x32xf32>
    %431 = vector.extract_strided_slice %422 {offsets = [0, 64], sizes = [8, 32], strides = [1, 1]} : vector<8x128xf32> to vector<8x32xf32>
    %432 = vector.extract_strided_slice %422 {offsets = [0, 96], sizes = [8, 32], strides = [1, 1]} : vector<8x128xf32> to vector<8x32xf32>
    %433 = arith.mulf %429, %432 : vector<8x32xf32>
    %434 = arith.addf %431, %433 : vector<8x32xf32>
    %435 = math.tanh %434 : vector<8x32xf32>
    %cst_143 = arith.constant 1.000000e+00 : f32
    %436 = vector.broadcast %cst_143 : f32 to vector<8x32xf32>
    %437 = arith.subf %436, %430 : vector<8x32xf32>
    %438 = arith.mulf %437, %435 : vector<8x32xf32>
    %439 = arith.mulf %430, %417 : vector<8x32xf32>
    %440 = arith.addf %438, %439 : vector<8x32xf32>
    %441 = tpu.concatenate %388, %440 in 1 : vector<8x64xf32>, vector<8x32xf32> -> vector<8x96xf32>
    %c0_144 = arith.constant 0 : index
    %c0_145 = arith.constant 0 : index
    %442 = vector.load %arg5[%c0_144, %c0_145] : memref<96x128xf32, #tpu.memory_space<vmem>>, vector<96x128xf32>
    %cst_146 = arith.constant dense<0.000000e+00> : vector<8x128xf32>
    %443 = tpu.matmul %441, %442, %cst_146 {dimension_numbers = #tpu.dot_dimension_numbers<[1], [0], [0], [1], [0, 0, 1, 1], [], []>} : vector<8x96xf32>, vector<96x128xf32>, vector<8x128xf32> -> vector<8x128xf32>
    %c0_147 = arith.constant 0 : index
    %c0_148 = arith.constant 0 : index
    %444 = vector.load %arg6[%c0_147, %c0_148] : memref<8x128xf32, #tpu.memory_space<vmem>>, vector<8x128xf32>
    %445 = arith.addf %443, %444 : vector<8x128xf32>
    %446 = vector.extract_strided_slice %445 {offsets = [0, 0], sizes = [8, 64], strides = [1, 1]} : vector<8x128xf32> to vector<8x64xf32>
    %447 = arith.negf %446 : vector<8x64xf32>
    %448 = math.exp %447 : vector<8x64xf32>
    %cst_149 = arith.constant 1.000000e+00 : f32
    %449 = vector.broadcast %cst_149 : f32 to vector<8x64xf32>
    %450 = arith.addf %449, %448 : vector<8x64xf32>
    %451 = arith.divf %449, %450 : vector<8x64xf32>
    %452 = vector.extract_strided_slice %451 {offsets = [0, 0], sizes = [8, 32], strides = [1, 1]} : vector<8x64xf32> to vector<8x32xf32>
    %453 = vector.extract_strided_slice %451 {offsets = [0, 32], sizes = [8, 32], strides = [1, 1]} : vector<8x64xf32> to vector<8x32xf32>
    %454 = vector.extract_strided_slice %445 {offsets = [0, 64], sizes = [8, 32], strides = [1, 1]} : vector<8x128xf32> to vector<8x32xf32>
    %455 = vector.extract_strided_slice %445 {offsets = [0, 96], sizes = [8, 32], strides = [1, 1]} : vector<8x128xf32> to vector<8x32xf32>
    %456 = arith.mulf %452, %455 : vector<8x32xf32>
    %457 = arith.addf %454, %456 : vector<8x32xf32>
    %458 = math.tanh %457 : vector<8x32xf32>
    %cst_150 = arith.constant 1.000000e+00 : f32
    %459 = vector.broadcast %cst_150 : f32 to vector<8x32xf32>
    %460 = arith.subf %459, %453 : vector<8x32xf32>
    %461 = arith.mulf %460, %458 : vector<8x32xf32>
    %462 = arith.mulf %453, %440 : vector<8x32xf32>
    %463 = arith.addf %461, %462 : vector<8x32xf32>
    %464 = tpu.concatenate %389, %463 in 1 : vector<8x64xf32>, vector<8x32xf32> -> vector<8x96xf32>
    %c0_151 = arith.constant 0 : index
    %c0_152 = arith.constant 0 : index
    %465 = vector.load %arg5[%c0_151, %c0_152] : memref<96x128xf32, #tpu.memory_space<vmem>>, vector<96x128xf32>
    %cst_153 = arith.constant dense<0.000000e+00> : vector<8x128xf32>
    %466 = tpu.matmul %464, %465, %cst_153 {dimension_numbers = #tpu.dot_dimension_numbers<[1], [0], [0], [1], [0, 0, 1, 1], [], []>} : vector<8x96xf32>, vector<96x128xf32>, vector<8x128xf32> -> vector<8x128xf32>
    %c0_154 = arith.constant 0 : index
    %c0_155 = arith.constant 0 : index
    %467 = vector.load %arg6[%c0_154, %c0_155] : memref<8x128xf32, #tpu.memory_space<vmem>>, vector<8x128xf32>
    %468 = arith.addf %466, %467 : vector<8x128xf32>
    %469 = vector.extract_strided_slice %468 {offsets = [0, 0], sizes = [8, 64], strides = [1, 1]} : vector<8x128xf32> to vector<8x64xf32>
    %470 = arith.negf %469 : vector<8x64xf32>
    %471 = math.exp %470 : vector<8x64xf32>
    %cst_156 = arith.constant 1.000000e+00 : f32
    %472 = vector.broadcast %cst_156 : f32 to vector<8x64xf32>
    %473 = arith.addf %472, %471 : vector<8x64xf32>
    %474 = arith.divf %472, %473 : vector<8x64xf32>
    %475 = vector.extract_strided_slice %474 {offsets = [0, 0], sizes = [8, 32], strides = [1, 1]} : vector<8x64xf32> to vector<8x32xf32>
    %476 = vector.extract_strided_slice %474 {offsets = [0, 32], sizes = [8, 32], strides = [1, 1]} : vector<8x64xf32> to vector<8x32xf32>
    %477 = vector.extract_strided_slice %468 {offsets = [0, 64], sizes = [8, 32], strides = [1, 1]} : vector<8x128xf32> to vector<8x32xf32>
    %478 = vector.extract_strided_slice %468 {offsets = [0, 96], sizes = [8, 32], strides = [1, 1]} : vector<8x128xf32> to vector<8x32xf32>
    %479 = arith.mulf %475, %478 : vector<8x32xf32>
    %480 = arith.addf %477, %479 : vector<8x32xf32>
    %481 = math.tanh %480 : vector<8x32xf32>
    %cst_157 = arith.constant 1.000000e+00 : f32
    %482 = vector.broadcast %cst_157 : f32 to vector<8x32xf32>
    %483 = arith.subf %482, %476 : vector<8x32xf32>
    %484 = arith.mulf %483, %481 : vector<8x32xf32>
    %485 = arith.mulf %476, %463 : vector<8x32xf32>
    %486 = arith.addf %484, %485 : vector<8x32xf32>
    %487 = tpu.concatenate %390, %486 in 1 : vector<8x64xf32>, vector<8x32xf32> -> vector<8x96xf32>
    %c0_158 = arith.constant 0 : index
    %c0_159 = arith.constant 0 : index
    %488 = vector.load %arg5[%c0_158, %c0_159] : memref<96x128xf32, #tpu.memory_space<vmem>>, vector<96x128xf32>
    %cst_160 = arith.constant dense<0.000000e+00> : vector<8x128xf32>
    %489 = tpu.matmul %487, %488, %cst_160 {dimension_numbers = #tpu.dot_dimension_numbers<[1], [0], [0], [1], [0, 0, 1, 1], [], []>} : vector<8x96xf32>, vector<96x128xf32>, vector<8x128xf32> -> vector<8x128xf32>
    %c0_161 = arith.constant 0 : index
    %c0_162 = arith.constant 0 : index
    %490 = vector.load %arg6[%c0_161, %c0_162] : memref<8x128xf32, #tpu.memory_space<vmem>>, vector<8x128xf32>
    %491 = arith.addf %489, %490 : vector<8x128xf32>
    %492 = vector.extract_strided_slice %491 {offsets = [0, 0], sizes = [8, 64], strides = [1, 1]} : vector<8x128xf32> to vector<8x64xf32>
    %493 = arith.negf %492 : vector<8x64xf32>
    %494 = math.exp %493 : vector<8x64xf32>
    %cst_163 = arith.constant 1.000000e+00 : f32
    %495 = vector.broadcast %cst_163 : f32 to vector<8x64xf32>
    %496 = arith.addf %495, %494 : vector<8x64xf32>
    %497 = arith.divf %495, %496 : vector<8x64xf32>
    %498 = vector.extract_strided_slice %497 {offsets = [0, 0], sizes = [8, 32], strides = [1, 1]} : vector<8x64xf32> to vector<8x32xf32>
    %499 = vector.extract_strided_slice %497 {offsets = [0, 32], sizes = [8, 32], strides = [1, 1]} : vector<8x64xf32> to vector<8x32xf32>
    %500 = vector.extract_strided_slice %491 {offsets = [0, 64], sizes = [8, 32], strides = [1, 1]} : vector<8x128xf32> to vector<8x32xf32>
    %501 = vector.extract_strided_slice %491 {offsets = [0, 96], sizes = [8, 32], strides = [1, 1]} : vector<8x128xf32> to vector<8x32xf32>
    %502 = arith.mulf %498, %501 : vector<8x32xf32>
    %503 = arith.addf %500, %502 : vector<8x32xf32>
    %504 = math.tanh %503 : vector<8x32xf32>
    %cst_164 = arith.constant 1.000000e+00 : f32
    %505 = vector.broadcast %cst_164 : f32 to vector<8x32xf32>
    %506 = arith.subf %505, %499 : vector<8x32xf32>
    %507 = arith.mulf %506, %504 : vector<8x32xf32>
    %508 = arith.mulf %499, %486 : vector<8x32xf32>
    %509 = arith.addf %507, %508 : vector<8x32xf32>
    %510 = tpu.concatenate %391, %509 in 1 : vector<8x64xf32>, vector<8x32xf32> -> vector<8x96xf32>
    %c0_165 = arith.constant 0 : index
    %c0_166 = arith.constant 0 : index
    %511 = vector.load %arg5[%c0_165, %c0_166] : memref<96x128xf32, #tpu.memory_space<vmem>>, vector<96x128xf32>
    %cst_167 = arith.constant dense<0.000000e+00> : vector<8x128xf32>
    %512 = tpu.matmul %510, %511, %cst_167 {dimension_numbers = #tpu.dot_dimension_numbers<[1], [0], [0], [1], [0, 0, 1, 1], [], []>} : vector<8x96xf32>, vector<96x128xf32>, vector<8x128xf32> -> vector<8x128xf32>
    %c0_168 = arith.constant 0 : index
    %c0_169 = arith.constant 0 : index
    %513 = vector.load %arg6[%c0_168, %c0_169] : memref<8x128xf32, #tpu.memory_space<vmem>>, vector<8x128xf32>
    %514 = arith.addf %512, %513 : vector<8x128xf32>
    %515 = vector.extract_strided_slice %514 {offsets = [0, 0], sizes = [8, 64], strides = [1, 1]} : vector<8x128xf32> to vector<8x64xf32>
    %516 = arith.negf %515 : vector<8x64xf32>
    %517 = math.exp %516 : vector<8x64xf32>
    %cst_170 = arith.constant 1.000000e+00 : f32
    %518 = vector.broadcast %cst_170 : f32 to vector<8x64xf32>
    %519 = arith.addf %518, %517 : vector<8x64xf32>
    %520 = arith.divf %518, %519 : vector<8x64xf32>
    %521 = vector.extract_strided_slice %520 {offsets = [0, 0], sizes = [8, 32], strides = [1, 1]} : vector<8x64xf32> to vector<8x32xf32>
    %522 = vector.extract_strided_slice %520 {offsets = [0, 32], sizes = [8, 32], strides = [1, 1]} : vector<8x64xf32> to vector<8x32xf32>
    %523 = vector.extract_strided_slice %514 {offsets = [0, 64], sizes = [8, 32], strides = [1, 1]} : vector<8x128xf32> to vector<8x32xf32>
    %524 = vector.extract_strided_slice %514 {offsets = [0, 96], sizes = [8, 32], strides = [1, 1]} : vector<8x128xf32> to vector<8x32xf32>
    %525 = arith.mulf %521, %524 : vector<8x32xf32>
    %526 = arith.addf %523, %525 : vector<8x32xf32>
    %527 = math.tanh %526 : vector<8x32xf32>
    %cst_171 = arith.constant 1.000000e+00 : f32
    %528 = vector.broadcast %cst_171 : f32 to vector<8x32xf32>
    %529 = arith.subf %528, %522 : vector<8x32xf32>
    %530 = arith.mulf %529, %527 : vector<8x32xf32>
    %531 = arith.mulf %522, %509 : vector<8x32xf32>
    %532 = arith.addf %530, %531 : vector<8x32xf32>
    %533 = tpu.concatenate %392, %532 in 1 : vector<8x64xf32>, vector<8x32xf32> -> vector<8x96xf32>
    %c0_172 = arith.constant 0 : index
    %c0_173 = arith.constant 0 : index
    %534 = vector.load %arg5[%c0_172, %c0_173] : memref<96x128xf32, #tpu.memory_space<vmem>>, vector<96x128xf32>
    %cst_174 = arith.constant dense<0.000000e+00> : vector<8x128xf32>
    %535 = tpu.matmul %533, %534, %cst_174 {dimension_numbers = #tpu.dot_dimension_numbers<[1], [0], [0], [1], [0, 0, 1, 1], [], []>} : vector<8x96xf32>, vector<96x128xf32>, vector<8x128xf32> -> vector<8x128xf32>
    %c0_175 = arith.constant 0 : index
    %c0_176 = arith.constant 0 : index
    %536 = vector.load %arg6[%c0_175, %c0_176] : memref<8x128xf32, #tpu.memory_space<vmem>>, vector<8x128xf32>
    %537 = arith.addf %535, %536 : vector<8x128xf32>
    %538 = vector.extract_strided_slice %537 {offsets = [0, 0], sizes = [8, 64], strides = [1, 1]} : vector<8x128xf32> to vector<8x64xf32>
    %539 = arith.negf %538 : vector<8x64xf32>
    %540 = math.exp %539 : vector<8x64xf32>
    %cst_177 = arith.constant 1.000000e+00 : f32
    %541 = vector.broadcast %cst_177 : f32 to vector<8x64xf32>
    %542 = arith.addf %541, %540 : vector<8x64xf32>
    %543 = arith.divf %541, %542 : vector<8x64xf32>
    %544 = vector.extract_strided_slice %543 {offsets = [0, 0], sizes = [8, 32], strides = [1, 1]} : vector<8x64xf32> to vector<8x32xf32>
    %545 = vector.extract_strided_slice %543 {offsets = [0, 32], sizes = [8, 32], strides = [1, 1]} : vector<8x64xf32> to vector<8x32xf32>
    %546 = vector.extract_strided_slice %537 {offsets = [0, 64], sizes = [8, 32], strides = [1, 1]} : vector<8x128xf32> to vector<8x32xf32>
    %547 = vector.extract_strided_slice %537 {offsets = [0, 96], sizes = [8, 32], strides = [1, 1]} : vector<8x128xf32> to vector<8x32xf32>
    %548 = arith.mulf %544, %547 : vector<8x32xf32>
    %549 = arith.addf %546, %548 : vector<8x32xf32>
    %550 = math.tanh %549 : vector<8x32xf32>
    %cst_178 = arith.constant 1.000000e+00 : f32
    %551 = vector.broadcast %cst_178 : f32 to vector<8x32xf32>
    %552 = arith.subf %551, %545 : vector<8x32xf32>
    %553 = arith.mulf %552, %550 : vector<8x32xf32>
    %554 = arith.mulf %545, %532 : vector<8x32xf32>
    %555 = arith.addf %553, %554 : vector<8x32xf32>
    %556 = tpu.concatenate %393, %555 in 1 : vector<8x64xf32>, vector<8x32xf32> -> vector<8x96xf32>
    %c0_179 = arith.constant 0 : index
    %c0_180 = arith.constant 0 : index
    %557 = vector.load %arg5[%c0_179, %c0_180] : memref<96x128xf32, #tpu.memory_space<vmem>>, vector<96x128xf32>
    %cst_181 = arith.constant dense<0.000000e+00> : vector<8x128xf32>
    %558 = tpu.matmul %556, %557, %cst_181 {dimension_numbers = #tpu.dot_dimension_numbers<[1], [0], [0], [1], [0, 0, 1, 1], [], []>} : vector<8x96xf32>, vector<96x128xf32>, vector<8x128xf32> -> vector<8x128xf32>
    %c0_182 = arith.constant 0 : index
    %c0_183 = arith.constant 0 : index
    %559 = vector.load %arg6[%c0_182, %c0_183] : memref<8x128xf32, #tpu.memory_space<vmem>>, vector<8x128xf32>
    %560 = arith.addf %558, %559 : vector<8x128xf32>
    %561 = vector.extract_strided_slice %560 {offsets = [0, 0], sizes = [8, 64], strides = [1, 1]} : vector<8x128xf32> to vector<8x64xf32>
    %562 = arith.negf %561 : vector<8x64xf32>
    %563 = math.exp %562 : vector<8x64xf32>
    %cst_184 = arith.constant 1.000000e+00 : f32
    %564 = vector.broadcast %cst_184 : f32 to vector<8x64xf32>
    %565 = arith.addf %564, %563 : vector<8x64xf32>
    %566 = arith.divf %564, %565 : vector<8x64xf32>
    %567 = vector.extract_strided_slice %566 {offsets = [0, 0], sizes = [8, 32], strides = [1, 1]} : vector<8x64xf32> to vector<8x32xf32>
    %568 = vector.extract_strided_slice %566 {offsets = [0, 32], sizes = [8, 32], strides = [1, 1]} : vector<8x64xf32> to vector<8x32xf32>
    %569 = vector.extract_strided_slice %560 {offsets = [0, 64], sizes = [8, 32], strides = [1, 1]} : vector<8x128xf32> to vector<8x32xf32>
    %570 = vector.extract_strided_slice %560 {offsets = [0, 96], sizes = [8, 32], strides = [1, 1]} : vector<8x128xf32> to vector<8x32xf32>
    %571 = arith.mulf %567, %570 : vector<8x32xf32>
    %572 = arith.addf %569, %571 : vector<8x32xf32>
    %573 = math.tanh %572 : vector<8x32xf32>
    %cst_185 = arith.constant 1.000000e+00 : f32
    %574 = vector.broadcast %cst_185 : f32 to vector<8x32xf32>
    %575 = arith.subf %574, %568 : vector<8x32xf32>
    %576 = arith.mulf %575, %573 : vector<8x32xf32>
    %577 = arith.mulf %568, %555 : vector<8x32xf32>
    %578 = arith.addf %576, %577 : vector<8x32xf32>
    %cst_186 = arith.constant 0.000000e+00 : f32
    %579 = vector.broadcast %cst_186 : f32 to vector<8x32xf32>
    %580 = tpu.concatenate %393, %579 in 1 : vector<8x64xf32>, vector<8x32xf32> -> vector<8x96xf32>
    %c0_187 = arith.constant 0 : index
    %c0_188 = arith.constant 0 : index
    %581 = vector.load %arg7[%c0_187, %c0_188] : memref<96x128xf32, #tpu.memory_space<vmem>>, vector<96x128xf32>
    %cst_189 = arith.constant dense<0.000000e+00> : vector<8x128xf32>
    %582 = tpu.matmul %580, %581, %cst_189 {dimension_numbers = #tpu.dot_dimension_numbers<[1], [0], [0], [1], [0, 0, 1, 1], [], []>} : vector<8x96xf32>, vector<96x128xf32>, vector<8x128xf32> -> vector<8x128xf32>
    %c0_190 = arith.constant 0 : index
    %c0_191 = arith.constant 0 : index
    %583 = vector.load %arg8[%c0_190, %c0_191] : memref<8x128xf32, #tpu.memory_space<vmem>>, vector<8x128xf32>
    %584 = arith.addf %582, %583 : vector<8x128xf32>
    %585 = vector.extract_strided_slice %584 {offsets = [0, 0], sizes = [8, 64], strides = [1, 1]} : vector<8x128xf32> to vector<8x64xf32>
    %586 = arith.negf %585 : vector<8x64xf32>
    %587 = math.exp %586 : vector<8x64xf32>
    %cst_192 = arith.constant 1.000000e+00 : f32
    %588 = vector.broadcast %cst_192 : f32 to vector<8x64xf32>
    %589 = arith.addf %588, %587 : vector<8x64xf32>
    %590 = arith.divf %588, %589 : vector<8x64xf32>
    %591 = vector.extract_strided_slice %590 {offsets = [0, 0], sizes = [8, 32], strides = [1, 1]} : vector<8x64xf32> to vector<8x32xf32>
    %592 = vector.extract_strided_slice %590 {offsets = [0, 32], sizes = [8, 32], strides = [1, 1]} : vector<8x64xf32> to vector<8x32xf32>
    %593 = vector.extract_strided_slice %584 {offsets = [0, 64], sizes = [8, 32], strides = [1, 1]} : vector<8x128xf32> to vector<8x32xf32>
    %594 = vector.extract_strided_slice %584 {offsets = [0, 96], sizes = [8, 32], strides = [1, 1]} : vector<8x128xf32> to vector<8x32xf32>
    %595 = arith.mulf %591, %594 : vector<8x32xf32>
    %596 = arith.addf %593, %595 : vector<8x32xf32>
    %597 = math.tanh %596 : vector<8x32xf32>
    %cst_193 = arith.constant 1.000000e+00 : f32
    %598 = vector.broadcast %cst_193 : f32 to vector<8x32xf32>
    %599 = arith.subf %598, %592 : vector<8x32xf32>
    %600 = arith.mulf %599, %597 : vector<8x32xf32>
    %601 = arith.mulf %592, %579 : vector<8x32xf32>
    %602 = arith.addf %600, %601 : vector<8x32xf32>
    %603 = tpu.concatenate %392, %602 in 1 : vector<8x64xf32>, vector<8x32xf32> -> vector<8x96xf32>
    %c0_194 = arith.constant 0 : index
    %c0_195 = arith.constant 0 : index
    %604 = vector.load %arg7[%c0_194, %c0_195] : memref<96x128xf32, #tpu.memory_space<vmem>>, vector<96x128xf32>
    %cst_196 = arith.constant dense<0.000000e+00> : vector<8x128xf32>
    %605 = tpu.matmul %603, %604, %cst_196 {dimension_numbers = #tpu.dot_dimension_numbers<[1], [0], [0], [1], [0, 0, 1, 1], [], []>} : vector<8x96xf32>, vector<96x128xf32>, vector<8x128xf32> -> vector<8x128xf32>
    %c0_197 = arith.constant 0 : index
    %c0_198 = arith.constant 0 : index
    %606 = vector.load %arg8[%c0_197, %c0_198] : memref<8x128xf32, #tpu.memory_space<vmem>>, vector<8x128xf32>
    %607 = arith.addf %605, %606 : vector<8x128xf32>
    %608 = vector.extract_strided_slice %607 {offsets = [0, 0], sizes = [8, 64], strides = [1, 1]} : vector<8x128xf32> to vector<8x64xf32>
    %609 = arith.negf %608 : vector<8x64xf32>
    %610 = math.exp %609 : vector<8x64xf32>
    %cst_199 = arith.constant 1.000000e+00 : f32
    %611 = vector.broadcast %cst_199 : f32 to vector<8x64xf32>
    %612 = arith.addf %611, %610 : vector<8x64xf32>
    %613 = arith.divf %611, %612 : vector<8x64xf32>
    %614 = vector.extract_strided_slice %613 {offsets = [0, 0], sizes = [8, 32], strides = [1, 1]} : vector<8x64xf32> to vector<8x32xf32>
    %615 = vector.extract_strided_slice %613 {offsets = [0, 32], sizes = [8, 32], strides = [1, 1]} : vector<8x64xf32> to vector<8x32xf32>
    %616 = vector.extract_strided_slice %607 {offsets = [0, 64], sizes = [8, 32], strides = [1, 1]} : vector<8x128xf32> to vector<8x32xf32>
    %617 = vector.extract_strided_slice %607 {offsets = [0, 96], sizes = [8, 32], strides = [1, 1]} : vector<8x128xf32> to vector<8x32xf32>
    %618 = arith.mulf %614, %617 : vector<8x32xf32>
    %619 = arith.addf %616, %618 : vector<8x32xf32>
    %620 = math.tanh %619 : vector<8x32xf32>
    %cst_200 = arith.constant 1.000000e+00 : f32
    %621 = vector.broadcast %cst_200 : f32 to vector<8x32xf32>
    %622 = arith.subf %621, %615 : vector<8x32xf32>
    %623 = arith.mulf %622, %620 : vector<8x32xf32>
    %624 = arith.mulf %615, %602 : vector<8x32xf32>
    %625 = arith.addf %623, %624 : vector<8x32xf32>
    %626 = tpu.concatenate %391, %625 in 1 : vector<8x64xf32>, vector<8x32xf32> -> vector<8x96xf32>
    %c0_201 = arith.constant 0 : index
    %c0_202 = arith.constant 0 : index
    %627 = vector.load %arg7[%c0_201, %c0_202] : memref<96x128xf32, #tpu.memory_space<vmem>>, vector<96x128xf32>
    %cst_203 = arith.constant dense<0.000000e+00> : vector<8x128xf32>
    %628 = tpu.matmul %626, %627, %cst_203 {dimension_numbers = #tpu.dot_dimension_numbers<[1], [0], [0], [1], [0, 0, 1, 1], [], []>} : vector<8x96xf32>, vector<96x128xf32>, vector<8x128xf32> -> vector<8x128xf32>
    %c0_204 = arith.constant 0 : index
    %c0_205 = arith.constant 0 : index
    %629 = vector.load %arg8[%c0_204, %c0_205] : memref<8x128xf32, #tpu.memory_space<vmem>>, vector<8x128xf32>
    %630 = arith.addf %628, %629 : vector<8x128xf32>
    %631 = vector.extract_strided_slice %630 {offsets = [0, 0], sizes = [8, 64], strides = [1, 1]} : vector<8x128xf32> to vector<8x64xf32>
    %632 = arith.negf %631 : vector<8x64xf32>
    %633 = math.exp %632 : vector<8x64xf32>
    %cst_206 = arith.constant 1.000000e+00 : f32
    %634 = vector.broadcast %cst_206 : f32 to vector<8x64xf32>
    %635 = arith.addf %634, %633 : vector<8x64xf32>
    %636 = arith.divf %634, %635 : vector<8x64xf32>
    %637 = vector.extract_strided_slice %636 {offsets = [0, 0], sizes = [8, 32], strides = [1, 1]} : vector<8x64xf32> to vector<8x32xf32>
    %638 = vector.extract_strided_slice %636 {offsets = [0, 32], sizes = [8, 32], strides = [1, 1]} : vector<8x64xf32> to vector<8x32xf32>
    %639 = vector.extract_strided_slice %630 {offsets = [0, 64], sizes = [8, 32], strides = [1, 1]} : vector<8x128xf32> to vector<8x32xf32>
    %640 = vector.extract_strided_slice %630 {offsets = [0, 96], sizes = [8, 32], strides = [1, 1]} : vector<8x128xf32> to vector<8x32xf32>
    %641 = arith.mulf %637, %640 : vector<8x32xf32>
    %642 = arith.addf %639, %641 : vector<8x32xf32>
    %643 = math.tanh %642 : vector<8x32xf32>
    %cst_207 = arith.constant 1.000000e+00 : f32
    %644 = vector.broadcast %cst_207 : f32 to vector<8x32xf32>
    %645 = arith.subf %644, %638 : vector<8x32xf32>
    %646 = arith.mulf %645, %643 : vector<8x32xf32>
    %647 = arith.mulf %638, %625 : vector<8x32xf32>
    %648 = arith.addf %646, %647 : vector<8x32xf32>
    %649 = tpu.concatenate %390, %648 in 1 : vector<8x64xf32>, vector<8x32xf32> -> vector<8x96xf32>
    %c0_208 = arith.constant 0 : index
    %c0_209 = arith.constant 0 : index
    %650 = vector.load %arg7[%c0_208, %c0_209] : memref<96x128xf32, #tpu.memory_space<vmem>>, vector<96x128xf32>
    %cst_210 = arith.constant dense<0.000000e+00> : vector<8x128xf32>
    %651 = tpu.matmul %649, %650, %cst_210 {dimension_numbers = #tpu.dot_dimension_numbers<[1], [0], [0], [1], [0, 0, 1, 1], [], []>} : vector<8x96xf32>, vector<96x128xf32>, vector<8x128xf32> -> vector<8x128xf32>
    %c0_211 = arith.constant 0 : index
    %c0_212 = arith.constant 0 : index
    %652 = vector.load %arg8[%c0_211, %c0_212] : memref<8x128xf32, #tpu.memory_space<vmem>>, vector<8x128xf32>
    %653 = arith.addf %651, %652 : vector<8x128xf32>
    %654 = vector.extract_strided_slice %653 {offsets = [0, 0], sizes = [8, 64], strides = [1, 1]} : vector<8x128xf32> to vector<8x64xf32>
    %655 = arith.negf %654 : vector<8x64xf32>
    %656 = math.exp %655 : vector<8x64xf32>
    %cst_213 = arith.constant 1.000000e+00 : f32
    %657 = vector.broadcast %cst_213 : f32 to vector<8x64xf32>
    %658 = arith.addf %657, %656 : vector<8x64xf32>
    %659 = arith.divf %657, %658 : vector<8x64xf32>
    %660 = vector.extract_strided_slice %659 {offsets = [0, 0], sizes = [8, 32], strides = [1, 1]} : vector<8x64xf32> to vector<8x32xf32>
    %661 = vector.extract_strided_slice %659 {offsets = [0, 32], sizes = [8, 32], strides = [1, 1]} : vector<8x64xf32> to vector<8x32xf32>
    %662 = vector.extract_strided_slice %653 {offsets = [0, 64], sizes = [8, 32], strides = [1, 1]} : vector<8x128xf32> to vector<8x32xf32>
    %663 = vector.extract_strided_slice %653 {offsets = [0, 96], sizes = [8, 32], strides = [1, 1]} : vector<8x128xf32> to vector<8x32xf32>
    %664 = arith.mulf %660, %663 : vector<8x32xf32>
    %665 = arith.addf %662, %664 : vector<8x32xf32>
    %666 = math.tanh %665 : vector<8x32xf32>
    %cst_214 = arith.constant 1.000000e+00 : f32
    %667 = vector.broadcast %cst_214 : f32 to vector<8x32xf32>
    %668 = arith.subf %667, %661 : vector<8x32xf32>
    %669 = arith.mulf %668, %666 : vector<8x32xf32>
    %670 = arith.mulf %661, %648 : vector<8x32xf32>
    %671 = arith.addf %669, %670 : vector<8x32xf32>
    %672 = tpu.concatenate %389, %671 in 1 : vector<8x64xf32>, vector<8x32xf32> -> vector<8x96xf32>
    %c0_215 = arith.constant 0 : index
    %c0_216 = arith.constant 0 : index
    %673 = vector.load %arg7[%c0_215, %c0_216] : memref<96x128xf32, #tpu.memory_space<vmem>>, vector<96x128xf32>
    %cst_217 = arith.constant dense<0.000000e+00> : vector<8x128xf32>
    %674 = tpu.matmul %672, %673, %cst_217 {dimension_numbers = #tpu.dot_dimension_numbers<[1], [0], [0], [1], [0, 0, 1, 1], [], []>} : vector<8x96xf32>, vector<96x128xf32>, vector<8x128xf32> -> vector<8x128xf32>
    %c0_218 = arith.constant 0 : index
    %c0_219 = arith.constant 0 : index
    %675 = vector.load %arg8[%c0_218, %c0_219] : memref<8x128xf32, #tpu.memory_space<vmem>>, vector<8x128xf32>
    %676 = arith.addf %674, %675 : vector<8x128xf32>
    %677 = vector.extract_strided_slice %676 {offsets = [0, 0], sizes = [8, 64], strides = [1, 1]} : vector<8x128xf32> to vector<8x64xf32>
    %678 = arith.negf %677 : vector<8x64xf32>
    %679 = math.exp %678 : vector<8x64xf32>
    %cst_220 = arith.constant 1.000000e+00 : f32
    %680 = vector.broadcast %cst_220 : f32 to vector<8x64xf32>
    %681 = arith.addf %680, %679 : vector<8x64xf32>
    %682 = arith.divf %680, %681 : vector<8x64xf32>
    %683 = vector.extract_strided_slice %682 {offsets = [0, 0], sizes = [8, 32], strides = [1, 1]} : vector<8x64xf32> to vector<8x32xf32>
    %684 = vector.extract_strided_slice %682 {offsets = [0, 32], sizes = [8, 32], strides = [1, 1]} : vector<8x64xf32> to vector<8x32xf32>
    %685 = vector.extract_strided_slice %676 {offsets = [0, 64], sizes = [8, 32], strides = [1, 1]} : vector<8x128xf32> to vector<8x32xf32>
    %686 = vector.extract_strided_slice %676 {offsets = [0, 96], sizes = [8, 32], strides = [1, 1]} : vector<8x128xf32> to vector<8x32xf32>
    %687 = arith.mulf %683, %686 : vector<8x32xf32>
    %688 = arith.addf %685, %687 : vector<8x32xf32>
    %689 = math.tanh %688 : vector<8x32xf32>
    %cst_221 = arith.constant 1.000000e+00 : f32
    %690 = vector.broadcast %cst_221 : f32 to vector<8x32xf32>
    %691 = arith.subf %690, %684 : vector<8x32xf32>
    %692 = arith.mulf %691, %689 : vector<8x32xf32>
    %693 = arith.mulf %684, %671 : vector<8x32xf32>
    %694 = arith.addf %692, %693 : vector<8x32xf32>
    %695 = tpu.concatenate %388, %694 in 1 : vector<8x64xf32>, vector<8x32xf32> -> vector<8x96xf32>
    %c0_222 = arith.constant 0 : index
    %c0_223 = arith.constant 0 : index
    %696 = vector.load %arg7[%c0_222, %c0_223] : memref<96x128xf32, #tpu.memory_space<vmem>>, vector<96x128xf32>
    %cst_224 = arith.constant dense<0.000000e+00> : vector<8x128xf32>
    %697 = tpu.matmul %695, %696, %cst_224 {dimension_numbers = #tpu.dot_dimension_numbers<[1], [0], [0], [1], [0, 0, 1, 1], [], []>} : vector<8x96xf32>, vector<96x128xf32>, vector<8x128xf32> -> vector<8x128xf32>
    %c0_225 = arith.constant 0 : index
    %c0_226 = arith.constant 0 : index
    %698 = vector.load %arg8[%c0_225, %c0_226] : memref<8x128xf32, #tpu.memory_space<vmem>>, vector<8x128xf32>
    %699 = arith.addf %697, %698 : vector<8x128xf32>
    %700 = vector.extract_strided_slice %699 {offsets = [0, 0], sizes = [8, 64], strides = [1, 1]} : vector<8x128xf32> to vector<8x64xf32>
    %701 = arith.negf %700 : vector<8x64xf32>
    %702 = math.exp %701 : vector<8x64xf32>
    %cst_227 = arith.constant 1.000000e+00 : f32
    %703 = vector.broadcast %cst_227 : f32 to vector<8x64xf32>
    %704 = arith.addf %703, %702 : vector<8x64xf32>
    %705 = arith.divf %703, %704 : vector<8x64xf32>
    %706 = vector.extract_strided_slice %705 {offsets = [0, 0], sizes = [8, 32], strides = [1, 1]} : vector<8x64xf32> to vector<8x32xf32>
    %707 = vector.extract_strided_slice %705 {offsets = [0, 32], sizes = [8, 32], strides = [1, 1]} : vector<8x64xf32> to vector<8x32xf32>
    %708 = vector.extract_strided_slice %699 {offsets = [0, 64], sizes = [8, 32], strides = [1, 1]} : vector<8x128xf32> to vector<8x32xf32>
    %709 = vector.extract_strided_slice %699 {offsets = [0, 96], sizes = [8, 32], strides = [1, 1]} : vector<8x128xf32> to vector<8x32xf32>
    %710 = arith.mulf %706, %709 : vector<8x32xf32>
    %711 = arith.addf %708, %710 : vector<8x32xf32>
    %712 = math.tanh %711 : vector<8x32xf32>
    %cst_228 = arith.constant 1.000000e+00 : f32
    %713 = vector.broadcast %cst_228 : f32 to vector<8x32xf32>
    %714 = arith.subf %713, %707 : vector<8x32xf32>
    %715 = arith.mulf %714, %712 : vector<8x32xf32>
    %716 = arith.mulf %707, %694 : vector<8x32xf32>
    %717 = arith.addf %715, %716 : vector<8x32xf32>
    %718 = tpu.concatenate %387, %717 in 1 : vector<8x64xf32>, vector<8x32xf32> -> vector<8x96xf32>
    %c0_229 = arith.constant 0 : index
    %c0_230 = arith.constant 0 : index
    %719 = vector.load %arg7[%c0_229, %c0_230] : memref<96x128xf32, #tpu.memory_space<vmem>>, vector<96x128xf32>
    %cst_231 = arith.constant dense<0.000000e+00> : vector<8x128xf32>
    %720 = tpu.matmul %718, %719, %cst_231 {dimension_numbers = #tpu.dot_dimension_numbers<[1], [0], [0], [1], [0, 0, 1, 1], [], []>} : vector<8x96xf32>, vector<96x128xf32>, vector<8x128xf32> -> vector<8x128xf32>
    %c0_232 = arith.constant 0 : index
    %c0_233 = arith.constant 0 : index
    %721 = vector.load %arg8[%c0_232, %c0_233] : memref<8x128xf32, #tpu.memory_space<vmem>>, vector<8x128xf32>
    %722 = arith.addf %720, %721 : vector<8x128xf32>
    %723 = vector.extract_strided_slice %722 {offsets = [0, 0], sizes = [8, 64], strides = [1, 1]} : vector<8x128xf32> to vector<8x64xf32>
    %724 = arith.negf %723 : vector<8x64xf32>
    %725 = math.exp %724 : vector<8x64xf32>
    %cst_234 = arith.constant 1.000000e+00 : f32
    %726 = vector.broadcast %cst_234 : f32 to vector<8x64xf32>
    %727 = arith.addf %726, %725 : vector<8x64xf32>
    %728 = arith.divf %726, %727 : vector<8x64xf32>
    %729 = vector.extract_strided_slice %728 {offsets = [0, 0], sizes = [8, 32], strides = [1, 1]} : vector<8x64xf32> to vector<8x32xf32>
    %730 = vector.extract_strided_slice %728 {offsets = [0, 32], sizes = [8, 32], strides = [1, 1]} : vector<8x64xf32> to vector<8x32xf32>
    %731 = vector.extract_strided_slice %722 {offsets = [0, 64], sizes = [8, 32], strides = [1, 1]} : vector<8x128xf32> to vector<8x32xf32>
    %732 = vector.extract_strided_slice %722 {offsets = [0, 96], sizes = [8, 32], strides = [1, 1]} : vector<8x128xf32> to vector<8x32xf32>
    %733 = arith.mulf %729, %732 : vector<8x32xf32>
    %734 = arith.addf %731, %733 : vector<8x32xf32>
    %735 = math.tanh %734 : vector<8x32xf32>
    %cst_235 = arith.constant 1.000000e+00 : f32
    %736 = vector.broadcast %cst_235 : f32 to vector<8x32xf32>
    %737 = arith.subf %736, %730 : vector<8x32xf32>
    %738 = arith.mulf %737, %735 : vector<8x32xf32>
    %739 = arith.mulf %730, %717 : vector<8x32xf32>
    %740 = arith.addf %738, %739 : vector<8x32xf32>
    %741 = tpu.concatenate %386, %740 in 1 : vector<8x64xf32>, vector<8x32xf32> -> vector<8x96xf32>
    %c0_236 = arith.constant 0 : index
    %c0_237 = arith.constant 0 : index
    %742 = vector.load %arg7[%c0_236, %c0_237] : memref<96x128xf32, #tpu.memory_space<vmem>>, vector<96x128xf32>
    %cst_238 = arith.constant dense<0.000000e+00> : vector<8x128xf32>
    %743 = tpu.matmul %741, %742, %cst_238 {dimension_numbers = #tpu.dot_dimension_numbers<[1], [0], [0], [1], [0, 0, 1, 1], [], []>} : vector<8x96xf32>, vector<96x128xf32>, vector<8x128xf32> -> vector<8x128xf32>
    %c0_239 = arith.constant 0 : index
    %c0_240 = arith.constant 0 : index
    %744 = vector.load %arg8[%c0_239, %c0_240] : memref<8x128xf32, #tpu.memory_space<vmem>>, vector<8x128xf32>
    %745 = arith.addf %743, %744 : vector<8x128xf32>
    %746 = vector.extract_strided_slice %745 {offsets = [0, 0], sizes = [8, 64], strides = [1, 1]} : vector<8x128xf32> to vector<8x64xf32>
    %747 = arith.negf %746 : vector<8x64xf32>
    %748 = math.exp %747 : vector<8x64xf32>
    %cst_241 = arith.constant 1.000000e+00 : f32
    %749 = vector.broadcast %cst_241 : f32 to vector<8x64xf32>
    %750 = arith.addf %749, %748 : vector<8x64xf32>
    %751 = arith.divf %749, %750 : vector<8x64xf32>
    %752 = vector.extract_strided_slice %751 {offsets = [0, 0], sizes = [8, 32], strides = [1, 1]} : vector<8x64xf32> to vector<8x32xf32>
    %753 = vector.extract_strided_slice %751 {offsets = [0, 32], sizes = [8, 32], strides = [1, 1]} : vector<8x64xf32> to vector<8x32xf32>
    %754 = vector.extract_strided_slice %745 {offsets = [0, 64], sizes = [8, 32], strides = [1, 1]} : vector<8x128xf32> to vector<8x32xf32>
    %755 = vector.extract_strided_slice %745 {offsets = [0, 96], sizes = [8, 32], strides = [1, 1]} : vector<8x128xf32> to vector<8x32xf32>
    %756 = arith.mulf %752, %755 : vector<8x32xf32>
    %757 = arith.addf %754, %756 : vector<8x32xf32>
    %758 = math.tanh %757 : vector<8x32xf32>
    %cst_242 = arith.constant 1.000000e+00 : f32
    %759 = vector.broadcast %cst_242 : f32 to vector<8x32xf32>
    %760 = arith.subf %759, %753 : vector<8x32xf32>
    %761 = arith.mulf %760, %758 : vector<8x32xf32>
    %762 = arith.mulf %753, %740 : vector<8x32xf32>
    %763 = arith.addf %761, %762 : vector<8x32xf32>
    %764 = tpu.concatenate %200, %385 in 1 : vector<8x32xf32>, vector<8x32xf32> -> vector<8x64xf32>
    %765 = tpu.concatenate %578, %763 in 1 : vector<8x32xf32>, vector<8x32xf32> -> vector<8x64xf32>
    %766 = tpu.iota {dimensions = array<i32: 1>} : vector<8x16xi32>
    %767 = arith.sitofp %766 : vector<8x16xi32> to vector<8x16xf32>
    %768 = tpu.iota {dimensions = array<i32: 1>} : vector<8x128xi32>
    %769 = arith.sitofp %768 : vector<8x128xi32> to vector<8x128xf32>
    %cst_243 = arith.constant 0.000000e+00 : f32
    %770 = vector.broadcast %cst_243 : f32 to vector<8x1xf32>
    %771 = vector.broadcast %770 : vector<8x1xf32> to vector<8x16xf32>
    %772 = arith.cmpf oeq, %767, %771 : vector<8x16xf32>
    %773 = arith.extui %772 : vector<8x16xi1> to vector<8x16xi32>
    %774 = arith.sitofp %773 : vector<8x16xi32> to vector<8x16xf32>
    %775 = tpu.concatenate %774, %764 in 1 : vector<8x16xf32>, vector<8x64xf32> -> vector<8x80xf32>
    %c0_244 = arith.constant 0 : index
    %c0_245 = arith.constant 0 : index
    %776 = vector.load %arg9[%c0_244, %c0_245] : memref<80x256xf32, #tpu.memory_space<vmem>>, vector<80x256xf32>
    %cst_246 = arith.constant dense<0.000000e+00> : vector<8x256xf32>
    %777 = tpu.matmul %775, %776, %cst_246 {dimension_numbers = #tpu.dot_dimension_numbers<[1], [0], [0], [1], [0, 0, 1, 1], [], []>} : vector<8x80xf32>, vector<80x256xf32>, vector<8x256xf32> -> vector<8x256xf32>
    %c0_247 = arith.constant 0 : index
    %c0_248 = arith.constant 0 : index
    %778 = vector.load %arg10[%c0_247, %c0_248] : memref<8x256xf32, #tpu.memory_space<vmem>>, vector<8x256xf32>
    %779 = arith.addf %777, %778 : vector<8x256xf32>
    %780 = vector.extract_strided_slice %779 {offsets = [0, 0], sizes = [8, 128], strides = [1, 1]} : vector<8x256xf32> to vector<8x128xf32>
    %781 = arith.negf %780 : vector<8x128xf32>
    %782 = math.exp %781 : vector<8x128xf32>
    %cst_249 = arith.constant 1.000000e+00 : f32
    %783 = vector.broadcast %cst_249 : f32 to vector<8x128xf32>
    %784 = arith.addf %783, %782 : vector<8x128xf32>
    %785 = arith.divf %783, %784 : vector<8x128xf32>
    %786 = vector.extract_strided_slice %785 {offsets = [0, 0], sizes = [8, 64], strides = [1, 1]} : vector<8x128xf32> to vector<8x64xf32>
    %787 = vector.extract_strided_slice %785 {offsets = [0, 64], sizes = [8, 64], strides = [1, 1]} : vector<8x128xf32> to vector<8x64xf32>
    %788 = vector.extract_strided_slice %779 {offsets = [0, 128], sizes = [8, 64], strides = [1, 1]} : vector<8x256xf32> to vector<8x64xf32>
    %789 = vector.extract_strided_slice %779 {offsets = [0, 192], sizes = [8, 64], strides = [1, 1]} : vector<8x256xf32> to vector<8x64xf32>
    %790 = arith.mulf %786, %789 : vector<8x64xf32>
    %791 = arith.addf %788, %790 : vector<8x64xf32>
    %792 = math.tanh %791 : vector<8x64xf32>
    %cst_250 = arith.constant 1.000000e+00 : f32
    %793 = vector.broadcast %cst_250 : f32 to vector<8x64xf32>
    %794 = arith.subf %793, %787 : vector<8x64xf32>
    %795 = arith.mulf %794, %792 : vector<8x64xf32>
    %796 = arith.mulf %787, %764 : vector<8x64xf32>
    %797 = arith.addf %795, %796 : vector<8x64xf32>
    %798 = tpu.concatenate %797, %765 in 1 : vector<8x64xf32>, vector<8x64xf32> -> vector<8x128xf32>
    %c0_251 = arith.constant 0 : index
    %c0_252 = arith.constant 0 : index
    %799 = vector.load %arg11[%c0_251, %c0_252] : memref<128x256xf32, #tpu.memory_space<vmem>>, vector<128x256xf32>
    %cst_253 = arith.constant dense<0.000000e+00> : vector<8x256xf32>
    %800 = tpu.matmul %798, %799, %cst_253 {dimension_numbers = #tpu.dot_dimension_numbers<[1], [0], [0], [1], [0, 0, 1, 1], [], []>} : vector<8x128xf32>, vector<128x256xf32>, vector<8x256xf32> -> vector<8x256xf32>
    %c0_254 = arith.constant 0 : index
    %c0_255 = arith.constant 0 : index
    %801 = vector.load %arg12[%c0_254, %c0_255] : memref<8x256xf32, #tpu.memory_space<vmem>>, vector<8x256xf32>
    %802 = arith.addf %800, %801 : vector<8x256xf32>
    %803 = vector.extract_strided_slice %802 {offsets = [0, 0], sizes = [8, 128], strides = [1, 1]} : vector<8x256xf32> to vector<8x128xf32>
    %804 = arith.negf %803 : vector<8x128xf32>
    %805 = math.exp %804 : vector<8x128xf32>
    %cst_256 = arith.constant 1.000000e+00 : f32
    %806 = vector.broadcast %cst_256 : f32 to vector<8x128xf32>
    %807 = arith.addf %806, %805 : vector<8x128xf32>
    %808 = arith.divf %806, %807 : vector<8x128xf32>
    %809 = vector.extract_strided_slice %808 {offsets = [0, 0], sizes = [8, 64], strides = [1, 1]} : vector<8x128xf32> to vector<8x64xf32>
    %810 = vector.extract_strided_slice %808 {offsets = [0, 64], sizes = [8, 64], strides = [1, 1]} : vector<8x128xf32> to vector<8x64xf32>
    %811 = vector.extract_strided_slice %802 {offsets = [0, 128], sizes = [8, 64], strides = [1, 1]} : vector<8x256xf32> to vector<8x64xf32>
    %812 = vector.extract_strided_slice %802 {offsets = [0, 192], sizes = [8, 64], strides = [1, 1]} : vector<8x256xf32> to vector<8x64xf32>
    %813 = arith.mulf %809, %812 : vector<8x64xf32>
    %814 = arith.addf %811, %813 : vector<8x64xf32>
    %815 = math.tanh %814 : vector<8x64xf32>
    %cst_257 = arith.constant 1.000000e+00 : f32
    %816 = vector.broadcast %cst_257 : f32 to vector<8x64xf32>
    %817 = arith.subf %816, %810 : vector<8x64xf32>
    %818 = arith.mulf %817, %815 : vector<8x64xf32>
    %819 = arith.mulf %810, %765 : vector<8x64xf32>
    %820 = arith.addf %818, %819 : vector<8x64xf32>
    %c0_258 = arith.constant 0 : index
    %c0_259 = arith.constant 0 : index
    %821 = vector.load %arg13[%c0_258, %c0_259] : memref<64x128xf32, #tpu.memory_space<vmem>>, vector<64x128xf32>
    %cst_260 = arith.constant dense<0.000000e+00> : vector<8x128xf32>
    %822 = tpu.matmul %820, %821, %cst_260 {dimension_numbers = #tpu.dot_dimension_numbers<[1], [0], [0], [1], [0, 0, 1, 1], [], []>} : vector<8x64xf32>, vector<64x128xf32>, vector<8x128xf32> -> vector<8x128xf32>
    %c0_261 = arith.constant 0 : index
    %c0_262 = arith.constant 0 : index
    %823 = vector.load %arg14[%c0_261, %c0_262] : memref<8x128xf32, #tpu.memory_space<vmem>>, vector<8x128xf32>
    %824 = arith.addf %822, %823 : vector<8x128xf32>
    %cst_263 = arith.constant dense<0xFF800000> : vector<8xf32>
    %825 = vector.multi_reduction <maximumf>, %824, %cst_263 [1] : vector<8x128xf32> to vector<8xf32>
    %826 = vector.shape_cast %825 : vector<8xf32> to vector<8x1xf32>
    %827 = vector.broadcast %826 : vector<8x1xf32> to vector<8x128xf32>
    %828 = arith.subf %824, %827 : vector<8x128xf32>
    %829 = math.exp %828 : vector<8x128xf32>
    %cst_264 = arith.constant dense<0.000000e+00> : vector<8xf32>
    %830 = vector.multi_reduction <add>, %829, %cst_264 [1] : vector<8x128xf32> to vector<8xf32>
    %831 = vector.shape_cast %830 : vector<8xf32> to vector<8x1xf32>
    %832 = math.log %831 : vector<8x1xf32>
    %833 = vector.broadcast %832 : vector<8x1xf32> to vector<8x128xf32>
    %834 = arith.subf %828, %833 : vector<8x128xf32>
    %c0_265 = arith.constant 0 : index
    %c0_266 = arith.constant 0 : index
    %c0_267 = arith.constant 0 : index
    %835 = vector.load %arg15[%c0_265, %c0_266, %c0_267] : memref<8x8x128xf32, #tpu.memory_space<vmem>>, vector<1x8x128xf32>
    %836 = vector.shape_cast %835 : vector<1x8x128xf32> to vector<8x128xf32>
    %837 = vector.shape_cast %834 : vector<8x128xf32> to vector<1x8x128xf32>
    tpu.vector_store %arg15[%c0_265, %c0_266, %c0_267], %837 {strides = array<i32>} : memref<8x8x128xf32, #tpu.memory_space<vmem>>, vector<1x8x128xf32>,
    %838 = vector.broadcast %826 : vector<8x1xf32> to vector<8x128xf32>
    %839 = arith.cmpf oeq, %824, %838 : vector<8x128xf32>
    %cst_268 = arith.constant 1.280000e+02 : f32
    %840 = vector.broadcast %cst_268 : f32 to vector<8x128xf32>
    %841 = arith.select %839, %769, %840 : vector<8x128xi1>, vector<8x128xf32>
    %cst_269 = arith.constant dense<0x7F800000> : vector<8xf32>
    %842 = vector.multi_reduction <minimumf>, %841, %cst_269 [1] : vector<8x128xf32> to vector<8xf32>
    %843 = vector.shape_cast %842 : vector<8xf32> to vector<8x1xf32>
    %844 = vector.broadcast %843 : vector<8x1xf32> to vector<8x16xf32>
    %845 = arith.cmpf oeq, %767, %844 : vector<8x16xf32>
    %846 = arith.extui %845 : vector<8x16xi1> to vector<8x16xi32>
    %847 = arith.sitofp %846 : vector<8x16xi32> to vector<8x16xf32>
    %848 = tpu.concatenate %847, %797 in 1 : vector<8x16xf32>, vector<8x64xf32> -> vector<8x80xf32>
    %c0_270 = arith.constant 0 : index
    %c0_271 = arith.constant 0 : index
    %849 = vector.load %arg9[%c0_270, %c0_271] : memref<80x256xf32, #tpu.memory_space<vmem>>, vector<80x256xf32>
    %cst_272 = arith.constant dense<0.000000e+00> : vector<8x256xf32>
    %850 = tpu.matmul %848, %849, %cst_272 {dimension_numbers = #tpu.dot_dimension_numbers<[1], [0], [0], [1], [0, 0, 1, 1], [], []>} : vector<8x80xf32>, vector<80x256xf32>, vector<8x256xf32> -> vector<8x256xf32>
    %c0_273 = arith.constant 0 : index
    %c0_274 = arith.constant 0 : index
    %851 = vector.load %arg10[%c0_273, %c0_274] : memref<8x256xf32, #tpu.memory_space<vmem>>, vector<8x256xf32>
    %852 = arith.addf %850, %851 : vector<8x256xf32>
    %853 = vector.extract_strided_slice %852 {offsets = [0, 0], sizes = [8, 128], strides = [1, 1]} : vector<8x256xf32> to vector<8x128xf32>
    %854 = arith.negf %853 : vector<8x128xf32>
    %855 = math.exp %854 : vector<8x128xf32>
    %cst_275 = arith.constant 1.000000e+00 : f32
    %856 = vector.broadcast %cst_275 : f32 to vector<8x128xf32>
    %857 = arith.addf %856, %855 : vector<8x128xf32>
    %858 = arith.divf %856, %857 : vector<8x128xf32>
    %859 = vector.extract_strided_slice %858 {offsets = [0, 0], sizes = [8, 64], strides = [1, 1]} : vector<8x128xf32> to vector<8x64xf32>
    %860 = vector.extract_strided_slice %858 {offsets = [0, 64], sizes = [8, 64], strides = [1, 1]} : vector<8x128xf32> to vector<8x64xf32>
    %861 = vector.extract_strided_slice %852 {offsets = [0, 128], sizes = [8, 64], strides = [1, 1]} : vector<8x256xf32> to vector<8x64xf32>
    %862 = vector.extract_strided_slice %852 {offsets = [0, 192], sizes = [8, 64], strides = [1, 1]} : vector<8x256xf32> to vector<8x64xf32>
    %863 = arith.mulf %859, %862 : vector<8x64xf32>
    %864 = arith.addf %861, %863 : vector<8x64xf32>
    %865 = math.tanh %864 : vector<8x64xf32>
    %cst_276 = arith.constant 1.000000e+00 : f32
    %866 = vector.broadcast %cst_276 : f32 to vector<8x64xf32>
    %867 = arith.subf %866, %860 : vector<8x64xf32>
    %868 = arith.mulf %867, %865 : vector<8x64xf32>
    %869 = arith.mulf %860, %797 : vector<8x64xf32>
    %870 = arith.addf %868, %869 : vector<8x64xf32>
    %871 = tpu.concatenate %870, %820 in 1 : vector<8x64xf32>, vector<8x64xf32> -> vector<8x128xf32>
    %c0_277 = arith.constant 0 : index
    %c0_278 = arith.constant 0 : index
    %872 = vector.load %arg11[%c0_277, %c0_278] : memref<128x256xf32, #tpu.memory_space<vmem>>, vector<128x256xf32>
    %cst_279 = arith.constant dense<0.000000e+00> : vector<8x256xf32>
    %873 = tpu.matmul %871, %872, %cst_279 {dimension_numbers = #tpu.dot_dimension_numbers<[1], [0], [0], [1], [0, 0, 1, 1], [], []>} : vector<8x128xf32>, vector<128x256xf32>, vector<8x256xf32> -> vector<8x256xf32>
    %c0_280 = arith.constant 0 : index
    %c0_281 = arith.constant 0 : index
    %874 = vector.load %arg12[%c0_280, %c0_281] : memref<8x256xf32, #tpu.memory_space<vmem>>, vector<8x256xf32>
    %875 = arith.addf %873, %874 : vector<8x256xf32>
    %876 = vector.extract_strided_slice %875 {offsets = [0, 0], sizes = [8, 128], strides = [1, 1]} : vector<8x256xf32> to vector<8x128xf32>
    %877 = arith.negf %876 : vector<8x128xf32>
    %878 = math.exp %877 : vector<8x128xf32>
    %cst_282 = arith.constant 1.000000e+00 : f32
    %879 = vector.broadcast %cst_282 : f32 to vector<8x128xf32>
    %880 = arith.addf %879, %878 : vector<8x128xf32>
    %881 = arith.divf %879, %880 : vector<8x128xf32>
    %882 = vector.extract_strided_slice %881 {offsets = [0, 0], sizes = [8, 64], strides = [1, 1]} : vector<8x128xf32> to vector<8x64xf32>
    %883 = vector.extract_strided_slice %881 {offsets = [0, 64], sizes = [8, 64], strides = [1, 1]} : vector<8x128xf32> to vector<8x64xf32>
    %884 = vector.extract_strided_slice %875 {offsets = [0, 128], sizes = [8, 64], strides = [1, 1]} : vector<8x256xf32> to vector<8x64xf32>
    %885 = vector.extract_strided_slice %875 {offsets = [0, 192], sizes = [8, 64], strides = [1, 1]} : vector<8x256xf32> to vector<8x64xf32>
    %886 = arith.mulf %882, %885 : vector<8x64xf32>
    %887 = arith.addf %884, %886 : vector<8x64xf32>
    %888 = math.tanh %887 : vector<8x64xf32>
    %cst_283 = arith.constant 1.000000e+00 : f32
    %889 = vector.broadcast %cst_283 : f32 to vector<8x64xf32>
    %890 = arith.subf %889, %883 : vector<8x64xf32>
    %891 = arith.mulf %890, %888 : vector<8x64xf32>
    %892 = arith.mulf %883, %820 : vector<8x64xf32>
    %893 = arith.addf %891, %892 : vector<8x64xf32>
    %c0_284 = arith.constant 0 : index
    %c0_285 = arith.constant 0 : index
    %894 = vector.load %arg13[%c0_284, %c0_285] : memref<64x128xf32, #tpu.memory_space<vmem>>, vector<64x128xf32>
    %cst_286 = arith.constant dense<0.000000e+00> : vector<8x128xf32>
    %895 = tpu.matmul %893, %894, %cst_286 {dimension_numbers = #tpu.dot_dimension_numbers<[1], [0], [0], [1], [0, 0, 1, 1], [], []>} : vector<8x64xf32>, vector<64x128xf32>, vector<8x128xf32> -> vector<8x128xf32>
    %c0_287 = arith.constant 0 : index
    %c0_288 = arith.constant 0 : index
    %896 = vector.load %arg14[%c0_287, %c0_288] : memref<8x128xf32, #tpu.memory_space<vmem>>, vector<8x128xf32>
    %897 = arith.addf %895, %896 : vector<8x128xf32>
    %cst_289 = arith.constant dense<0xFF800000> : vector<8xf32>
    %898 = vector.multi_reduction <maximumf>, %897, %cst_289 [1] : vector<8x128xf32> to vector<8xf32>
    %899 = vector.shape_cast %898 : vector<8xf32> to vector<8x1xf32>
    %900 = vector.broadcast %899 : vector<8x1xf32> to vector<8x128xf32>
    %901 = arith.subf %897, %900 : vector<8x128xf32>
    %902 = math.exp %901 : vector<8x128xf32>
    %cst_290 = arith.constant dense<0.000000e+00> : vector<8xf32>
    %903 = vector.multi_reduction <add>, %902, %cst_290 [1] : vector<8x128xf32> to vector<8xf32>
    %904 = vector.shape_cast %903 : vector<8xf32> to vector<8x1xf32>
    %905 = math.log %904 : vector<8x1xf32>
    %906 = vector.broadcast %905 : vector<8x1xf32> to vector<8x128xf32>
    %907 = arith.subf %901, %906 : vector<8x128xf32>
    %c1_291 = arith.constant 1 : index
    %c0_292 = arith.constant 0 : index
    %c0_293 = arith.constant 0 : index
    %908 = vector.load %arg15[%c1_291, %c0_292, %c0_293] : memref<8x8x128xf32, #tpu.memory_space<vmem>>, vector<1x8x128xf32>
    %909 = vector.shape_cast %908 : vector<1x8x128xf32> to vector<8x128xf32>
    %910 = vector.shape_cast %907 : vector<8x128xf32> to vector<1x8x128xf32>
    tpu.vector_store %arg15[%c1_291, %c0_292, %c0_293], %910 {strides = array<i32>} : memref<8x8x128xf32, #tpu.memory_space<vmem>>, vector<1x8x128xf32>,
    %911 = vector.broadcast %899 : vector<8x1xf32> to vector<8x128xf32>
    %912 = arith.cmpf oeq, %897, %911 : vector<8x128xf32>
    %cst_294 = arith.constant 1.280000e+02 : f32
    %913 = vector.broadcast %cst_294 : f32 to vector<8x128xf32>
    %914 = arith.select %912, %769, %913 : vector<8x128xi1>, vector<8x128xf32>
    %cst_295 = arith.constant dense<0x7F800000> : vector<8xf32>
    %915 = vector.multi_reduction <minimumf>, %914, %cst_295 [1] : vector<8x128xf32> to vector<8xf32>
    %916 = vector.shape_cast %915 : vector<8xf32> to vector<8x1xf32>
    %917 = vector.broadcast %916 : vector<8x1xf32> to vector<8x16xf32>
    %918 = arith.cmpf oeq, %767, %917 : vector<8x16xf32>
    %919 = arith.extui %918 : vector<8x16xi1> to vector<8x16xi32>
    %920 = arith.sitofp %919 : vector<8x16xi32> to vector<8x16xf32>
    %921 = tpu.concatenate %920, %870 in 1 : vector<8x16xf32>, vector<8x64xf32> -> vector<8x80xf32>
    %c0_296 = arith.constant 0 : index
    %c0_297 = arith.constant 0 : index
    %922 = vector.load %arg9[%c0_296, %c0_297] : memref<80x256xf32, #tpu.memory_space<vmem>>, vector<80x256xf32>
    %cst_298 = arith.constant dense<0.000000e+00> : vector<8x256xf32>
    %923 = tpu.matmul %921, %922, %cst_298 {dimension_numbers = #tpu.dot_dimension_numbers<[1], [0], [0], [1], [0, 0, 1, 1], [], []>} : vector<8x80xf32>, vector<80x256xf32>, vector<8x256xf32> -> vector<8x256xf32>
    %c0_299 = arith.constant 0 : index
    %c0_300 = arith.constant 0 : index
    %924 = vector.load %arg10[%c0_299, %c0_300] : memref<8x256xf32, #tpu.memory_space<vmem>>, vector<8x256xf32>
    %925 = arith.addf %923, %924 : vector<8x256xf32>
    %926 = vector.extract_strided_slice %925 {offsets = [0, 0], sizes = [8, 128], strides = [1, 1]} : vector<8x256xf32> to vector<8x128xf32>
    %927 = arith.negf %926 : vector<8x128xf32>
    %928 = math.exp %927 : vector<8x128xf32>
    %cst_301 = arith.constant 1.000000e+00 : f32
    %929 = vector.broadcast %cst_301 : f32 to vector<8x128xf32>
    %930 = arith.addf %929, %928 : vector<8x128xf32>
    %931 = arith.divf %929, %930 : vector<8x128xf32>
    %932 = vector.extract_strided_slice %931 {offsets = [0, 0], sizes = [8, 64], strides = [1, 1]} : vector<8x128xf32> to vector<8x64xf32>
    %933 = vector.extract_strided_slice %931 {offsets = [0, 64], sizes = [8, 64], strides = [1, 1]} : vector<8x128xf32> to vector<8x64xf32>
    %934 = vector.extract_strided_slice %925 {offsets = [0, 128], sizes = [8, 64], strides = [1, 1]} : vector<8x256xf32> to vector<8x64xf32>
    %935 = vector.extract_strided_slice %925 {offsets = [0, 192], sizes = [8, 64], strides = [1, 1]} : vector<8x256xf32> to vector<8x64xf32>
    %936 = arith.mulf %932, %935 : vector<8x64xf32>
    %937 = arith.addf %934, %936 : vector<8x64xf32>
    %938 = math.tanh %937 : vector<8x64xf32>
    %cst_302 = arith.constant 1.000000e+00 : f32
    %939 = vector.broadcast %cst_302 : f32 to vector<8x64xf32>
    %940 = arith.subf %939, %933 : vector<8x64xf32>
    %941 = arith.mulf %940, %938 : vector<8x64xf32>
    %942 = arith.mulf %933, %870 : vector<8x64xf32>
    %943 = arith.addf %941, %942 : vector<8x64xf32>
    %944 = tpu.concatenate %943, %893 in 1 : vector<8x64xf32>, vector<8x64xf32> -> vector<8x128xf32>
    %c0_303 = arith.constant 0 : index
    %c0_304 = arith.constant 0 : index
    %945 = vector.load %arg11[%c0_303, %c0_304] : memref<128x256xf32, #tpu.memory_space<vmem>>, vector<128x256xf32>
    %cst_305 = arith.constant dense<0.000000e+00> : vector<8x256xf32>
    %946 = tpu.matmul %944, %945, %cst_305 {dimension_numbers = #tpu.dot_dimension_numbers<[1], [0], [0], [1], [0, 0, 1, 1], [], []>} : vector<8x128xf32>, vector<128x256xf32>, vector<8x256xf32> -> vector<8x256xf32>
    %c0_306 = arith.constant 0 : index
    %c0_307 = arith.constant 0 : index
    %947 = vector.load %arg12[%c0_306, %c0_307] : memref<8x256xf32, #tpu.memory_space<vmem>>, vector<8x256xf32>
    %948 = arith.addf %946, %947 : vector<8x256xf32>
    %949 = vector.extract_strided_slice %948 {offsets = [0, 0], sizes = [8, 128], strides = [1, 1]} : vector<8x256xf32> to vector<8x128xf32>
    %950 = arith.negf %949 : vector<8x128xf32>
    %951 = math.exp %950 : vector<8x128xf32>
    %cst_308 = arith.constant 1.000000e+00 : f32
    %952 = vector.broadcast %cst_308 : f32 to vector<8x128xf32>
    %953 = arith.addf %952, %951 : vector<8x128xf32>
    %954 = arith.divf %952, %953 : vector<8x128xf32>
    %955 = vector.extract_strided_slice %954 {offsets = [0, 0], sizes = [8, 64], strides = [1, 1]} : vector<8x128xf32> to vector<8x64xf32>
    %956 = vector.extract_strided_slice %954 {offsets = [0, 64], sizes = [8, 64], strides = [1, 1]} : vector<8x128xf32> to vector<8x64xf32>
    %957 = vector.extract_strided_slice %948 {offsets = [0, 128], sizes = [8, 64], strides = [1, 1]} : vector<8x256xf32> to vector<8x64xf32>
    %958 = vector.extract_strided_slice %948 {offsets = [0, 192], sizes = [8, 64], strides = [1, 1]} : vector<8x256xf32> to vector<8x64xf32>
    %959 = arith.mulf %955, %958 : vector<8x64xf32>
    %960 = arith.addf %957, %959 : vector<8x64xf32>
    %961 = math.tanh %960 : vector<8x64xf32>
    %cst_309 = arith.constant 1.000000e+00 : f32
    %962 = vector.broadcast %cst_309 : f32 to vector<8x64xf32>
    %963 = arith.subf %962, %956 : vector<8x64xf32>
    %964 = arith.mulf %963, %961 : vector<8x64xf32>
    %965 = arith.mulf %956, %893 : vector<8x64xf32>
    %966 = arith.addf %964, %965 : vector<8x64xf32>
    %c0_310 = arith.constant 0 : index
    %c0_311 = arith.constant 0 : index
    %967 = vector.load %arg13[%c0_310, %c0_311] : memref<64x128xf32, #tpu.memory_space<vmem>>, vector<64x128xf32>
    %cst_312 = arith.constant dense<0.000000e+00> : vector<8x128xf32>
    %968 = tpu.matmul %966, %967, %cst_312 {dimension_numbers = #tpu.dot_dimension_numbers<[1], [0], [0], [1], [0, 0, 1, 1], [], []>} : vector<8x64xf32>, vector<64x128xf32>, vector<8x128xf32> -> vector<8x128xf32>
    %c0_313 = arith.constant 0 : index
    %c0_314 = arith.constant 0 : index
    %969 = vector.load %arg14[%c0_313, %c0_314] : memref<8x128xf32, #tpu.memory_space<vmem>>, vector<8x128xf32>
    %970 = arith.addf %968, %969 : vector<8x128xf32>
    %cst_315 = arith.constant dense<0xFF800000> : vector<8xf32>
    %971 = vector.multi_reduction <maximumf>, %970, %cst_315 [1] : vector<8x128xf32> to vector<8xf32>
    %972 = vector.shape_cast %971 : vector<8xf32> to vector<8x1xf32>
    %973 = vector.broadcast %972 : vector<8x1xf32> to vector<8x128xf32>
    %974 = arith.subf %970, %973 : vector<8x128xf32>
    %975 = math.exp %974 : vector<8x128xf32>
    %cst_316 = arith.constant dense<0.000000e+00> : vector<8xf32>
    %976 = vector.multi_reduction <add>, %975, %cst_316 [1] : vector<8x128xf32> to vector<8xf32>
    %977 = vector.shape_cast %976 : vector<8xf32> to vector<8x1xf32>
    %978 = math.log %977 : vector<8x1xf32>
    %979 = vector.broadcast %978 : vector<8x1xf32> to vector<8x128xf32>
    %980 = arith.subf %974, %979 : vector<8x128xf32>
    %c2_317 = arith.constant 2 : index
    %c0_318 = arith.constant 0 : index
    %c0_319 = arith.constant 0 : index
    %981 = vector.load %arg15[%c2_317, %c0_318, %c0_319] : memref<8x8x128xf32, #tpu.memory_space<vmem>>, vector<1x8x128xf32>
    %982 = vector.shape_cast %981 : vector<1x8x128xf32> to vector<8x128xf32>
    %983 = vector.shape_cast %980 : vector<8x128xf32> to vector<1x8x128xf32>
    tpu.vector_store %arg15[%c2_317, %c0_318, %c0_319], %983 {strides = array<i32>} : memref<8x8x128xf32, #tpu.memory_space<vmem>>, vector<1x8x128xf32>,
    %984 = vector.broadcast %972 : vector<8x1xf32> to vector<8x128xf32>
    %985 = arith.cmpf oeq, %970, %984 : vector<8x128xf32>
    %cst_320 = arith.constant 1.280000e+02 : f32
    %986 = vector.broadcast %cst_320 : f32 to vector<8x128xf32>
    %987 = arith.select %985, %769, %986 : vector<8x128xi1>, vector<8x128xf32>
    %cst_321 = arith.constant dense<0x7F800000> : vector<8xf32>
    %988 = vector.multi_reduction <minimumf>, %987, %cst_321 [1] : vector<8x128xf32> to vector<8xf32>
    %989 = vector.shape_cast %988 : vector<8xf32> to vector<8x1xf32>
    %990 = vector.broadcast %989 : vector<8x1xf32> to vector<8x16xf32>
    %991 = arith.cmpf oeq, %767, %990 : vector<8x16xf32>
    %992 = arith.extui %991 : vector<8x16xi1> to vector<8x16xi32>
    %993 = arith.sitofp %992 : vector<8x16xi32> to vector<8x16xf32>
    %994 = tpu.concatenate %993, %943 in 1 : vector<8x16xf32>, vector<8x64xf32> -> vector<8x80xf32>
    %c0_322 = arith.constant 0 : index
    %c0_323 = arith.constant 0 : index
    %995 = vector.load %arg9[%c0_322, %c0_323] : memref<80x256xf32, #tpu.memory_space<vmem>>, vector<80x256xf32>
    %cst_324 = arith.constant dense<0.000000e+00> : vector<8x256xf32>
    %996 = tpu.matmul %994, %995, %cst_324 {dimension_numbers = #tpu.dot_dimension_numbers<[1], [0], [0], [1], [0, 0, 1, 1], [], []>} : vector<8x80xf32>, vector<80x256xf32>, vector<8x256xf32> -> vector<8x256xf32>
    %c0_325 = arith.constant 0 : index
    %c0_326 = arith.constant 0 : index
    %997 = vector.load %arg10[%c0_325, %c0_326] : memref<8x256xf32, #tpu.memory_space<vmem>>, vector<8x256xf32>
    %998 = arith.addf %996, %997 : vector<8x256xf32>
    %999 = vector.extract_strided_slice %998 {offsets = [0, 0], sizes = [8, 128], strides = [1, 1]} : vector<8x256xf32> to vector<8x128xf32>
    %1000 = arith.negf %999 : vector<8x128xf32>
    %1001 = math.exp %1000 : vector<8x128xf32>
    %cst_327 = arith.constant 1.000000e+00 : f32
    %1002 = vector.broadcast %cst_327 : f32 to vector<8x128xf32>
    %1003 = arith.addf %1002, %1001 : vector<8x128xf32>
    %1004 = arith.divf %1002, %1003 : vector<8x128xf32>
    %1005 = vector.extract_strided_slice %1004 {offsets = [0, 0], sizes = [8, 64], strides = [1, 1]} : vector<8x128xf32> to vector<8x64xf32>
    %1006 = vector.extract_strided_slice %1004 {offsets = [0, 64], sizes = [8, 64], strides = [1, 1]} : vector<8x128xf32> to vector<8x64xf32>
    %1007 = vector.extract_strided_slice %998 {offsets = [0, 128], sizes = [8, 64], strides = [1, 1]} : vector<8x256xf32> to vector<8x64xf32>
    %1008 = vector.extract_strided_slice %998 {offsets = [0, 192], sizes = [8, 64], strides = [1, 1]} : vector<8x256xf32> to vector<8x64xf32>
    %1009 = arith.mulf %1005, %1008 : vector<8x64xf32>
    %1010 = arith.addf %1007, %1009 : vector<8x64xf32>
    %1011 = math.tanh %1010 : vector<8x64xf32>
    %cst_328 = arith.constant 1.000000e+00 : f32
    %1012 = vector.broadcast %cst_328 : f32 to vector<8x64xf32>
    %1013 = arith.subf %1012, %1006 : vector<8x64xf32>
    %1014 = arith.mulf %1013, %1011 : vector<8x64xf32>
    %1015 = arith.mulf %1006, %943 : vector<8x64xf32>
    %1016 = arith.addf %1014, %1015 : vector<8x64xf32>
    %1017 = tpu.concatenate %1016, %966 in 1 : vector<8x64xf32>, vector<8x64xf32> -> vector<8x128xf32>
    %c0_329 = arith.constant 0 : index
    %c0_330 = arith.constant 0 : index
    %1018 = vector.load %arg11[%c0_329, %c0_330] : memref<128x256xf32, #tpu.memory_space<vmem>>, vector<128x256xf32>
    %cst_331 = arith.constant dense<0.000000e+00> : vector<8x256xf32>
    %1019 = tpu.matmul %1017, %1018, %cst_331 {dimension_numbers = #tpu.dot_dimension_numbers<[1], [0], [0], [1], [0, 0, 1, 1], [], []>} : vector<8x128xf32>, vector<128x256xf32>, vector<8x256xf32> -> vector<8x256xf32>
    %c0_332 = arith.constant 0 : index
    %c0_333 = arith.constant 0 : index
    %1020 = vector.load %arg12[%c0_332, %c0_333] : memref<8x256xf32, #tpu.memory_space<vmem>>, vector<8x256xf32>
    %1021 = arith.addf %1019, %1020 : vector<8x256xf32>
    %1022 = vector.extract_strided_slice %1021 {offsets = [0, 0], sizes = [8, 128], strides = [1, 1]} : vector<8x256xf32> to vector<8x128xf32>
    %1023 = arith.negf %1022 : vector<8x128xf32>
    %1024 = math.exp %1023 : vector<8x128xf32>
    %cst_334 = arith.constant 1.000000e+00 : f32
    %1025 = vector.broadcast %cst_334 : f32 to vector<8x128xf32>
    %1026 = arith.addf %1025, %1024 : vector<8x128xf32>
    %1027 = arith.divf %1025, %1026 : vector<8x128xf32>
    %1028 = vector.extract_strided_slice %1027 {offsets = [0, 0], sizes = [8, 64], strides = [1, 1]} : vector<8x128xf32> to vector<8x64xf32>
    %1029 = vector.extract_strided_slice %1027 {offsets = [0, 64], sizes = [8, 64], strides = [1, 1]} : vector<8x128xf32> to vector<8x64xf32>
    %1030 = vector.extract_strided_slice %1021 {offsets = [0, 128], sizes = [8, 64], strides = [1, 1]} : vector<8x256xf32> to vector<8x64xf32>
    %1031 = vector.extract_strided_slice %1021 {offsets = [0, 192], sizes = [8, 64], strides = [1, 1]} : vector<8x256xf32> to vector<8x64xf32>
    %1032 = arith.mulf %1028, %1031 : vector<8x64xf32>
    %1033 = arith.addf %1030, %1032 : vector<8x64xf32>
    %1034 = math.tanh %1033 : vector<8x64xf32>
    %cst_335 = arith.constant 1.000000e+00 : f32
    %1035 = vector.broadcast %cst_335 : f32 to vector<8x64xf32>
    %1036 = arith.subf %1035, %1029 : vector<8x64xf32>
    %1037 = arith.mulf %1036, %1034 : vector<8x64xf32>
    %1038 = arith.mulf %1029, %966 : vector<8x64xf32>
    %1039 = arith.addf %1037, %1038 : vector<8x64xf32>
    %c0_336 = arith.constant 0 : index
    %c0_337 = arith.constant 0 : index
    %1040 = vector.load %arg13[%c0_336, %c0_337] : memref<64x128xf32, #tpu.memory_space<vmem>>, vector<64x128xf32>
    %cst_338 = arith.constant dense<0.000000e+00> : vector<8x128xf32>
    %1041 = tpu.matmul %1039, %1040, %cst_338 {dimension_numbers = #tpu.dot_dimension_numbers<[1], [0], [0], [1], [0, 0, 1, 1], [], []>} : vector<8x64xf32>, vector<64x128xf32>, vector<8x128xf32> -> vector<8x128xf32>
    %c0_339 = arith.constant 0 : index
    %c0_340 = arith.constant 0 : index
    %1042 = vector.load %arg14[%c0_339, %c0_340] : memref<8x128xf32, #tpu.memory_space<vmem>>, vector<8x128xf32>
    %1043 = arith.addf %1041, %1042 : vector<8x128xf32>
    %cst_341 = arith.constant dense<0xFF800000> : vector<8xf32>
    %1044 = vector.multi_reduction <maximumf>, %1043, %cst_341 [1] : vector<8x128xf32> to vector<8xf32>
    %1045 = vector.shape_cast %1044 : vector<8xf32> to vector<8x1xf32>
    %1046 = vector.broadcast %1045 : vector<8x1xf32> to vector<8x128xf32>
    %1047 = arith.subf %1043, %1046 : vector<8x128xf32>
    %1048 = math.exp %1047 : vector<8x128xf32>
    %cst_342 = arith.constant dense<0.000000e+00> : vector<8xf32>
    %1049 = vector.multi_reduction <add>, %1048, %cst_342 [1] : vector<8x128xf32> to vector<8xf32>
    %1050 = vector.shape_cast %1049 : vector<8xf32> to vector<8x1xf32>
    %1051 = math.log %1050 : vector<8x1xf32>
    %1052 = vector.broadcast %1051 : vector<8x1xf32> to vector<8x128xf32>
    %1053 = arith.subf %1047, %1052 : vector<8x128xf32>
    %c3_343 = arith.constant 3 : index
    %c0_344 = arith.constant 0 : index
    %c0_345 = arith.constant 0 : index
    %1054 = vector.load %arg15[%c3_343, %c0_344, %c0_345] : memref<8x8x128xf32, #tpu.memory_space<vmem>>, vector<1x8x128xf32>
    %1055 = vector.shape_cast %1054 : vector<1x8x128xf32> to vector<8x128xf32>
    %1056 = vector.shape_cast %1053 : vector<8x128xf32> to vector<1x8x128xf32>
    tpu.vector_store %arg15[%c3_343, %c0_344, %c0_345], %1056 {strides = array<i32>} : memref<8x8x128xf32, #tpu.memory_space<vmem>>, vector<1x8x128xf32>,
    %1057 = vector.broadcast %1045 : vector<8x1xf32> to vector<8x128xf32>
    %1058 = arith.cmpf oeq, %1043, %1057 : vector<8x128xf32>
    %cst_346 = arith.constant 1.280000e+02 : f32
    %1059 = vector.broadcast %cst_346 : f32 to vector<8x128xf32>
    %1060 = arith.select %1058, %769, %1059 : vector<8x128xi1>, vector<8x128xf32>
    %cst_347 = arith.constant dense<0x7F800000> : vector<8xf32>
    %1061 = vector.multi_reduction <minimumf>, %1060, %cst_347 [1] : vector<8x128xf32> to vector<8xf32>
    %1062 = vector.shape_cast %1061 : vector<8xf32> to vector<8x1xf32>
    %1063 = vector.broadcast %1062 : vector<8x1xf32> to vector<8x16xf32>
    %1064 = arith.cmpf oeq, %767, %1063 : vector<8x16xf32>
    %1065 = arith.extui %1064 : vector<8x16xi1> to vector<8x16xi32>
    %1066 = arith.sitofp %1065 : vector<8x16xi32> to vector<8x16xf32>
    %1067 = tpu.concatenate %1066, %1016 in 1 : vector<8x16xf32>, vector<8x64xf32> -> vector<8x80xf32>
    %c0_348 = arith.constant 0 : index
    %c0_349 = arith.constant 0 : index
    %1068 = vector.load %arg9[%c0_348, %c0_349] : memref<80x256xf32, #tpu.memory_space<vmem>>, vector<80x256xf32>
    %cst_350 = arith.constant dense<0.000000e+00> : vector<8x256xf32>
    %1069 = tpu.matmul %1067, %1068, %cst_350 {dimension_numbers = #tpu.dot_dimension_numbers<[1], [0], [0], [1], [0, 0, 1, 1], [], []>} : vector<8x80xf32>, vector<80x256xf32>, vector<8x256xf32> -> vector<8x256xf32>
    %c0_351 = arith.constant 0 : index
    %c0_352 = arith.constant 0 : index
    %1070 = vector.load %arg10[%c0_351, %c0_352] : memref<8x256xf32, #tpu.memory_space<vmem>>, vector<8x256xf32>
    %1071 = arith.addf %1069, %1070 : vector<8x256xf32>
    %1072 = vector.extract_strided_slice %1071 {offsets = [0, 0], sizes = [8, 128], strides = [1, 1]} : vector<8x256xf32> to vector<8x128xf32>
    %1073 = arith.negf %1072 : vector<8x128xf32>
    %1074 = math.exp %1073 : vector<8x128xf32>
    %cst_353 = arith.constant 1.000000e+00 : f32
    %1075 = vector.broadcast %cst_353 : f32 to vector<8x128xf32>
    %1076 = arith.addf %1075, %1074 : vector<8x128xf32>
    %1077 = arith.divf %1075, %1076 : vector<8x128xf32>
    %1078 = vector.extract_strided_slice %1077 {offsets = [0, 0], sizes = [8, 64], strides = [1, 1]} : vector<8x128xf32> to vector<8x64xf32>
    %1079 = vector.extract_strided_slice %1077 {offsets = [0, 64], sizes = [8, 64], strides = [1, 1]} : vector<8x128xf32> to vector<8x64xf32>
    %1080 = vector.extract_strided_slice %1071 {offsets = [0, 128], sizes = [8, 64], strides = [1, 1]} : vector<8x256xf32> to vector<8x64xf32>
    %1081 = vector.extract_strided_slice %1071 {offsets = [0, 192], sizes = [8, 64], strides = [1, 1]} : vector<8x256xf32> to vector<8x64xf32>
    %1082 = arith.mulf %1078, %1081 : vector<8x64xf32>
    %1083 = arith.addf %1080, %1082 : vector<8x64xf32>
    %1084 = math.tanh %1083 : vector<8x64xf32>
    %cst_354 = arith.constant 1.000000e+00 : f32
    %1085 = vector.broadcast %cst_354 : f32 to vector<8x64xf32>
    %1086 = arith.subf %1085, %1079 : vector<8x64xf32>
    %1087 = arith.mulf %1086, %1084 : vector<8x64xf32>
    %1088 = arith.mulf %1079, %1016 : vector<8x64xf32>
    %1089 = arith.addf %1087, %1088 : vector<8x64xf32>
    %1090 = tpu.concatenate %1089, %1039 in 1 : vector<8x64xf32>, vector<8x64xf32> -> vector<8x128xf32>
    %c0_355 = arith.constant 0 : index
    %c0_356 = arith.constant 0 : index
    %1091 = vector.load %arg11[%c0_355, %c0_356] : memref<128x256xf32, #tpu.memory_space<vmem>>, vector<128x256xf32>
    %cst_357 = arith.constant dense<0.000000e+00> : vector<8x256xf32>
    %1092 = tpu.matmul %1090, %1091, %cst_357 {dimension_numbers = #tpu.dot_dimension_numbers<[1], [0], [0], [1], [0, 0, 1, 1], [], []>} : vector<8x128xf32>, vector<128x256xf32>, vector<8x256xf32> -> vector<8x256xf32>
    %c0_358 = arith.constant 0 : index
    %c0_359 = arith.constant 0 : index
    %1093 = vector.load %arg12[%c0_358, %c0_359] : memref<8x256xf32, #tpu.memory_space<vmem>>, vector<8x256xf32>
    %1094 = arith.addf %1092, %1093 : vector<8x256xf32>
    %1095 = vector.extract_strided_slice %1094 {offsets = [0, 0], sizes = [8, 128], strides = [1, 1]} : vector<8x256xf32> to vector<8x128xf32>
    %1096 = arith.negf %1095 : vector<8x128xf32>
    %1097 = math.exp %1096 : vector<8x128xf32>
    %cst_360 = arith.constant 1.000000e+00 : f32
    %1098 = vector.broadcast %cst_360 : f32 to vector<8x128xf32>
    %1099 = arith.addf %1098, %1097 : vector<8x128xf32>
    %1100 = arith.divf %1098, %1099 : vector<8x128xf32>
    %1101 = vector.extract_strided_slice %1100 {offsets = [0, 0], sizes = [8, 64], strides = [1, 1]} : vector<8x128xf32> to vector<8x64xf32>
    %1102 = vector.extract_strided_slice %1100 {offsets = [0, 64], sizes = [8, 64], strides = [1, 1]} : vector<8x128xf32> to vector<8x64xf32>
    %1103 = vector.extract_strided_slice %1094 {offsets = [0, 128], sizes = [8, 64], strides = [1, 1]} : vector<8x256xf32> to vector<8x64xf32>
    %1104 = vector.extract_strided_slice %1094 {offsets = [0, 192], sizes = [8, 64], strides = [1, 1]} : vector<8x256xf32> to vector<8x64xf32>
    %1105 = arith.mulf %1101, %1104 : vector<8x64xf32>
    %1106 = arith.addf %1103, %1105 : vector<8x64xf32>
    %1107 = math.tanh %1106 : vector<8x64xf32>
    %cst_361 = arith.constant 1.000000e+00 : f32
    %1108 = vector.broadcast %cst_361 : f32 to vector<8x64xf32>
    %1109 = arith.subf %1108, %1102 : vector<8x64xf32>
    %1110 = arith.mulf %1109, %1107 : vector<8x64xf32>
    %1111 = arith.mulf %1102, %1039 : vector<8x64xf32>
    %1112 = arith.addf %1110, %1111 : vector<8x64xf32>
    %c0_362 = arith.constant 0 : index
    %c0_363 = arith.constant 0 : index
    %1113 = vector.load %arg13[%c0_362, %c0_363] : memref<64x128xf32, #tpu.memory_space<vmem>>, vector<64x128xf32>
    %cst_364 = arith.constant dense<0.000000e+00> : vector<8x128xf32>
    %1114 = tpu.matmul %1112, %1113, %cst_364 {dimension_numbers = #tpu.dot_dimension_numbers<[1], [0], [0], [1], [0, 0, 1, 1], [], []>} : vector<8x64xf32>, vector<64x128xf32>, vector<8x128xf32> -> vector<8x128xf32>
    %c0_365 = arith.constant 0 : index
    %c0_366 = arith.constant 0 : index
    %1115 = vector.load %arg14[%c0_365, %c0_366] : memref<8x128xf32, #tpu.memory_space<vmem>>, vector<8x128xf32>
    %1116 = arith.addf %1114, %1115 : vector<8x128xf32>
    %cst_367 = arith.constant dense<0xFF800000> : vector<8xf32>
    %1117 = vector.multi_reduction <maximumf>, %1116, %cst_367 [1] : vector<8x128xf32> to vector<8xf32>
    %1118 = vector.shape_cast %1117 : vector<8xf32> to vector<8x1xf32>
    %1119 = vector.broadcast %1118 : vector<8x1xf32> to vector<8x128xf32>
    %1120 = arith.subf %1116, %1119 : vector<8x128xf32>
    %1121 = math.exp %1120 : vector<8x128xf32>
    %cst_368 = arith.constant dense<0.000000e+00> : vector<8xf32>
    %1122 = vector.multi_reduction <add>, %1121, %cst_368 [1] : vector<8x128xf32> to vector<8xf32>
    %1123 = vector.shape_cast %1122 : vector<8xf32> to vector<8x1xf32>
    %1124 = math.log %1123 : vector<8x1xf32>
    %1125 = vector.broadcast %1124 : vector<8x1xf32> to vector<8x128xf32>
    %1126 = arith.subf %1120, %1125 : vector<8x128xf32>
    %c4_369 = arith.constant 4 : index
    %c0_370 = arith.constant 0 : index
    %c0_371 = arith.constant 0 : index
    %1127 = vector.load %arg15[%c4_369, %c0_370, %c0_371] : memref<8x8x128xf32, #tpu.memory_space<vmem>>, vector<1x8x128xf32>
    %1128 = vector.shape_cast %1127 : vector<1x8x128xf32> to vector<8x128xf32>
    %1129 = vector.shape_cast %1126 : vector<8x128xf32> to vector<1x8x128xf32>
    tpu.vector_store %arg15[%c4_369, %c0_370, %c0_371], %1129 {strides = array<i32>} : memref<8x8x128xf32, #tpu.memory_space<vmem>>, vector<1x8x128xf32>,
    %1130 = vector.broadcast %1118 : vector<8x1xf32> to vector<8x128xf32>
    %1131 = arith.cmpf oeq, %1116, %1130 : vector<8x128xf32>
    %cst_372 = arith.constant 1.280000e+02 : f32
    %1132 = vector.broadcast %cst_372 : f32 to vector<8x128xf32>
    %1133 = arith.select %1131, %769, %1132 : vector<8x128xi1>, vector<8x128xf32>
    %cst_373 = arith.constant dense<0x7F800000> : vector<8xf32>
    %1134 = vector.multi_reduction <minimumf>, %1133, %cst_373 [1] : vector<8x128xf32> to vector<8xf32>
    %1135 = vector.shape_cast %1134 : vector<8xf32> to vector<8x1xf32>
    %1136 = vector.broadcast %1135 : vector<8x1xf32> to vector<8x16xf32>
    %1137 = arith.cmpf oeq, %767, %1136 : vector<8x16xf32>
    %1138 = arith.extui %1137 : vector<8x16xi1> to vector<8x16xi32>
    %1139 = arith.sitofp %1138 : vector<8x16xi32> to vector<8x16xf32>
    %1140 = tpu.concatenate %1139, %1089 in 1 : vector<8x16xf32>, vector<8x64xf32> -> vector<8x80xf32>
    %c0_374 = arith.constant 0 : index
    %c0_375 = arith.constant 0 : index
    %1141 = vector.load %arg9[%c0_374, %c0_375] : memref<80x256xf32, #tpu.memory_space<vmem>>, vector<80x256xf32>
    %cst_376 = arith.constant dense<0.000000e+00> : vector<8x256xf32>
    %1142 = tpu.matmul %1140, %1141, %cst_376 {dimension_numbers = #tpu.dot_dimension_numbers<[1], [0], [0], [1], [0, 0, 1, 1], [], []>} : vector<8x80xf32>, vector<80x256xf32>, vector<8x256xf32> -> vector<8x256xf32>
    %c0_377 = arith.constant 0 : index
    %c0_378 = arith.constant 0 : index
    %1143 = vector.load %arg10[%c0_377, %c0_378] : memref<8x256xf32, #tpu.memory_space<vmem>>, vector<8x256xf32>
    %1144 = arith.addf %1142, %1143 : vector<8x256xf32>
    %1145 = vector.extract_strided_slice %1144 {offsets = [0, 0], sizes = [8, 128], strides = [1, 1]} : vector<8x256xf32> to vector<8x128xf32>
    %1146 = arith.negf %1145 : vector<8x128xf32>
    %1147 = math.exp %1146 : vector<8x128xf32>
    %cst_379 = arith.constant 1.000000e+00 : f32
    %1148 = vector.broadcast %cst_379 : f32 to vector<8x128xf32>
    %1149 = arith.addf %1148, %1147 : vector<8x128xf32>
    %1150 = arith.divf %1148, %1149 : vector<8x128xf32>
    %1151 = vector.extract_strided_slice %1150 {offsets = [0, 0], sizes = [8, 64], strides = [1, 1]} : vector<8x128xf32> to vector<8x64xf32>
    %1152 = vector.extract_strided_slice %1150 {offsets = [0, 64], sizes = [8, 64], strides = [1, 1]} : vector<8x128xf32> to vector<8x64xf32>
    %1153 = vector.extract_strided_slice %1144 {offsets = [0, 128], sizes = [8, 64], strides = [1, 1]} : vector<8x256xf32> to vector<8x64xf32>
    %1154 = vector.extract_strided_slice %1144 {offsets = [0, 192], sizes = [8, 64], strides = [1, 1]} : vector<8x256xf32> to vector<8x64xf32>
    %1155 = arith.mulf %1151, %1154 : vector<8x64xf32>
    %1156 = arith.addf %1153, %1155 : vector<8x64xf32>
    %1157 = math.tanh %1156 : vector<8x64xf32>
    %cst_380 = arith.constant 1.000000e+00 : f32
    %1158 = vector.broadcast %cst_380 : f32 to vector<8x64xf32>
    %1159 = arith.subf %1158, %1152 : vector<8x64xf32>
    %1160 = arith.mulf %1159, %1157 : vector<8x64xf32>
    %1161 = arith.mulf %1152, %1089 : vector<8x64xf32>
    %1162 = arith.addf %1160, %1161 : vector<8x64xf32>
    %1163 = tpu.concatenate %1162, %1112 in 1 : vector<8x64xf32>, vector<8x64xf32> -> vector<8x128xf32>
    %c0_381 = arith.constant 0 : index
    %c0_382 = arith.constant 0 : index
    %1164 = vector.load %arg11[%c0_381, %c0_382] : memref<128x256xf32, #tpu.memory_space<vmem>>, vector<128x256xf32>
    %cst_383 = arith.constant dense<0.000000e+00> : vector<8x256xf32>
    %1165 = tpu.matmul %1163, %1164, %cst_383 {dimension_numbers = #tpu.dot_dimension_numbers<[1], [0], [0], [1], [0, 0, 1, 1], [], []>} : vector<8x128xf32>, vector<128x256xf32>, vector<8x256xf32> -> vector<8x256xf32>
    %c0_384 = arith.constant 0 : index
    %c0_385 = arith.constant 0 : index
    %1166 = vector.load %arg12[%c0_384, %c0_385] : memref<8x256xf32, #tpu.memory_space<vmem>>, vector<8x256xf32>
    %1167 = arith.addf %1165, %1166 : vector<8x256xf32>
    %1168 = vector.extract_strided_slice %1167 {offsets = [0, 0], sizes = [8, 128], strides = [1, 1]} : vector<8x256xf32> to vector<8x128xf32>
    %1169 = arith.negf %1168 : vector<8x128xf32>
    %1170 = math.exp %1169 : vector<8x128xf32>
    %cst_386 = arith.constant 1.000000e+00 : f32
    %1171 = vector.broadcast %cst_386 : f32 to vector<8x128xf32>
    %1172 = arith.addf %1171, %1170 : vector<8x128xf32>
    %1173 = arith.divf %1171, %1172 : vector<8x128xf32>
    %1174 = vector.extract_strided_slice %1173 {offsets = [0, 0], sizes = [8, 64], strides = [1, 1]} : vector<8x128xf32> to vector<8x64xf32>
    %1175 = vector.extract_strided_slice %1173 {offsets = [0, 64], sizes = [8, 64], strides = [1, 1]} : vector<8x128xf32> to vector<8x64xf32>
    %1176 = vector.extract_strided_slice %1167 {offsets = [0, 128], sizes = [8, 64], strides = [1, 1]} : vector<8x256xf32> to vector<8x64xf32>
    %1177 = vector.extract_strided_slice %1167 {offsets = [0, 192], sizes = [8, 64], strides = [1, 1]} : vector<8x256xf32> to vector<8x64xf32>
    %1178 = arith.mulf %1174, %1177 : vector<8x64xf32>
    %1179 = arith.addf %1176, %1178 : vector<8x64xf32>
    %1180 = math.tanh %1179 : vector<8x64xf32>
    %cst_387 = arith.constant 1.000000e+00 : f32
    %1181 = vector.broadcast %cst_387 : f32 to vector<8x64xf32>
    %1182 = arith.subf %1181, %1175 : vector<8x64xf32>
    %1183 = arith.mulf %1182, %1180 : vector<8x64xf32>
    %1184 = arith.mulf %1175, %1112 : vector<8x64xf32>
    %1185 = arith.addf %1183, %1184 : vector<8x64xf32>
    %c0_388 = arith.constant 0 : index
    %c0_389 = arith.constant 0 : index
    %1186 = vector.load %arg13[%c0_388, %c0_389] : memref<64x128xf32, #tpu.memory_space<vmem>>, vector<64x128xf32>
    %cst_390 = arith.constant dense<0.000000e+00> : vector<8x128xf32>
    %1187 = tpu.matmul %1185, %1186, %cst_390 {dimension_numbers = #tpu.dot_dimension_numbers<[1], [0], [0], [1], [0, 0, 1, 1], [], []>} : vector<8x64xf32>, vector<64x128xf32>, vector<8x128xf32> -> vector<8x128xf32>
    %c0_391 = arith.constant 0 : index
    %c0_392 = arith.constant 0 : index
    %1188 = vector.load %arg14[%c0_391, %c0_392] : memref<8x128xf32, #tpu.memory_space<vmem>>, vector<8x128xf32>
    %1189 = arith.addf %1187, %1188 : vector<8x128xf32>
    %cst_393 = arith.constant dense<0xFF800000> : vector<8xf32>
    %1190 = vector.multi_reduction <maximumf>, %1189, %cst_393 [1] : vector<8x128xf32> to vector<8xf32>
    %1191 = vector.shape_cast %1190 : vector<8xf32> to vector<8x1xf32>
    %1192 = vector.broadcast %1191 : vector<8x1xf32> to vector<8x128xf32>
    %1193 = arith.subf %1189, %1192 : vector<8x128xf32>
    %1194 = math.exp %1193 : vector<8x128xf32>
    %cst_394 = arith.constant dense<0.000000e+00> : vector<8xf32>
    %1195 = vector.multi_reduction <add>, %1194, %cst_394 [1] : vector<8x128xf32> to vector<8xf32>
    %1196 = vector.shape_cast %1195 : vector<8xf32> to vector<8x1xf32>
    %1197 = math.log %1196 : vector<8x1xf32>
    %1198 = vector.broadcast %1197 : vector<8x1xf32> to vector<8x128xf32>
    %1199 = arith.subf %1193, %1198 : vector<8x128xf32>
    %c5_395 = arith.constant 5 : index
    %c0_396 = arith.constant 0 : index
    %c0_397 = arith.constant 0 : index
    %1200 = vector.load %arg15[%c5_395, %c0_396, %c0_397] : memref<8x8x128xf32, #tpu.memory_space<vmem>>, vector<1x8x128xf32>
    %1201 = vector.shape_cast %1200 : vector<1x8x128xf32> to vector<8x128xf32>
    %1202 = vector.shape_cast %1199 : vector<8x128xf32> to vector<1x8x128xf32>
    tpu.vector_store %arg15[%c5_395, %c0_396, %c0_397], %1202 {strides = array<i32>} : memref<8x8x128xf32, #tpu.memory_space<vmem>>, vector<1x8x128xf32>,
    %1203 = vector.broadcast %1191 : vector<8x1xf32> to vector<8x128xf32>
    %1204 = arith.cmpf oeq, %1189, %1203 : vector<8x128xf32>
    %cst_398 = arith.constant 1.280000e+02 : f32
    %1205 = vector.broadcast %cst_398 : f32 to vector<8x128xf32>
    %1206 = arith.select %1204, %769, %1205 : vector<8x128xi1>, vector<8x128xf32>
    %cst_399 = arith.constant dense<0x7F800000> : vector<8xf32>
    %1207 = vector.multi_reduction <minimumf>, %1206, %cst_399 [1] : vector<8x128xf32> to vector<8xf32>
    %1208 = vector.shape_cast %1207 : vector<8xf32> to vector<8x1xf32>
    %1209 = vector.broadcast %1208 : vector<8x1xf32> to vector<8x16xf32>
    %1210 = arith.cmpf oeq, %767, %1209 : vector<8x16xf32>
    %1211 = arith.extui %1210 : vector<8x16xi1> to vector<8x16xi32>
    %1212 = arith.sitofp %1211 : vector<8x16xi32> to vector<8x16xf32>
    %1213 = tpu.concatenate %1212, %1162 in 1 : vector<8x16xf32>, vector<8x64xf32> -> vector<8x80xf32>
    %c0_400 = arith.constant 0 : index
    %c0_401 = arith.constant 0 : index
    %1214 = vector.load %arg9[%c0_400, %c0_401] : memref<80x256xf32, #tpu.memory_space<vmem>>, vector<80x256xf32>
    %cst_402 = arith.constant dense<0.000000e+00> : vector<8x256xf32>
    %1215 = tpu.matmul %1213, %1214, %cst_402 {dimension_numbers = #tpu.dot_dimension_numbers<[1], [0], [0], [1], [0, 0, 1, 1], [], []>} : vector<8x80xf32>, vector<80x256xf32>, vector<8x256xf32> -> vector<8x256xf32>
    %c0_403 = arith.constant 0 : index
    %c0_404 = arith.constant 0 : index
    %1216 = vector.load %arg10[%c0_403, %c0_404] : memref<8x256xf32, #tpu.memory_space<vmem>>, vector<8x256xf32>
    %1217 = arith.addf %1215, %1216 : vector<8x256xf32>
    %1218 = vector.extract_strided_slice %1217 {offsets = [0, 0], sizes = [8, 128], strides = [1, 1]} : vector<8x256xf32> to vector<8x128xf32>
    %1219 = arith.negf %1218 : vector<8x128xf32>
    %1220 = math.exp %1219 : vector<8x128xf32>
    %cst_405 = arith.constant 1.000000e+00 : f32
    %1221 = vector.broadcast %cst_405 : f32 to vector<8x128xf32>
    %1222 = arith.addf %1221, %1220 : vector<8x128xf32>
    %1223 = arith.divf %1221, %1222 : vector<8x128xf32>
    %1224 = vector.extract_strided_slice %1223 {offsets = [0, 0], sizes = [8, 64], strides = [1, 1]} : vector<8x128xf32> to vector<8x64xf32>
    %1225 = vector.extract_strided_slice %1223 {offsets = [0, 64], sizes = [8, 64], strides = [1, 1]} : vector<8x128xf32> to vector<8x64xf32>
    %1226 = vector.extract_strided_slice %1217 {offsets = [0, 128], sizes = [8, 64], strides = [1, 1]} : vector<8x256xf32> to vector<8x64xf32>
    %1227 = vector.extract_strided_slice %1217 {offsets = [0, 192], sizes = [8, 64], strides = [1, 1]} : vector<8x256xf32> to vector<8x64xf32>
    %1228 = arith.mulf %1224, %1227 : vector<8x64xf32>
    %1229 = arith.addf %1226, %1228 : vector<8x64xf32>
    %1230 = math.tanh %1229 : vector<8x64xf32>
    %cst_406 = arith.constant 1.000000e+00 : f32
    %1231 = vector.broadcast %cst_406 : f32 to vector<8x64xf32>
    %1232 = arith.subf %1231, %1225 : vector<8x64xf32>
    %1233 = arith.mulf %1232, %1230 : vector<8x64xf32>
    %1234 = arith.mulf %1225, %1162 : vector<8x64xf32>
    %1235 = arith.addf %1233, %1234 : vector<8x64xf32>
    %1236 = tpu.concatenate %1235, %1185 in 1 : vector<8x64xf32>, vector<8x64xf32> -> vector<8x128xf32>
    %c0_407 = arith.constant 0 : index
    %c0_408 = arith.constant 0 : index
    %1237 = vector.load %arg11[%c0_407, %c0_408] : memref<128x256xf32, #tpu.memory_space<vmem>>, vector<128x256xf32>
    %cst_409 = arith.constant dense<0.000000e+00> : vector<8x256xf32>
    %1238 = tpu.matmul %1236, %1237, %cst_409 {dimension_numbers = #tpu.dot_dimension_numbers<[1], [0], [0], [1], [0, 0, 1, 1], [], []>} : vector<8x128xf32>, vector<128x256xf32>, vector<8x256xf32> -> vector<8x256xf32>
    %c0_410 = arith.constant 0 : index
    %c0_411 = arith.constant 0 : index
    %1239 = vector.load %arg12[%c0_410, %c0_411] : memref<8x256xf32, #tpu.memory_space<vmem>>, vector<8x256xf32>
    %1240 = arith.addf %1238, %1239 : vector<8x256xf32>
    %1241 = vector.extract_strided_slice %1240 {offsets = [0, 0], sizes = [8, 128], strides = [1, 1]} : vector<8x256xf32> to vector<8x128xf32>
    %1242 = arith.negf %1241 : vector<8x128xf32>
    %1243 = math.exp %1242 : vector<8x128xf32>
    %cst_412 = arith.constant 1.000000e+00 : f32
    %1244 = vector.broadcast %cst_412 : f32 to vector<8x128xf32>
    %1245 = arith.addf %1244, %1243 : vector<8x128xf32>
    %1246 = arith.divf %1244, %1245 : vector<8x128xf32>
    %1247 = vector.extract_strided_slice %1246 {offsets = [0, 0], sizes = [8, 64], strides = [1, 1]} : vector<8x128xf32> to vector<8x64xf32>
    %1248 = vector.extract_strided_slice %1246 {offsets = [0, 64], sizes = [8, 64], strides = [1, 1]} : vector<8x128xf32> to vector<8x64xf32>
    %1249 = vector.extract_strided_slice %1240 {offsets = [0, 128], sizes = [8, 64], strides = [1, 1]} : vector<8x256xf32> to vector<8x64xf32>
    %1250 = vector.extract_strided_slice %1240 {offsets = [0, 192], sizes = [8, 64], strides = [1, 1]} : vector<8x256xf32> to vector<8x64xf32>
    %1251 = arith.mulf %1247, %1250 : vector<8x64xf32>
    %1252 = arith.addf %1249, %1251 : vector<8x64xf32>
    %1253 = math.tanh %1252 : vector<8x64xf32>
    %cst_413 = arith.constant 1.000000e+00 : f32
    %1254 = vector.broadcast %cst_413 : f32 to vector<8x64xf32>
    %1255 = arith.subf %1254, %1248 : vector<8x64xf32>
    %1256 = arith.mulf %1255, %1253 : vector<8x64xf32>
    %1257 = arith.mulf %1248, %1185 : vector<8x64xf32>
    %1258 = arith.addf %1256, %1257 : vector<8x64xf32>
    %c0_414 = arith.constant 0 : index
    %c0_415 = arith.constant 0 : index
    %1259 = vector.load %arg13[%c0_414, %c0_415] : memref<64x128xf32, #tpu.memory_space<vmem>>, vector<64x128xf32>
    %cst_416 = arith.constant dense<0.000000e+00> : vector<8x128xf32>
    %1260 = tpu.matmul %1258, %1259, %cst_416 {dimension_numbers = #tpu.dot_dimension_numbers<[1], [0], [0], [1], [0, 0, 1, 1], [], []>} : vector<8x64xf32>, vector<64x128xf32>, vector<8x128xf32> -> vector<8x128xf32>
    %c0_417 = arith.constant 0 : index
    %c0_418 = arith.constant 0 : index
    %1261 = vector.load %arg14[%c0_417, %c0_418] : memref<8x128xf32, #tpu.memory_space<vmem>>, vector<8x128xf32>
    %1262 = arith.addf %1260, %1261 : vector<8x128xf32>
    %cst_419 = arith.constant dense<0xFF800000> : vector<8xf32>
    %1263 = vector.multi_reduction <maximumf>, %1262, %cst_419 [1] : vector<8x128xf32> to vector<8xf32>
    %1264 = vector.shape_cast %1263 : vector<8xf32> to vector<8x1xf32>
    %1265 = vector.broadcast %1264 : vector<8x1xf32> to vector<8x128xf32>
    %1266 = arith.subf %1262, %1265 : vector<8x128xf32>
    %1267 = math.exp %1266 : vector<8x128xf32>
    %cst_420 = arith.constant dense<0.000000e+00> : vector<8xf32>
    %1268 = vector.multi_reduction <add>, %1267, %cst_420 [1] : vector<8x128xf32> to vector<8xf32>
    %1269 = vector.shape_cast %1268 : vector<8xf32> to vector<8x1xf32>
    %1270 = math.log %1269 : vector<8x1xf32>
    %1271 = vector.broadcast %1270 : vector<8x1xf32> to vector<8x128xf32>
    %1272 = arith.subf %1266, %1271 : vector<8x128xf32>
    %c6_421 = arith.constant 6 : index
    %c0_422 = arith.constant 0 : index
    %c0_423 = arith.constant 0 : index
    %1273 = vector.load %arg15[%c6_421, %c0_422, %c0_423] : memref<8x8x128xf32, #tpu.memory_space<vmem>>, vector<1x8x128xf32>
    %1274 = vector.shape_cast %1273 : vector<1x8x128xf32> to vector<8x128xf32>
    %1275 = vector.shape_cast %1272 : vector<8x128xf32> to vector<1x8x128xf32>
    tpu.vector_store %arg15[%c6_421, %c0_422, %c0_423], %1275 {strides = array<i32>} : memref<8x8x128xf32, #tpu.memory_space<vmem>>, vector<1x8x128xf32>,
    %1276 = vector.broadcast %1264 : vector<8x1xf32> to vector<8x128xf32>
    %1277 = arith.cmpf oeq, %1262, %1276 : vector<8x128xf32>
    %cst_424 = arith.constant 1.280000e+02 : f32
    %1278 = vector.broadcast %cst_424 : f32 to vector<8x128xf32>
    %1279 = arith.select %1277, %769, %1278 : vector<8x128xi1>, vector<8x128xf32>
    %cst_425 = arith.constant dense<0x7F800000> : vector<8xf32>
    %1280 = vector.multi_reduction <minimumf>, %1279, %cst_425 [1] : vector<8x128xf32> to vector<8xf32>
    %1281 = vector.shape_cast %1280 : vector<8xf32> to vector<8x1xf32>
    %1282 = vector.broadcast %1281 : vector<8x1xf32> to vector<8x16xf32>
    %1283 = arith.cmpf oeq, %767, %1282 : vector<8x16xf32>
    %1284 = arith.extui %1283 : vector<8x16xi1> to vector<8x16xi32>
    %1285 = arith.sitofp %1284 : vector<8x16xi32> to vector<8x16xf32>
    %1286 = tpu.concatenate %1285, %1235 in 1 : vector<8x16xf32>, vector<8x64xf32> -> vector<8x80xf32>
    %c0_426 = arith.constant 0 : index
    %c0_427 = arith.constant 0 : index
    %1287 = vector.load %arg9[%c0_426, %c0_427] : memref<80x256xf32, #tpu.memory_space<vmem>>, vector<80x256xf32>
    %cst_428 = arith.constant dense<0.000000e+00> : vector<8x256xf32>
    %1288 = tpu.matmul %1286, %1287, %cst_428 {dimension_numbers = #tpu.dot_dimension_numbers<[1], [0], [0], [1], [0, 0, 1, 1], [], []>} : vector<8x80xf32>, vector<80x256xf32>, vector<8x256xf32> -> vector<8x256xf32>
    %c0_429 = arith.constant 0 : index
    %c0_430 = arith.constant 0 : index
    %1289 = vector.load %arg10[%c0_429, %c0_430] : memref<8x256xf32, #tpu.memory_space<vmem>>, vector<8x256xf32>
    %1290 = arith.addf %1288, %1289 : vector<8x256xf32>
    %1291 = vector.extract_strided_slice %1290 {offsets = [0, 0], sizes = [8, 128], strides = [1, 1]} : vector<8x256xf32> to vector<8x128xf32>
    %1292 = arith.negf %1291 : vector<8x128xf32>
    %1293 = math.exp %1292 : vector<8x128xf32>
    %cst_431 = arith.constant 1.000000e+00 : f32
    %1294 = vector.broadcast %cst_431 : f32 to vector<8x128xf32>
    %1295 = arith.addf %1294, %1293 : vector<8x128xf32>
    %1296 = arith.divf %1294, %1295 : vector<8x128xf32>
    %1297 = vector.extract_strided_slice %1296 {offsets = [0, 0], sizes = [8, 64], strides = [1, 1]} : vector<8x128xf32> to vector<8x64xf32>
    %1298 = vector.extract_strided_slice %1296 {offsets = [0, 64], sizes = [8, 64], strides = [1, 1]} : vector<8x128xf32> to vector<8x64xf32>
    %1299 = vector.extract_strided_slice %1290 {offsets = [0, 128], sizes = [8, 64], strides = [1, 1]} : vector<8x256xf32> to vector<8x64xf32>
    %1300 = vector.extract_strided_slice %1290 {offsets = [0, 192], sizes = [8, 64], strides = [1, 1]} : vector<8x256xf32> to vector<8x64xf32>
    %1301 = arith.mulf %1297, %1300 : vector<8x64xf32>
    %1302 = arith.addf %1299, %1301 : vector<8x64xf32>
    %1303 = math.tanh %1302 : vector<8x64xf32>
    %cst_432 = arith.constant 1.000000e+00 : f32
    %1304 = vector.broadcast %cst_432 : f32 to vector<8x64xf32>
    %1305 = arith.subf %1304, %1298 : vector<8x64xf32>
    %1306 = arith.mulf %1305, %1303 : vector<8x64xf32>
    %1307 = arith.mulf %1298, %1235 : vector<8x64xf32>
    %1308 = arith.addf %1306, %1307 : vector<8x64xf32>
    %1309 = tpu.concatenate %1308, %1258 in 1 : vector<8x64xf32>, vector<8x64xf32> -> vector<8x128xf32>
    %c0_433 = arith.constant 0 : index
    %c0_434 = arith.constant 0 : index
    %1310 = vector.load %arg11[%c0_433, %c0_434] : memref<128x256xf32, #tpu.memory_space<vmem>>, vector<128x256xf32>
    %cst_435 = arith.constant dense<0.000000e+00> : vector<8x256xf32>
    %1311 = tpu.matmul %1309, %1310, %cst_435 {dimension_numbers = #tpu.dot_dimension_numbers<[1], [0], [0], [1], [0, 0, 1, 1], [], []>} : vector<8x128xf32>, vector<128x256xf32>, vector<8x256xf32> -> vector<8x256xf32>
    %c0_436 = arith.constant 0 : index
    %c0_437 = arith.constant 0 : index
    %1312 = vector.load %arg12[%c0_436, %c0_437] : memref<8x256xf32, #tpu.memory_space<vmem>>, vector<8x256xf32>
    %1313 = arith.addf %1311, %1312 : vector<8x256xf32>
    %1314 = vector.extract_strided_slice %1313 {offsets = [0, 0], sizes = [8, 128], strides = [1, 1]} : vector<8x256xf32> to vector<8x128xf32>
    %1315 = arith.negf %1314 : vector<8x128xf32>
    %1316 = math.exp %1315 : vector<8x128xf32>
    %cst_438 = arith.constant 1.000000e+00 : f32
    %1317 = vector.broadcast %cst_438 : f32 to vector<8x128xf32>
    %1318 = arith.addf %1317, %1316 : vector<8x128xf32>
    %1319 = arith.divf %1317, %1318 : vector<8x128xf32>
    %1320 = vector.extract_strided_slice %1319 {offsets = [0, 0], sizes = [8, 64], strides = [1, 1]} : vector<8x128xf32> to vector<8x64xf32>
    %1321 = vector.extract_strided_slice %1319 {offsets = [0, 64], sizes = [8, 64], strides = [1, 1]} : vector<8x128xf32> to vector<8x64xf32>
    %1322 = vector.extract_strided_slice %1313 {offsets = [0, 128], sizes = [8, 64], strides = [1, 1]} : vector<8x256xf32> to vector<8x64xf32>
    %1323 = vector.extract_strided_slice %1313 {offsets = [0, 192], sizes = [8, 64], strides = [1, 1]} : vector<8x256xf32> to vector<8x64xf32>
    %1324 = arith.mulf %1320, %1323 : vector<8x64xf32>
    %1325 = arith.addf %1322, %1324 : vector<8x64xf32>
    %1326 = math.tanh %1325 : vector<8x64xf32>
    %cst_439 = arith.constant 1.000000e+00 : f32
    %1327 = vector.broadcast %cst_439 : f32 to vector<8x64xf32>
    %1328 = arith.subf %1327, %1321 : vector<8x64xf32>
    %1329 = arith.mulf %1328, %1326 : vector<8x64xf32>
    %1330 = arith.mulf %1321, %1258 : vector<8x64xf32>
    %1331 = arith.addf %1329, %1330 : vector<8x64xf32>
    %c0_440 = arith.constant 0 : index
    %c0_441 = arith.constant 0 : index
    %1332 = vector.load %arg13[%c0_440, %c0_441] : memref<64x128xf32, #tpu.memory_space<vmem>>, vector<64x128xf32>
    %cst_442 = arith.constant dense<0.000000e+00> : vector<8x128xf32>
    %1333 = tpu.matmul %1331, %1332, %cst_442 {dimension_numbers = #tpu.dot_dimension_numbers<[1], [0], [0], [1], [0, 0, 1, 1], [], []>} : vector<8x64xf32>, vector<64x128xf32>, vector<8x128xf32> -> vector<8x128xf32>
    %c0_443 = arith.constant 0 : index
    %c0_444 = arith.constant 0 : index
    %1334 = vector.load %arg14[%c0_443, %c0_444] : memref<8x128xf32, #tpu.memory_space<vmem>>, vector<8x128xf32>
    %1335 = arith.addf %1333, %1334 : vector<8x128xf32>
    %cst_445 = arith.constant dense<0xFF800000> : vector<8xf32>
    %1336 = vector.multi_reduction <maximumf>, %1335, %cst_445 [1] : vector<8x128xf32> to vector<8xf32>
    %1337 = vector.shape_cast %1336 : vector<8xf32> to vector<8x1xf32>
    %1338 = vector.broadcast %1337 : vector<8x1xf32> to vector<8x128xf32>
    %1339 = arith.subf %1335, %1338 : vector<8x128xf32>
    %1340 = math.exp %1339 : vector<8x128xf32>
    %cst_446 = arith.constant dense<0.000000e+00> : vector<8xf32>
    %1341 = vector.multi_reduction <add>, %1340, %cst_446 [1] : vector<8x128xf32> to vector<8xf32>
    %1342 = vector.shape_cast %1341 : vector<8xf32> to vector<8x1xf32>
    %1343 = math.log %1342 : vector<8x1xf32>
    %1344 = vector.broadcast %1343 : vector<8x1xf32> to vector<8x128xf32>
    %1345 = arith.subf %1339, %1344 : vector<8x128xf32>
    %c7_447 = arith.constant 7 : index
    %c0_448 = arith.constant 0 : index
    %c0_449 = arith.constant 0 : index
    %1346 = vector.load %arg15[%c7_447, %c0_448, %c0_449] : memref<8x8x128xf32, #tpu.memory_space<vmem>>, vector<1x8x128xf32>
    %1347 = vector.shape_cast %1346 : vector<1x8x128xf32> to vector<8x128xf32>
    %1348 = vector.shape_cast %1345 : vector<8x128xf32> to vector<1x8x128xf32>
    tpu.vector_store %arg15[%c7_447, %c0_448, %c0_449], %1348 {strides = array<i32>} : memref<8x8x128xf32, #tpu.memory_space<vmem>>, vector<1x8x128xf32>,
    return
  }
}

</mosaic_0001>

<bundles_post_ra>
// kernel: seq2seq_forward.1
= control target key start
LH: loop header
LB: loop body
LE: loop exit
PB: predicated region body
PF: predicated region fallthrough
CT: control target
= control target key end

     0   :  { %v8890_v0 = vmov 0.0|0.0   ;;  %vm8891_vm0 = vmmov 0   ;;  %v8892_v4 = vmov 0.0   ;;  %vm65_vm1 = vcmask 130048   ;;  %s8893_s18 = smov 32   ;;  %s8894_s19 = smov 64   ;;  %s11347_s1 = inlined_call_operand.vmem [shape: f32[48,128], index: 1, kind: input, shape index: {}]   ;;  %s11348_s0 = inlined_call_operand.vmem [shape: f32[8,8,16], index: 0, kind: input, shape index: {}]   ;;  %s11349_s2 = inlined_call_operand.vmem [shape: f32[8,128], index: 2, kind: input, shape index: {}]   ;;  %s11350_s3 = inlined_call_operand.vmem [shape: f32[48,128], index: 3, kind: input, shape index: {}]   ;;  %s11351_s4 = inlined_call_operand.vmem [shape: f32[8,128], index: 4, kind: input, shape index: {}]   ;;  %s11352_s5 = inlined_call_operand.vmem [shape: f32[96,128], index: 5, kind: input, shape index: {}]   ;;  %s11353_s6 = inlined_call_operand.vmem [shape: f32[8,128], index: 6, kind: input, shape index: {}]   ;;  %s11354_s7 = inlined_call_operand.vmem [shape: f32[96,128], index: 7, kind: input, shape index: {}]   ;;  %s11355_s8 = inlined_call_operand.vmem [shape: f32[8,128], index: 8, kind: input, shape index: {}]   ;;  %s11356_s9 = inlined_call_operand.vmem [shape: f32[80,256], index: 9, kind: input, shape index: {}]   ;;  %s11357_s10 = inlined_call_operand.vmem [shape: f32[8,256], index: 10, kind: input, shape index: {}]   ;;  %s11358_s11 = inlined_call_operand.vmem [shape: f32[128,256], index: 11, kind: input, shape index: {}]   ;;  %s11359_s12 = inlined_call_operand.vmem [shape: f32[8,256], index: 12, kind: input, shape index: {}]   ;;  %s11360_s13 = inlined_call_operand.vmem [shape: f32[64,128], index: 13, kind: input, shape index: {}]   ;;  %s11361_s14 = inlined_call_operand.vmem [shape: f32[8,128], index: 14, kind: input, shape index: {}]   ;;  %s11362_s15 = inlined_call_operand.vmem [shape: f32[8,8,128], index: 15, kind: output, shape index: {}]  }
   0x1   :  { %7614 = vmatprep.subr.bf16.mxu0 %v8890_v0  ;;  %v67_v1 = vld [vmem:[%s11347_s1] sm:$0xff]  ;;  %v68_v2 = vld [vmem:[%s11347_s1 + $0x8] sm:$0xff]  ;;  %v69_v3 = vld [vmem:[%s11347_s1 + $0x10] sm:$0xff]  ;;  %6802 = vmatprep.mubr.msk.f32.mxu0 %vm8891_vm0, %v8892_v4  ;;  %vm74_vm2 = vcmask 392192   ;;  %s8895_s20 = smov 96   ;;  %s8896_s21 = smov 112  }
   0x2   :  { %v8991_v5 = vpack.c.bf16 %v68_v2, %v67_v1  ;;  %v70_v6 = vld [vmem:[%s11347_s1 + $0x18] sm:$0xff]  ;;  %7623 = vmatprep.subr.bf16.mxu1 %v8890_v0  ;;  %6817 = vmatprep.mubr.msk.f32.mxu1 %vm8891_vm0, %v8892_v4  ;;  %v71_v8 = vld [vmem:[%s11347_s1 + $0x20] sm:$0xff]  ;;  %v72_v9 = vld [vmem:[%s11347_s1 + $0x28] sm:$0xff]  ;;  %vm1724_vm3 = vcmask 261120   ;;  %vm1755_vm4 = vcmask 523264   ;;  %vm1770_vm5 = vcmask 785408  }
   0x3   :  { %v9000_v7 = vpack.c.bf16 %v70_v6, %v69_v3  ;;  %v9012_v10 = vpack.c.bf16 %v72_v9, %v71_v8  ;;  %v50_v11 = vld [vmem:[%s11348_s0] sm:$0xff]  ;;  %v9050_v31 = vld [vmem:[%s11348_s0 + $0x8] sm:$0xff]  ;;  %v9075_v51 = vld [vmem:[%s11348_s0 + $0x10] sm:$0xff]  ;;  %vm3462_vm7 = vcmask 654336   ;;  %s8898_s26 = smov 80  }
   0x4   :  { %7616 = vmatpush3.bf16.msra.mxu0 %v8991_v5  ;;  %7625 = vmatpush3.bf16.msra.mxu1 %v8991_v5  ;;  %v66_v12 = vsel %vm65_vm1, %v50_v11, 0.0  ;;  %v9037_v13 = vld [vmem:[%s11349_s2] sm:$0xff] }
   0x5   :  { %7617 = vmatprep.subr.bf16.mxu0 %v8890_v0  ;;  %7626 = vmatprep.subr.bf16.mxu1 %v8890_v0 }
   0x8   :  { %7619 = vmatpush3.bf16.msra.mxu0 %v9000_v7  ;;  %7628 = vmatpush3.bf16.msra.mxu1 %v9000_v7 }
   0x9   :  { %7620 = vmatprep.subr.bf16.mxu0 %v8890_v0  ;;  %7629 = vmatprep.subr.bf16.mxu1 %v8890_v0 }
   0xc   :  { %7622 = vmatpush3.bf16.msra.mxu0 %v9012_v10  ;;  %7631 = vmatpush3.bf16.msra.mxu1 %v9012_v10 }
   0xd   :  { %7632 = vmatprep.subr.bf16.mxu0 %v8890_v0  ;;  %7641 = vmatprep.subr.bf16.mxu1 %v8890_v0 }
   0xf   :  { %6803 = vmatmul.mubr.msk.f32.vlgmr.msra.gmra.mrb[0].mxu0 %vm74_vm2, %v66_v12  ;;  %v9100_v12 = vld [vmem:[%s11348_s0 + $0x18] sm:$0xff] }
  0x10   :  { %7634 = vmatpush3.bf16.msra.mxu0 %v8991_v5  ;;  %6832 = vmatprep.mubr.msk.f32.mxu0 %vm8891_vm0, %v8892_v4 }
  0x11   :  { %7635 = vmatprep.subr.bf16.mxu0 %v8890_v0 }
  0x14   :  { %7637 = vmatpush3.bf16.msra.mxu0 %v9000_v7 }
  0x15   :  { %7638 = vmatprep.subr.bf16.mxu0 %v8890_v0 }
  0x18   :  { %7640 = vmatpush3.bf16.msra.mxu0 %v9012_v10 }
  0x19   :  { %7650 = vmatprep.subr.bf16.mxu0 %v8890_v0 }
  0xe2   :  { %v144_v14 = vpop.f32.mrb[0].mxu0 }
  0xe3   :  { %v145_v15 = vadd.f32 %v144_v14, %v9037_v13  ;;  %v6804_v16 = vpop.f32.mrb[1].mxu0 }
  0xe5   :  { %155 = vrot.lane.b32.xlu0 %v145_v15, %s8893_s18  ;;  %v6288_v17 = vmul.f32 -1.442695, %v145_v15 }
  0xe7   :  { %8567 = vpow2.f32 %v6288_v17 }
  0xf1   :  { %v8568_v18 = vpop.eup %8567 }
  0xf2   :  { %v151_v19 = vadd.f32 1.0, %v8568_v18 }
  0xf4   :  { %8569 = vrcp.f32 %v151_v19 }
  0xfe   :  { %v8570_v20 = vpop.eup %8569 }
  0xff   :  { %v165_v26 = vsub.f32 1.0, %v8570_v20  ;;  %v171_v28 = vmul.f32 0.0, %v8570_v20 }
 0x157   :  { %v156_v21 = vpop.permute.xlu0 %155 }
 0x158   :  { %v158_v22 = vmul.f32 %v8570_v20, %v156_v21 }
 0x15a   :  { %160 = vrot.lane.b32.xlu0 %v158_v22, %s8894_s19 }
 0x1cc   :  { %v161_v23 = vpop.permute.xlu0 %160 }
 0x1cd   :  { %v163_v24 = vadd.f32 %v161_v23, %v145_v15 }
 0x1cf   :  { %8571 = vtanh.f32 %v163_v24 }
 0x1d9   :  { %v8572_v25 = vpop.eup %8571 }
 0x1da   :  { %167 = vrot.lane.b32.xlu1 %v8572_v25, %s8895_s20 }
 0x24c   :  { %v168_v27 = vpop.permute.xlu1 %167 }
 0x24d   :  { %v170_v29 = vmul.f32 %v168_v27, %v165_v26 }
 0x24f   :  { %v9043_v30 = vadd.f32 %v171_v28, %v170_v29 }
 0x251   :  { %174 = vrot.lane.b32.xlu1 %v9043_v30, %s8896_s21 }
 0x2c3   :  { %v175_v32 = vpop.permute.xlu1 %174 }
 0x2c4   :  { %v177_v33 = vsel %vm65_vm1, %v9050_v31, %v175_v32 }
 0x2c5   :  { %6818 = vmatmul.mubr.msk.f32.vlgmr.msra.gmra.mrb[0].mxu1 %vm74_vm2, %v177_v33 }
 0x2c6   :  { %7643 = vmatpush3.bf16.msra.mxu1 %v8991_v5  ;;  %6847 = vmatprep.mubr.msk.f32.mxu1 %vm8891_vm0, %v8892_v4 }
 0x2c7   :  { %7644 = vmatprep.subr.bf16.mxu1 %v8890_v0 }
 0x2ca   :  { %7646 = vmatpush3.bf16.msra.mxu1 %v9000_v7 }
 0x2cb   :  { %7647 = vmatprep.subr.bf16.mxu1 %v8890_v0 }
 0x2ce   :  { %7649 = vmatpush3.bf16.msra.mxu1 %v9012_v10 }
 0x2cf   :  { %7659 = vmatprep.subr.bf16.mxu1 %v8890_v0 }
 0x398   :  { %v247_v34 = vpop.f32.mrb[0].mxu1 }
 0x399   :  { %v248_v35 = vadd.f32 %v247_v34, %v9037_v13  ;;  %v6819_v36 = vpop.f32.mrb[1].mxu1 }
 0x39b   :  { %258 = vrot.lane.b32.xlu0 %v248_v35, %s8893_s18  ;;  %v6290_v37 = vmul.f32 -1.442695, %v248_v35 }
 0x39d   :  { %8573 = vpow2.f32 %v6290_v37 }
 0x3a7   :  { %v8574_v38 = vpop.eup %8573 }
 0x3a8   :  { %v254_v39 = vadd.f32 1.0, %v8574_v38 }
 0x3aa   :  { %8575 = vrcp.f32 %v254_v39 }
 0x3b4   :  { %v8576_v40 = vpop.eup %8575 }
 0x3b5   :  { %v268_v46 = vsub.f32 1.0, %v8576_v40  ;;  %v274_v48 = vmul.f32 %v8576_v40, %v9043_v30 }
 0x40d   :  { %v259_v41 = vpop.permute.xlu0 %258 }
 0x40e   :  { %v261_v42 = vmul.f32 %v8576_v40, %v259_v41 }
 0x410   :  { %263 = vrot.lane.b32.xlu1 %v261_v42, %s8894_s19 }
 0x482   :  { %v264_v43 = vpop.permute.xlu1 %263 }
 0x483   :  { %v266_v44 = vadd.f32 %v264_v43, %v248_v35  ;;  %v9125_v35 = vld [vmem:[%s11348_s0 + $0x20] sm:$0xff] }
 0x485   :  { %8577 = vtanh.f32 %v266_v44 }
 0x48f   :  { %v8578_v45 = vpop.eup %8577 }
 0x490   :  { %270 = vrot.lane.b32.xlu0 %v8578_v45, %s8895_s20 }
 0x502   :  { %v271_v47 = vpop.permute.xlu0 %270 }
 0x503   :  { %v273_v49 = vmul.f32 %v271_v47, %v268_v46 }
 0x505   :  { %v9068_v50 = vadd.f32 %v274_v48, %v273_v49 }
 0x507   :  { %277 = vrot.lane.b32.xlu1 %v9068_v50, %s8896_s21 }
 0x579   :  { %v278_v52 = vpop.permute.xlu1 %277 }
 0x57a   :  { %v280_v53 = vsel %vm65_vm1, %v9075_v51, %v278_v52 }
 0x57b   :  { %6833 = vmatmul.mubr.msk.f32.vlgmr.msra.gmra.mrb[2].mxu0 %vm74_vm2, %v280_v53 }
 0x57c   :  { %7652 = vmatpush3.bf16.msra.mxu0 %v8991_v5  ;;  %6862 = vmatprep.mubr.msk.f32.mxu0 %vm8891_vm0, %v8892_v4 }
 0x57d   :  { %7653 = vmatprep.subr.bf16.mxu0 %v8890_v0 }
 0x580   :  { %7655 = vmatpush3.bf16.msra.mxu0 %v9000_v7 }
 0x581   :  { %7656 = vmatprep.subr.bf16.mxu0 %v8890_v0 }
 0x584   :  { %7658 = vmatpush3.bf16.msra.mxu0 %v9012_v10 }
 0x585   :  { %7668 = vmatprep.subr.bf16.mxu0 %v8890_v0 }
 0x64e   :  { %v350_v54 = vpop.f32.mrb[2].mxu0 }
 0x64f   :  { %v351_v55 = vadd.f32 %v350_v54, %v9037_v13  ;;  %v6834_v56 = vpop.f32.mrb[3].mxu0 }
 0x651   :  { %361 = vrot.lane.b32.xlu0 %v351_v55, %s8893_s18  ;;  %v6292_v57 = vmul.f32 -1.442695, %v351_v55 }
 0x653   :  { %8579 = vpow2.f32 %v6292_v57  ;;  %v9150_v57 = vld [vmem:[%s11348_s0 + $0x28] sm:$0xff] }
 0x65d   :  { %v8580_v58 = vpop.eup %8579 }
 0x65e   :  { %v357_v59 = vadd.f32 1.0, %v8580_v58 }
 0x660   :  { %8581 = vrcp.f32 %v357_v59 }
 0x66a   :  { %v8582_v60 = vpop.eup %8581 }
 0x66b   :  { %v371_v3 = vsub.f32 1.0, %v8582_v60  ;;  %v377_v8 = vmul.f32 %v8582_v60, %v9068_v50 }
 0x6c3   :  { %v362_v61 = vpop.permute.xlu0 %361 }
 0x6c4   :  { %v364_v62 = vmul.f32 %v8582_v60, %v362_v61 }
 0x6c6   :  { %366 = vrot.lane.b32.xlu1 %v364_v62, %s8894_s19 }
 0x738   :  { %v367_v63 = vpop.permute.xlu1 %366 }
 0x739   :  { %v369_v1 = vadd.f32 %v367_v63, %v351_v55 }
 0x73b   :  { %8583 = vtanh.f32 %v369_v1 }
 0x745   :  { %v8584_v2 = vpop.eup %8583 }
 0x746   :  { %373 = vrot.lane.b32.xlu0 %v8584_v2, %s8895_s20 }
 0x7b8   :  { %v374_v6 = vpop.permute.xlu0 %373 }
 0x7b9   :  { %v376_v9 = vmul.f32 %v374_v6, %v371_v3 }
 0x7bb   :  { %v9093_v11 = vadd.f32 %v377_v8, %v376_v9 }
 0x7bd   :  { %380 = vrot.lane.b32.xlu1 %v9093_v11, %s8896_s21 }
 0x82f   :  { %v381_v14 = vpop.permute.xlu1 %380 }
 0x830   :  { %v383_v15 = vsel %vm65_vm1, %v9100_v12, %v381_v14 }
 0x831   :  { %6848 = vmatmul.mubr.msk.f32.vlgmr.msra.gmra.mrb[2].mxu1 %vm74_vm2, %v383_v15 }
 0x832   :  { %7661 = vmatpush3.bf16.msra.mxu1 %v8991_v5  ;;  %6877 = vmatprep.mubr.msk.f32.mxu1 %vm8891_vm0, %v8892_v4 }
 0x833   :  { %7662 = vmatprep.subr.bf16.mxu1 %v8890_v0 }
 0x836   :  { %7664 = vmatpush3.bf16.msra.mxu1 %v9000_v7 }
 0x837   :  { %7665 = vmatprep.subr.bf16.mxu1 %v8890_v0 }
 0x83a   :  { %7667 = vmatpush3.bf16.msra.mxu1 %v9012_v10 }
 0x83b   :  { %7677 = vmatprep.subr.bf16.mxu1 %v8890_v0 }
 0x904   :  { %v453_v16 = vpop.f32.mrb[2].mxu1 }
 0x905   :  { %v454_v17 = vadd.f32 %v453_v16, %v9037_v13  ;;  %v6849_v18 = vpop.f32.mrb[3].mxu1 }
 0x906   :  { %v895_v18 = vld [vmem:[%s11350_s3] sm:$0xff] }
 0x907   :  { %464 = vrot.lane.b32.xlu0 %v454_v17, %s8893_s18  ;;  %v6294_v19 = vmul.f32 -1.442695, %v454_v17 }
 0x909   :  { %8585 = vpow2.f32 %v6294_v19  ;;  %v896_v19 = vld [vmem:[%s11350_s3 + $0x8] sm:$0xff] }
 0x913   :  { %v8586_v20 = vpop.eup %8585 }
 0x914   :  { %v460_v21 = vadd.f32 1.0, %v8586_v20  ;;  %v9181_v20 = vld [vmem:[%s11348_s0 + $0x30] sm:$0xff] }
 0x916   :  { %8587 = vrcp.f32 %v460_v21  ;;  %v9183_v21 = vpack.c.bf16 %v896_v19, %v895_v18 }
 0x920   :  { %v8588_v22 = vpop.eup %8587 }
 0x921   :  { %v474_v28 = vsub.f32 1.0, %v8588_v22  ;;  %v480_v32 = vmul.f32 %v8588_v22, %v9093_v11 }
 0x979   :  { %v465_v23 = vpop.permute.xlu0 %464 }
 0x97a   :  { %v467_v24 = vmul.f32 %v8588_v22, %v465_v23  ;;  %v897_v23 = vld [vmem:[%s11350_s3 + $0x10] sm:$0xff] }
 0x97c   :  { %469 = vrot.lane.b32.xlu1 %v467_v24, %s8894_s19  ;;  %v898_v24 = vld [vmem:[%s11350_s3 + $0x18] sm:$0xff] }
 0x9ee   :  { %v470_v25 = vpop.permute.xlu1 %469 }
 0x9ef   :  { %v472_v26 = vadd.f32 %v470_v25, %v454_v17 }
 0x9f1   :  { %8589 = vtanh.f32 %v472_v26  ;;  %v9195_v26 = vpack.c.bf16 %v898_v24, %v897_v23 }
 0x9fb   :  { %v8590_v27 = vpop.eup %8589 }
 0x9fc   :  { %476 = vrot.lane.b32.xlu0 %v8590_v27, %s8895_s20  ;;  %v899_v27 = vld [vmem:[%s11350_s3 + $0x20] sm:$0xff] }
 0xa6e   :  { %v477_v29 = vpop.permute.xlu0 %476 }
 0xa6f   :  { %v479_v33 = vmul.f32 %v477_v29, %v474_v28  ;;  %v900_v28 = vld [vmem:[%s11350_s3 + $0x28] sm:$0xff] }
 0xa70   :  { %v9207_v29 = vpack.c.bf16 %v900_v28, %v899_v27 }
 0xa71   :  { %v9118_v34 = vadd.f32 %v480_v32, %v479_v33  ;;  %v9213_v32 = vld [vmem:[%s11348_s0 + $0x38] sm:$0xff] }
 0xa72   :  { %v894_v33 = vsel %vm65_vm1, %v9213_v32, 0.0 }
 0xa73   :  { %483 = vrot.lane.b32.xlu1 %v9118_v34, %s8896_s21 }
 0xae5   :  { %v484_v36 = vpop.permute.xlu1 %483 }
 0xae6   :  { %v486_v37 = vsel %vm65_vm1, %v9125_v35, %v484_v36 }
 0xae7   :  { %6863 = vmatmul.mubr.msk.f32.vlgmr.msra.gmra.mrb[4].mxu0 %vm74_vm2, %v486_v37 }
 0xae8   :  { %7670 = vmatpush3.bf16.msra.mxu0 %v8991_v5  ;;  %6892 = vmatprep.mubr.msk.f32.mxu0 %vm8891_vm0, %v8892_v4 }
 0xae9   :  { %7671 = vmatprep.subr.bf16.mxu0 %v8890_v0 }
 0xaec   :  { %7673 = vmatpush3.bf16.msra.mxu0 %v9000_v7 }
 0xaed   :  { %7674 = vmatprep.subr.bf16.mxu0 %v8890_v0 }
 0xaf0   :  { %7676 = vmatpush3.bf16.msra.mxu0 %v9012_v10 }
 0xaf1   :  { %7686 = vmatprep.subr.bf16.mxu0 %v8890_v0 }
 0xbba   :  { %v556_v38 = vpop.f32.mrb[4].mxu0 }
 0xbbb   :  { %v557_v39 = vadd.f32 %v556_v38, %v9037_v13  ;;  %v6864_v40 = vpop.f32.mrb[5].mxu0 }
 0xbbd   :  { %567 = vrot.lane.b32.xlu0 %v557_v39, %s8893_s18  ;;  %v6296_v41 = vmul.f32 -1.442695, %v557_v39 }
 0xbbf   :  { %8591 = vpow2.f32 %v6296_v41 }
 0xbc9   :  { %v8592_v42 = vpop.eup %8591 }
 0xbca   :  { %v563_v43 = vadd.f32 1.0, %v8592_v42 }
 0xbcc   :  { %8593 = vrcp.f32 %v563_v43 }
 0xbd6   :  { %v8594_v44 = vpop.eup %8593 }
 0xbd7   :  { %v577_v52 = vsub.f32 1.0, %v8594_v44  ;;  %v583_v54 = vmul.f32 %v8594_v44, %v9118_v34 }
 0xc2f   :  { %v568_v45 = vpop.permute.xlu0 %567 }
 0xc30   :  { %v570_v46 = vmul.f32 %v8594_v44, %v568_v45 }
 0xc32   :  { %572 = vrot.lane.b32.xlu1 %v570_v46, %s8894_s19 }
 0xca4   :  { %v573_v47 = vpop.permute.xlu1 %572 }
 0xca5   :  { %v575_v48 = vadd.f32 %v573_v47, %v557_v39  ;;  %v9233_v39 = vld [vmem:[%s11351_s4] sm:$0xff] }
 0xca7   :  { %8595 = vtanh.f32 %v575_v48 }
 0xcb1   :  { %v8596_v49 = vpop.eup %8595 }
 0xcb2   :  { %579 = vrot.lane.b32.xlu0 %v8596_v49, %s8895_s20 }
 0xd24   :  { %v580_v53 = vpop.permute.xlu0 %579 }
 0xd25   :  { %v582_v55 = vmul.f32 %v580_v53, %v577_v52 }
 0xd27   :  { %v9143_v56 = vadd.f32 %v583_v54, %v582_v55 }
 0xd29   :  { %586 = vrot.lane.b32.xlu1 %v9143_v56, %s8896_s21 }
 0xd9b   :  { %v587_v58 = vpop.permute.xlu1 %586 }
 0xd9c   :  { %v589_v59 = vsel %vm65_vm1, %v9150_v57, %v587_v58 }
 0xd9d   :  { %6878 = vmatmul.mubr.msk.f32.vlgmr.msra.gmra.mrb[4].mxu1 %vm74_vm2, %v589_v59 }
 0xd9e   :  { %7679 = vmatpush3.bf16.msra.mxu1 %v8991_v5  ;;  %6907 = vmatprep.mubr.msk.f32.mxu1 %vm8891_vm0, %v8892_v4 }
 0xd9f   :  { %7680 = vmatprep.subr.bf16.mxu1 %v8890_v0 }
 0xda2   :  { %7682 = vmatpush3.bf16.msra.mxu1 %v9000_v7 }
 0xda3   :  { %7683 = vmatprep.subr.bf16.mxu1 %v8890_v0 }
 0xda6   :  { %7685 = vmatpush3.bf16.msra.mxu1 %v9012_v10 }
 0xda7   :  { %7695 = vmatprep.subr.bf16.mxu1 %v8890_v0 }
 0xe70   :  { %v659_v60 = vpop.f32.mrb[4].mxu1 }
 0xe71   :  { %v660_v61 = vadd.f32 %v659_v60, %v9037_v13  ;;  %v6879_v62 = vpop.f32.mrb[5].mxu1 }
 0xe73   :  { %670 = vrot.lane.b32.xlu0 %v660_v61, %s8893_s18  ;;  %v6298_v5 = vmul.f32 -1.442695, %v660_v61 }
 0xe75   :  { %8597 = vpow2.f32 %v6298_v5 }
 0xe7f   :  { %v8598_v63 = vpop.eup %8597 }
 0xe80   :  { %v666_v1 = vadd.f32 1.0, %v8598_v63 }
 0xe82   :  { %8599 = vrcp.f32 %v666_v1 }
 0xe8c   :  { %v8600_v2 = vpop.eup %8599 }
 0xe8d   :  { %v680_v9 = vsub.f32 1.0, %v8600_v2  ;;  %v686_v15 = vmul.f32 %v8600_v2, %v9143_v56 }
 0xee5   :  { %v671_v3 = vpop.permute.xlu0 %670 }
 0xee6   :  { %v673_v7 = vmul.f32 %v8600_v2, %v671_v3 }
 0xee8   :  { %675 = vrot.lane.b32.xlu1 %v673_v7, %s8894_s19 }
 0xf5a   :  { %v676_v6 = vpop.permute.xlu1 %675 }
 0xf5b   :  { %v678_v10 = vadd.f32 %v676_v6, %v660_v61 }
 0xf5d   :  { %8601 = vtanh.f32 %v678_v10 }
 0xf67   :  { %v8602_v8 = vpop.eup %8601 }
 0xf68   :  { %682 = vrot.lane.b32.xlu0 %v8602_v8, %s8895_s20 }
 0xfda   :  { %v683_v14 = vpop.permute.xlu0 %682 }
 0xfdb   :  { %v685_v16 = vmul.f32 %v683_v14, %v680_v9 }
 0xfdd   :  { %v9168_v17 = vadd.f32 %v686_v15, %v685_v16 }
 0xfdf   :  { %689 = vrot.lane.b32.xlu1 %v9168_v17, %s8896_s21 }
0x1051   :  { %v690_v22 = vpop.permute.xlu1 %689 }
0x1052   :  { %v692_v25 = vsel %vm65_vm1, %v9181_v20, %v690_v22 }
0x1053   :  { %6893 = vmatmul.mubr.msk.f32.vlgmr.msra.gmra.mrb[6].mxu0 %vm74_vm2, %v692_v25 }
0x1054   :  { %7688 = vmatpush3.bf16.msra.mxu0 %v9183_v21  ;;  %6922 = vmatprep.mubr.msk.f32.mxu0 %vm8891_vm0, %v8892_v4 }
0x1055   :  { %7689 = vmatprep.subr.bf16.mxu0 %v8890_v0 }
0x1058   :  { %7691 = vmatpush3.bf16.msra.mxu0 %v9195_v26 }
0x1059   :  { %7692 = vmatprep.subr.bf16.mxu0 %v8890_v0 }
0x105c   :  { %7694 = vmatpush3.bf16.msra.mxu0 %v9207_v29 }
0x105d   :  { %7704 = vmatprep.subr.bf16.mxu0 %v8890_v0 }
0x105f   :  { %6923 = vmatmul.mubr.msk.f32.vlgmr.msra.gmra.mrb[8].mxu0 %vm74_vm2, %v894_v33 }
0x1060   :  { %7706 = vmatpush3.bf16.msra.mxu0 %v9183_v21  ;;  %6952 = vmatprep.mubr.msk.f32.mxu0 %vm8891_vm0, %v8892_v4 }
0x1061   :  { %7707 = vmatprep.subr.bf16.mxu0 %v8890_v0 }
0x1064   :  { %7709 = vmatpush3.bf16.msra.mxu0 %v9195_v26 }
0x1065   :  { %7710 = vmatprep.subr.bf16.mxu0 %v8890_v0 }
0x1068   :  { %7712 = vmatpush3.bf16.msra.mxu0 %v9207_v29 }
0x1069   :  { %7722 = vmatprep.subr.bf16.mxu0 %v8890_v0 }
0x1126   :  { %v762_v36 = vpop.f32.mrb[6].mxu0 }
0x1127   :  { %v763_v37 = vadd.f32 %v762_v36, %v9037_v13  ;;  %v6894_v38 = vpop.f32.mrb[7].mxu0 }
0x1129   :  { %773 = vrot.lane.b32.xlu0 %v763_v37, %s8893_s18  ;;  %v6300_v43 = vmul.f32 -1.442695, %v763_v37 }
0x112b   :  { %8603 = vpow2.f32 %v6300_v43 }
0x1132   :  { %v971_v40 = vpop.f32.mrb[8].mxu0 }
0x1133   :  { %v972_v41 = vadd.f32 %v971_v40, %v9233_v39  ;;  %v6924_v42 = vpop.f32.mrb[9].mxu0 }
0x1135   :  { %982 = vrot.lane.b32.xlu1 %v972_v41, %s8893_s18  ;;  %v6304_v44 = vmul.f32 -1.442695, %v972_v41  ;;  %v8604_v45 = vpop.eup %8603 }
0x1136   :  { %v769_v13 = vadd.f32 1.0, %v8604_v45 }
0x1137   :  { %8605 = vpow2.f32 %v6304_v44 }
0x1138   :  { %8607 = vrcp.f32 %v769_v13 }
0x1141   :  { %v8606_v46 = vpop.eup %8605 }
0x1142   :  { %v978_v47 = vadd.f32 1.0, %v8606_v46  ;;  %v8608_v48 = vpop.eup %8607 }
0x1143   :  { %v783_v63 = vsub.f32 1.0, %v8608_v48  ;;  %v789_v2 = vmul.f32 %v8608_v48, %v9168_v17 }
0x1144   :  { %8609 = vrcp.f32 %v978_v47 }
0x114e   :  { %v8610_v53 = vpop.eup %8609 }
0x114f   :  { %v992_v6 = vsub.f32 1.0, %v8610_v53  ;;  %v998_v8 = vmul.f32 0.0, %v8610_v53 }
0x119b   :  { %v774_v49 = vpop.permute.xlu0 %773 }
0x119c   :  { %v776_v52 = vmul.f32 %v8608_v48, %v774_v49 }
0x119e   :  { %778 = vrot.lane.b32.xlu0 %v776_v52, %s8894_s19 }
0x11a7   :  { %v983_v54 = vpop.permute.xlu1 %982 }
0x11a8   :  { %v985_v55 = vmul.f32 %v8610_v53, %v983_v54 }
0x11aa   :  { %987 = vrot.lane.b32.xlu1 %v985_v55, %s8894_s19 }
0x1210   :  { %v779_v58 = vpop.permute.xlu0 %778 }
0x1211   :  { %v781_v59 = vadd.f32 %v779_v58, %v763_v37 }
0x1213   :  { %8611 = vtanh.f32 %v781_v59 }
0x121c   :  { %v988_v60 = vpop.permute.xlu1 %987 }
0x121d   :  { %v8612_v61 = vpop.eup %8611  ;;  %v990_v62 = vadd.f32 %v988_v60, %v972_v41 }
0x121e   :  { %785 = vrot.lane.b32.xlu0 %v8612_v61, %s8895_s20 }
0x121f   :  { %8613 = vtanh.f32 %v990_v62 }
0x1229   :  { %v8614_v5 = vpop.eup %8613 }
0x122a   :  { %994 = vrot.lane.b32.xlu1 %v8614_v5, %s8895_s20 }
0x1290   :  { %v786_v1 = vpop.permute.xlu0 %785 }
0x1291   :  { %v788_v3 = vmul.f32 %v786_v1, %v783_v63 }
0x1293   :  { %v9242_v7 = vadd.f32 %v789_v2, %v788_v3 }
0x1295   :  { %792 = vrot.lane.b32.xlu0 %v9242_v7, %s8896_s21 }
0x129c   :  { %v995_v10 = vpop.permute.xlu1 %994 }
0x129d   :  { %v997_v9 = vmul.f32 %v995_v10, %v992_v6 }
0x129f   :  { %v9246_v14 = vadd.f32 %v998_v8, %v997_v9 }
0x12a1   :  { %1001 = vrot.lane.b32.xlu1 %v9246_v14, %s8896_s21 }
0x1307   :  { %v793_v15 = vpop.permute.xlu0 %792 }
0x1308   :  { %v795_v16 = vsel %vm65_vm1, %v9213_v32, %v793_v15 }
0x1309   :  { %6908 = vmatmul.mubr.msk.f32.vlgmr.msra.gmra.mrb[6].mxu1 %vm74_vm2, %v795_v16 }
0x130a   :  { %7697 = vmatpush3.bf16.msra.mxu1 %v9183_v21  ;;  %6937 = vmatprep.mubr.msk.f32.mxu1 %vm8891_vm0, %v8892_v4 }
0x130b   :  { %7698 = vmatprep.subr.bf16.mxu1 %v8890_v0 }
0x130e   :  { %7700 = vmatpush3.bf16.msra.mxu1 %v9195_v26 }
0x130f   :  { %7701 = vmatprep.subr.bf16.mxu1 %v8890_v0 }
0x1312   :  { %7703 = vmatpush3.bf16.msra.mxu1 %v9207_v29 }
0x1313   :  { %v1002_v18 = vpop.permute.xlu1 %1001  ;;  %7713 = vmatprep.subr.bf16.mxu1 %v8890_v0 }
0x1314   :  { %v1004_v19 = vsel %vm65_vm1, %v9181_v20, %v1002_v18 }
0x1315   :  { %6938 = vmatmul.mubr.msk.f32.vlgmr.msra.gmra.mrb[8].mxu1 %vm74_vm2, %v1004_v19 }
0x1316   :  { %7715 = vmatpush3.bf16.msra.mxu1 %v9183_v21  ;;  %6967 = vmatprep.mubr.msk.f32.mxu1 %vm8891_vm0, %v8892_v4 }
0x1317   :  { %7716 = vmatprep.subr.bf16.mxu1 %v8890_v0 }
0x131a   :  { %7718 = vmatpush3.bf16.msra.mxu1 %v9195_v26 }
0x131b   :  { %7719 = vmatprep.subr.bf16.mxu1 %v8890_v0 }
0x131e   :  { %7721 = vmatpush3.bf16.msra.mxu1 %v9207_v29 }
0x131f   :  { %7731 = vmatprep.subr.bf16.mxu1 %v8890_v0 }
0x13dc   :  { %v9272_v22 = vpop.f32.mrb[6].mxu1 }
0x13dd   :  { %v6909_v20 = vpop.f32.mrb[7].mxu1 }
0x13e8   :  { %v1074_v23 = vpop.f32.mrb[8].mxu1 }
0x13e9   :  { %v1075_v24 = vadd.f32 %v1074_v23, %v9233_v39  ;;  %v6939_v25 = vpop.f32.mrb[9].mxu1 }
0x13eb   :  { %1085 = vrot.lane.b32.xlu0 %v1075_v24, %s8893_s18  ;;  %v6306_v27 = vmul.f32 -1.442695, %v1075_v24 }
0x13ed   :  { %8615 = vpow2.f32 %v6306_v27 }
0x13f7   :  { %v8616_v28 = vpop.eup %8615 }
0x13f8   :  { %v1081_v32 = vadd.f32 1.0, %v8616_v28 }
0x13fa   :  { %8617 = vrcp.f32 %v1081_v32 }
0x1404   :  { %v8618_v33 = vpop.eup %8617 }
0x1405   :  { %v1095_v42 = vsub.f32 1.0, %v8618_v33  ;;  %v1101_v44 = vmul.f32 %v8618_v33, %v9246_v14 }
0x145d   :  { %v1086_v36 = vpop.permute.xlu0 %1085 }
0x145e   :  { %v1088_v37 = vmul.f32 %v8618_v33, %v1086_v36 }
0x1460   :  { %1090 = vrot.lane.b32.xlu1 %v1088_v37, %s8894_s19 }
0x14d2   :  { %v1091_v38 = vpop.permute.xlu1 %1090 }
0x14d3   :  { %v1093_v40 = vadd.f32 %v1091_v38, %v1075_v24 }
0x14d5   :  { %8619 = vtanh.f32 %v1093_v40 }
0x14df   :  { %v8620_v41 = vpop.eup %8619 }
0x14e0   :  { %1097 = vrot.lane.b32.xlu0 %v8620_v41, %s8895_s20 }
0x1552   :  { %v1098_v43 = vpop.permute.xlu0 %1097 }
0x1553   :  { %v1100_v45 = vmul.f32 %v1098_v43, %v1095_v42 }
0x1555   :  { %v9279_v13 = vadd.f32 %v1101_v44, %v1100_v45 }
0x1557   :  { %1104 = vrot.lane.b32.xlu1 %v9279_v13, %s8896_s21 }
0x15c9   :  { %v1105_v46 = vpop.permute.xlu1 %1104 }
0x15ca   :  { %v1107_v47 = vsel %vm65_vm1, %v9150_v57, %v1105_v46 }
0x15cb   :  { %6953 = vmatmul.mubr.msk.f32.vlgmr.msra.gmra.mrb[10].mxu0 %vm74_vm2, %v1107_v47 }
0x15cc   :  { %7724 = vmatpush3.bf16.msra.mxu0 %v9183_v21  ;;  %6982 = vmatprep.mubr.msk.f32.mxu0 %vm8891_vm0, %v8892_v4 }
0x15cd   :  { %7725 = vmatprep.subr.bf16.mxu0 %v8890_v0 }
0x15d0   :  { %7727 = vmatpush3.bf16.msra.mxu0 %v9195_v26 }
0x15d1   :  { %7728 = vmatprep.subr.bf16.mxu0 %v8890_v0 }
0x15d4   :  { %7730 = vmatpush3.bf16.msra.mxu0 %v9207_v29 }
0x15d5   :  { %7740 = vmatprep.subr.bf16.mxu0 %v8890_v0 }
0x169e   :  { %v1177_v48 = vpop.f32.mrb[10].mxu0 }
0x169f   :  { %v1178_v57 = vadd.f32 %v1177_v48, %v9233_v39  ;;  %v6954_v49 = vpop.f32.mrb[11].mxu0 }
0x16a1   :  { %1188 = vrot.lane.b32.xlu0 %v1178_v57, %s8893_s18  ;;  %v6308_v52 = vmul.f32 -1.442695, %v1178_v57 }
0x16a3   :  { %8621 = vpow2.f32 %v6308_v52 }
0x16ad   :  { %v8622_v53 = vpop.eup %8621 }
0x16ae   :  { %v1184_v54 = vadd.f32 1.0, %v8622_v53 }
0x16b0   :  { %8623 = vrcp.f32 %v1184_v54 }
0x16ba   :  { %v8624_v55 = vpop.eup %8623 }
0x16bb   :  { %v1198_v5 = vsub.f32 1.0, %v8624_v55  ;;  %v1204_v1 = vmul.f32 %v8624_v55, %v9279_v13 }
0x1713   :  { %v1189_v58 = vpop.permute.xlu0 %1188 }
0x1714   :  { %v1191_v59 = vmul.f32 %v8624_v55, %v1189_v58 }
0x1716   :  { %1193 = vrot.lane.b32.xlu1 %v1191_v59, %s8894_s19 }
0x1788   :  { %v1194_v60 = vpop.permute.xlu1 %1193 }
0x1789   :  { %v1196_v61 = vadd.f32 %v1194_v60, %v1178_v57 }
0x178b   :  { %8625 = vtanh.f32 %v1196_v61 }
0x1795   :  { %v8626_v62 = vpop.eup %8625 }
0x1796   :  { %1200 = vrot.lane.b32.xlu0 %v8626_v62, %s8895_s20 }
0x1808   :  { %v1201_v63 = vpop.permute.xlu0 %1200 }
0x1809   :  { %v1203_v2 = vmul.f32 %v1201_v63, %v1198_v5 }
0x180b   :  { %v9299_v3 = vadd.f32 %v1204_v1, %v1203_v2 }
0x180d   :  { %1207 = vrot.lane.b32.xlu1 %v9299_v3, %s8896_s21 }
0x187f   :  { %v1208_v6 = vpop.permute.xlu1 %1207 }
0x1880   :  { %v1210_v10 = vsel %vm65_vm1, %v9125_v35, %v1208_v6 }
0x1881   :  { %6968 = vmatmul.mubr.msk.f32.vlgmr.msra.gmra.mrb[10].mxu1 %vm74_vm2, %v1210_v10 }
0x1882   :  { %7733 = vmatpush3.bf16.msra.mxu1 %v9183_v21  ;;  %6997 = vmatprep.mubr.msk.f32.mxu1 %vm8891_vm0, %v8892_v4 }
0x1883   :  { %7734 = vmatprep.subr.bf16.mxu1 %v8890_v0 }
0x1886   :  { %7736 = vmatpush3.bf16.msra.mxu1 %v9195_v26 }
0x1887   :  { %7737 = vmatprep.subr.bf16.mxu1 %v8890_v0 }
0x188a   :  { %7739 = vmatpush3.bf16.msra.mxu1 %v9207_v29 }
0x188b   :  { %7749 = vmatprep.subr.bf16.mxu1 %v8890_v0 }
0x1954   :  { %v1280_v8 = vpop.f32.mrb[10].mxu1 }
0x1955   :  { %v1281_v35 = vadd.f32 %v1280_v8, %v9233_v39  ;;  %v6969_v9 = vpop.f32.mrb[11].mxu1 }
0x1957   :  { %1291 = vrot.lane.b32.xlu0 %v1281_v35, %s8893_s18  ;;  %v6310_v15 = vmul.f32 -1.442695, %v1281_v35 }
0x1959   :  { %8627 = vpow2.f32 %v6310_v15 }
0x1963   :  { %v8628_v16 = vpop.eup %8627 }
0x1964   :  { %v1287_v18 = vadd.f32 1.0, %v8628_v16 }
0x1966   :  { %8629 = vrcp.f32 %v1287_v18 }
0x1970   :  { %v8630_v19 = vpop.eup %8629 }
0x1971   :  { %v1301_v28 = vsub.f32 1.0, %v8630_v19  ;;  %v1307_v33 = vmul.f32 %v8630_v19, %v9299_v3 }
0x19c9   :  { %v1292_v20 = vpop.permute.xlu0 %1291 }
0x19ca   :  { %v1294_v23 = vmul.f32 %v8630_v19, %v1292_v20 }
0x19cc   :  { %1296 = vrot.lane.b32.xlu1 %v1294_v23, %s8894_s19 }
0x1a3e   :  { %v1297_v24 = vpop.permute.xlu1 %1296 }
0x1a3f   :  { %v1299_v25 = vadd.f32 %v1297_v24, %v1281_v35 }
0x1a41   :  { %8631 = vtanh.f32 %v1299_v25 }
0x1a4b   :  { %v8632_v27 = vpop.eup %8631 }
0x1a4c   :  { %1303 = vrot.lane.b32.xlu0 %v8632_v27, %s8895_s20 }
0x1abe   :  { %v1304_v32 = vpop.permute.xlu0 %1303 }
0x1abf   :  { %v1306_v36 = vmul.f32 %v1304_v32, %v1301_v28 }
0x1ac1   :  { %v9319_v37 = vadd.f32 %v1307_v33, %v1306_v36 }
0x1ac3   :  { %1310 = vrot.lane.b32.xlu1 %v9319_v37, %s8896_s21 }
0x1b35   :  { %v1311_v38 = vpop.permute.xlu1 %1310 }
0x1b36   :  { %v1313_v40 = vsel %vm65_vm1, %v9100_v12, %v1311_v38 }
0x1b37   :  { %6983 = vmatmul.mubr.msk.f32.vlgmr.msra.gmra.mrb[12].mxu0 %vm74_vm2, %v1313_v40 }
0x1b38   :  { %7742 = vmatpush3.bf16.msra.mxu0 %v9183_v21  ;;  %7012 = vmatprep.mubr.msk.f32.mxu0 %vm8891_vm0, %v8892_v4 }
0x1b39   :  { %7743 = vmatprep.subr.bf16.mxu0 %v8890_v0 }
0x1b3c   :  { %7745 = vmatpush3.bf16.msra.mxu0 %v9195_v26 }
0x1b3d   :  { %7746 = vmatprep.subr.bf16.mxu0 %v8890_v0 }
0x1b40   :  { %7748 = vmatpush3.bf16.msra.mxu0 %v9207_v29 }
0x1b41   :  { %7758 = vmatprep.subr.bf16.mxu0 %v8890_v0 }
0x1c0a   :  { %v1383_v41 = vpop.f32.mrb[12].mxu0 }
0x1c0b   :  { %v1384_v12 = vadd.f32 %v1383_v41, %v9233_v39  ;;  %v6984_v42 = vpop.f32.mrb[13].mxu0 }
0x1c0d   :  { %1394 = vrot.lane.b32.xlu0 %v1384_v12, %s8893_s18  ;;  %v6312_v43 = vmul.f32 -1.442695, %v1384_v12 }
0x1c0f   :  { %8633 = vpow2.f32 %v6312_v43 }
0x1c19   :  { %v8634_v44 = vpop.eup %8633 }
0x1c1a   :  { %v1390_v45 = vadd.f32 1.0, %v8634_v44 }
0x1c1c   :  { %8635 = vrcp.f32 %v1390_v45 }
0x1c26   :  { %v8636_v46 = vpop.eup %8635 }
0x1c27   :  { %v1404_v53 = vsub.f32 1.0, %v8636_v46  ;;  %v1410_v55 = vmul.f32 %v8636_v46, %v9319_v37 }
0x1c7f   :  { %v1395_v47 = vpop.permute.xlu0 %1394 }
0x1c80   :  { %v1397_v48 = vmul.f32 %v8636_v46, %v1395_v47  ;;  %v8887_v47 = vld [vmem:[%s11348_s0] sm:$0xff] }
0x1c82   :  { %1399 = vrot.lane.b32.xlu1 %v1397_v48, %s8894_s19 }
0x1cf4   :  { %v1400_v57 = vpop.permute.xlu1 %1399 }
0x1cf5   :  { %v1402_v49 = vadd.f32 %v1400_v57, %v1384_v12 }
0x1cf7   :  { %8637 = vtanh.f32 %v1402_v49 }
0x1d01   :  { %v8638_v52 = vpop.eup %8637 }
0x1d02   :  { %1406 = vrot.lane.b32.xlu0 %v8638_v52, %s8895_s20 }
0x1d74   :  { %v1407_v54 = vpop.permute.xlu0 %1406 }
0x1d75   :  { %v1409_v58 = vmul.f32 %v1407_v54, %v1404_v53 }
0x1d77   :  { %v9339_v59 = vadd.f32 %v1410_v55, %v1409_v58 }
0x1d79   :  { %1413 = vrot.lane.b32.xlu1 %v9339_v59, %s8896_s21 }
0x1deb   :  { %v1414_v60 = vpop.permute.xlu1 %1413 }
0x1dec   :  { %v1416_v61 = vsel %vm65_vm1, %v9075_v51, %v1414_v60 }
0x1ded   :  { %6998 = vmatmul.mubr.msk.f32.vlgmr.msra.gmra.mrb[12].mxu1 %vm74_vm2, %v1416_v61 }
0x1dee   :  { %7751 = vmatpush3.bf16.msra.mxu1 %v9183_v21  ;;  %7027 = vmatprep.mubr.msk.f32.mxu1 %vm8891_vm0, %v8892_v4 }
0x1def   :  { %7752 = vmatprep.subr.bf16.mxu1 %v8890_v0 }
0x1df2   :  { %7754 = vmatpush3.bf16.msra.mxu1 %v9195_v26 }
0x1df3   :  { %7755 = vmatprep.subr.bf16.mxu1 %v8890_v0 }
0x1df6   :  { %7757 = vmatpush3.bf16.msra.mxu1 %v9207_v29 }
0x1df7   :  { %7776 = vmatprep.subr.bf16.mxu1 %v8890_v0 }
0x1ec0   :  { %v1486_v62 = vpop.f32.mrb[12].mxu1 }
0x1ec1   :  { %v1487_v51 = vadd.f32 %v1486_v62, %v9233_v39  ;;  %v6999_v5 = vpop.f32.mrb[13].mxu1  ;;  %v1757_v62 = vld [vmem:[%s11352_s5] sm:$0xff] }
0x1ec3   :  { %1497 = vrot.lane.b32.xlu0 %v1487_v51, %s8893_s18  ;;  %v6314_v21 = vmul.f32 -1.442695, %v1487_v51 }
0x1ec5   :  { %8639 = vpow2.f32 %v6314_v21  ;;  %v1760_v21 = vld [vmem:[%s11352_s5 + $0x18] sm:$0xff] }
0x1ecf   :  { %v8640_v63 = vpop.eup %8639 }
0x1ed0   :  { %v1493_v1 = vadd.f32 1.0, %v8640_v63 }
0x1ed2   :  { %8641 = vrcp.f32 %v1493_v1  ;;  %v1761_v1 = vld [vmem:[%s11352_s5 + $0x20] sm:$0xff] }
0x1edc   :  { %v8642_v2 = vpop.eup %8641 }
0x1edd   :  { %v1507_v35 = vsub.f32 1.0, %v8642_v2  ;;  %v1513_v15 = vmul.f32 %v8642_v2, %v9339_v59 }
0x1f35   :  { %v1498_v6 = vpop.permute.xlu0 %1497 }
0x1f36   :  { %v1500_v26 = vmul.f32 %v8642_v2, %v1498_v6  ;;  %v1762_v2 = vld [vmem:[%s11352_s5 + $0x28] sm:$0xff]  ;;  %v1763_v6 = vld [vmem:[%s11352_s5 + $0x30] sm:$0xff] }
0x1f38   :  { %1502 = vrot.lane.b32.xlu1 %v1500_v26, %s8894_s19  ;;  %v1764_v26 = vld [vmem:[%s11352_s5 + $0x38] sm:$0xff] }
0x1faa   :  { %v1503_v10 = vpop.permute.xlu1 %1502 }
0x1fab   :  { %v1505_v29 = vadd.f32 %v1503_v10, %v1487_v51  ;;  %v1759_v51 = vld [vmem:[%s11352_s5 + $0x10] sm:$0xff]  ;;  %v9428_v10 = vpack.c.bf16 %v1764_v26, %v1763_v6 }
0x1fac   :  { %v9404_v63 = vpack.c.bf16 %v1760_v21, %v1759_v51 }
0x1fad   :  { %8643 = vtanh.f32 %v1505_v29  ;;  %v1765_v29 = vld [vmem:[%s11352_s5 + $0x40] sm:$0xff] }
0x1fb7   :  { %v8644_v8 = vpop.eup %8643 }
0x1fb8   :  { %1509 = vrot.lane.b32.xlu0 %v8644_v8, %s8895_s20  ;;  %v1766_v8 = vld [vmem:[%s11352_s5 + $0x48] sm:$0xff] }
0x202a   :  { %v1510_v9 = vpop.permute.xlu0 %1509 }
0x202b   :  { %v1512_v16 = vmul.f32 %v1510_v9, %v1507_v35  ;;  %v9440_v35 = vpack.c.bf16 %v1766_v8, %v1765_v29 }
0x202d   :  { %v9359_v18 = vadd.f32 %v1513_v15, %v1512_v16  ;;  %v1767_v16 = vld [vmem:[%s11352_s5 + $0x50] sm:$0xff] }
0x202f   :  { %1516 = vrot.lane.b32.xlu1 %v9359_v18, %s8896_s21 }
0x20a1   :  { %v1517_v19 = vpop.permute.xlu1 %1516 }
0x20a2   :  { %v1519_v20 = vsel %vm65_vm1, %v9050_v31, %v1517_v19  ;;  %v1768_v19 = vld [vmem:[%s11352_s5 + $0x58] sm:$0xff] }
0x20a3   :  { %7013 = vmatmul.mubr.msk.f32.vlgmr.msra.gmra.mrb[14].mxu0 %vm74_vm2, %v1519_v20  ;;  %v9455_v20 = vpack.c.bf16 %v1768_v19, %v1767_v16 }
0x20a4   :  { %7054 = vmatprep.mubr.msk.f32.mxu0 %vm8891_vm0, %v8892_v4 }
0x2176   :  { %v1589_v23 = vpop.f32.mrb[14].mxu0 }
0x2177   :  { %v1590_v24 = vadd.f32 %v1589_v23, %v9233_v39  ;;  %v7014_v25 = vpop.f32.mrb[15].mxu0 }
0x2179   :  { %1600 = vrot.lane.b32.xlu0 %v1590_v24, %s8893_s18  ;;  %v6316_v27 = vmul.f32 -1.442695, %v1590_v24 }
0x217b   :  { %8645 = vpow2.f32 %v6316_v27 }
0x2185   :  { %v8646_v28 = vpop.eup %8645 }
0x2186   :  { %v1596_v32 = vadd.f32 1.0, %v8646_v28 }
0x2188   :  { %8647 = vrcp.f32 %v1596_v32 }
0x2192   :  { %v8648_v33 = vpop.eup %8647 }
0x2193   :  { %v1610_v12 = vsub.f32 1.0, %v8648_v33  ;;  %v1616_v43 = vmul.f32 %v8648_v33, %v9359_v18 }
0x21eb   :  { %v1601_v36 = vpop.permute.xlu0 %1600 }
0x21ec   :  { %v1603_v38 = vmul.f32 %v8648_v33, %v1601_v36 }
0x21ee   :  { %1605 = vrot.lane.b32.xlu1 %v1603_v38, %s8894_s19 }
0x2260   :  { %v1606_v31 = vpop.permute.xlu1 %1605 }
0x2261   :  { %v1608_v40 = vadd.f32 %v1606_v31, %v1590_v24  ;;  %v9489_v31 = vld [vmem:[%s11353_s6] sm:$0xff] }
0x2263   :  { %8649 = vtanh.f32 %v1608_v40 }
0x226d   :  { %v8650_v41 = vpop.eup %8649 }
0x226e   :  { %1612 = vrot.lane.b32.xlu0 %v8650_v41, %s8895_s20 }
0x22e0   :  { %v1613_v42 = vpop.permute.xlu0 %1612 }
0x22e1   :  { %v1615_v44 = vmul.f32 %v1613_v42, %v1610_v12 }
0x22e3   :  { %v9373_v45 = vadd.f32 %v1616_v43, %v1615_v44 }
0x22e5   :  { %1619 = vrot.lane.b32.xlu1 %v9373_v45, %s8896_s21 }
0x2357   :  { %v1620_v46 = vpop.permute.xlu1 %1619 }
0x2358   :  { %v1622_v48 = vsel %vm65_vm1, %v8887_v47, %v1620_v46 }
0x2359   :  { %7028 = vmatmul.mubr.msk.f32.vlgmr.msra.gmra.mrb[14].mxu1 %vm74_vm2, %v1622_v48 }
0x235a   :  { %7081 = vmatprep.mubr.msk.f32.mxu1 %vm8891_vm0, %v8892_v4 }
0x242c   :  { %v1692_v57 = vpop.f32.mrb[14].mxu1 }
0x242d   :  { %v1693_v49 = vadd.f32 %v1692_v57, %v9233_v39  ;;  %v7029_v52 = vpop.f32.mrb[15].mxu1  ;;  %v1758_v39 = vld [vmem:[%s11352_s5 + $0x8] sm:$0xff] }
0x242e   :  { %v9396_v5 = vpack.c.bf16 %v1758_v39, %v1757_v62 }
0x242f   :  { %1703 = vrot.lane.b32.xlu0 %v1693_v49, %s8893_s18  ;;  %v6318_v53 = vmul.f32 -1.442695, %v1693_v49 }
0x2430   :  { %7760 = vmatpush3.bf16.msra.mxu0 %v9396_v5  ;;  %7778 = vmatpush3.bf16.msra.mxu1 %v9396_v5 }
0x2431   :  { %8651 = vpow2.f32 %v6318_v53  ;;  %7761 = vmatprep.subr.bf16.mxu0 %v8890_v0  ;;  %7779 = vmatprep.subr.bf16.mxu1 %v8890_v0 }
0x2434   :  { %7763 = vmatpush3.bf16.msra.mxu0 %v9404_v63  ;;  %7781 = vmatpush3.bf16.msra.mxu1 %v9404_v63 }
0x2435   :  { %7764 = vmatprep.subr.bf16.mxu0 %v8890_v0  ;;  %7782 = vmatprep.subr.bf16.mxu1 %v8890_v0 }
0x243b   :  { %v8652_v54 = vpop.eup %8651 }
0x243c   :  { %v1699_v55 = vadd.f32 1.0, %v8652_v54 }
0x243e   :  { %8653 = vrcp.f32 %v1699_v55 }
0x2448   :  { %v8654_v58 = vpop.eup %8653 }
0x2449   :  { %v1713_v24 = vsub.f32 1.0, %v8654_v58  ;;  %v1719_v27 = vmul.f32 %v8654_v58, %v9373_v45 }
0x24a1   :  { %v1704_v60 = vpop.permute.xlu0 %1703 }
0x24a2   :  { %v1706_v61 = vmul.f32 %v8654_v58, %v1704_v60 }
0x24a4   :  { %1708 = vrot.lane.b32.xlu1 %v1706_v61, %s8894_s19 }
0x24a8   :  { %1721 = vrot.lane.b32.xlu1 %v9043_v30, %s8895_s20  ;;  %v9416_v30 = vpack.c.bf16 %v1762_v2, %v1761_v1 }
0x24aa   :  { %7766 = vmatpush3.bf16.msra.mxu0 %v9416_v30  ;;  %7784 = vmatpush3.bf16.msra.mxu1 %v9416_v30 }
0x24ab   :  { %7767 = vmatprep.subr.bf16.mxu0 %v8890_v0  ;;  %7785 = vmatprep.subr.bf16.mxu1 %v8890_v0 }
0x24ae   :  { %7769 = vmatpush3.bf16.msra.mxu0 %v9428_v10  ;;  %7787 = vmatpush3.bf16.msra.mxu1 %v9428_v10 }
0x24af   :  { %7770 = vmatprep.subr.bf16.mxu0 %v8890_v0  ;;  %7788 = vmatprep.subr.bf16.mxu1 %v8890_v0 }
0x24b2   :  { %7772 = vmatpush3.bf16.msra.mxu0 %v9440_v35  ;;  %7790 = vmatpush3.bf16.msra.mxu1 %v9440_v35 }
0x24b3   :  { %7773 = vmatprep.subr.bf16.mxu0 %v8890_v0  ;;  %7791 = vmatprep.subr.bf16.mxu1 %v8890_v0 }
0x24b6   :  { %7775 = vmatpush3.bf16.msra.mxu0 %v9455_v20  ;;  %7793 = vmatpush3.bf16.msra.mxu1 %v9455_v20 }
0x24b7   :  { %7794 = vmatprep.subr.bf16.mxu0 %v8890_v0  ;;  %7812 = vmatprep.subr.bf16.mxu1 %v8890_v0 }
0x2516   :  { %v1709_v9 = vpop.permute.xlu1 %1708 }
0x2517   :  { %v1711_v15 = vadd.f32 %v1709_v9, %v1693_v49 }
0x2519   :  { %8655 = vtanh.f32 %v1711_v15 }
0x251a   :  { %v1722_v33 = vpop.permute.xlu1 %1721 }
0x2523   :  { %v8656_v23 = vpop.eup %8655 }
0x2524   :  { %1715 = vrot.lane.b32.xlu0 %v8656_v23, %s8895_s20 }
0x2596   :  { %v1716_v25 = vpop.permute.xlu0 %1715 }
0x2597   :  { %v1718_v28 = vmul.f32 %v1716_v25, %v1713_v24 }
0x2599   :  { %v9463_v32 = vadd.f32 %v1719_v27, %v1718_v28 }
0x259b   :  { %v9467_v36 = vsel %vm1724_vm3, %v1722_v33, %v9463_v32 }
0x259c   :  { %v1756_v38 = vsel %vm1755_vm4, %v9467_v36, 0.0 }
0x259d   :  { %7055 = vmatmul.mubr.msk.f32.vlgmr.msra.gmra.mrb[16].mxu0 %vm1770_vm5, %v1756_v38 }
0x259e   :  { %7796 = vmatpush3.bf16.msra.mxu0 %v9396_v5  ;;  %7108 = vmatprep.mubr.msk.f32.mxu0 %vm8891_vm0, %v8892_v4 }
0x259f   :  { %7797 = vmatprep.subr.bf16.mxu0 %v8890_v0 }
0x25a2   :  { %7799 = vmatpush3.bf16.msra.mxu0 %v9404_v63 }
0x25a3   :  { %7800 = vmatprep.subr.bf16.mxu0 %v8890_v0 }
0x25a6   :  { %7802 = vmatpush3.bf16.msra.mxu0 %v9416_v30 }
0x25a7   :  { %7803 = vmatprep.subr.bf16.mxu0 %v8890_v0 }
0x25aa   :  { %7805 = vmatpush3.bf16.msra.mxu0 %v9428_v10 }
0x25ab   :  { %7806 = vmatprep.subr.bf16.mxu0 %v8890_v0 }
0x25ae   :  { %7808 = vmatpush3.bf16.msra.mxu0 %v9440_v35 }
0x25af   :  { %7809 = vmatprep.subr.bf16.mxu0 %v8890_v0 }
0x25b2   :  { %7811 = vmatpush3.bf16.msra.mxu0 %v9455_v20 }
0x25b3   :  { %7830 = vmatprep.subr.bf16.mxu0 %v8890_v0 }
0x2670   :  { %v1840_v40 = vpop.f32.mrb[16].mxu0 }
0x2671   :  { %v1841_v41 = vadd.f32 %v1840_v40, %v9489_v31  ;;  %v7056_v12 = vpop.f32.mrb[17].mxu0 }
0x2673   :  { %1851 = vrot.lane.b32.xlu0 %v1841_v41, %s8893_s18  ;;  %v6320_v42 = vmul.f32 -1.442695, %v1841_v41 }
0x2675   :  { %8657 = vpow2.f32 %v6320_v42 }
0x267f   :  { %v8658_v43 = vpop.eup %8657 }
0x2680   :  { %v1847_v44 = vadd.f32 1.0, %v8658_v43 }
0x2682   :  { %8659 = vrcp.f32 %v1847_v44 }
0x268c   :  { %v8660_v46 = vpop.eup %8659 }
0x268d   :  { %v1861_v53 = vsub.f32 1.0, %v8660_v46  ;;  %v1867_v55 = vmul.f32 0.0, %v8660_v46 }
0x26e5   :  { %v1852_v47 = vpop.permute.xlu0 %1851 }
0x26e6   :  { %v1854_v48 = vmul.f32 %v8660_v46, %v1852_v47 }
0x26e8   :  { %1856 = vrot.lane.b32.xlu1 %v1854_v48, %s8894_s19 }
0x26ec   :  { %1726 = vrot.lane.b32.xlu1 %v9068_v50, %s8895_s20 }
0x275a   :  { %v1857_v57 = vpop.permute.xlu1 %1856 }
0x275b   :  { %v1859_v49 = vadd.f32 %v1857_v57, %v1841_v41 }
0x275d   :  { %8661 = vtanh.f32 %v1859_v49 }
0x275e   :  { %v1727_v61 = vpop.permute.xlu1 %1726 }
0x275f   :  { %v9500_v62 = vsel %vm1724_vm3, %v1727_v61, %v9373_v45 }
0x2767   :  { %v8662_v52 = vpop.eup %8661 }
0x2768   :  { %1863 = vrot.lane.b32.xlu0 %v8662_v52, %s8895_s20 }
0x27da   :  { %v1864_v54 = vpop.permute.xlu0 %1863 }
0x27db   :  { %v1866_v58 = vmul.f32 %v1864_v54, %v1861_v53 }
0x27dd   :  { %v1868_v60 = vadd.f32 %v1867_v55, %v1866_v58 }
0x27df   :  { %1870 = vrot.lane.b32.xlu0 %v1868_v60, %s8893_s18 }
0x2851   :  { %v1871_v39 = vpop.permute.xlu0 %1870 }
0x2852   :  { %v1873_v50 = vsel %vm1755_vm4, %v9500_v62, %v1871_v39 }
0x2853   :  { %7082 = vmatmul.mubr.msk.f32.vlgmr.msra.gmra.mrb[16].mxu1 %vm1770_vm5, %v1873_v50 }
0x2854   :  { %7814 = vmatpush3.bf16.msra.mxu1 %v9396_v5  ;;  %7135 = vmatprep.mubr.msk.f32.mxu1 %vm8891_vm0, %v8892_v4 }
0x2855   :  { %7815 = vmatprep.subr.bf16.mxu1 %v8890_v0 }
0x2858   :  { %7817 = vmatpush3.bf16.msra.mxu1 %v9404_v63 }
0x2859   :  { %7818 = vmatprep.subr.bf16.mxu1 %v8890_v0 }
0x285c   :  { %7820 = vmatpush3.bf16.msra.mxu1 %v9416_v30 }
0x285d   :  { %7821 = vmatprep.subr.bf16.mxu1 %v8890_v0 }
0x2860   :  { %7823 = vmatpush3.bf16.msra.mxu1 %v9428_v10 }
0x2861   :  { %7824 = vmatprep.subr.bf16.mxu1 %v8890_v0 }
0x2864   :  { %7826 = vmatpush3.bf16.msra.mxu1 %v9440_v35 }
0x2865   :  { %7827 = vmatprep.subr.bf16.mxu1 %v8890_v0 }
0x2868   :  { %7829 = vmatpush3.bf16.msra.mxu1 %v9455_v20 }
0x2869   :  { %7848 = vmatprep.subr.bf16.mxu1 %v8890_v0 }
0x2926   :  { %v1943_v45 = vpop.f32.mrb[16].mxu1 }
0x2927   :  { %v1944_v51 = vadd.f32 %v1943_v45, %v9489_v31  ;;  %v7083_v21 = vpop.f32.mrb[17].mxu1 }
0x2929   :  { %1954 = vrot.lane.b32.xlu1 %v1944_v51, %s8893_s18  ;;  %v6322_v1 = vmul.f32 -1.442695, %v1944_v51 }
0x292b   :  { %8663 = vpow2.f32 %v6322_v1 }
0x2935   :  { %v8664_v2 = vpop.eup %8663 }
0x2936   :  { %v1950_v6 = vadd.f32 1.0, %v8664_v2 }
0x2938   :  { %8665 = vrcp.f32 %v1950_v6 }
0x2942   :  { %v8666_v26 = vpop.eup %8665 }
0x2943   :  { %v1964_v19 = vsub.f32 1.0, %v8666_v26  ;;  %v1970_v24 = vmul.f32 %v8666_v26, %v1868_v60 }
0x299b   :  { %v1955_v29 = vpop.permute.xlu1 %1954 }
0x299c   :  { %v1957_v8 = vmul.f32 %v8666_v26, %v1955_v29 }
0x299e   :  { %1959 = vrot.lane.b32.xlu0 %v1957_v8, %s8894_s19 }
0x29a2   :  { %1730 = vrot.lane.b32.xlu0 %v9093_v11, %s8895_s20 }
0x2a10   :  { %v1960_v9 = vpop.permute.xlu0 %1959 }
0x2a11   :  { %v1962_v15 = vadd.f32 %v1960_v9, %v1944_v51 }
0x2a13   :  { %8667 = vtanh.f32 %v1962_v15 }
0x2a14   :  { %v1731_v28 = vpop.permute.xlu0 %1730 }
0x2a15   :  { %v9528_v33 = vsel %vm1724_vm3, %v1731_v28, %v9359_v18 }
0x2a1d   :  { %v8668_v16 = vpop.eup %8667 }
0x2a1e   :  { %1966 = vrot.lane.b32.xlu1 %v8668_v16, %s8895_s20 }
0x2a90   :  { %v1967_v23 = vpop.permute.xlu1 %1966 }
0x2a91   :  { %v1969_v25 = vmul.f32 %v1967_v23, %v1964_v19 }
0x2a93   :  { %v1971_v27 = vadd.f32 %v1970_v24, %v1969_v25 }
0x2a95   :  { %1973 = vrot.lane.b32.xlu1 %v1971_v27, %s8893_s18 }
0x2b07   :  { %v1974_v38 = vpop.permute.xlu1 %1973 }
0x2b08   :  { %v1976_v11 = vsel %vm1755_vm4, %v9528_v33, %v1974_v38 }
0x2b09   :  { %7109 = vmatmul.mubr.msk.f32.vlgmr.msra.gmra.mrb[18].mxu0 %vm1770_vm5, %v1976_v11 }
0x2b0a   :  { %7832 = vmatpush3.bf16.msra.mxu0 %v9396_v5  ;;  %7162 = vmatprep.mubr.msk.f32.mxu0 %vm8891_vm0, %v8892_v4 }
0x2b0b   :  { %7833 = vmatprep.subr.bf16.mxu0 %v8890_v0 }
0x2b0e   :  { %7835 = vmatpush3.bf16.msra.mxu0 %v9404_v63 }
0x2b0f   :  { %7836 = vmatprep.subr.bf16.mxu0 %v8890_v0 }
0x2b12   :  { %7838 = vmatpush3.bf16.msra.mxu0 %v9416_v30 }
0x2b13   :  { %7839 = vmatprep.subr.bf16.mxu0 %v8890_v0 }
0x2b16   :  { %7841 = vmatpush3.bf16.msra.mxu0 %v9428_v10 }
0x2b17   :  { %7842 = vmatprep.subr.bf16.mxu0 %v8890_v0 }
0x2b1a   :  { %7844 = vmatpush3.bf16.msra.mxu0 %v9440_v35 }
0x2b1b   :  { %7845 = vmatprep.subr.bf16.mxu0 %v8890_v0 }
0x2b1e   :  { %7847 = vmatpush3.bf16.msra.mxu0 %v9455_v20 }
0x2b1f   :  { %7866 = vmatprep.subr.bf16.mxu0 %v8890_v0 }
0x2bdc   :  { %v2046_v18 = vpop.f32.mrb[18].mxu0 }
0x2bdd   :  { %v2047_v40 = vadd.f32 %v2046_v18, %v9489_v31  ;;  %v7110_v41 = vpop.f32.mrb[19].mxu0 }
0x2bdf   :  { %2057 = vrot.lane.b32.xlu0 %v2047_v40, %s8893_s18  ;;  %v6324_v12 = vmul.f32 -1.442695, %v2047_v40 }
0x2be1   :  { %8669 = vpow2.f32 %v6324_v12 }
0x2beb   :  { %v8670_v42 = vpop.eup %8669 }
0x2bec   :  { %v2053_v43 = vadd.f32 1.0, %v8670_v42 }
0x2bee   :  { %8671 = vrcp.f32 %v2053_v43 }
0x2bf8   :  { %v8672_v44 = vpop.eup %8671 }
0x2bf9   :  { %v2067_v52 = vsub.f32 1.0, %v8672_v44  ;;  %v2073_v54 = vmul.f32 %v8672_v44, %v1971_v27 }
0x2c51   :  { %v2058_v46 = vpop.permute.xlu0 %2057 }
0x2c52   :  { %v2060_v47 = vmul.f32 %v8672_v44, %v2058_v46 }
0x2c54   :  { %2062 = vrot.lane.b32.xlu1 %v2060_v47, %s8894_s19 }
0x2c58   :  { %1734 = vrot.lane.b32.xlu1 %v9118_v34, %s8895_s20 }
0x2cc6   :  { %v2063_v48 = vpop.permute.xlu1 %2062 }
0x2cc7   :  { %v2065_v57 = vadd.f32 %v2063_v48, %v2047_v40 }
0x2cc9   :  { %8673 = vtanh.f32 %v2065_v57 }
0x2cca   :  { %v1735_v60 = vpop.permute.xlu1 %1734 }
0x2ccb   :  { %v9556_v61 = vsel %vm1724_vm3, %v1735_v60, %v9339_v59 }
0x2cd3   :  { %v8674_v49 = vpop.eup %8673 }
0x2cd4   :  { %2069 = vrot.lane.b32.xlu0 %v8674_v49, %s8895_s20 }
0x2d46   :  { %v2070_v53 = vpop.permute.xlu0 %2069 }
0x2d47   :  { %v2072_v55 = vmul.f32 %v2070_v53, %v2067_v52 }
0x2d49   :  { %v2074_v58 = vadd.f32 %v2073_v54, %v2072_v55  ;;  %v8888_v54 = vld [vmem:[%s11349_s2] sm:$0xff] }
0x2d4b   :  { %2076 = vrot.lane.b32.xlu0 %v2074_v58, %s8893_s18 }
0x2dbd   :  { %v2077_v39 = vpop.permute.xlu0 %2076 }
0x2dbe   :  { %v2079_v34 = vsel %vm1755_vm4, %v9556_v61, %v2077_v39 }
0x2dbf   :  { %7136 = vmatmul.mubr.msk.f32.vlgmr.msra.gmra.mrb[18].mxu1 %vm1770_vm5, %v2079_v34 }
0x2dc0   :  { %7850 = vmatpush3.bf16.msra.mxu1 %v9396_v5  ;;  %7189 = vmatprep.mubr.msk.f32.mxu1 %vm8891_vm0, %v8892_v4 }
0x2dc1   :  { %7851 = vmatprep.subr.bf16.mxu1 %v8890_v0 }
0x2dc4   :  { %7853 = vmatpush3.bf16.msra.mxu1 %v9404_v63 }
0x2dc5   :  { %7854 = vmatprep.subr.bf16.mxu1 %v8890_v0 }
0x2dc8   :  { %7856 = vmatpush3.bf16.msra.mxu1 %v9416_v30 }
0x2dc9   :  { %7857 = vmatprep.subr.bf16.mxu1 %v8890_v0 }
0x2dcc   :  { %7859 = vmatpush3.bf16.msra.mxu1 %v9428_v10 }
0x2dcd   :  { %7860 = vmatprep.subr.bf16.mxu1 %v8890_v0 }
0x2dd0   :  { %7862 = vmatpush3.bf16.msra.mxu1 %v9440_v35 }
0x2dd1   :  { %7863 = vmatprep.subr.bf16.mxu1 %v8890_v0 }
0x2dd4   :  { %7865 = vmatpush3.bf16.msra.mxu1 %v9455_v20 }
0x2dd5   :  { %7884 = vmatprep.subr.bf16.mxu1 %v8890_v0 }
0x2e92   :  { %v2149_v59 = vpop.f32.mrb[18].mxu1 }
0x2e93   :  { %v2150_v50 = vadd.f32 %v2149_v59, %v9489_v31  ;;  %v7137_v45 = vpop.f32.mrb[19].mxu1 }
0x2e95   :  { %2160 = vrot.lane.b32.xlu1 %v2150_v50, %s8893_s18  ;;  %v6326_v51 = vmul.f32 -1.442695, %v2150_v50 }
0x2e97   :  { %8675 = vpow2.f32 %v6326_v51 }
0x2ea1   :  { %v8676_v21 = vpop.eup %8675 }
0x2ea2   :  { %v2156_v1 = vadd.f32 1.0, %v8676_v21 }
0x2ea4   :  { %8677 = vrcp.f32 %v2156_v1 }
0x2eae   :  { %v8678_v2 = vpop.eup %8677 }
0x2eaf   :  { %v2170_v15 = vsub.f32 1.0, %v8678_v2  ;;  %v2176_v19 = vmul.f32 %v8678_v2, %v2074_v58 }
0x2f07   :  { %v2161_v6 = vpop.permute.xlu1 %2160 }
0x2f08   :  { %v2163_v26 = vmul.f32 %v8678_v2, %v2161_v6 }
0x2f0a   :  { %2165 = vrot.lane.b32.xlu0 %v2163_v26, %s8894_s19 }
0x2f0e   :  { %1738 = vrot.lane.b32.xlu0 %v9143_v56, %s8895_s20 }
0x2f7c   :  { %v2166_v29 = vpop.permute.xlu0 %2165 }
0x2f7d   :  { %v2168_v8 = vadd.f32 %v2166_v29, %v2150_v50 }
0x2f7f   :  { %8679 = vtanh.f32 %v2168_v8 }
0x2f80   :  { %v1739_v25 = vpop.permute.xlu0 %1738 }
0x2f81   :  { %v9584_v27 = vsel %vm1724_vm3, %v1739_v25, %v9319_v37 }
0x2f89   :  { %v8680_v9 = vpop.eup %8679 }
0x2f8a   :  { %2172 = vrot.lane.b32.xlu1 %v8680_v9, %s8895_s20 }
0x2ffc   :  { %v2173_v16 = vpop.permute.xlu1 %2172 }
0x2ffd   :  { %v2175_v23 = vmul.f32 %v2173_v16, %v2170_v15 }
0x2fff   :  { %v2177_v24 = vadd.f32 %v2176_v19, %v2175_v23 }
0x3001   :  { %2179 = vrot.lane.b32.xlu1 %v2177_v24, %s8893_s18 }
0x3073   :  { %v2180_v28 = vpop.permute.xlu1 %2179 }
0x3074   :  { %v2182_v56 = vsel %vm1755_vm4, %v9584_v27, %v2180_v28 }
0x3075   :  { %7163 = vmatmul.mubr.msk.f32.vlgmr.msra.gmra.mrb[20].mxu0 %vm1770_vm5, %v2182_v56 }
0x3076   :  { %7868 = vmatpush3.bf16.msra.mxu0 %v9396_v5  ;;  %7216 = vmatprep.mubr.msk.f32.mxu0 %vm8891_vm0, %v8892_v4 }
0x3077   :  { %7869 = vmatprep.subr.bf16.mxu0 %v8890_v0 }
0x307a   :  { %7871 = vmatpush3.bf16.msra.mxu0 %v9404_v63 }
0x307b   :  { %7872 = vmatprep.subr.bf16.mxu0 %v8890_v0 }
0x307e   :  { %7874 = vmatpush3.bf16.msra.mxu0 %v9416_v30 }
0x307f   :  { %7875 = vmatprep.subr.bf16.mxu0 %v8890_v0 }
0x3082   :  { %7877 = vmatpush3.bf16.msra.mxu0 %v9428_v10 }
0x3083   :  { %7878 = vmatprep.subr.bf16.mxu0 %v8890_v0 }
0x3086   :  { %7880 = vmatpush3.bf16.msra.mxu0 %v9440_v35 }
0x3087   :  { %7881 = vmatprep.subr.bf16.mxu0 %v8890_v0 }
0x308a   :  { %7883 = vmatpush3.bf16.msra.mxu0 %v9455_v20 }
0x308b   :  { %7902 = vmatprep.subr.bf16.mxu0 %v8890_v0 }
0x3148   :  { %v2252_v37 = vpop.f32.mrb[20].mxu0 }
0x3149   :  { %v2253_v38 = vadd.f32 %v2252_v37, %v9489_v31  ;;  %v7164_v11 = vpop.f32.mrb[21].mxu0 }
0x314a   :  { %v2591_v11 = vld [vmem:[%s11354_s7] sm:$0xff] }
0x314b   :  { %2263 = vrot.lane.b32.xlu0 %v2253_v38, %s8893_s18  ;;  %v6328_v18 = vmul.f32 -1.442695, %v2253_v38 }
0x314d   :  { %8681 = vpow2.f32 %v6328_v18 }
0x3157   :  { %v8682_v40 = vpop.eup %8681 }
0x3158   :  { %v2259_v41 = vadd.f32 1.0, %v8682_v40 }
0x315a   :  { %8683 = vrcp.f32 %v2259_v41 }
0x3164   :  { %v8684_v12 = vpop.eup %8683 }
0x3165   :  { %v2273_v48 = vsub.f32 1.0, %v8684_v12  ;;  %v2279_v49 = vmul.f32 %v8684_v12, %v2177_v24 }
0x31bd   :  { %v2264_v42 = vpop.permute.xlu0 %2263 }
0x31be   :  { %v2266_v43 = vmul.f32 %v8684_v12, %v2264_v42  ;;  %v2593_v42 = vld [vmem:[%s11354_s7 + $0x10] sm:$0xff] }
0x31c0   :  { %2268 = vrot.lane.b32.xlu1 %v2266_v43, %s8894_s19  ;;  %v2594_v43 = vld [vmem:[%s11354_s7 + $0x18] sm:$0xff] }
0x31c4   :  { %1742 = vrot.lane.b32.xlu1 %v9168_v17, %s8895_s20  ;;  %v866_v17 = vadd.f32 %v8888_v54, %v9272_v22  ;;  %v2600_v54 = vld [vmem:[%s11354_s7 + $0x48] sm:$0xff] }
0x31c6   :  { %v6302_v55 = vmul.f32 -1.442695, %v866_v17 }
0x3232   :  { %v2269_v44 = vpop.permute.xlu1 %2268 }
0x3233   :  { %v2271_v46 = vadd.f32 %v2269_v44, %v2253_v38 }
0x3235   :  { %8685 = vtanh.f32 %v2271_v46  ;;  %v9676_v46 = vpack.c.bf16 %v2594_v43, %v2593_v42 }
0x3236   :  { %8687 = vpow2.f32 %v6302_v55  ;;  %v1743_v39 = vpop.permute.xlu1 %1742  ;;  %v2601_v55 = vld [vmem:[%s11354_s7 + $0x50] sm:$0xff] }
0x3237   :  { %v9620_v34 = vsel %vm1724_vm3, %v1743_v39, %v9299_v3 }
0x323f   :  { %v8686_v47 = vpop.eup %8685 }
0x3240   :  { %2275 = vrot.lane.b32.xlu0 %v8686_v47, %s8895_s20  ;;  %v8688_v58 = vpop.eup %8687  ;;  %v2596_v47 = vld [vmem:[%s11354_s7 + $0x28] sm:$0xff] }
0x3241   :  { %v872_v60 = vadd.f32 1.0, %v8688_v58  ;;  %v2602_v58 = vld [vmem:[%s11354_s7 + $0x58] sm:$0xff] }
0x3242   :  { %v9720_v39 = vpack.c.bf16 %v2602_v58, %v2601_v55 }
0x3243   :  { %8689 = vrcp.f32 %v872_v60 }
0x324d   :  { %v8690_v22 = vpop.eup %8689 }
0x324e   :  { %v886_v16 = vsub.f32 1.0, %v8690_v22  ;;  %v892_v23 = vmul.f32 %v8690_v22, %v9242_v7 }
0x32b2   :  { %v2276_v57 = vpop.permute.xlu0 %2275 }
0x32b3   :  { %v2278_v52 = vmul.f32 %v2276_v57, %v2273_v48  ;;  %v2597_v57 = vld [vmem:[%s11354_s7 + $0x30] sm:$0xff] }
0x32b5   :  { %v9609_v53 = vadd.f32 %v2279_v49, %v2278_v52  ;;  %v2598_v49 = vld [vmem:[%s11354_s7 + $0x38] sm:$0xff] }
0x32b6   :  { %v9698_v52 = vpack.c.bf16 %v2598_v49, %v2597_v57 }
0x32b7   :  { %2282 = vrot.lane.b32.xlu0 %v9609_v53, %s8893_s18 }
0x32bb   :  { %876 = vrot.lane.b32.xlu0 %v866_v17, %s8893_s18 }
0x3329   :  { %v2283_v59 = vpop.permute.xlu0 %2282 }
0x332a   :  { %v2285_v50 = vsel %vm1755_vm4, %v9620_v34, %v2283_v59 }
0x332b   :  { %7190 = vmatmul.mubr.msk.f32.vlgmr.msra.gmra.mrb[20].mxu1 %vm1770_vm5, %v2285_v50 }
0x332c   :  { %7886 = vmatpush3.bf16.msra.mxu1 %v9396_v5  ;;  %7243 = vmatprep.mubr.msk.f32.mxu1 %vm8891_vm0, %v8892_v4 }
0x332d   :  { %v877_v45 = vpop.permute.xlu0 %876  ;;  %7887 = vmatprep.subr.bf16.mxu1 %v8890_v0 }
0x332e   :  { %v879_v51 = vmul.f32 %v8690_v22, %v877_v45 }
0x3330   :  { %881 = vrot.lane.b32.xlu0 %v879_v51, %s8894_s19  ;;  %7889 = vmatpush3.bf16.msra.mxu1 %v9404_v63  ;;  %v9752_v51 = vld [vmem:[%s11355_s8] sm:$0xff]  ;;  %s8897_s8 = smov 16  }
0x3331   :  { %7890 = vmatprep.subr.bf16.mxu1 %v8890_v0 }
0x3334   :  { %7892 = vmatpush3.bf16.msra.mxu1 %v9416_v30 }
0x3335   :  { %7893 = vmatprep.subr.bf16.mxu1 %v8890_v0 }
0x3338   :  { %7895 = vmatpush3.bf16.msra.mxu1 %v9428_v10 }
0x3339   :  { %7896 = vmatprep.subr.bf16.mxu1 %v8890_v0 }
0x333c   :  { %7898 = vmatpush3.bf16.msra.mxu1 %v9440_v35 }
0x333d   :  { %7899 = vmatprep.subr.bf16.mxu1 %v8890_v0 }
0x3340   :  { %7901 = vmatpush3.bf16.msra.mxu1 %v9455_v20 }
0x3341   :  { %7920 = vmatprep.subr.bf16.mxu1 %v8890_v0 }
0x33a2   :  { %v882_v3 = vpop.permute.xlu0 %881 }
0x33a3   :  { %v884_v5 = vadd.f32 %v882_v3, %v866_v17 }
0x33a5   :  { %8691 = vtanh.f32 %v884_v5 }
0x33af   :  { %v8692_v63 = vpop.eup %8691 }
0x33b0   :  { %888 = vrot.lane.b32.xlu0 %v8692_v63, %s8895_s20 }
0x33fe   :  { %v2355_v30 = vpop.f32.mrb[20].mxu1 }
0x33ff   :  { %v2356_v21 = vadd.f32 %v2355_v30, %v9489_v31  ;;  %v7191_v10 = vpop.f32.mrb[21].mxu1 }
0x3401   :  { %2366 = vrot.lane.b32.xlu1 %v2356_v21, %s8893_s18  ;;  %v6330_v1 = vmul.f32 -1.442695, %v2356_v21 }
0x3403   :  { %8693 = vpow2.f32 %v6330_v1 }
0x340d   :  { %v8694_v35 = vpop.eup %8693 }
0x340e   :  { %v2362_v2 = vadd.f32 1.0, %v8694_v35 }
0x3410   :  { %8695 = vrcp.f32 %v2362_v2 }
0x341a   :  { %v8696_v20 = vpop.eup %8695 }
0x341b   :  { %v2376_v25 = vsub.f32 1.0, %v8696_v20  ;;  %v2382_v56 = vmul.f32 %v8696_v20, %v9609_v53  ;;  %v2599_v53 = vld [vmem:[%s11354_s7 + $0x40] sm:$0xff] }
0x341c   :  { %v9708_v17 = vpack.c.bf16 %v2600_v54, %v2599_v53 }
0x3422   :  { %v889_v15 = vpop.permute.xlu0 %888 }
0x3423   :  { %v891_v19 = vmul.f32 %v889_v15, %v886_v16 }
0x3425   :  { %v893_v24 = vadd.f32 %v892_v23, %v891_v19 }
0x3473   :  { %v2367_v6 = vpop.permute.xlu1 %2366 }
0x3474   :  { %v2369_v26 = vmul.f32 %v8696_v20, %v2367_v6 }
0x3476   :  { %2371 = vrot.lane.b32.xlu1 %v2369_v26, %s8894_s19 }
0x34e8   :  { %v2372_v29 = vpop.permute.xlu1 %2371 }
0x34e9   :  { %v2374_v8 = vadd.f32 %v2372_v29, %v2356_v21 }
0x34eb   :  { %8697 = vtanh.f32 %v2374_v8 }
0x34f5   :  { %v8698_v9 = vpop.eup %8697 }
0x34f6   :  { %2378 = vrot.lane.b32.xlu1 %v8698_v9, %s8895_s20 }
0x34fa   :  { %1746 = vrot.lane.b32.xlu1 %v9242_v7, %s8895_s20  ;;  %v2592_v7 = vld [vmem:[%s11354_s7 + $0x8] sm:$0xff] }
0x34fb   :  { %v9660_v40 = vpack.c.bf16 %v2592_v7, %v2591_v11 }
0x34fe   :  { %1751 = vrot.lane.b32.xlu1 %v893_v24, %s8895_s20 }
0x3568   :  { %v2379_v28 = vpop.permute.xlu1 %2378 }
0x3569   :  { %v2381_v37 = vmul.f32 %v2379_v28, %v2376_v25 }
0x356b   :  { %v9650_v38 = vadd.f32 %v2382_v56, %v2381_v37 }
0x356c   :  { %v1747_v18 = vpop.permute.xlu1 %1746 }
0x356d   :  { %2385 = vrot.lane.b32.xlu0 %v9650_v38, %s8893_s18  ;;  %v9664_v41 = vsel %vm1724_vm3, %v1747_v18, %v9279_v13  ;;  %v2595_v13 = vld [vmem:[%s11354_s7 + $0x20] sm:$0xff] }
0x356e   :  { %v9688_v48 = vpack.c.bf16 %v2596_v47, %v2595_v13 }
0x3570   :  { %v9717_v60 = vpop.permute.xlu1 %1751 }
0x3571   :  { %v9726_v59 = vsel %vm1724_vm3, %v9717_v60, %v9246_v14 }
0x3572   :  { %v2590_v50 = vsel %vm1755_vm4, %v9726_v59, 0.0 }
0x35df   :  { %v2386_v12 = vpop.permute.xlu0 %2385 }
0x35e0   :  { %v2388_v44 = vsel %vm1755_vm4, %v9664_v41, %v2386_v12 }
0x35e1   :  { %7217 = vmatmul.mubr.msk.f32.vlgmr.msra.gmra.mrb[22].mxu0 %vm1770_vm5, %v2388_v44 }
0x35e2   :  { %7904 = vmatpush3.bf16.msra.mxu0 %v9660_v40  ;;  %7270 = vmatprep.mubr.msk.f32.mxu0 %vm8891_vm0, %v8892_v4 }
0x35e3   :  { %7905 = vmatprep.subr.bf16.mxu0 %v8890_v0 }
0x35e6   :  { %7907 = vmatpush3.bf16.msra.mxu0 %v9676_v46 }
0x35e7   :  { %7908 = vmatprep.subr.bf16.mxu0 %v8890_v0 }
0x35ea   :  { %7910 = vmatpush3.bf16.msra.mxu0 %v9688_v48 }
0x35eb   :  { %7911 = vmatprep.subr.bf16.mxu0 %v8890_v0 }
0x35ee   :  { %7913 = vmatpush3.bf16.msra.mxu0 %v9698_v52 }
0x35ef   :  { %7914 = vmatprep.subr.bf16.mxu0 %v8890_v0 }
0x35f2   :  { %7916 = vmatpush3.bf16.msra.mxu0 %v9708_v17 }
0x35f3   :  { %7917 = vmatprep.subr.bf16.mxu0 %v8890_v0 }
0x35f6   :  { %7919 = vmatpush3.bf16.msra.mxu0 %v9720_v39 }
0x35f7   :  { %7938 = vmatprep.subr.bf16.mxu0 %v8890_v0 }
0x35f9   :  { %7271 = vmatmul.mubr.msk.f32.vlgmr.msra.gmra.mrb[24].mxu0 %vm1770_vm5, %v2590_v50 }
0x35fa   :  { %7940 = vmatpush3.bf16.msra.mxu0 %v9660_v40  ;;  %7324 = vmatprep.mubr.msk.f32.mxu0 %vm8891_vm0, %v8892_v4 }
0x35fb   :  { %7941 = vmatprep.subr.bf16.mxu0 %v8890_v0 }
0x35fe   :  { %7943 = vmatpush3.bf16.msra.mxu0 %v9676_v46 }
0x35ff   :  { %7944 = vmatprep.subr.bf16.mxu0 %v8890_v0 }
0x3602   :  { %7946 = vmatpush3.bf16.msra.mxu0 %v9688_v48 }
0x3603   :  { %7947 = vmatprep.subr.bf16.mxu0 %v8890_v0 }
0x3606   :  { %7949 = vmatpush3.bf16.msra.mxu0 %v9698_v52 }
0x3607   :  { %7950 = vmatprep.subr.bf16.mxu0 %v8890_v0 }
0x360a   :  { %7952 = vmatpush3.bf16.msra.mxu0 %v9708_v17 }
0x360b   :  { %7953 = vmatprep.subr.bf16.mxu0 %v8890_v0 }
0x360e   :  { %7955 = vmatpush3.bf16.msra.mxu0 %v9720_v39 }
0x360f   :  { %7974 = vmatprep.subr.bf16.mxu0 %v8890_v0 }
0x36b4   :  { %v2458_v14 = vpop.f32.mrb[22].mxu0 }
0x36b5   :  { %v2459_v22 = vadd.f32 %v2458_v14, %v9489_v31  ;;  %v7218_v45 = vpop.f32.mrb[23].mxu0 }
0x36b7   :  { %2469 = vrot.lane.b32.xlu0 %v2459_v22, %s8893_s18  ;;  %v6332_v30 = vmul.f32 -1.442695, %v2459_v22 }
0x36b9   :  { %8699 = vpow2.f32 %v6332_v30 }
0x36c3   :  { %v8700_v21 = vpop.eup %8699 }
0x36c4   :  { %v2465_v10 = vadd.f32 1.0, %v8700_v21 }
0x36c6   :  { %8701 = vrcp.f32 %v2465_v10 }
0x36cc   :  { %v2673_v3 = vpop.f32.mrb[24].mxu0 }
0x36cd   :  { %v2674_v5 = vadd.f32 %v2673_v3, %v9752_v51  ;;  %v7272_v63 = vpop.f32.mrb[25].mxu0 }
0x36cf   :  { %2684 = vrot.lane.b32.xlu1 %v2674_v5, %s8893_s18  ;;  %v6336_v31 = vmul.f32 -1.442695, %v2674_v5 }
0x36d0   :  { %v8702_v1 = vpop.eup %8701 }
0x36d1   :  { %8703 = vpow2.f32 %v6336_v31  ;;  %v2479_v25 = vsub.f32 1.0, %v8702_v1  ;;  %v2485_v56 = vmul.f32 %v8702_v1, %v9650_v38 }
0x36db   :  { %v8704_v20 = vpop.eup %8703 }
0x36dc   :  { %v2680_v6 = vadd.f32 1.0, %v8704_v20 }
0x36de   :  { %8705 = vrcp.f32 %v2680_v6 }
0x36e8   :  { %v8706_v26 = vpop.eup %8705 }
0x36e9   :  { %v2694_v7 = vsub.f32 1.0, %v8706_v26  ;;  %v2700_v12 = vmul.f32 0.0, %v8706_v26 }
0x3729   :  { %v2470_v35 = vpop.permute.xlu0 %2469 }
0x372a   :  { %v2472_v2 = vmul.f32 %v8702_v1, %v2470_v35 }
0x372c   :  { %2474 = vrot.lane.b32.xlu0 %v2472_v2, %s8894_s19 }
0x3741   :  { %v2685_v29 = vpop.permute.xlu1 %2684 }
0x3742   :  { %v2687_v8 = vmul.f32 %v8706_v26, %v2685_v29 }
0x3744   :  { %2689 = vrot.lane.b32.xlu1 %v2687_v8, %s8894_s19 }
0x379e   :  { %v2475_v9 = vpop.permute.xlu0 %2474 }
0x379f   :  { %v2477_v15 = vadd.f32 %v2475_v9, %v2459_v22 }
0x37a1   :  { %8707 = vtanh.f32 %v2477_v15 }
0x37ab   :  { %v8708_v16 = vpop.eup %8707 }
0x37ac   :  { %2481 = vrot.lane.b32.xlu0 %v8708_v16, %s8895_s20 }
0x37b6   :  { %v2690_v19 = vpop.permute.xlu1 %2689 }
0x37b7   :  { %v2692_v23 = vadd.f32 %v2690_v19, %v2674_v5 }
0x37b9   :  { %8709 = vtanh.f32 %v2692_v23 }
0x37c3   :  { %v8710_v24 = vpop.eup %8709 }
0x37c4   :  { %2696 = vrot.lane.b32.xlu1 %v8710_v24, %s8895_s20 }
0x381e   :  { %v2482_v28 = vpop.permute.xlu0 %2481 }
0x381f   :  { %v2484_v37 = vmul.f32 %v2482_v28, %v2479_v25 }
0x3821   :  { %v9761_v11 = vadd.f32 %v2485_v56, %v2484_v37 }
0x3823   :  { %2488 = vrot.lane.b32.xlu0 %v9761_v11, %s8893_s18 }
0x3836   :  { %v2697_v18 = vpop.permute.xlu1 %2696 }
0x3837   :  { %v2699_v42 = vmul.f32 %v2697_v18, %v2694_v7 }
0x3839   :  { %v2701_v43 = vadd.f32 %v2700_v12, %v2699_v42 }
0x383b   :  { %2703 = vrot.lane.b32.xlu1 %v2701_v43, %s8893_s18 }
0x3895   :  { %v2489_v44 = vpop.permute.xlu0 %2488 }
0x3896   :  { %v2491_v13 = vsel %vm1755_vm4, %v9726_v59, %v2489_v44 }
0x3897   :  { %7244 = vmatmul.mubr.msk.f32.vlgmr.msra.gmra.mrb[22].mxu1 %vm1770_vm5, %v2491_v13 }
0x3898   :  { %7922 = vmatpush3.bf16.msra.mxu1 %v9660_v40  ;;  %7297 = vmatprep.mubr.msk.f32.mxu1 %vm8891_vm0, %v8892_v4 }
0x3899   :  { %7923 = vmatprep.subr.bf16.mxu1 %v8890_v0 }
0x389c   :  { %7925 = vmatpush3.bf16.msra.mxu1 %v9676_v46 }
0x389d   :  { %7926 = vmatprep.subr.bf16.mxu1 %v8890_v0 }
0x38a0   :  { %7928 = vmatpush3.bf16.msra.mxu1 %v9688_v48 }
0x38a1   :  { %7929 = vmatprep.subr.bf16.mxu1 %v8890_v0 }
0x38a4   :  { %7931 = vmatpush3.bf16.msra.mxu1 %v9698_v52 }
0x38a5   :  { %7932 = vmatprep.subr.bf16.mxu1 %v8890_v0 }
0x38a8   :  { %7934 = vmatpush3.bf16.msra.mxu1 %v9708_v17 }
0x38a9   :  { %7935 = vmatprep.subr.bf16.mxu1 %v8890_v0 }
0x38ac   :  { %7937 = vmatpush3.bf16.msra.mxu1 %v9720_v39 }
0x38ad   :  { %v2704_v38 = vpop.permute.xlu1 %2703  ;;  %7956 = vmatprep.subr.bf16.mxu1 %v8890_v0 }
0x38ae   :  { %v2706_v47 = vsel %vm1755_vm4, %v9664_v41, %v2704_v38 }
0x38af   :  { %7298 = vmatmul.mubr.msk.f32.vlgmr.msra.gmra.mrb[24].mxu1 %vm1770_vm5, %v2706_v47 }
0x38b0   :  { %7958 = vmatpush3.bf16.msra.mxu1 %v9660_v40  ;;  %7351 = vmatprep.mubr.msk.f32.mxu1 %vm8891_vm0, %v8892_v4 }
0x38b1   :  { %7959 = vmatprep.subr.bf16.mxu1 %v8890_v0 }
0x38b4   :  { %7961 = vmatpush3.bf16.msra.mxu1 %v9676_v46 }
0x38b5   :  { %7962 = vmatprep.subr.bf16.mxu1 %v8890_v0 }
0x38b8   :  { %7964 = vmatpush3.bf16.msra.mxu1 %v9688_v48 }
0x38b9   :  { %7965 = vmatprep.subr.bf16.mxu1 %v8890_v0 }
0x38bc   :  { %7967 = vmatpush3.bf16.msra.mxu1 %v9698_v52 }
0x38bd   :  { %7968 = vmatprep.subr.bf16.mxu1 %v8890_v0 }
0x38c0   :  { %7970 = vmatpush3.bf16.msra.mxu1 %v9708_v17 }
0x38c1   :  { %7971 = vmatprep.subr.bf16.mxu1 %v8890_v0 }
0x38c4   :  { %7973 = vmatpush3.bf16.msra.mxu1 %v9720_v39 }
0x38c5   :  { %7992 = vmatprep.subr.bf16.mxu1 %v8890_v0 }
0x396a   :  { %v9800_v41 = vpop.f32.mrb[22].mxu1 }
0x396b   :  { %v7245_v57 = vpop.f32.mrb[23].mxu1 }
0x3982   :  { %v2776_v49 = vpop.f32.mrb[24].mxu1 }
0x3983   :  { %v2777_v53 = vadd.f32 %v2776_v49, %v9752_v51  ;;  %v7299_v54 = vpop.f32.mrb[25].mxu1 }
0x3985   :  { %2787 = vrot.lane.b32.xlu0 %v2777_v53, %s8893_s18  ;;  %v6338_v55 = vmul.f32 -1.442695, %v2777_v53 }
0x3987   :  { %8711 = vpow2.f32 %v6338_v55 }
0x3991   :  { %v8712_v58 = vpop.eup %8711 }
0x3992   :  { %v2783_v59 = vadd.f32 1.0, %v8712_v58 }
0x3994   :  { %8713 = vrcp.f32 %v2783_v59 }
0x399e   :  { %v8714_v50 = vpop.eup %8713 }
0x399f   :  { %v2797_v63 = vsub.f32 1.0, %v8714_v50  ;;  %v2803_v21 = vmul.f32 %v8714_v50, %v2701_v43 }
0x39f7   :  { %v2788_v14 = vpop.permute.xlu0 %2787 }
0x39f8   :  { %v2790_v22 = vmul.f32 %v8714_v50, %v2788_v14 }
0x39fa   :  { %2792 = vrot.lane.b32.xlu1 %v2790_v22, %s8894_s19 }
0x3a6c   :  { %v2793_v45 = vpop.permute.xlu1 %2792 }
0x3a6d   :  { %v2795_v3 = vadd.f32 %v2793_v45, %v2777_v53 }
0x3a6f   :  { %8715 = vtanh.f32 %v2795_v3 }
0x3a79   :  { %v8716_v5 = vpop.eup %8715 }
0x3a7a   :  { %2799 = vrot.lane.b32.xlu0 %v8716_v5, %s8895_s20 }
0x3aec   :  { %v2800_v30 = vpop.permute.xlu0 %2799 }
0x3aed   :  { %v2802_v10 = vmul.f32 %v2800_v30, %v2797_v63 }
0x3aef   :  { %v2804_v31 = vadd.f32 %v2803_v21, %v2802_v10 }
0x3af1   :  { %2806 = vrot.lane.b32.xlu1 %v2804_v31, %s8893_s18 }
0x3b63   :  { %v2807_v1 = vpop.permute.xlu1 %2806 }
0x3b64   :  { %v2809_v35 = vsel %vm1755_vm4, %v9620_v34, %v2807_v1 }
0x3b65   :  { %7325 = vmatmul.mubr.msk.f32.vlgmr.msra.gmra.mrb[26].mxu0 %vm1770_vm5, %v2809_v35 }
0x3b66   :  { %7976 = vmatpush3.bf16.msra.mxu0 %v9660_v40  ;;  %7378 = vmatprep.mubr.msk.f32.mxu0 %vm8891_vm0, %v8892_v4 }
0x3b67   :  { %7977 = vmatprep.subr.bf16.mxu0 %v8890_v0 }
0x3b6a   :  { %7979 = vmatpush3.bf16.msra.mxu0 %v9676_v46 }
0x3b6b   :  { %7980 = vmatprep.subr.bf16.mxu0 %v8890_v0 }
0x3b6e   :  { %7982 = vmatpush3.bf16.msra.mxu0 %v9688_v48 }
0x3b6f   :  { %7983 = vmatprep.subr.bf16.mxu0 %v8890_v0 }
0x3b72   :  { %7985 = vmatpush3.bf16.msra.mxu0 %v9698_v52 }
0x3b73   :  { %7986 = vmatprep.subr.bf16.mxu0 %v8890_v0 }
0x3b76   :  { %7988 = vmatpush3.bf16.msra.mxu0 %v9708_v17 }
0x3b77   :  { %7989 = vmatprep.subr.bf16.mxu0 %v8890_v0 }
0x3b7a   :  { %7991 = vmatpush3.bf16.msra.mxu0 %v9720_v39 }
0x3b7b   :  { %8010 = vmatprep.subr.bf16.mxu0 %v8890_v0 }
0x3c38   :  { %v2879_v34 = vpop.f32.mrb[26].mxu0 }
0x3c39   :  { %v2880_v2 = vadd.f32 %v2879_v34, %v9752_v51  ;;  %v7326_v20 = vpop.f32.mrb[27].mxu0 }
0x3c3b   :  { %2890 = vrot.lane.b32.xlu0 %v2880_v2, %s8893_s18  ;;  %v6340_v6 = vmul.f32 -1.442695, %v2880_v2 }
0x3c3d   :  { %8717 = vpow2.f32 %v6340_v6 }
0x3c47   :  { %v8718_v26 = vpop.eup %8717 }
0x3c48   :  { %v2886_v29 = vadd.f32 1.0, %v8718_v26 }
0x3c4a   :  { %8719 = vrcp.f32 %v2886_v29 }
0x3c54   :  { %v8720_v8 = vpop.eup %8719 }
0x3c55   :  { %v2900_v24 = vsub.f32 1.0, %v8720_v8  ;;  %v2906_v28 = vmul.f32 %v8720_v8, %v2804_v31 }
0x3cad   :  { %v2891_v9 = vpop.permute.xlu0 %2890 }
0x3cae   :  { %v2893_v15 = vmul.f32 %v8720_v8, %v2891_v9 }
0x3cb0   :  { %2895 = vrot.lane.b32.xlu1 %v2893_v15, %s8894_s19 }
0x3d22   :  { %v2896_v16 = vpop.permute.xlu1 %2895 }
0x3d23   :  { %v2898_v19 = vadd.f32 %v2896_v16, %v2880_v2 }
0x3d25   :  { %8721 = vtanh.f32 %v2898_v19 }
0x3d2f   :  { %v8722_v23 = vpop.eup %8721 }
0x3d30   :  { %2902 = vrot.lane.b32.xlu0 %v8722_v23, %s8895_s20 }
0x3da2   :  { %v2903_v25 = vpop.permute.xlu0 %2902 }
0x3da3   :  { %v2905_v56 = vmul.f32 %v2903_v25, %v2900_v24 }
0x3da5   :  { %v2907_v37 = vadd.f32 %v2906_v28, %v2905_v56 }
0x3da7   :  { %2909 = vrot.lane.b32.xlu1 %v2907_v37, %s8893_s18 }
0x3e19   :  { %v2910_v7 = vpop.permute.xlu1 %2909 }
0x3e1a   :  { %v2912_v18 = vsel %vm1755_vm4, %v9584_v27, %v2910_v7 }
0x3e1b   :  { %7352 = vmatmul.mubr.msk.f32.vlgmr.msra.gmra.mrb[26].mxu1 %vm1770_vm5, %v2912_v18 }
0x3e1c   :  { %7994 = vmatpush3.bf16.msra.mxu1 %v9660_v40  ;;  %7405 = vmatprep.mubr.msk.f32.mxu1 %vm8891_vm0, %v8892_v4 }
0x3e1d   :  { %7995 = vmatprep.subr.bf16.mxu1 %v8890_v0 }
0x3e20   :  { %7997 = vmatpush3.bf16.msra.mxu1 %v9676_v46 }
0x3e21   :  { %7998 = vmatprep.subr.bf16.mxu1 %v8890_v0 }
0x3e24   :  { %8000 = vmatpush3.bf16.msra.mxu1 %v9688_v48 }
0x3e25   :  { %8001 = vmatprep.subr.bf16.mxu1 %v8890_v0 }
0x3e28   :  { %8003 = vmatpush3.bf16.msra.mxu1 %v9698_v52 }
0x3e29   :  { %8004 = vmatprep.subr.bf16.mxu1 %v8890_v0 }
0x3e2c   :  { %8006 = vmatpush3.bf16.msra.mxu1 %v9708_v17 }
0x3e2d   :  { %8007 = vmatprep.subr.bf16.mxu1 %v8890_v0 }
0x3e30   :  { %8009 = vmatpush3.bf16.msra.mxu1 %v9720_v39 }
0x3e31   :  { %8028 = vmatprep.subr.bf16.mxu1 %v8890_v0 }
0x3eee   :  { %v2982_v27 = vpop.f32.mrb[26].mxu1 }
0x3eef   :  { %v2983_v12 = vadd.f32 %v2982_v27, %v9752_v51  ;;  %v7353_v42 = vpop.f32.mrb[27].mxu1 }
0x3ef1   :  { %2993 = vrot.lane.b32.xlu0 %v2983_v12, %s8893_s18  ;;  %v6342_v43 = vmul.f32 -1.442695, %v2983_v12 }
0x3ef3   :  { %8723 = vpow2.f32 %v6342_v43 }
0x3efd   :  { %v8724_v44 = vpop.eup %8723 }
0x3efe   :  { %v2989_v13 = vadd.f32 1.0, %v8724_v44 }
0x3f00   :  { %8725 = vrcp.f32 %v2989_v13 }
0x3f0a   :  { %v8726_v38 = vpop.eup %8725 }
0x3f0b   :  { %v3003_v55 = vsub.f32 1.0, %v8726_v38  ;;  %v3009_v59 = vmul.f32 %v8726_v38, %v2907_v37 }
0x3f63   :  { %v2994_v47 = vpop.permute.xlu0 %2993 }
0x3f64   :  { %v2996_v57 = vmul.f32 %v8726_v38, %v2994_v47 }
0x3f66   :  { %2998 = vrot.lane.b32.xlu1 %v2996_v57, %s8894_s19 }
0x3fd8   :  { %v2999_v49 = vpop.permute.xlu1 %2998 }
0x3fd9   :  { %v3001_v53 = vadd.f32 %v2999_v49, %v2983_v12 }
0x3fdb   :  { %8727 = vtanh.f32 %v3001_v53 }
0x3fe5   :  { %v8728_v54 = vpop.eup %8727 }
0x3fe6   :  { %3005 = vrot.lane.b32.xlu0 %v8728_v54, %s8895_s20  ;;  %v3443_v54 = vld [vmem:[%s11356_s9 + $0x18] sm:$0xff] }
0x4058   :  { %v3006_v58 = vpop.permute.xlu0 %3005 }
0x4059   :  { %v3008_v50 = vmul.f32 %v3006_v58, %v3003_v55  ;;  %v3440_v55 = vld [vmem:[%s11356_s9] sm:$0xff] }
0x405b   :  { %v3010_v14 = vadd.f32 %v3009_v59, %v3008_v50  ;;  %v3442_v59 = vld [vmem:[%s11356_s9 + $0x10] sm:$0xff]  ;;  %v3445_v50 = vld [vmem:[%s11356_s9 + $0x28] sm:$0xff] }
0x405d   :  { %3012 = vrot.lane.b32.xlu1 %v3010_v14, %s8893_s18 }
0x40cf   :  { %v3013_v22 = vpop.permute.xlu1 %3012 }
0x40d0   :  { %v3015_v45 = vsel %vm1755_vm4, %v9556_v61, %v3013_v22  ;;  %v9923_v22 = vpack.c.bf16 %v3442_v59, %v3440_v55 }
0x40d1   :  { %7379 = vmatmul.mubr.msk.f32.vlgmr.msra.gmra.mrb[28].mxu0 %vm1770_vm5, %v3015_v45 }
0x40d2   :  { %8012 = vmatpush3.bf16.msra.mxu0 %v9660_v40  ;;  %7432 = vmatprep.mubr.msk.f32.mxu0 %vm8891_vm0, %v8892_v4 }
0x40d3   :  { %8013 = vmatprep.subr.bf16.mxu0 %v8890_v0 }
0x40d6   :  { %8015 = vmatpush3.bf16.msra.mxu0 %v9676_v46 }
0x40d7   :  { %8016 = vmatprep.subr.bf16.mxu0 %v8890_v0 }
0x40da   :  { %8018 = vmatpush3.bf16.msra.mxu0 %v9688_v48 }
0x40db   :  { %8019 = vmatprep.subr.bf16.mxu0 %v8890_v0 }
0x40de   :  { %8021 = vmatpush3.bf16.msra.mxu0 %v9698_v52 }
0x40df   :  { %8022 = vmatprep.subr.bf16.mxu0 %v8890_v0 }
0x40e2   :  { %8024 = vmatpush3.bf16.msra.mxu0 %v9708_v17 }
0x40e3   :  { %8025 = vmatprep.subr.bf16.mxu0 %v8890_v0 }
0x40e6   :  { %8027 = vmatpush3.bf16.msra.mxu0 %v9720_v39 }
0x41a4   :  { %v3085_v61 = vpop.f32.mrb[28].mxu0 }
0x41a5   :  { %v3086_v3 = vadd.f32 %v3085_v61, %v9752_v51  ;;  %v7380_v5 = vpop.f32.mrb[29].mxu0  ;;  %v3444_v61 = vld [vmem:[%s11356_s9 + $0x20] sm:$0xff] }
0x41a6   :  { %v3449_v5 = vld [vmem:[%s11356_s9 + $0x48] sm:$0xff] }
0x41a7   :  { %3096 = vrot.lane.b32.xlu0 %v3086_v3, %s8893_s18  ;;  %v6344_v63 = vmul.f32 -1.442695, %v3086_v3 }
0x41a9   :  { %8729 = vpow2.f32 %v6344_v63  ;;  %v3451_v63 = vld [vmem:[%s11356_s9 + $0x58] sm:$0xff] }
0x41b3   :  { %v8730_v30 = vpop.eup %8729 }
0x41b4   :  { %v3092_v21 = vadd.f32 1.0, %v8730_v30 }
0x41b6   :  { %8731 = vrcp.f32 %v3092_v21  ;;  %v9944_v21 = vpack.c.bf16 %v3451_v63, %v3449_v5 }
0x41c0   :  { %v8732_v10 = vpop.eup %8731 }
0x41c1   :  { %v3106_v20 = vsub.f32 1.0, %v8732_v10  ;;  %v3112_v26 = vmul.f32 %v8732_v10, %v3010_v14  ;;  %v3447_v14 = vld [vmem:[%s11356_s9 + $0x38] sm:$0xff] }
0x41c2   :  { %v9925_v45 = vpack.c.bf16 %v3447_v14, %v3445_v50  ;;  %v10037_v14 = vld [vmem:[%s11357_s10] sm:$0xff] }
0x4219   :  { %v3097_v31 = vpop.permute.xlu0 %3096 }
0x421a   :  { %v3099_v1 = vmul.f32 %v8732_v10, %v3097_v31  ;;  %v3448_v10 = vld [vmem:[%s11356_s9 + $0x40] sm:$0xff]  ;;  %v3450_v31 = vld [vmem:[%s11356_s9 + $0x50] sm:$0xff] }
0x421c   :  { %3101 = vrot.lane.b32.xlu1 %v3099_v1, %s8894_s19  ;;  %v3453_v1 = vld [vmem:[%s11356_s9 + $0x68] sm:$0xff] }
0x428e   :  { %v3102_v35 = vpop.permute.xlu1 %3101 }
0x428f   :  { %v3104_v34 = vadd.f32 %v3102_v35, %v3086_v3  ;;  %v3446_v3 = vld [vmem:[%s11356_s9 + $0x30] sm:$0xff]  ;;  %v3455_v35 = vld [vmem:[%s11356_s9 + $0x78] sm:$0xff] }
0x4290   :  { %v9941_v30 = vpack.c.bf16 %v3446_v3, %v3444_v61 }
0x4291   :  { %8733 = vtanh.f32 %v3104_v34  ;;  %v9959_v34 = vpack.c.bf16 %v3450_v31, %v3448_v10 }
0x429b   :  { %v8734_v2 = vpop.eup %8733 }
0x429c   :  { %3108 = vrot.lane.b32.xlu0 %v8734_v2, %s8895_s20  ;;  %v9962_v2 = vpack.c.bf16 %v3455_v35, %v3453_v1 }
0x430e   :  { %v3109_v6 = vpop.permute.xlu0 %3108 }
0x430f   :  { %v3111_v29 = vmul.f32 %v3109_v6, %v3106_v20  ;;  %v3452_v20 = vld [vmem:[%s11356_s9 + $0x60] sm:$0xff]  ;;  %v3454_v6 = vld [vmem:[%s11356_s9 + $0x70] sm:$0xff] }
0x4311   :  { %v3113_v8 = vadd.f32 %v3112_v26, %v3111_v29  ;;  %v9971_v26 = vpack.c.bf16 %v3454_v6, %v3452_v20  ;;  %v3457_v29 = vld [vmem:[%s11356_s9 + $0x88] sm:$0xff] }
0x4313   :  { %3115 = vrot.lane.b32.xlu1 %v3113_v8, %s8893_s18 }
0x4385   :  { %v3116_v9 = vpop.permute.xlu1 %3115 }
0x4386   :  { %v3118_v15 = vsel %vm1755_vm4, %v9528_v33, %v3116_v9 }
0x4387   :  { %7406 = vmatmul.mubr.msk.f32.vlgmr.msra.gmra.mrb[28].mxu1 %vm1770_vm5, %v3118_v15 }
0x4388   :  { %8030 = vmatpush3.bf16.msra.mxu1 %v9660_v40  ;;  %7459 = vmatprep.mubr.msk.f32.mxu1 %vm8891_vm0, %v8892_v4 }
0x4389   :  { %8031 = vmatprep.subr.bf16.mxu1 %v8890_v0 }
0x438c   :  { %8033 = vmatpush3.bf16.msra.mxu1 %v9676_v46 }
0x438d   :  { %8034 = vmatprep.subr.bf16.mxu1 %v8890_v0 }
0x4390   :  { %8036 = vmatpush3.bf16.msra.mxu1 %v9688_v48 }
0x4391   :  { %8037 = vmatprep.subr.bf16.mxu1 %v8890_v0 }
0x4394   :  { %8039 = vmatpush3.bf16.msra.mxu1 %v9698_v52 }
0x4395   :  { %8040 = vmatprep.subr.bf16.mxu1 %v8890_v0 }
0x4398   :  { %8042 = vmatpush3.bf16.msra.mxu1 %v9708_v17 }
0x4399   :  { %8043 = vmatprep.subr.bf16.mxu1 %v8890_v0 }
0x439c   :  { %8045 = vmatpush3.bf16.msra.mxu1 %v9720_v39 }
0x445a   :  { %v3188_v33 = vpop.f32.mrb[28].mxu1 }
0x445b   :  { %v3189_v40 = vadd.f32 %v3188_v33, %v9752_v51  ;;  %v7407_v46 = vpop.f32.mrb[29].mxu1  ;;  %v3456_v33 = vld [vmem:[%s11356_s9 + $0x80] sm:$0xff] }
0x445d   :  { %3199 = vrot.lane.b32.xlu0 %v3189_v40, %s8893_s18  ;;  %v6346_v16 = vmul.f32 -1.442695, %v3189_v40 }
0x445f   :  { %8735 = vpow2.f32 %v6346_v16 }
0x4469   :  { %v8736_v48 = vpop.eup %8735 }
0x446a   :  { %v3195_v19 = vadd.f32 1.0, %v8736_v48 }
0x446c   :  { %8737 = vrcp.f32 %v3195_v19  ;;  %v9998_v19 = vsel %vm1724_vm3, %v9717_v60, %v9463_v32 }
0x4476   :  { %v8738_v52 = vpop.eup %8737 }
0x4477   :  { %v3209_v28 = vsub.f32 1.0, %v8738_v52  ;;  %v3215_v37 = vmul.f32 %v8738_v52, %v3113_v8  ;;  %v3459_v8 = vld [vmem:[%s11356_s9 + $0x98] sm:$0xff] }
0x4478   :  { %v9981_v15 = vpack.c.bf16 %v3459_v8, %v3457_v29 }
0x44cf   :  { %v3200_v23 = vpop.permute.xlu0 %3199 }
0x44d0   :  { %v3202_v24 = vmul.f32 %v8738_v52, %v3200_v23  ;;  %v3429_v52 = vlaneseq }
0x44d2   :  { %3204 = vrot.lane.b32.xlu1 %v3202_v24, %s8894_s19  ;;  %v3430_v23 = vand.u32 127, %v3429_v52 }
0x44d4   :  { %v10001_v24 = vcvt.s32.f32 %v3430_v23 }
0x44d6   :  { %vm3432_vm6 = vcmp.eq.f32.partialorder %v10001_v24, 0.0 }
0x4544   :  { %v3205_v17 = vpop.permute.xlu1 %3204 }
0x4545   :  { %v3207_v25 = vadd.f32 %v3205_v17, %v3189_v40  ;;  %v3458_v40 = vld [vmem:[%s11356_s9 + $0x90] sm:$0xff] }
0x4546   :  { %v9989_v16 = vpack.c.bf16 %v3458_v40, %v3456_v33 }
0x4547   :  { %8739 = vtanh.f32 %v3207_v25 }
0x4551   :  { %v8740_v39 = vpop.eup %8739 }
0x4552   :  { %3211 = vrot.lane.b32.xlu0 %v8740_v39, %s8895_s20 }
0x45c4   :  { %v3212_v56 = vpop.permute.xlu0 %3211 }
0x45c5   :  { %v3214_v7 = vmul.f32 %v3212_v56, %v3209_v28  ;;  %v6351_v56 = vsel %vm3432_vm6, 1.0, %v8892_v4 }
0x45c7   :  { %v9892_v18 = vadd.f32 %v3215_v37, %v3214_v7  ;;  %v8889_v7 = vld [vmem:[%s11353_s6] sm:$0xff] }
0x45c9   :  { %3218 = vrot.lane.b32.xlu1 %v9892_v18, %s8893_s18 }
0x463b   :  { %v3219_v27 = vpop.permute.xlu1 %3218 }
0x463c   :  { %v3221_v12 = vsel %vm1755_vm4, %v9500_v62, %v3219_v27  ;;  %v3441_v62 = vld [vmem:[%s11356_s9 + $0x8] sm:$0xff] }
0x463d   :  { %7433 = vmatmul.mubr.msk.f32.vlgmr.msra.gmra.mrb[30].mxu0 %vm1770_vm5, %v3221_v12  ;;  %v9912_v58 = vpack.c.bf16 %v3443_v54, %v3441_v62 }
0x463e   :  { %3530 = vmatprep.mubr.f32.mxu0 %v8892_v4 }
0x463f   :  { %8047 = vmatprep.subr.bf16.mxu0 %v9912_v58 }
0x4640   :  { %8049 = vmatpush1.bf16.msra.mxu0 %v9923_v22 }
0x4641   :  { %8051 = vmatprep.subr.bf16.mxu0 %v9925_v45 }
0x4644   :  { %8053 = vmatpush1.bf16.msra.mxu0 %v9941_v30 }
0x4645   :  { %8055 = vmatprep.subr.bf16.mxu0 %v9944_v21 }
0x4648   :  { %8057 = vmatpush1.bf16.msra.mxu0 %v9959_v34 }
0x4649   :  { %8059 = vmatprep.subr.bf16.mxu0 %v9962_v2 }
0x464c   :  { %8061 = vmatpush1.bf16.msra.mxu0 %v9971_v26 }
0x464d   :  { %8063 = vmatprep.subr.bf16.mxu0 %v9981_v15 }
0x4650   :  { %8065 = vmatpush1.bf16.msra.mxu0 %v9989_v16 }
0x4651   :  { %8098 = vmatprep.subr.bf16.mxu0 %v8890_v0 }
0x4710   :  { %v3291_v42 = vpop.f32.mrb[30].mxu0 }
0x4711   :  { %v3292_v43 = vadd.f32 %v3291_v42, %v9752_v51  ;;  %v7434_v44 = vpop.f32.mrb[31].mxu0 }
0x4713   :  { %3302 = vrot.lane.b32.xlu0 %v3292_v43, %s8893_s18  ;;  %v6348_v13 = vmul.f32 -1.442695, %v3292_v43 }
0x4715   :  { %8741 = vpow2.f32 %v6348_v13 }
0x471f   :  { %v8742_v38 = vpop.eup %8741 }
0x4720   :  { %v3298_v47 = vadd.f32 1.0, %v8742_v38 }
0x4722   :  { %8743 = vrcp.f32 %v3298_v47 }
0x472c   :  { %v8744_v57 = vpop.eup %8743 }
0x472d   :  { %v3312_v17 = vsub.f32 1.0, %v8744_v57  ;;  %v3318_v39 = vmul.f32 %v8744_v57, %v9892_v18  ;;  %v2562_v18 = vadd.f32 %v8889_v7, %v9800_v41  ;;  %v3577_v7 = vld [vmem:[%s11358_s11 + $0x38] sm:$0xff] }
0x472f   :  { %v6334_v27 = vmul.f32 -1.442695, %v2562_v18 }
0x4785   :  { %v3303_v49 = vpop.permute.xlu0 %3302 }
0x4786   :  { %v3305_v53 = vmul.f32 %v8744_v57, %v3303_v49 }
0x4788   :  { %3307 = vrot.lane.b32.xlu1 %v3305_v53, %s8894_s19 }
0x47fa   :  { %v3308_v9 = vpop.permute.xlu1 %3307 }
0x47fb   :  { %v3310_v46 = vadd.f32 %v3308_v9, %v3292_v43 }
0x47fd   :  { %8745 = vtanh.f32 %v3310_v46 }
0x47fe   :  { %8747 = vpow2.f32 %v6334_v27 }
0x4807   :  { %v8746_v48 = vpop.eup %8745 }
0x4808   :  { %3314 = vrot.lane.b32.xlu0 %v8746_v48, %s8895_s20  ;;  %v8748_v12 = vpop.eup %8747 }
0x4809   :  { %v2568_v42 = vadd.f32 1.0, %v8748_v12  ;;  %v3574_v12 = vld [vmem:[%s11358_s11 + $0x20] sm:$0xff] }
0x480b   :  { %8749 = vrcp.f32 %v2568_v42  ;;  %v3576_v42 = vld [vmem:[%s11358_s11 + $0x30] sm:$0xff] }
0x480c   :  { %3436 = vrot.lane.b32.xlu0 %v9998_v19, %s8897_s8 }
0x4815   :  { %v8750_v13 = vpop.eup %8749 }
0x4816   :  { %v2582_v40 = vsub.f32 1.0, %v8750_v13  ;;  %v2588_v52 = vmul.f32 %v8750_v13, %v9761_v11  ;;  %v3570_v11 = vld [vmem:[%s11358_s11] sm:$0xff] }
0x487a   :  { %v3315_v25 = vpop.permute.xlu0 %3314 }
0x487b   :  { %v3317_v28 = vmul.f32 %v3315_v25, %v3312_v17 }
0x487d   :  { %v10006_v37 = vadd.f32 %v3318_v39, %v3317_v28  ;;  %v3571_v39 = vld [vmem:[%s11358_s11 + $0x8] sm:$0xff]  ;;  %v3573_v28 = vld [vmem:[%s11358_s11 + $0x18] sm:$0xff] }
0x487e   :  { %v3437_v32 = vpop.permute.xlu0 %3436 }
0x487f   :  { %v3439_v60 = vsel %vm65_vm1, %v6351_v56, %v3437_v32  ;;  %3321 = vrot.lane.b32.xlu1 %v10006_v37, %s8893_s18  ;;  %v10059_v56 = vpack.c.bf16 %v3573_v28, %v3571_v39  ;;  %v3572_v32 = vld [vmem:[%s11358_s11 + $0x10] sm:$0xff]  ;;  %v3598_v39 = vld [vmem:[%s11358_s11 + $0xe0] sm:$0xff] }
0x4880   :  { %6352 = vmatmul.mubr.msk.f32.vlgmr.msra.gmra.mrb[32].mxu0 %vm3462_vm7, %v3439_v60  ;;  %v3575_v60 = vld [vmem:[%s11358_s11 + $0x28] sm:$0xff]  ;;  %v3600_v28 = vld [vmem:[%s11358_s11 + $0xf0] sm:$0xff] }
0x4881   :  { %7478 = vmatprep.mubr.msk.f32.mxu0 %vm8891_vm0, %v8892_v4  ;;  %v10072_v27 = vpack.c.bf16 %v3577_v7, %v3575_v60  ;;  %8067 = vmatprep.subr.bf16.mxu1 %v10059_v56 }
0x4883   :  { %2572 = vrot.lane.b32.xlu1 %v2562_v18, %s8893_s18 }
0x48f1   :  { %v3322_v43 = vpop.permute.xlu1 %3321 }
0x48f2   :  { %v3324_v44 = vsel %vm1755_vm4, %v9467_v36, %v3322_v43  ;;  %v10028_v36 = vld [vmem:[%s11357_s10 + $0x8] sm:$0xff] }
0x48f3   :  { %7460 = vmatmul.mubr.msk.f32.vlgmr.msra.gmra.mrb[30].mxu1 %vm1770_vm5, %v3324_v44  ;;  %v3579_v43 = vld [vmem:[%s11358_s11 + $0x48] sm:$0xff] }
0x48f4   :  { %3668 = vmatprep.mubr.f32.mxu1 %v8892_v4 }
0x48f5   :  { %v2573_v41 = vpop.permute.xlu1 %2572 }
0x48f6   :  { %v2575_v38 = vmul.f32 %v8750_v13, %v2573_v41  ;;  %v3581_v13 = vld [vmem:[%s11358_s11 + $0x58] sm:$0xff]  ;;  %v10089_v41 = vpack.c.bf16 %v3576_v42, %v3574_v12 }
0x48f8   :  { %2577 = vrot.lane.b32.xlu1 %v2575_v38, %s8894_s19  ;;  %v10092_v38 = vpack.c.bf16 %v3581_v13, %v3579_v43 }
0x4953   :  { %v3532_v47 = vpop.f32.mrb[32].mxu0 }
0x4954   :  { %v3534_v57 = vpop.f32.mrb[33].mxu0 }
0x4955   :  { %v3535_v59 = vadd.f32 %v3534_v57, %v10028_v36  ;;  %v3580_v57 = vld [vmem:[%s11358_s11 + $0x50] sm:$0xff] }
0x496a   :  { %v2578_v49 = vpop.permute.xlu1 %2577 }
0x496b   :  { %v2580_v53 = vadd.f32 %v2578_v49, %v2562_v18  ;;  %v10070_v18 = vpack.c.bf16 %v3572_v32, %v3570_v11  ;;  %v3583_v49 = vld [vmem:[%s11358_s11 + $0x68] sm:$0xff]  ;;  %v10193_v11 = vpack.c.bf16 %v3600_v28, %v3598_v39  ;;  %v3698_v39 = vld [vmem:[%s11360_s13 + $0x10] sm:$0xff] }
0x496d   :  { %8751 = vtanh.f32 %v2580_v53  ;;  %8069 = vmatpush1.bf16.msra.mxu1 %v10070_v18  ;;  %v3585_v53 = vld [vmem:[%s11358_s11 + $0x78] sm:$0xff] }
0x496e   :  { %8071 = vmatprep.subr.bf16.mxu1 %v10072_v27 }
0x4971   :  { %8073 = vmatpush1.bf16.msra.mxu1 %v10089_v41 }
0x4972   :  { %8075 = vmatprep.subr.bf16.mxu1 %v10092_v38 }
0x4977   :  { %v8752_v50 = vpop.eup %8751 }
0x49c6   :  { %v3394_v62 = vpop.f32.mrb[30].mxu1 }
0x49c7   :  { %v3395_v54 = vadd.f32 %v3394_v62, %v9752_v51  ;;  %v7461_v55 = vpop.f32.mrb[31].mxu1  ;;  %v3533_v51 = vadd.f32 %v3532_v47, %v10037_v14  ;;  %v3578_v47 = vld [vmem:[%s11358_s11 + $0x40] sm:$0xff] }
0x49c8   :  { %v10109_v62 = vpack.c.bf16 %v3580_v57, %v3578_v47  ;;  %v3582_v55 = vld [vmem:[%s11358_s11 + $0x60] sm:$0xff] }
0x49c9   :  { %3405 = vrot.lane.b32.xlu0 %v3395_v54, %s8893_s18  ;;  %v6350_v61 = vmul.f32 -1.442695, %v3395_v54  ;;  %v6353_v3 = vmul.f32 -1.442695, %v3533_v51 }
0x49ca   :  { %8077 = vmatpush1.bf16.msra.mxu1 %v10109_v62 }
0x49cb   :  { %8753 = vpow2.f32 %v6350_v61 }
0x49cc   :  { %8755 = vpow2.f32 %v6353_v3  ;;  %v3586_v3 = vld [vmem:[%s11358_s11 + $0x80] sm:$0xff] }
0x49cd   :  { %3544 = vrot.lane.b32.xlu0 %v3535_v59, %s8894_s19 }
0x49d1   :  { %2584 = vrot.lane.b32.xlu0 %v8752_v50, %s8895_s20  ;;  %v3589_v50 = vld [vmem:[%s11358_s11 + $0x98] sm:$0xff] }
0x49d5   :  { %v8754_v5 = vpop.eup %8753 }
0x49d6   :  { %v3401_v63 = vadd.f32 1.0, %v8754_v5  ;;  %v8756_v10 = vpop.eup %8755  ;;  %v3588_v5 = vld [vmem:[%s11358_s11 + $0x90] sm:$0xff] }
0x49d7   :  { %v3540_v31 = vadd.f32 1.0, %v8756_v10  ;;  %v3593_v10 = vld [vmem:[%s11358_s11 + $0xb8] sm:$0xff] }
0x49d8   :  { %8757 = vrcp.f32 %v3401_v63  ;;  %v3591_v63 = vld [vmem:[%s11358_s11 + $0xa8] sm:$0xff] }
0x49d9   :  { %8759 = vrcp.f32 %v3540_v31  ;;  %v10145_v31 = vpack.c.bf16 %v3588_v5, %v3586_v3  ;;  %v10231_v5 = vld [vmem:[%s11359_s12] sm:$0xff] }
0x49e2   :  { %v10040_v1 = vpop.eup %8757 }
0x49e3   :  { %v10044_v6 = vpop.eup %8759  ;;  %v3415_v60 = vsub.f32 1.0, %v10040_v1  ;;  %v3421_v12 = vmul.f32 %v10040_v1, %v10006_v37 }
0x49e4   :  { %v3550_v43 = vsub.f32 1.0, %v10044_v6 }
0x4a3b   :  { %v3406_v35 = vpop.permute.xlu0 %3405 }
0x4a3c   :  { %v3408_v20 = vmul.f32 %v10040_v1, %v3406_v35  ;;  %v10148_v35 = vpack.c.bf16 %v3593_v10, %v3591_v63 }
0x4a3e   :  { %3410 = vrot.lane.b32.xlu1 %v3408_v20, %s8894_s19  ;;  %v3590_v20 = vld [vmem:[%s11358_s11 + $0xa0] sm:$0xff] }
0x4a3f   :  { %v3545_v29 = vpop.permute.xlu0 %3544 }
0x4a40   :  { %v3547_v8 = vmul.f32 %v10044_v6, %v3545_v29  ;;  %v3592_v29 = vld [vmem:[%s11358_s11 + $0xb0] sm:$0xff] }
0x4a42   :  { %v3548_v9 = vadd.f32 %v3547_v8, %v3535_v59  ;;  %v3584_v59 = vld [vmem:[%s11358_s11 + $0x70] sm:$0xff]  ;;  %v3595_v8 = vld [vmem:[%s11358_s11 + $0xc8] sm:$0xff] }
0x4a43   :  { %v2585_v33 = vpop.permute.xlu0 %2584  ;;  %v10127_v51 = vpack.c.bf16 %v3584_v59, %v3582_v55 }
0x4a44   :  { %8761 = vtanh.f32 %v3548_v9  ;;  %v2587_v46 = vmul.f32 %v2585_v33, %v2582_v40  ;;  %v3597_v9 = vld [vmem:[%s11358_s11 + $0xd8] sm:$0xff]  ;;  %v10163_v33 = vpack.c.bf16 %v3592_v29, %v3590_v20 }
0x4a45   :  { %v10166_v40 = vpack.c.bf16 %v3597_v9, %v3595_v8 }
0x4a46   :  { %v2589_v23 = vadd.f32 %v2588_v52, %v2587_v46  ;;  %v3594_v46 = vld [vmem:[%s11358_s11 + $0xc0] sm:$0xff] }
0x4a4e   :  { %v8762_v48 = vpop.eup %8761 }
0x4a4f   :  { %3552 = vrot.lane.b32.xlu0 %v8762_v48, %s8894_s19  ;;  %v3596_v48 = vld [vmem:[%s11358_s11 + $0xd0] sm:$0xff] }
0x4a50   :  { %v10175_v52 = vpack.c.bf16 %v3596_v48, %v3594_v46 }
0x4a53   :  { %3425 = vrot.lane.b32.xlu0 %v2589_v23, %s8895_s20  ;;  %v3599_v23 = vld [vmem:[%s11358_s11 + $0xe8] sm:$0xff] }
0x4ab0   :  { %v3411_v17 = vpop.permute.xlu1 %3410 }
0x4ab1   :  { %v3413_v25 = vadd.f32 %v3411_v17, %v3395_v54  ;;  %v10112_v54 = vpack.c.bf16 %v3585_v53, %v3583_v49  ;;  %v3601_v17 = vld [vmem:[%s11358_s11 + $0xf8] sm:$0xff] }
0x4ab3   :  { %8763 = vtanh.f32 %v3413_v25  ;;  %8079 = vmatprep.subr.bf16.mxu1 %v10112_v54  ;;  %v10185_v25 = vpack.c.bf16 %v3601_v17, %v3599_v23  ;;  %v3696_v23 = vld [vmem:[%s11360_s13] sm:$0xff]  ;;  %v3697_v17 = vld [vmem:[%s11360_s13 + $0x8] sm:$0xff] }
0x4ab4   :  { %8081 = vmatpush1.bf16.msra.mxu1 %v10127_v51  ;;  %v10243_v28 = vpack.c.bf16 %v3697_v17, %v3696_v23 }
0x4ab6   :  { %8100 = vmatpush3.bf16.msra.mxu0 %v10243_v28 }
0x4ab7   :  { %8101 = vmatprep.subr.bf16.mxu0 %v8890_v0 }
0x4abd   :  { %v8764_v44 = vpop.eup %8763 }
0x4abe   :  { %3417 = vrot.lane.b32.xlu1 %v8764_v44, %s8895_s20 }
0x4ac1   :  { %v3553_v32 = vpop.permute.xlu0 %3552 }
0x4ac2   :  { %3556 = vrot.lane.b32.xlu1 %v9998_v19, %s8894_s19  ;;  %v3587_v19 = vld [vmem:[%s11358_s11 + $0x88] sm:$0xff]  ;;  %v3555_v57 = vmul.f32 %v3553_v32, %v3550_v43  ;;  %v3699_v32 = vld [vmem:[%s11360_s13 + $0x18] sm:$0xff] }
0x4ac3   :  { %v10130_v61 = vpack.c.bf16 %v3589_v50, %v3587_v19 }
0x4ac5   :  { %8083 = vmatprep.subr.bf16.mxu1 %v10130_v61  ;;  %v3426_v13 = vpop.permute.xlu0 %3425 }
0x4ac6   :  { %8085 = vmatpush1.bf16.msra.mxu1 %v10145_v31 }
0x4ac7   :  { %8087 = vmatprep.subr.bf16.mxu1 %v10148_v35 }
0x4aca   :  { %8089 = vmatpush1.bf16.msra.mxu1 %v10163_v33 }
0x4acb   :  { %8091 = vmatprep.subr.bf16.mxu1 %v10166_v40 }
0x4ace   :  { %8093 = vmatpush1.bf16.msra.mxu1 %v10175_v52 }
0x4acf   :  { %8095 = vmatprep.subr.bf16.mxu1 %v10185_v25 }
0x4ad2   :  { %8097 = vmatpush1.bf16.msra.mxu1 %v10193_v11 }
0x4ad3   :  { %8111 = vmatprep.subr.bf16.mxu1 %v9912_v58 }
0x4b30   :  { %v3418_v7 = vpop.permute.xlu1 %3417 }
0x4b31   :  { %v3420_v42 = vmul.f32 %v3418_v7, %v3415_v60  ;;  %v10249_v60 = vpack.c.bf16 %v3699_v32, %v3698_v39  ;;  %v3700_v7 = vld [vmem:[%s11360_s13 + $0x20] sm:$0xff] }
0x4b33   :  { %v3422_v44 = vadd.f32 %v3421_v12, %v3420_v42  ;;  %v3701_v12 = vld [vmem:[%s11360_s13 + $0x28] sm:$0xff]  ;;  %8103 = vmatpush3.bf16.msra.mxu0 %v10249_v60 }
0x4b34   :  { %v3557_v47 = vpop.permute.xlu1 %3556  ;;  %v10259_v43 = vpack.c.bf16 %v3701_v12, %v3700_v7  ;;  %8104 = vmatprep.subr.bf16.mxu0 %v8890_v0 }
0x4b35   :  { %v3559_v49 = vmul.f32 %v10044_v6, %v3557_v47  ;;  %v3428_v53 = vsel %vm1724_vm3, %v3426_v13, %v3422_v44  ;;  %v10224_v6 = vld [vmem:[%s11359_s12 + $0x8] sm:$0xff]  ;;  %v3702_v44 = vld [vmem:[%s11360_s13 + $0x30] sm:$0xff]  ;;  %v3703_v13 = vld [vmem:[%s11360_s13 + $0x38] sm:$0xff] }
0x4b36   :  { %3566 = vrot.lane.b32.xlu0 %v3428_v53, %s8894_s19  ;;  %v10270_v47 = vpack.c.bf16 %v3703_v13, %v3702_v44 }
0x4b37   :  { %v10205_v55 = vadd.f32 %v3559_v49, %v3555_v57  ;;  %8106 = vmatpush3.bf16.msra.mxu0 %v10259_v43 }
0x4b38   :  { %8107 = vmatprep.subr.bf16.mxu0 %v8890_v0 }
0x4b39   :  { %3562 = vrot.lane.b32.xlu1 %v10205_v55, %s8894_s19 }
0x4b3b   :  { %8109 = vmatpush3.bf16.msra.mxu0 %v10270_v47 }
0x4b3c   :  { %8131 = vmatprep.subr.bf16.mxu0 %v10059_v56 }
0x4ba8   :  { %v3567_v59 = vpop.permute.xlu0 %3566 }
0x4bab   :  { %v3563_v37 = vpop.permute.xlu1 %3562 }
0x4bac   :  { %v3569_v1 = vsel %vm1755_vm4, %v3563_v37, %v3567_v59 }
0x4bad   :  { %3669 = vmatmul.mubr.f32.vlgmr.msra.gmra.mrb[32].mxu1 %v3569_v1 }
0x4bae   :  { %8113 = vmatpush1.bf16.msra.mxu1 %v9923_v22  ;;  %3891 = vmatprep.mubr.f32.mxu1 %v8892_v4 }
0x4baf   :  { %8115 = vmatprep.subr.bf16.mxu1 %v9925_v45 }
0x4bb2   :  { %8117 = vmatpush1.bf16.msra.mxu1 %v9941_v30 }
0x4bb3   :  { %8119 = vmatprep.subr.bf16.mxu1 %v9944_v21 }
0x4bb6   :  { %8121 = vmatpush1.bf16.msra.mxu1 %v9959_v34 }
0x4bb7   :  { %8123 = vmatprep.subr.bf16.mxu1 %v9962_v2 }
0x4bba   :  { %8125 = vmatpush1.bf16.msra.mxu1 %v9971_v26 }
0x4bbb   :  { %8127 = vmatprep.subr.bf16.mxu1 %v9981_v15 }
0x4bbe   :  { %8129 = vmatpush1.bf16.msra.mxu1 %v9989_v16 }
0x4bbf   :  { %8162 = vmatprep.subr.bf16.mxu1 %v8890_v0 }
0x4c80   :  { %v3670_v19 = vpop.f32.mrb[32].mxu1 }
0x4c81   :  { %v3672_v50 = vpop.f32.mrb[33].mxu1  ;;  %v3671_v63 = vadd.f32 %v3670_v19, %v10231_v5 }
0x4c82   :  { %v3673_v3 = vadd.f32 %v3672_v50, %v10224_v6 }
0x4c83   :  { %v6354_v10 = vmul.f32 -1.442695, %v3671_v63 }
0x4c84   :  { %3682 = vrot.lane.b32.xlu1 %v3673_v3, %s8894_s19 }
0x4c85   :  { %8765 = vpow2.f32 %v6354_v10 }
0x4c8f   :  { %v8766_v20 = vpop.eup %8765 }
0x4c90   :  { %v3678_v29 = vadd.f32 1.0, %v8766_v20 }
0x4c92   :  { %8767 = vrcp.f32 %v3678_v29 }
0x4c9c   :  { %v8768_v8 = vpop.eup %8767 }
0x4c9d   :  { %v3688_v57 = vsub.f32 1.0, %v8768_v8  ;;  %v3694_v53 = vmul.f32 %v8768_v8, %v3567_v59  ;;  %v10300_v59 = vld [vmem:[%s11361_s14] sm:$0xff] }
0x4cf6   :  { %v3683_v9 = vpop.permute.xlu1 %3682 }
0x4cf7   :  { %v3685_v46 = vmul.f32 %v8768_v8, %v3683_v9 }
0x4cf9   :  { %v3686_v48 = vadd.f32 %v3685_v46, %v3673_v3 }
0x4cfb   :  { %8769 = vtanh.f32 %v3686_v48 }
0x4d05   :  { %v8770_v42 = vpop.eup %8769 }
0x4d06   :  { %3690 = vrot.lane.b32.xlu0 %v8770_v42, %s8894_s19 }
0x4d78   :  { %v3691_v49 = vpop.permute.xlu0 %3690 }
0x4d79   :  { %v3693_v37 = vmul.f32 %v3691_v49, %v3688_v57 }
0x4d7b   :  { %v10275_v1 = vadd.f32 %v3694_v53, %v3693_v37 }
0x4d7d   :  { %3706 = vrot.lane.b32.xlu1 %v10275_v1, %s8894_s19 }
0x4def   :  { %v3707_v19 = vpop.permute.xlu1 %3706 }
0x4df0   :  { %7479 = vmatmul.mubr.msk.f32.vlgmr.msra.gmra.mrb[34].mxu0 %vm1755_vm4, %v3707_v19 }
0x4df1   :  { %8133 = vmatpush1.bf16.msra.mxu0 %v10070_v18  ;;  %4022 = vmatprep.mubr.f32.mxu0 %v8892_v4 }
0x4df2   :  { %8135 = vmatprep.subr.bf16.mxu0 %v10072_v27 }
0x4df5   :  { %8137 = vmatpush1.bf16.msra.mxu0 %v10089_v41 }
0x4df6   :  { %8139 = vmatprep.subr.bf16.mxu0 %v10092_v38 }
0x4df9   :  { %8141 = vmatpush1.bf16.msra.mxu0 %v10109_v62 }
0x4dfa   :  { %8143 = vmatprep.subr.bf16.mxu0 %v10112_v54 }
0x4dfd   :  { %8145 = vmatpush1.bf16.msra.mxu0 %v10127_v51 }
0x4dfe   :  { %8147 = vmatprep.subr.bf16.mxu0 %v10130_v61 }
0x4e01   :  { %8149 = vmatpush1.bf16.msra.mxu0 %v10145_v31 }
0x4e02   :  { %8151 = vmatprep.subr.bf16.mxu0 %v10148_v35 }
0x4e05   :  { %8153 = vmatpush1.bf16.msra.mxu0 %v10163_v33 }
0x4e06   :  { %8155 = vmatprep.subr.bf16.mxu0 %v10166_v40 }
0x4e09   :  { %8157 = vmatpush1.bf16.msra.mxu0 %v10175_v52 }
0x4e0a   :  { %8159 = vmatprep.subr.bf16.mxu0 %v10185_v25 }
0x4e0d   :  { %8161 = vmatpush1.bf16.msra.mxu0 %v10193_v11 }
0x4e0e   :  { %8175 = vmatprep.subr.bf16.mxu0 %v9912_v58 }
0x4ec3   :  { %v3776_v50 = vpop.f32.mrb[34].mxu0 }
0x4ec4   :  { %v10303_v3 = vadd.f32 %v3776_v50, %v10300_v59  ;;  %v7480_v63 = vpop.f32.mrb[35].mxu0 }
0x4ec6   :  { %3780 = vmax.xlane.f32.xlu0 %v10303_v3 }
0x4edc   :  { %3798 = vrot.lane.b32.xlu0 %v10205_v55, %s8898_s26 }
0x4f53   :  { %v10308_v10 = vpop.xlane.xlu0 %3780 }
0x4f54   :  { %vm3791_vm8 = vcmp.eq.f32.partialorder %v10303_v3, %v10308_v10 }
0x4f55   :  { %v3792_v58 = vsel %vm3791_vm8, %v10001_v24, 128.0 }
0x4f56   :  { %3793 = vmin.xlane.f32.xlu1 %v3792_v58 }
0x4f57   :  { %v3799_v29 = vpop.permute.xlu0 %3798 }
0x4fe3   :  { %v3794_v20 = vpop.xlane.xlu1 %3793 }
0x4fe4   :  { %vm3795_vm9 = vcmp.eq.f32.partialorder %v10001_v24, %v3794_v20 }
0x4fe5   :  { %v6356_v8 = vsel %vm3795_vm9, 1.0, %v8892_v4 }
0x4fe6   :  { %v3801_v9 = vsel %vm65_vm1, %v6356_v8, %v3799_v29 }
0x4fe7   :  { %6357 = vmatmul.mubr.msk.f32.vlgmr.msra.gmra.mrb[34].mxu1 %vm3462_vm7, %v3801_v9 }
0x4fe8   :  { %8164 = vmatpush3.bf16.msra.mxu1 %v10243_v28  ;;  %7497 = vmatprep.mubr.msk.f32.mxu1 %vm8891_vm0, %v8892_v4 }
0x4fe9   :  { %8165 = vmatprep.subr.bf16.mxu1 %v8890_v0 }
0x4fec   :  { %8167 = vmatpush3.bf16.msra.mxu1 %v10249_v60 }
0x4fed   :  { %8168 = vmatprep.subr.bf16.mxu1 %v8890_v0 }
0x4ff0   :  { %8170 = vmatpush3.bf16.msra.mxu1 %v10259_v43 }
0x4ff1   :  { %8171 = vmatprep.subr.bf16.mxu1 %v8890_v0 }
0x4ff4   :  { %8173 = vmatpush3.bf16.msra.mxu1 %v10270_v47 }
0x4ff5   :  { %8195 = vmatprep.subr.bf16.mxu1 %v10059_v56 }
0x50ba   :  { %v3893_v46 = vpop.f32.mrb[34].mxu1 }
0x50bb   :  { %v3895_v48 = vpop.f32.mrb[35].mxu1  ;;  %v3894_v17 = vadd.f32 %v3893_v46, %v10037_v14 }
0x50bc   :  { %v3896_v23 = vadd.f32 %v3895_v48, %v10028_v36 }
0x50bd   :  { %v6358_v39 = vmul.f32 -1.442695, %v3894_v17 }
0x50be   :  { %3905 = vrot.lane.b32.xlu1 %v3896_v23, %s8894_s19 }
0x50bf   :  { %8771 = vpow2.f32 %v6358_v39 }
0x50c9   :  { %v8772_v32 = vpop.eup %8771 }
0x50ca   :  { %v3901_v7 = vadd.f32 1.0, %v8772_v32 }
0x50cc   :  { %8773 = vrcp.f32 %v3901_v7 }
0x50d6   :  { %v8774_v12 = vpop.eup %8773 }
0x50d7   :  { %v3911_v56 = vsub.f32 1.0, %v8774_v12  ;;  %v3917_v53 = vmul.f32 %v8774_v12, %v10205_v55 }
0x5130   :  { %v3906_v42 = vpop.permute.xlu1 %3905 }
0x5131   :  { %v3908_v44 = vmul.f32 %v8774_v12, %v3906_v42 }
0x5133   :  { %v3909_v13 = vadd.f32 %v3908_v44, %v3896_v23 }
0x5135   :  { %8775 = vtanh.f32 %v3909_v13 }
0x513f   :  { %v8776_v57 = vpop.eup %8775 }
0x5140   :  { %3913 = vrot.lane.b32.xlu0 %v8776_v57, %s8894_s19 }
0x51b2   :  { %v3914_v49 = vpop.permute.xlu0 %3913 }
0x51b3   :  { %v3916_v37 = vmul.f32 %v3914_v49, %v3911_v56 }
0x51b5   :  { %v10332_v19 = vadd.f32 %v3917_v53, %v3916_v37 }
0x51b7   :  { %3920 = vrot.lane.b32.xlu1 %v10332_v19, %s8894_s19 }
0x5229   :  { %v3921_v50 = vpop.permute.xlu1 %3920 }
0x522a   :  { %v3923_v63 = vsel %vm1755_vm4, %v3921_v50, %v10275_v1 }
0x522b   :  { %4023 = vmatmul.mubr.f32.vlgmr.msra.gmra.mrb[36].mxu0 %v3923_v63 }
0x522c   :  { %8177 = vmatpush1.bf16.msra.mxu0 %v9923_v22  ;;  %4246 = vmatprep.mubr.f32.mxu0 %v8892_v4 }
0x522d   :  { %8179 = vmatprep.subr.bf16.mxu0 %v9925_v45 }
0x5230   :  { %8181 = vmatpush1.bf16.msra.mxu0 %v9941_v30 }
0x5231   :  { %8183 = vmatprep.subr.bf16.mxu0 %v9944_v21 }
0x5234   :  { %8185 = vmatpush1.bf16.msra.mxu0 %v9959_v34 }
0x5235   :  { %8187 = vmatprep.subr.bf16.mxu0 %v9962_v2 }
0x5238   :  { %8189 = vmatpush1.bf16.msra.mxu0 %v9971_v26 }
0x5239   :  { %8191 = vmatprep.subr.bf16.mxu0 %v9981_v15 }
0x523c   :  { %8193 = vmatpush1.bf16.msra.mxu0 %v9989_v16 }
0x523d   :  { %8226 = vmatprep.subr.bf16.mxu0 %v8890_v0 }
0x52fe   :  { %v4024_v22 = vpop.f32.mrb[36].mxu0 }
0x52ff   :  { %v4026_v55 = vpop.f32.mrb[37].mxu0  ;;  %v4025_v30 = vadd.f32 %v4024_v22, %v10231_v5 }
0x5300   :  { %v4027_v45 = vadd.f32 %v4026_v55, %v10224_v6 }
0x5301   :  { %v6359_v21 = vmul.f32 -1.442695, %v4025_v30 }
0x5302   :  { %4036 = vrot.lane.b32.xlu0 %v4027_v45, %s8894_s19 }
0x5303   :  { %8777 = vpow2.f32 %v6359_v21 }
0x530d   :  { %v8778_v34 = vpop.eup %8777 }
0x530e   :  { %v4032_v2 = vadd.f32 1.0, %v8778_v34 }
0x5310   :  { %8779 = vrcp.f32 %v4032_v2 }
0x531a   :  { %v8780_v26 = vpop.eup %8779 }
0x531b   :  { %v4042_v29 = vsub.f32 1.0, %v8780_v26  ;;  %v4048_v9 = vmul.f32 %v8780_v26, %v10275_v1 }
0x5374   :  { %v4037_v58 = vpop.permute.xlu0 %4036 }
0x5375   :  { %v4039_v15 = vmul.f32 %v8780_v26, %v4037_v58 }
0x5377   :  { %v4040_v20 = vadd.f32 %v4039_v15, %v4027_v45  ;;  %v4513_v15 = vld [vmem:[%s11356_s9 + $0x8] sm:$0xff] }
0x5379   :  { %8781 = vtanh.f32 %v4040_v20  ;;  %v4515_v20 = vld [vmem:[%s11356_s9 + $0x18] sm:$0xff] }
0x5383   :  { %v8782_v16 = vpop.eup %8781 }
0x5384   :  { %4044 = vrot.lane.b32.xlu1 %v8782_v16, %s8894_s19  ;;  %v4512_v16 = vld [vmem:[%s11356_s9] sm:$0xff] }
0x53f6   :  { %v4045_v8 = vpop.permute.xlu1 %4044 }
0x53f7   :  { %v4047_v46 = vmul.f32 %v4045_v8, %v4042_v29  ;;  %v10435_v29 = vpack.c.bf16 %v4515_v20, %v4513_v15  ;;  %v4517_v8 = vld [vmem:[%s11356_s9 + $0x28] sm:$0xff]  ;;  %v4641_v20 = vld [vmem:[%s11358_s11 + $0x38] sm:$0xff] }
0x53f8   :  { %v4639_v15 = vld [vmem:[%s11358_s11 + $0x28] sm:$0xff] }
0x53f9   :  { %v10354_v48 = vadd.f32 %v4048_v9, %v4047_v46  ;;  %v4519_v9 = vld [vmem:[%s11356_s9 + $0x38] sm:$0xff] }
0x53fb   :  { %4060 = vrot.lane.b32.xlu0 %v10354_v48, %s8894_s19 }
0x546d   :  { %v4061_v23 = vpop.permute.xlu0 %4060 }
0x546e   :  { %7498 = vmatmul.mubr.msk.f32.vlgmr.msra.gmra.mrb[36].mxu1 %vm1755_vm4, %v4061_v23  ;;  %v4516_v23 = vld [vmem:[%s11356_s9 + $0x20] sm:$0xff] }
0x546f   :  { %8197 = vmatpush1.bf16.msra.mxu1 %v10070_v18  ;;  %4377 = vmatprep.mubr.f32.mxu1 %v8892_v4 }
0x5470   :  { %8199 = vmatprep.subr.bf16.mxu1 %v10072_v27 }
0x5473   :  { %8201 = vmatpush1.bf16.msra.mxu1 %v10089_v41 }
0x5474   :  { %8203 = vmatprep.subr.bf16.mxu1 %v10092_v38 }
0x5477   :  { %8205 = vmatpush1.bf16.msra.mxu1 %v10109_v62 }
0x5478   :  { %8207 = vmatprep.subr.bf16.mxu1 %v10112_v54 }
0x547b   :  { %8209 = vmatpush1.bf16.msra.mxu1 %v10127_v51 }
0x547c   :  { %8211 = vmatprep.subr.bf16.mxu1 %v10130_v61 }
0x547f   :  { %8213 = vmatpush1.bf16.msra.mxu1 %v10145_v31 }
0x5480   :  { %8215 = vmatprep.subr.bf16.mxu1 %v10148_v35 }
0x5483   :  { %8217 = vmatpush1.bf16.msra.mxu1 %v10163_v33 }
0x5484   :  { %8219 = vmatprep.subr.bf16.mxu1 %v10166_v40 }
0x5487   :  { %8221 = vmatpush1.bf16.msra.mxu1 %v10175_v52 }
0x5488   :  { %8223 = vmatprep.subr.bf16.mxu1 %v10185_v25 }
0x548b   :  { %8225 = vmatpush1.bf16.msra.mxu1 %v10193_v11 }
0x548c   :  { %8239 = vmatprep.subr.bf16.mxu1 %v10435_v29 }
0x5541   :  { %v4130_v18 = vpop.f32.mrb[36].mxu1 }
0x5542   :  { %v10376_v27 = vadd.f32 %v4130_v18, %v10300_v59  ;;  %v7499_v41 = vpop.f32.mrb[37].mxu1  ;;  %v4518_v18 = vld [vmem:[%s11356_s9 + $0x30] sm:$0xff] }
0x5543   :  { %v4521_v41 = vld [vmem:[%s11356_s9 + $0x48] sm:$0xff] }
0x5544   :  { %4134 = vmax.xlane.f32.xlu1 %v10376_v27 }
0x55d1   :  { %v10379_v38 = vpop.xlane.xlu1 %4134 }
0x55d2   :  { %vm4146_vm10 = vcmp.eq.f32.partialorder %v10376_v27, %v10379_v38 }
0x55d3   :  { %v4147_v62 = vsel %vm4146_vm10, %v10001_v24, 128.0 }
0x55d4   :  { %4148 = vmin.xlane.f32.xlu0 %v4147_v62  ;;  %v4523_v62 = vld [vmem:[%s11356_s9 + $0x58] sm:$0xff] }
0x55ea   :  { %4153 = vrot.lane.b32.xlu0 %v10332_v19, %s8898_s26 }
0x5661   :  { %v4149_v54 = vpop.xlane.xlu0 %4148 }
0x5662   :  { %vm4150_vm11 = vcmp.eq.f32.partialorder %v10001_v24, %v4149_v54  ;;  %v10466_v54 = vpack.c.bf16 %v4518_v18, %v4516_v23  ;;  %v4643_v23 = vld [vmem:[%s11358_s11 + $0x48] sm:$0xff]  ;;  %v4645_v18 = vld [vmem:[%s11358_s11 + $0x58] sm:$0xff] }
0x5663   :  { %v6362_v51 = vsel %vm4150_vm11, 1.0, %v8892_v4 }
0x5665   :  { %v4154_v61 = vpop.permute.xlu0 %4153 }
0x5666   :  { %v4156_v31 = vsel %vm65_vm1, %v6362_v51, %v4154_v61  ;;  %v10469_v51 = vpack.c.bf16 %v4523_v62, %v4521_v41  ;;  %v4520_v61 = vld [vmem:[%s11356_s9 + $0x40] sm:$0xff]  ;;  %v10587_v62 = vpack.c.bf16 %v4645_v18, %v4643_v23 }
0x5667   :  { %6363 = vmatmul.mubr.msk.f32.vlgmr.msra.gmra.mrb[38].mxu0 %vm3462_vm7, %v4156_v31  ;;  %v4522_v31 = vld [vmem:[%s11356_s9 + $0x50] sm:$0xff] }
0x5668   :  { %8228 = vmatpush3.bf16.msra.mxu0 %v10243_v28  ;;  %7516 = vmatprep.mubr.msk.f32.mxu0 %vm8891_vm0, %v8892_v4 }
0x5669   :  { %8229 = vmatprep.subr.bf16.mxu0 %v8890_v0 }
0x566c   :  { %8231 = vmatpush3.bf16.msra.mxu0 %v10249_v60 }
0x566d   :  { %8232 = vmatprep.subr.bf16.mxu0 %v8890_v0 }
0x5670   :  { %8234 = vmatpush3.bf16.msra.mxu0 %v10259_v43 }
0x5671   :  { %8235 = vmatprep.subr.bf16.mxu0 %v8890_v0 }
0x5674   :  { %8237 = vmatpush3.bf16.msra.mxu0 %v10270_v47 }
0x573a   :  { %v4248_v35 = vpop.f32.mrb[38].mxu0 }
0x573b   :  { %v4250_v33 = vpop.f32.mrb[39].mxu0  ;;  %v4249_v52 = vadd.f32 %v4248_v35, %v10037_v14  ;;  %v4525_v35 = vld [vmem:[%s11356_s9 + $0x68] sm:$0xff] }
0x573c   :  { %v4251_v40 = vadd.f32 %v4250_v33, %v10028_v36  ;;  %v4527_v33 = vld [vmem:[%s11356_s9 + $0x78] sm:$0xff] }
0x573d   :  { %v6364_v25 = vmul.f32 -1.442695, %v4249_v52  ;;  %v10487_v52 = vpack.c.bf16 %v4527_v33, %v4525_v35  ;;  %v4647_v35 = vld [vmem:[%s11358_s11 + $0x68] sm:$0xff]  ;;  %v4649_v33 = vld [vmem:[%s11358_s11 + $0x78] sm:$0xff] }
0x573e   :  { %4260 = vrot.lane.b32.xlu1 %v4251_v40, %s8894_s19 }
0x573f   :  { %8783 = vpow2.f32 %v6364_v25  ;;  %v4524_v25 = vld [vmem:[%s11356_s9 + $0x60] sm:$0xff] }
0x5749   :  { %v8784_v11 = vpop.eup %8783 }
0x574a   :  { %v4256_v28 = vadd.f32 1.0, %v8784_v11  ;;  %v4526_v11 = vld [vmem:[%s11356_s9 + $0x70] sm:$0xff] }
0x574c   :  { %8785 = vrcp.f32 %v4256_v28  ;;  %v4529_v28 = vld [vmem:[%s11356_s9 + $0x88] sm:$0xff] }
0x5756   :  { %v8786_v60 = vpop.eup %8785 }
0x5757   :  { %v4266_v47 = vsub.f32 1.0, %v8786_v60  ;;  %v4272_v36 = vmul.f32 %v8786_v60, %v10332_v19 }
0x57b0   :  { %v4261_v1 = vpop.permute.xlu1 %4260 }
0x57b1   :  { %v4263_v43 = vmul.f32 %v8786_v60, %v4261_v1  ;;  %v4531_v60 = vld [vmem:[%s11356_s9 + $0x98] sm:$0xff]  ;;  %v10502_v1 = vpack.c.bf16 %v4526_v11, %v4524_v25 }
0x57b3   :  { %v4264_v17 = vadd.f32 %v4263_v43, %v4251_v40  ;;  %v10484_v40 = vpack.c.bf16 %v4522_v31, %v4520_v61  ;;  %v10505_v43 = vpack.c.bf16 %v4531_v60, %v4529_v28  ;;  %v4642_v61 = vld [vmem:[%s11358_s11 + $0x40] sm:$0xff]  ;;  %v4644_v31 = vld [vmem:[%s11358_s11 + $0x50] sm:$0xff]  ;;  %v10606_v28 = vpack.c.bf16 %v4649_v33, %v4647_v35 }
0x57b4   :  { %v10602_v11 = vpack.c.bf16 %v4644_v31, %v4642_v61  ;;  %v4646_v60 = vld [vmem:[%s11358_s11 + $0x60] sm:$0xff] }
0x57b5   :  { %8787 = vtanh.f32 %v4264_v17 }
0x57bf   :  { %v8788_v39 = vpop.eup %8787 }
0x57c0   :  { %4268 = vrot.lane.b32.xlu1 %v8788_v39, %s8894_s19 }
0x5832   :  { %v4269_v32 = vpop.permute.xlu1 %4268 }
0x5833   :  { %v4271_v7 = vmul.f32 %v4269_v32, %v4266_v47  ;;  %v4528_v47 = vld [vmem:[%s11356_s9 + $0x80] sm:$0xff]  ;;  %v4530_v32 = vld [vmem:[%s11356_s9 + $0x90] sm:$0xff] }
0x5835   :  { %v10404_v12 = vadd.f32 %v4272_v36, %v4271_v7  ;;  %v10520_v36 = vpack.c.bf16 %v4530_v32, %v4528_v47  ;;  %v4651_v47 = vld [vmem:[%s11358_s11 + $0x88] sm:$0xff]  ;;  %v4653_v32 = vld [vmem:[%s11358_s11 + $0x98] sm:$0xff] }
0x5837   :  { %4275 = vrot.lane.b32.xlu0 %v10404_v12, %s8894_s19 }
0x58a9   :  { %v4276_v14 = vpop.permute.xlu0 %4275 }
0x58aa   :  { %v4278_v42 = vsel %vm1755_vm4, %v4276_v14, %v10354_v48 }
0x58ab   :  { %4378 = vmatmul.mubr.f32.vlgmr.msra.gmra.mrb[38].mxu1 %v4278_v42 }
0x58ac   :  { %4601 = vmatprep.mubr.f32.mxu1 %v8892_v4 }
0x597e   :  { %v4379_v44 = vpop.f32.mrb[38].mxu1 }
0x597f   :  { %v4381_v13 = vpop.f32.mrb[39].mxu1  ;;  %v4380_v56 = vadd.f32 %v4379_v44, %v10231_v5 }
0x5980   :  { %v4382_v57 = vadd.f32 %v4381_v13, %v10224_v6  ;;  %v10533_v13 = vld [vmem:[%s11357_s10 + $0x8] sm:$0xff] }
0x5981   :  { %v6365_v49 = vmul.f32 -1.442695, %v4380_v56 }
0x5982   :  { %4391 = vrot.lane.b32.xlu1 %v4382_v57, %s8894_s19 }
0x5983   :  { %8789 = vpow2.f32 %v6365_v49 }
0x598d   :  { %v8790_v53 = vpop.eup %8789 }
0x598e   :  { %v4387_v37 = vadd.f32 1.0, %v8790_v53  ;;  %v10540_v53 = vld [vmem:[%s11357_s10] sm:$0xff] }
0x5990   :  { %8791 = vrcp.f32 %v4387_v37 }
0x599a   :  { %v8792_v19 = vpop.eup %8791 }
0x599b   :  { %v4397_v45 = vsub.f32 1.0, %v8792_v19  ;;  %v4403_v6 = vmul.f32 %v8792_v19, %v10354_v48  ;;  %v10448_v48 = vpack.c.bf16 %v4519_v9, %v4517_v8  ;;  %v4638_v8 = vld [vmem:[%s11358_s11 + $0x20] sm:$0xff]  ;;  %v4640_v9 = vld [vmem:[%s11358_s11 + $0x30] sm:$0xff] }
0x599c   :  { %v10584_v41 = vpack.c.bf16 %v4640_v9, %v4638_v8  ;;  %v4662_v8 = vld [vmem:[%s11358_s11 + $0xe0] sm:$0xff]  ;;  %v4664_v9 = vld [vmem:[%s11358_s11 + $0xf0] sm:$0xff] }
0x599d   :  { %v10687_v23 = vpack.c.bf16 %v4664_v9, %v4662_v8  ;;  %v4763_v8 = vld [vmem:[%s11360_s13 + $0x18] sm:$0xff] }
0x59f4   :  { %v4392_v50 = vpop.permute.xlu1 %4391 }
0x59f5   :  { %v4394_v63 = vmul.f32 %v8792_v19, %v4392_v50 }
0x59f7   :  { %v4395_v22 = vadd.f32 %v4394_v63, %v4382_v57 }
0x59f9   :  { %8793 = vtanh.f32 %v4395_v22 }
0x5a03   :  { %v8794_v55 = vpop.eup %8793 }
0x5a04   :  { %4399 = vrot.lane.b32.xlu0 %v8794_v55, %s8894_s19 }
0x5a76   :  { %v4400_v30 = vpop.permute.xlu0 %4399 }
0x5a77   :  { %v4402_v21 = vmul.f32 %v4400_v30, %v4397_v45 }
0x5a79   :  { %v10416_v34 = vadd.f32 %v4403_v6, %v4402_v21  ;;  %v4635_v6 = vld [vmem:[%s11358_s11 + $0x8] sm:$0xff]  ;;  %v4637_v21 = vld [vmem:[%s11358_s11 + $0x18] sm:$0xff] }
0x5a7b   :  { %4415 = vrot.lane.b32.xlu1 %v10416_v34, %s8894_s19 }
0x5aed   :  { %v4416_v5 = vpop.permute.xlu1 %4415 }
0x5aee   :  { %7517 = vmatmul.mubr.msk.f32.vlgmr.msra.gmra.mrb[40].mxu0 %vm1755_vm4, %v4416_v5  ;;  %v4634_v5 = vld [vmem:[%s11358_s11] sm:$0xff] }
0x5aef   :  { %4732 = vmatprep.mubr.f32.mxu0 %v8892_v4 }
0x5bc1   :  { %v4485_v2 = vpop.f32.mrb[40].mxu0 }
0x5bc2   :  { %v10423_v26 = vadd.f32 %v4485_v2, %v10300_v59  ;;  %v7518_v58 = vpop.f32.mrb[41].mxu0  ;;  %v4514_v59 = vld [vmem:[%s11356_s9 + $0x10] sm:$0xff]  ;;  %v10555_v2 = vpack.c.bf16 %v4637_v21, %v4635_v6  ;;  %v4658_v6 = vld [vmem:[%s11358_s11 + $0xc0] sm:$0xff] }
0x5bc3   :  { %v10446_v46 = vpack.c.bf16 %v4514_v59, %v4512_v16  ;;  %v4636_v58 = vld [vmem:[%s11358_s11 + $0x10] sm:$0xff]  ;;  %v10568_v59 = vpack.c.bf16 %v4641_v20, %v4639_v15 }
0x5bc4   :  { %4489 = vmax.xlane.f32.xlu0 %v10423_v26  ;;  %v10566_v16 = vpack.c.bf16 %v4636_v58, %v4634_v5  ;;  %8259 = vmatprep.subr.bf16.mxu0 %v10555_v2  ;;  %v4660_v21 = vld [vmem:[%s11358_s11 + $0xd0] sm:$0xff]  ;;  %v4663_v5 = vld [vmem:[%s11358_s11 + $0xe8] sm:$0xff]  ;;  %v4665_v58 = vld [vmem:[%s11358_s11 + $0xf8] sm:$0xff] }
0x5bc5   :  { %8241 = vmatpush1.bf16.msra.mxu1 %v10446_v46  ;;  %v10675_v15 = vpack.c.bf16 %v4660_v21, %v4658_v6  ;;  %v10678_v20 = vpack.c.bf16 %v4665_v58, %v4663_v5  ;;  %v4760_v6 = vld [vmem:[%s11360_s13] sm:$0xff]  ;;  %v4761_v21 = vld [vmem:[%s11360_s13 + $0x8] sm:$0xff]  ;;  %v4762_v5 = vld [vmem:[%s11360_s13 + $0x10] sm:$0xff] }
0x5bc6   :  { %8243 = vmatprep.subr.bf16.mxu1 %v10448_v48  ;;  %8261 = vmatpush1.bf16.msra.mxu0 %v10566_v16  ;;  %v10734_v58 = vpack.c.bf16 %v4761_v21, %v4760_v6  ;;  %v10740_v9 = vpack.c.bf16 %v4763_v8, %v4762_v5 }
0x5bc7   :  { %8263 = vmatprep.subr.bf16.mxu0 %v10568_v59 }
0x5bc9   :  { %8245 = vmatpush1.bf16.msra.mxu1 %v10466_v54 }
0x5bca   :  { %8247 = vmatprep.subr.bf16.mxu1 %v10469_v51  ;;  %8265 = vmatpush1.bf16.msra.mxu0 %v10584_v41 }
0x5bcb   :  { %8267 = vmatprep.subr.bf16.mxu0 %v10587_v62 }
0x5bcd   :  { %8249 = vmatpush1.bf16.msra.mxu1 %v10484_v40 }
0x5bce   :  { %8251 = vmatprep.subr.bf16.mxu1 %v10487_v52  ;;  %8269 = vmatpush1.bf16.msra.mxu0 %v10602_v11 }
0x5bcf   :  { %8271 = vmatprep.subr.bf16.mxu0 %v10606_v28 }
0x5bd1   :  { %8253 = vmatpush1.bf16.msra.mxu1 %v10502_v1 }
0x5bd2   :  { %8255 = vmatprep.subr.bf16.mxu1 %v10505_v43 }
0x5bd5   :  { %8257 = vmatpush1.bf16.msra.mxu1 %v10520_v36 }
0x5bd6   :  { %8290 = vmatprep.subr.bf16.mxu1 %v8890_v0 }
0x5bda   :  { %4508 = vrot.lane.b32.xlu0 %v10404_v12, %s8898_s26 }
0x5c51   :  { %v10509_v17 = vpop.xlane.xlu0 %4489 }
0x5c52   :  { %vm4501_vm12 = vcmp.eq.f32.partialorder %v10423_v26, %v10509_v17 }
0x5c53   :  { %v4502_v39 = vsel %vm4501_vm12, %v10001_v24, 128.0 }
0x5c54   :  { %4503 = vmin.xlane.f32.xlu1 %v4502_v39  ;;  %v4648_v39 = vld [vmem:[%s11358_s11 + $0x70] sm:$0xff] }
0x5c55   :  { %v4509_v14 = vpop.permute.xlu0 %4508 }
0x5ce1   :  { %v4504_v7 = vpop.xlane.xlu1 %4503 }
0x5ce2   :  { %vm4505_vm13 = vcmp.eq.f32.partialorder %v10001_v24, %v4504_v7  ;;  %v10621_v7 = vpack.c.bf16 %v4648_v39, %v4646_v60 }
0x5ce3   :  { %v6368_v42 = vsel %vm4505_vm13, 1.0, %v8892_v4 }
0x5ce4   :  { %v4511_v44 = vsel %vm65_vm1, %v6368_v42, %v4509_v14  ;;  %v10624_v14 = vpack.c.bf16 %v4653_v32, %v4651_v47  ;;  %v4650_v42 = vld [vmem:[%s11358_s11 + $0x80] sm:$0xff]  ;;  %8273 = vmatpush1.bf16.msra.mxu0 %v10621_v7 }
0x5ce5   :  { %6369 = vmatmul.mubr.msk.f32.vlgmr.msra.gmra.mrb[40].mxu1 %vm3462_vm7, %v4511_v44  ;;  %v4652_v44 = vld [vmem:[%s11358_s11 + $0x90] sm:$0xff]  ;;  %v10722_v32 = vld [vmem:[%s11359_s12] sm:$0xff] }
0x5ce6   :  { %7535 = vmatprep.mubr.msk.f32.mxu1 %vm8891_vm0, %v8892_v4  ;;  %8275 = vmatprep.subr.bf16.mxu0 %v10624_v14 }
0x5ce7   :  { %8292 = vmatpush3.bf16.msra.mxu1 %v10734_v58 }
0x5ce8   :  { %8293 = vmatprep.subr.bf16.mxu1 %v8890_v0 }
0x5ceb   :  { %8295 = vmatpush3.bf16.msra.mxu1 %v10740_v9 }
0x5cec   :  { %8296 = vmatprep.subr.bf16.mxu1 %v8890_v0 }
0x5db8   :  { %v4603_v57 = vpop.f32.mrb[40].mxu1 }
0x5db9   :  { %v4605_v56 = vpop.f32.mrb[41].mxu1  ;;  %v4604_v37 = vadd.f32 %v4603_v57, %v10540_v53  ;;  %v4655_v57 = vld [vmem:[%s11358_s11 + $0xa8] sm:$0xff] }
0x5dba   :  { %v4606_v49 = vadd.f32 %v4605_v56, %v10533_v13  ;;  %v4657_v56 = vld [vmem:[%s11358_s11 + $0xb8] sm:$0xff] }
0x5dbb   :  { %v6370_v19 = vmul.f32 -1.442695, %v4604_v37  ;;  %v10642_v37 = vpack.c.bf16 %v4657_v56, %v4655_v57 }
0x5dbc   :  { %4615 = vrot.lane.b32.xlu1 %v4606_v49, %s8894_s19 }
0x5dbd   :  { %8795 = vpow2.f32 %v6370_v19  ;;  %v4654_v19 = vld [vmem:[%s11358_s11 + $0xa0] sm:$0xff] }
0x5dc7   :  { %v8796_v50 = vpop.eup %8795 }
0x5dc8   :  { %v4611_v63 = vadd.f32 1.0, %v8796_v50  ;;  %v4656_v50 = vld [vmem:[%s11358_s11 + $0xb0] sm:$0xff] }
0x5dca   :  { %8797 = vrcp.f32 %v4611_v63  ;;  %v4659_v63 = vld [vmem:[%s11358_s11 + $0xc8] sm:$0xff] }
0x5dd4   :  { %v10543_v22 = vpop.eup %8797 }
0x5dd5   :  { %v4621_v18 = vsub.f32 1.0, %v10543_v22  ;;  %v4627_v31 = vmul.f32 %v10543_v22, %v10404_v12  ;;  %v10715_v12 = vld [vmem:[%s11359_s12 + $0x8] sm:$0xff] }
0x5e2e   :  { %v4616_v55 = vpop.permute.xlu1 %4615 }
0x5e2f   :  { %v4618_v45 = vmul.f32 %v10543_v22, %v4616_v55  ;;  %v4661_v55 = vld [vmem:[%s11358_s11 + $0xd8] sm:$0xff] }
0x5e31   :  { %v4619_v30 = vadd.f32 %v4618_v45, %v4606_v49  ;;  %v10639_v49 = vpack.c.bf16 %v4652_v44, %v4650_v42  ;;  %v10657_v45 = vpack.c.bf16 %v4656_v50, %v4654_v19 }
0x5e33   :  { %8799 = vtanh.f32 %v4619_v30  ;;  %8277 = vmatpush1.bf16.msra.mxu0 %v10639_v49  ;;  %v10660_v30 = vpack.c.bf16 %v4661_v55, %v4659_v63 }
0x5e34   :  { %8279 = vmatprep.subr.bf16.mxu0 %v10642_v37 }
0x5e37   :  { %8281 = vmatpush1.bf16.msra.mxu0 %v10657_v45 }
0x5e38   :  { %8283 = vmatprep.subr.bf16.mxu0 %v10660_v30 }
0x5e3b   :  { %8285 = vmatpush1.bf16.msra.mxu0 %v10675_v15 }
0x5e3c   :  { %8287 = vmatprep.subr.bf16.mxu0 %v10678_v20 }
0x5e3d   :  { %v8800_v25 = vpop.eup %8799 }
0x5e3e   :  { %4623 = vrot.lane.b32.xlu0 %v8800_v25, %s8894_s19 }
0x5e3f   :  { %8289 = vmatpush1.bf16.msra.mxu0 %v10687_v23 }
0x5e40   :  { %8303 = vmatprep.subr.bf16.mxu0 %v10435_v29 }
0x5eb0   :  { %v4624_v61 = vpop.permute.xlu0 %4623 }
0x5eb1   :  { %v4626_v35 = vmul.f32 %v4624_v61, %v4621_v18  ;;  %v4764_v18 = vld [vmem:[%s11360_s13 + $0x20] sm:$0xff]  ;;  %v4765_v61 = vld [vmem:[%s11360_s13 + $0x28] sm:$0xff] }
0x5eb3   :  { %v10695_v33 = vadd.f32 %v4627_v31, %v4626_v35  ;;  %v10750_v31 = vpack.c.bf16 %v4765_v61, %v4764_v18 }
0x5eb5   :  { %4630 = vrot.lane.b32.xlu1 %v10695_v33, %s8894_s19  ;;  %8298 = vmatpush3.bf16.msra.mxu1 %v10750_v31 }
0x5eb6   :  { %8299 = vmatprep.subr.bf16.mxu1 %v8890_v0 }
0x5f27   :  { %v4631_v25 = vpop.permute.xlu1 %4630 }
0x5f28   :  { %v4633_v60 = vsel %vm1755_vm4, %v4631_v25, %v10416_v34  ;;  %v4766_v25 = vld [vmem:[%s11360_s13 + $0x30] sm:$0xff] }
0x5f29   :  { %4733 = vmatmul.mubr.f32.vlgmr.msra.gmra.mrb[42].mxu0 %v4633_v60  ;;  %v4767_v60 = vld [vmem:[%s11360_s13 + $0x38] sm:$0xff] }
0x5f2a   :  { %8305 = vmatpush1.bf16.msra.mxu0 %v10446_v46  ;;  %4956 = vmatprep.mubr.f32.mxu0 %v8892_v4 }
0x5f2b   :  { %8307 = vmatprep.subr.bf16.mxu0 %v10448_v48 }
0x5f2e   :  { %8309 = vmatpush1.bf16.msra.mxu0 %v10466_v54 }
0x5f2f   :  { %8311 = vmatprep.subr.bf16.mxu0 %v10469_v51 }
0x5f32   :  { %8313 = vmatpush1.bf16.msra.mxu0 %v10484_v40 }
0x5f33   :  { %8315 = vmatprep.subr.bf16.mxu0 %v10487_v52 }
0x5f36   :  { %8317 = vmatpush1.bf16.msra.mxu0 %v10502_v1 }
0x5f37   :  { %8319 = vmatprep.subr.bf16.mxu0 %v10505_v43 }
0x5f3a   :  { %8321 = vmatpush1.bf16.msra.mxu0 %v10520_v36 }
0x5f3b   :  { %8354 = vmatprep.subr.bf16.mxu0 %v8890_v0 }
0x5ffc   :  { %v4734_v22 = vpop.f32.mrb[42].mxu0 }
0x5ffd   :  { %v4736_v39 = vpop.f32.mrb[43].mxu0  ;;  %v4735_v42 = vadd.f32 %v4734_v22, %v10722_v32  ;;  %v10761_v22 = vpack.c.bf16 %v4767_v60, %v4766_v25 }
0x5ffe   :  { %v4737_v47 = vadd.f32 %v4736_v39, %v10715_v12 }
0x5fff   :  { %v6371_v44 = vmul.f32 -1.442695, %v4735_v42  ;;  %8301 = vmatpush3.bf16.msra.mxu1 %v10761_v22 }
0x6000   :  { %4746 = vrot.lane.b32.xlu0 %v4737_v47, %s8894_s19  ;;  %8323 = vmatprep.subr.bf16.mxu1 %v10555_v2 }
0x6001   :  { %8801 = vpow2.f32 %v6371_v44 }
0x600b   :  { %v8802_v57 = vpop.eup %8801 }
0x600c   :  { %v4742_v56 = vadd.f32 1.0, %v8802_v57 }
0x600e   :  { %8803 = vrcp.f32 %v4742_v56 }
0x6018   :  { %v8804_v19 = vpop.eup %8803 }
0x6019   :  { %v4752_v39 = vsub.f32 1.0, %v8804_v19  ;;  %v4758_v42 = vmul.f32 %v8804_v19, %v10416_v34  ;;  %v10792_v34 = vld [vmem:[%s11361_s14] sm:$0xff] }
0x6072   :  { %v4747_v50 = vpop.permute.xlu0 %4746 }
0x6073   :  { %v4749_v63 = vmul.f32 %v8804_v19, %v4747_v50 }
0x6075   :  { %v4750_v55 = vadd.f32 %v4749_v63, %v4737_v47 }
0x6077   :  { %8805 = vtanh.f32 %v4750_v55 }
0x6081   :  { %v8806_v35 = vpop.eup %8805 }
0x6082   :  { %4754 = vrot.lane.b32.xlu1 %v8806_v35, %s8894_s19 }
0x60f4   :  { %v4755_v47 = vpop.permute.xlu1 %4754 }
0x60f5   :  { %v4757_v44 = vmul.f32 %v4755_v47, %v4752_v39 }
0x60f7   :  { %v10767_v57 = vadd.f32 %v4758_v42, %v4757_v44 }
0x60f9   :  { %4770 = vrot.lane.b32.xlu0 %v10767_v57, %s8894_s19 }
0x616b   :  { %v4771_v56 = vpop.permute.xlu0 %4770 }
0x616c   :  { %7536 = vmatmul.mubr.msk.f32.vlgmr.msra.gmra.mrb[42].mxu1 %vm1755_vm4, %v4771_v56 }
0x616d   :  { %8325 = vmatpush1.bf16.msra.mxu1 %v10566_v16  ;;  %5087 = vmatprep.mubr.f32.mxu1 %v8892_v4 }
0x616e   :  { %8327 = vmatprep.subr.bf16.mxu1 %v10568_v59 }
0x6171   :  { %8329 = vmatpush1.bf16.msra.mxu1 %v10584_v41 }
0x6172   :  { %8331 = vmatprep.subr.bf16.mxu1 %v10587_v62 }
0x6175   :  { %8333 = vmatpush1.bf16.msra.mxu1 %v10602_v11 }
0x6176   :  { %8335 = vmatprep.subr.bf16.mxu1 %v10606_v28 }
0x6179   :  { %8337 = vmatpush1.bf16.msra.mxu1 %v10621_v7 }
0x617a   :  { %8339 = vmatprep.subr.bf16.mxu1 %v10624_v14 }
0x617d   :  { %8341 = vmatpush1.bf16.msra.mxu1 %v10639_v49 }
0x617e   :  { %8343 = vmatprep.subr.bf16.mxu1 %v10642_v37 }
0x6181   :  { %8345 = vmatpush1.bf16.msra.mxu1 %v10657_v45 }
0x6182   :  { %8347 = vmatprep.subr.bf16.mxu1 %v10660_v30 }
0x6185   :  { %8349 = vmatpush1.bf16.msra.mxu1 %v10675_v15 }
0x6186   :  { %8351 = vmatprep.subr.bf16.mxu1 %v10678_v20 }
0x6189   :  { %8353 = vmatpush1.bf16.msra.mxu1 %v10687_v23 }
0x618a   :  { %8367 = vmatprep.subr.bf16.mxu1 %v10435_v29 }
0x623f   :  { %v4840_v19 = vpop.f32.mrb[42].mxu1 }
0x6240   :  { %v10795_v50 = vadd.f32 %v4840_v19, %v10792_v34  ;;  %v7537_v63 = vpop.f32.mrb[43].mxu1 }
0x6242   :  { %4844 = vmax.xlane.f32.xlu1 %v10795_v50 }
0x62cf   :  { %v10798_v55 = vpop.xlane.xlu1 %4844 }
0x62d0   :  { %vm4856_vm14 = vcmp.eq.f32.partialorder %v10795_v50, %v10798_v55 }
0x62d1   :  { %v4857_v6 = vsel %vm4856_vm14, %v10001_v24, 128.0 }
0x62d2   :  { %4858 = vmin.xlane.f32.xlu0 %v4857_v6 }
0x62e8   :  { %4863 = vrot.lane.b32.xlu0 %v10695_v33, %s8898_s26 }
0x635f   :  { %v4859_v29 = vpop.xlane.xlu0 %4858 }
0x6360   :  { %vm4860_vm15 = vcmp.eq.f32.partialorder %v10001_v24, %v4859_v29 }
0x6361   :  { %v6374_v21 = vsel %vm4860_vm15, 1.0, %v8892_v4 }
0x6363   :  { %v4864_v5 = vpop.permute.xlu0 %4863 }
0x6364   :  { %v4866_v8 = vsel %vm65_vm1, %v6374_v21, %v4864_v5 }
0x6365   :  { %6375 = vmatmul.mubr.msk.f32.vlgmr.msra.gmra.mrb[44].mxu0 %vm3462_vm7, %v4866_v8 }
0x6366   :  { %8356 = vmatpush3.bf16.msra.mxu0 %v10734_v58  ;;  %7554 = vmatprep.mubr.msk.f32.mxu0 %vm8891_vm0, %v8892_v4 }
0x6367   :  { %8357 = vmatprep.subr.bf16.mxu0 %v8890_v0 }
0x636a   :  { %8359 = vmatpush3.bf16.msra.mxu0 %v10740_v9 }
0x636b   :  { %8360 = vmatprep.subr.bf16.mxu0 %v8890_v0 }
0x636e   :  { %8362 = vmatpush3.bf16.msra.mxu0 %v10750_v31 }
0x636f   :  { %8363 = vmatprep.subr.bf16.mxu0 %v8890_v0 }
0x6372   :  { %8365 = vmatpush3.bf16.msra.mxu0 %v10761_v22 }
0x6373   :  { %8387 = vmatprep.subr.bf16.mxu0 %v10555_v2 }
0x6438   :  { %v4958_v18 = vpop.f32.mrb[44].mxu0 }
0x6439   :  { %v4960_v61 = vpop.f32.mrb[45].mxu0  ;;  %v4959_v25 = vadd.f32 %v4958_v18, %v10540_v53 }
0x643a   :  { %v4961_v35 = vadd.f32 %v4960_v61, %v10533_v13 }
0x643b   :  { %v6376_v60 = vmul.f32 -1.442695, %v4959_v25 }
0x643c   :  { %4970 = vrot.lane.b32.xlu1 %v4961_v35, %s8894_s19 }
0x643d   :  { %8807 = vpow2.f32 %v6376_v60 }
0x6447   :  { %v8808_v39 = vpop.eup %8807 }
0x6448   :  { %v4966_v47 = vadd.f32 1.0, %v8808_v39 }
0x644a   :  { %8809 = vrcp.f32 %v4966_v47 }
0x6454   :  { %v8810_v42 = vpop.eup %8809 }
0x6455   :  { %v4976_v2 = vsub.f32 1.0, %v8810_v42  ;;  %v4982_v29 = vmul.f32 %v8810_v42, %v10695_v33 }
0x64ae   :  { %v4971_v44 = vpop.permute.xlu1 %4970 }
0x64af   :  { %v4973_v56 = vmul.f32 %v8810_v42, %v4971_v44 }
0x64b1   :  { %v4974_v19 = vadd.f32 %v4973_v56, %v4961_v35 }
0x64b3   :  { %8811 = vtanh.f32 %v4974_v19 }
0x64bd   :  { %v8812_v63 = vpop.eup %8811 }
0x64be   :  { %4978 = vrot.lane.b32.xlu1 %v8812_v63, %s8894_s19 }
0x6530   :  { %v4979_v6 = vpop.permute.xlu1 %4978 }
0x6531   :  { %v4981_v21 = vmul.f32 %v4979_v6, %v4976_v2 }
0x6533   :  { %v10824_v5 = vadd.f32 %v4982_v29, %v4981_v21 }
0x6535   :  { %4985 = vrot.lane.b32.xlu0 %v10824_v5, %s8894_s19 }
0x65a7   :  { %v4986_v8 = vpop.permute.xlu0 %4985 }
0x65a8   :  { %v4988_v18 = vsel %vm1755_vm4, %v4986_v8, %v10767_v57 }
0x65a9   :  { %5088 = vmatmul.mubr.f32.vlgmr.msra.gmra.mrb[44].mxu1 %v4988_v18 }
0x65aa   :  { %8369 = vmatpush1.bf16.msra.mxu1 %v10446_v46  ;;  %5311 = vmatprep.mubr.f32.mxu1 %v8892_v4 }
0x65ab   :  { %8371 = vmatprep.subr.bf16.mxu1 %v10448_v48 }
0x65ae   :  { %8373 = vmatpush1.bf16.msra.mxu1 %v10466_v54 }
0x65af   :  { %8375 = vmatprep.subr.bf16.mxu1 %v10469_v51 }
0x65b2   :  { %8377 = vmatpush1.bf16.msra.mxu1 %v10484_v40 }
0x65b3   :  { %8379 = vmatprep.subr.bf16.mxu1 %v10487_v52 }
0x65b6   :  { %8381 = vmatpush1.bf16.msra.mxu1 %v10502_v1 }
0x65b7   :  { %8383 = vmatprep.subr.bf16.mxu1 %v10505_v43 }
0x65ba   :  { %8385 = vmatpush1.bf16.msra.mxu1 %v10520_v36 }
0x65bb   :  { %8418 = vmatprep.subr.bf16.mxu1 %v8890_v0 }
0x667c   :  { %v5089_v46 = vpop.f32.mrb[44].mxu1 }
0x667d   :  { %v5091_v33 = vpop.f32.mrb[45].mxu1  ;;  %v5090_v54 = vadd.f32 %v5089_v46, %v10722_v32 }
0x667e   :  { %v5092_v48 = vadd.f32 %v5091_v33, %v10715_v12 }
0x667f   :  { %v6377_v51 = vmul.f32 -1.442695, %v5090_v54 }
0x6680   :  { %5101 = vrot.lane.b32.xlu1 %v5092_v48, %s8894_s19 }
0x6681   :  { %8813 = vpow2.f32 %v6377_v51 }
0x668b   :  { %v8814_v40 = vpop.eup %8813 }
0x668c   :  { %v5097_v52 = vadd.f32 1.0, %v8814_v40 }
0x668e   :  { %8815 = vrcp.f32 %v5097_v52 }
0x6698   :  { %v8816_v1 = vpop.eup %8815 }
0x6699   :  { %v5107_v25 = vsub.f32 1.0, %v8816_v1  ;;  %v5113_v39 = vmul.f32 %v8816_v1, %v10767_v57 }
0x66f2   :  { %v5102_v61 = vpop.permute.xlu1 %5101 }
0x66f3   :  { %v5104_v43 = vmul.f32 %v8816_v1, %v5102_v61 }
0x66f5   :  { %v5105_v35 = vadd.f32 %v5104_v43, %v5092_v48 }
0x66f7   :  { %8817 = vtanh.f32 %v5105_v35 }
0x6701   :  { %v8818_v36 = vpop.eup %8817 }
0x6702   :  { %5109 = vrot.lane.b32.xlu0 %v8818_v36, %s8894_s19 }
0x6774   :  { %v5110_v60 = vpop.permute.xlu0 %5109 }
0x6775   :  { %v5112_v47 = vmul.f32 %v5110_v60, %v5107_v25 }
0x6777   :  { %v10846_v42 = vadd.f32 %v5113_v39, %v5112_v47  ;;  %v5578_v47 = vld [vmem:[%s11356_s9 + $0x8] sm:$0xff] }
0x6779   :  { %5125 = vrot.lane.b32.xlu1 %v10846_v42, %s8894_s19 }
0x67eb   :  { %v5126_v44 = vpop.permute.xlu1 %5125 }
0x67ec   :  { %7555 = vmatmul.mubr.msk.f32.vlgmr.msra.gmra.mrb[46].mxu0 %vm1755_vm4, %v5126_v44  ;;  %v5577_v44 = vld [vmem:[%s11356_s9] sm:$0xff] }
0x67ed   :  { %8389 = vmatpush1.bf16.msra.mxu0 %v10566_v16  ;;  %5442 = vmatprep.mubr.f32.mxu0 %v8892_v4 }
0x67ee   :  { %8391 = vmatprep.subr.bf16.mxu0 %v10568_v59 }
0x67f1   :  { %8393 = vmatpush1.bf16.msra.mxu0 %v10584_v41 }
0x67f2   :  { %8395 = vmatprep.subr.bf16.mxu0 %v10587_v62 }
0x67f5   :  { %8397 = vmatpush1.bf16.msra.mxu0 %v10602_v11 }
0x67f6   :  { %8399 = vmatprep.subr.bf16.mxu0 %v10606_v28 }
0x67f9   :  { %8401 = vmatpush1.bf16.msra.mxu0 %v10621_v7 }
0x67fa   :  { %8403 = vmatprep.subr.bf16.mxu0 %v10624_v14 }
0x67fd   :  { %8405 = vmatpush1.bf16.msra.mxu0 %v10639_v49 }
0x67fe   :  { %8407 = vmatprep.subr.bf16.mxu0 %v10642_v37 }
0x6801   :  { %8409 = vmatpush1.bf16.msra.mxu0 %v10657_v45 }
0x6802   :  { %8411 = vmatprep.subr.bf16.mxu0 %v10660_v30 }
0x6805   :  { %8413 = vmatpush1.bf16.msra.mxu0 %v10675_v15 }
0x6806   :  { %8415 = vmatprep.subr.bf16.mxu0 %v10678_v20 }
0x6809   :  { %8417 = vmatpush1.bf16.msra.mxu0 %v10687_v23 }
0x68bf   :  { %v5195_v16 = vpop.f32.mrb[46].mxu0 }
0x68c0   :  { %v10868_v59 = vadd.f32 %v5195_v16, %v10792_v34  ;;  %v7556_v41 = vpop.f32.mrb[47].mxu0 }
0x68c1   :  { %v5582_v41 = vld [vmem:[%s11356_s9 + $0x28] sm:$0xff] }
0x68c2   :  { %5199 = vmax.xlane.f32.xlu0 %v10868_v59 }
0x68d8   :  { %5218 = vrot.lane.b32.xlu0 %v10824_v5, %s8898_s26 }
0x694f   :  { %v10873_v62 = vpop.xlane.xlu0 %5199 }
0x6950   :  { %vm5211_vm2 = vcmp.eq.f32.partialorder %v10868_v59, %v10873_v62 }
0x6951   :  { %v5212_v11 = vsel %vm5211_vm2, %v10001_v24, 128.0 }
0x6952   :  { %5213 = vmin.xlane.f32.xlu1 %v5212_v11  ;;  %v5584_v11 = vld [vmem:[%s11356_s9 + $0x38] sm:$0xff] }
0x6953   :  { %v5219_v7 = vpop.permute.xlu0 %5218 }
0x69df   :  { %v5214_v28 = vpop.xlane.xlu1 %5213 }
0x69e0   :  { %vm5215_vm3 = vcmp.eq.f32.partialorder %v10001_v24, %v5214_v28 }
0x69e1   :  { %v6380_v14 = vsel %vm5215_vm3, 1.0, %v8892_v4 }
0x69e2   :  { %v5221_v49 = vsel %vm65_vm1, %v6380_v14, %v5219_v7  ;;  %v10940_v7 = vpack.c.bf16 %v5584_v11, %v5582_v41  ;;  %v5581_v14 = vld [vmem:[%s11356_s9 + $0x20] sm:$0xff]  ;;  %v5701_v11 = vld [vmem:[%s11358_s11 + $0x10] sm:$0xff] }
0x69e3   :  { %6381 = vmatmul.mubr.msk.f32.vlgmr.msra.gmra.mrb[46].mxu1 %vm3462_vm7, %v5221_v49  ;;  %v5583_v49 = vld [vmem:[%s11356_s9 + $0x30] sm:$0xff] }
0x69e4   :  { %8420 = vmatpush3.bf16.msra.mxu1 %v10734_v58  ;;  %7573 = vmatprep.mubr.msk.f32.mxu1 %vm8891_vm0, %v8892_v4 }
0x69e5   :  { %8421 = vmatprep.subr.bf16.mxu1 %v8890_v0 }
0x69e8   :  { %8423 = vmatpush3.bf16.msra.mxu1 %v10740_v9 }
0x69e9   :  { %8424 = vmatprep.subr.bf16.mxu1 %v8890_v0 }
0x69ec   :  { %8426 = vmatpush3.bf16.msra.mxu1 %v10750_v31 }
0x69ed   :  { %8427 = vmatprep.subr.bf16.mxu1 %v8890_v0 }
0x69f0   :  { %8429 = vmatpush3.bf16.msra.mxu1 %v10761_v22 }
0x6ab6   :  { %v5313_v37 = vpop.f32.mrb[46].mxu1 }
0x6ab7   :  { %v5315_v45 = vpop.f32.mrb[47].mxu1  ;;  %v5314_v15 = vadd.f32 %v5313_v37, %v10540_v53  ;;  %v5586_v37 = vld [vmem:[%s11356_s9 + $0x48] sm:$0xff] }
0x6ab8   :  { %v5316_v30 = vadd.f32 %v5315_v45, %v10533_v13  ;;  %v5588_v45 = vld [vmem:[%s11356_s9 + $0x58] sm:$0xff] }
0x6ab9   :  { %v6382_v20 = vmul.f32 -1.442695, %v5314_v15  ;;  %v10959_v15 = vpack.c.bf16 %v5588_v45, %v5586_v37 }
0x6aba   :  { %5325 = vrot.lane.b32.xlu1 %v5316_v30, %s8894_s19 }
0x6abb   :  { %8819 = vpow2.f32 %v6382_v20  ;;  %v5585_v20 = vld [vmem:[%s11356_s9 + $0x40] sm:$0xff] }
0x6ac5   :  { %v8820_v23 = vpop.eup %8819 }
0x6ac6   :  { %v5321_v58 = vadd.f32 1.0, %v8820_v23  ;;  %v5587_v23 = vld [vmem:[%s11356_s9 + $0x50] sm:$0xff] }
0x6ac8   :  { %8821 = vrcp.f32 %v5321_v58  ;;  %v5590_v58 = vld [vmem:[%s11356_s9 + $0x68] sm:$0xff] }
0x6ad2   :  { %v8822_v9 = vpop.eup %8821 }
0x6ad3   :  { %v5331_v22 = vsub.f32 1.0, %v8822_v9  ;;  %v5337_v13 = vmul.f32 %v8822_v9, %v10824_v5 }
0x6b2c   :  { %v5326_v57 = vpop.permute.xlu1 %5325 }
0x6b2d   :  { %v5328_v31 = vmul.f32 %v8822_v9, %v5326_v57  ;;  %v5592_v9 = vld [vmem:[%s11356_s9 + $0x78] sm:$0xff]  ;;  %v10974_v57 = vpack.c.bf16 %v5587_v23, %v5585_v20  ;;  %v5703_v20 = vld [vmem:[%s11358_s11 + $0x20] sm:$0xff]  ;;  %v5705_v23 = vld [vmem:[%s11358_s11 + $0x30] sm:$0xff] }
0x6b2f   :  { %v5329_v56 = vadd.f32 %v5328_v31, %v5316_v30  ;;  %v10956_v30 = vpack.c.bf16 %v5583_v49, %v5581_v14  ;;  %v10977_v31 = vpack.c.bf16 %v5592_v9, %v5590_v58  ;;  %v5704_v14 = vld [vmem:[%s11358_s11 + $0x28] sm:$0xff]  ;;  %v5706_v49 = vld [vmem:[%s11358_s11 + $0x38] sm:$0xff] }
0x6b30   :  { %v11060_v45 = vpack.c.bf16 %v5706_v49, %v5704_v14  ;;  %v5708_v58 = vld [vmem:[%s11358_s11 + $0x48] sm:$0xff]  ;;  %v5710_v9 = vld [vmem:[%s11358_s11 + $0x58] sm:$0xff] }
0x6b31   :  { %8823 = vtanh.f32 %v5329_v56  ;;  %v5589_v56 = vld [vmem:[%s11356_s9 + $0x60] sm:$0xff] }
0x6b3b   :  { %v8824_v19 = vpop.eup %8823 }
0x6b3c   :  { %5333 = vrot.lane.b32.xlu0 %v8824_v19, %s8894_s19  ;;  %v5591_v19 = vld [vmem:[%s11356_s9 + $0x70] sm:$0xff] }
0x6bae   :  { %v5334_v63 = vpop.permute.xlu0 %5333 }
0x6baf   :  { %v5336_v2 = vmul.f32 %v5334_v63, %v5331_v22  ;;  %v10986_v22 = vpack.c.bf16 %v5591_v19, %v5589_v56  ;;  %v11076_v56 = vpack.c.bf16 %v5705_v23, %v5703_v20  ;;  %v11079_v19 = vpack.c.bf16 %v5710_v9, %v5708_v58  ;;  %v5723_v20 = vld [vmem:[%s11358_s11 + $0xc0] sm:$0xff]  ;;  %v5725_v23 = vld [vmem:[%s11358_s11 + $0xd0] sm:$0xff]  ;;  %v5728_v58 = vld [vmem:[%s11358_s11 + $0xe8] sm:$0xff] }
0x6bb0   :  { %v5730_v9 = vld [vmem:[%s11358_s11 + $0xf8] sm:$0xff] }
0x6bb1   :  { %v10896_v6 = vadd.f32 %v5337_v13, %v5336_v2  ;;  %v5594_v2 = vld [vmem:[%s11356_s9 + $0x88] sm:$0xff] }
0x6bb3   :  { %5340 = vrot.lane.b32.xlu1 %v10896_v6, %s8894_s19 }
0x6c25   :  { %v5341_v53 = vpop.permute.xlu1 %5340 }
0x6c26   :  { %v5343_v29 = vsel %vm1755_vm4, %v5341_v53, %v10846_v42  ;;  %v5596_v53 = vld [vmem:[%s11356_s9 + $0x98] sm:$0xff] }
0x6c27   :  { %5443 = vmatmul.mubr.f32.vlgmr.msra.gmra.mrb[48].mxu0 %v5343_v29  ;;  %v11001_v29 = vpack.c.bf16 %v5596_v53, %v5594_v2  ;;  %v5709_v2 = vld [vmem:[%s11358_s11 + $0x50] sm:$0xff]  ;;  %v5712_v53 = vld [vmem:[%s11358_s11 + $0x68] sm:$0xff] }
0x6c28   :  { %5666 = vmatprep.mubr.f32.mxu0 %v8892_v4 }
0x6cfa   :  { %v5444_v21 = vpop.f32.mrb[48].mxu0 }
0x6cfb   :  { %v5446_v8 = vpop.f32.mrb[49].mxu0  ;;  %v5445_v5 = vadd.f32 %v5444_v21, %v10722_v32  ;;  %v5593_v21 = vld [vmem:[%s11356_s9 + $0x80] sm:$0xff] }
0x6cfc   :  { %v5447_v18 = vadd.f32 %v5446_v8, %v10715_v12  ;;  %v5595_v8 = vld [vmem:[%s11356_s9 + $0x90] sm:$0xff] }
0x6cfd   :  { %v6383_v46 = vmul.f32 -1.442695, %v5445_v5 }
0x6cfe   :  { %5456 = vrot.lane.b32.xlu0 %v5447_v18, %s8894_s19 }
0x6cff   :  { %8825 = vpow2.f32 %v6383_v46 }
0x6d09   :  { %v8826_v33 = vpop.eup %8825 }
0x6d0a   :  { %v5452_v48 = vadd.f32 1.0, %v8826_v33 }
0x6d0c   :  { %8827 = vrcp.f32 %v5452_v48 }
0x6d16   :  { %v8828_v54 = vpop.eup %8827 }
0x6d17   :  { %v5462_v61 = vsub.f32 1.0, %v8828_v54  ;;  %v5468_v12 = vmul.f32 %v8828_v54, %v10846_v42  ;;  %v5580_v42 = vld [vmem:[%s11356_s9 + $0x18] sm:$0xff] }
0x6d18   :  { %v10927_v16 = vpack.c.bf16 %v5580_v42, %v5578_v47  ;;  %v5700_v42 = vld [vmem:[%s11358_s11 + $0x8] sm:$0xff] }
0x6d1a   :  { %8431 = vmatprep.subr.bf16.mxu0 %v10927_v16 }
0x6d70   :  { %v5457_v51 = vpop.permute.xlu0 %5456 }
0x6d71   :  { %v5459_v40 = vmul.f32 %v8828_v54, %v5457_v51  ;;  %v11025_v54 = vld [vmem:[%s11357_s10 + $0x8] sm:$0xff] }
0x6d73   :  { %v5460_v52 = vadd.f32 %v5459_v40, %v5447_v18  ;;  %v11009_v18 = vpack.c.bf16 %v5595_v8, %v5593_v21  ;;  %v5714_v21 = vld [vmem:[%s11358_s11 + $0x78] sm:$0xff] }
0x6d75   :  { %8829 = vtanh.f32 %v5460_v52 }
0x6d7f   :  { %v8830_v1 = vpop.eup %8829 }
0x6d80   :  { %5464 = vrot.lane.b32.xlu1 %v8830_v1, %s8894_s19  ;;  %v11032_v1 = vld [vmem:[%s11357_s10] sm:$0xff] }
0x6df2   :  { %v5465_v43 = vpop.permute.xlu1 %5464 }
0x6df3   :  { %v5467_v35 = vmul.f32 %v5465_v43, %v5462_v61 }
0x6df5   :  { %v10908_v36 = vadd.f32 %v5468_v12, %v5467_v35 }
0x6df7   :  { %5480 = vrot.lane.b32.xlu0 %v10908_v36, %s8894_s19 }
0x6e69   :  { %v5481_v32 = vpop.permute.xlu0 %5480 }
0x6e6a   :  { %7574 = vmatmul.mubr.msk.f32.vlgmr.msra.gmra.mrb[48].mxu1 %vm1755_vm4, %v5481_v32 }
0x6e6b   :  { %5797 = vmatprep.mubr.f32.mxu1 %v8892_v4 }
0x6f3d   :  { %v5550_v25 = vpop.f32.mrb[48].mxu1 }
0x6f3e   :  { %v10915_v60 = vadd.f32 %v5550_v25, %v10792_v34  ;;  %v7575_v39 = vpop.f32.mrb[49].mxu1  ;;  %v5579_v34 = vld [vmem:[%s11356_s9 + $0x10] sm:$0xff] }
0x6f3f   :  { %v10938_v28 = vpack.c.bf16 %v5579_v34, %v5577_v44  ;;  %v5702_v44 = vld [vmem:[%s11358_s11 + $0x18] sm:$0xff]  ;;  %v5699_v34 = vld [vmem:[%s11358_s11] sm:$0xff] }
0x6f40   :  { %5554 = vmax.xlane.f32.xlu1 %v10915_v60  ;;  %v11047_v41 = vpack.c.bf16 %v5702_v44, %v5700_v42  ;;  %v11058_v37 = vpack.c.bf16 %v5701_v11, %v5699_v34  ;;  %v5719_v42 = vld [vmem:[%s11358_s11 + $0xa0] sm:$0xff]  ;;  %v5721_v44 = vld [vmem:[%s11358_s11 + $0xb0] sm:$0xff]  ;;  %v5724_v34 = vld [vmem:[%s11358_s11 + $0xc8] sm:$0xff] }
0x6f41   :  { %8433 = vmatpush1.bf16.msra.mxu0 %v10938_v28  ;;  %v5726_v11 = vld [vmem:[%s11358_s11 + $0xd8] sm:$0xff]  ;;  %v11149_v14 = vpack.c.bf16 %v5721_v44, %v5719_v42  ;;  %v5825_v42 = vld [vmem:[%s11360_s13] sm:$0xff]  ;;  %v5826_v44 = vld [vmem:[%s11360_s13 + $0x8] sm:$0xff] }
0x6f42   :  { %8435 = vmatprep.subr.bf16.mxu0 %v10940_v7  ;;  %8451 = vmatprep.subr.bf16.mxu1 %v11047_v41  ;;  %v11152_v49 = vpack.c.bf16 %v5726_v11, %v5724_v34  ;;  %v5827_v34 = vld [vmem:[%s11360_s13 + $0x10] sm:$0xff]  ;;  %v8483_v11 = vpack.c.bf16 %v5826_v44, %v5825_v42 }
0x6f43   :  { %8453 = vmatpush1.bf16.msra.mxu1 %v11058_v37 }
0x6f44   :  { %8455 = vmatprep.subr.bf16.mxu1 %v11060_v45 }
0x6f45   :  { %8437 = vmatpush1.bf16.msra.mxu0 %v10956_v30 }
0x6f46   :  { %8439 = vmatprep.subr.bf16.mxu0 %v10959_v15 }
0x6f47   :  { %8457 = vmatpush1.bf16.msra.mxu1 %v11076_v56 }
0x6f48   :  { %8459 = vmatprep.subr.bf16.mxu1 %v11079_v19 }
0x6f49   :  { %8441 = vmatpush1.bf16.msra.mxu0 %v10974_v57 }
0x6f4a   :  { %8443 = vmatprep.subr.bf16.mxu0 %v10977_v31 }
0x6f4d   :  { %8445 = vmatpush1.bf16.msra.mxu0 %v10986_v22 }
0x6f4e   :  { %8447 = vmatprep.subr.bf16.mxu0 %v11001_v29 }
0x6f51   :  { %8449 = vmatpush1.bf16.msra.mxu0 %v11009_v18 }
0x6f52   :  { %8482 = vmatprep.subr.bf16.mxu0 %v8890_v0 }
0x6fcd   :  { %v10990_v63 = vpop.xlane.xlu1 %5554 }
0x6fce   :  { %vm5566_vm5 = vcmp.eq.f32.partialorder %v10915_v60, %v10990_v63 }
0x6fcf   :  { %v5567_v13 = vsel %vm5566_vm5, %v10001_v24, 128.0 }
0x6fd0   :  { %5568 = vmin.xlane.f32.xlu0 %v5567_v13  ;;  %v5707_v13 = vld [vmem:[%s11358_s11 + $0x40] sm:$0xff] }
0x6fe6   :  { %5573 = vrot.lane.b32.xlu0 %v10896_v6, %s8898_s26 }
0x705d   :  { %v5569_v5 = vpop.xlane.xlu0 %5568 }
0x705e   :  { %vm5570_vm6 = vcmp.eq.f32.partialorder %v10001_v24, %v5569_v5  ;;  %v11094_v5 = vpack.c.bf16 %v5709_v2, %v5707_v13  ;;  %v11167_v13 = vpack.c.bf16 %v5725_v23, %v5723_v20  ;;  %v11170_v2 = vpack.c.bf16 %v5730_v9, %v5728_v58  ;;  %v5828_v20 = vld [vmem:[%s11360_s13 + $0x18] sm:$0xff]  ;;  %v5829_v58 = vld [vmem:[%s11360_s13 + $0x20] sm:$0xff]  ;;  %v5830_v9 = vld [vmem:[%s11360_s13 + $0x28] sm:$0xff] }
0x705f   :  { %v6386_v46 = vsel %vm5570_vm6, 1.0, %v8892_v4  ;;  %v8486_v23 = vpack.c.bf16 %v5828_v20, %v5827_v34 }
0x7060   :  { %8461 = vmatpush1.bf16.msra.mxu1 %v11094_v5 }
0x7061   :  { %v5574_v33 = vpop.permute.xlu0 %5573 }
0x7062   :  { %v5576_v48 = vsel %vm65_vm1, %v6386_v46, %v5574_v33  ;;  %v11098_v46 = vpack.c.bf16 %v5714_v21, %v5712_v53  ;;  %v5711_v33 = vld [vmem:[%s11358_s11 + $0x60] sm:$0xff]  ;;  %v5729_v21 = vld [vmem:[%s11358_s11 + $0xf0] sm:$0xff] }
0x7063   :  { %6387 = vmatmul.mubr.msk.f32.vlgmr.msra.gmra.mrb[50].mxu0 %vm3462_vm7, %v5576_v48  ;;  %v5713_v48 = vld [vmem:[%s11358_s11 + $0x70] sm:$0xff]  ;;  %v5727_v53 = vld [vmem:[%s11358_s11 + $0xe0] sm:$0xff] }
0x7064   :  { %7592 = vmatprep.mubr.msk.f32.mxu0 %vm8891_vm0, %v8892_v4  ;;  %8463 = vmatprep.subr.bf16.mxu1 %v11098_v46 }
0x7065   :  { %8484 = vmatpush3.bf16.msra.mxu0 %v8483_v11 }
0x7066   :  { %8485 = vmatprep.subr.bf16.mxu0 %v8890_v0 }
0x7069   :  { %8487 = vmatpush3.bf16.msra.mxu0 %v8486_v23 }
0x706a   :  { %8488 = vmatprep.subr.bf16.mxu0 %v8890_v0 }
0x7136   :  { %v5668_v51 = vpop.f32.mrb[50].mxu0 }
0x7137   :  { %v5670_v40 = vpop.f32.mrb[51].mxu0  ;;  %v5669_v61 = vadd.f32 %v5668_v51, %v11032_v1  ;;  %v5716_v51 = vld [vmem:[%s11358_s11 + $0x88] sm:$0xff] }
0x7138   :  { %v5671_v52 = vadd.f32 %v5670_v40, %v11025_v54  ;;  %v5718_v40 = vld [vmem:[%s11358_s11 + $0x98] sm:$0xff] }
0x7139   :  { %v6388_v43 = vmul.f32 -1.442695, %v5669_v61  ;;  %v11116_v61 = vpack.c.bf16 %v5718_v40, %v5716_v51 }
0x713a   :  { %5680 = vrot.lane.b32.xlu1 %v5671_v52, %s8894_s19 }
0x713b   :  { %8831 = vpow2.f32 %v6388_v43  ;;  %v5715_v43 = vld [vmem:[%s11358_s11 + $0x80] sm:$0xff] }
0x7145   :  { %v8832_v12 = vpop.eup %8831 }
0x7146   :  { %v5676_v35 = vadd.f32 1.0, %v8832_v12  ;;  %v5717_v12 = vld [vmem:[%s11358_s11 + $0x90] sm:$0xff] }
0x7148   :  { %8833 = vrcp.f32 %v5676_v35  ;;  %v5720_v35 = vld [vmem:[%s11358_s11 + $0xa8] sm:$0xff] }
0x7152   :  { %v11035_v32 = vpop.eup %8833 }
0x7153   :  { %v5692_v51 = vmul.f32 %v11035_v32, %v10896_v6  ;;  %v11207_v6 = vld [vmem:[%s11359_s12 + $0x8] sm:$0xff] }
0x71ac   :  { %v5681_v25 = vpop.permute.xlu1 %5680 }
0x71ad   :  { %v5683_v39 = vmul.f32 %v11035_v32, %v5681_v25  ;;  %v5722_v25 = vld [vmem:[%s11358_s11 + $0xb8] sm:$0xff] }
0x71af   :  { %v5684_v47 = vadd.f32 %v5683_v39, %v5671_v52  ;;  %v11113_v52 = vpack.c.bf16 %v5713_v48, %v5711_v33  ;;  %v11131_v39 = vpack.c.bf16 %v5717_v12, %v5715_v43  ;;  %v5686_v33 = vsub.f32 1.0, %v11035_v32 }
0x71b1   :  { %8835 = vtanh.f32 %v5684_v47  ;;  %8465 = vmatpush1.bf16.msra.mxu1 %v11113_v52  ;;  %v11134_v47 = vpack.c.bf16 %v5722_v25, %v5720_v35 }
0x71b2   :  { %8467 = vmatprep.subr.bf16.mxu1 %v11116_v61 }
0x71b5   :  { %8469 = vmatpush1.bf16.msra.mxu1 %v11131_v39 }
0x71b6   :  { %8471 = vmatprep.subr.bf16.mxu1 %v11134_v47 }
0x71b9   :  { %8473 = vmatpush1.bf16.msra.mxu1 %v11149_v14 }
0x71ba   :  { %8475 = vmatprep.subr.bf16.mxu1 %v11152_v49 }
0x71bb   :  { %v8836_v8 = vpop.eup %8835 }
0x71bc   :  { %5688 = vrot.lane.b32.xlu1 %v8836_v8, %s8894_s19  ;;  %v11179_v8 = vpack.c.bf16 %v5729_v21, %v5727_v53  ;;  %v8489_v53 = vpack.c.bf16 %v5830_v9, %v5829_v58 }
0x71bd   :  { %8477 = vmatpush1.bf16.msra.mxu1 %v11167_v13 }
0x71be   :  { %8479 = vmatprep.subr.bf16.mxu1 %v11170_v2  ;;  %8490 = vmatpush3.bf16.msra.mxu0 %v8489_v53 }
0x71bf   :  { %8491 = vmatprep.subr.bf16.mxu0 %v8890_v0 }
0x71c1   :  { %8481 = vmatpush1.bf16.msra.mxu1 %v11179_v8 }
0x71c2   :  { %8495 = vmatprep.subr.bf16.mxu1 %v10927_v16 }
0x722e   :  { %v5689_v48 = vpop.permute.xlu1 %5688 }
0x722f   :  { %v5691_v40 = vmul.f32 %v5689_v48, %v5686_v33  ;;  %v5831_v33 = vld [vmem:[%s11360_s13 + $0x30] sm:$0xff]  ;;  %v5832_v48 = vld [vmem:[%s11360_s13 + $0x38] sm:$0xff] }
0x7231   :  { %v11187_v43 = vadd.f32 %v5692_v51, %v5691_v40  ;;  %v8492_v51 = vpack.c.bf16 %v5832_v48, %v5831_v33 }
0x7233   :  { %5695 = vrot.lane.b32.xlu0 %v11187_v43, %s8894_s19  ;;  %8493 = vmatpush3.bf16.msra.mxu0 %v8492_v51 }
0x7234   :  { %8515 = vmatprep.subr.bf16.mxu0 %v11047_v41 }
0x72a5   :  { %v5696_v12 = vpop.permute.xlu0 %5695 }
0x72a6   :  { %v5698_v35 = vsel %vm1755_vm4, %v5696_v12, %v10908_v36 }
0x72a7   :  { %5798 = vmatmul.mubr.f32.vlgmr.msra.gmra.mrb[50].mxu1 %v5698_v35 }
0x72a8   :  { %8497 = vmatpush1.bf16.msra.mxu1 %v10938_v28  ;;  %6021 = vmatprep.mubr.f32.mxu1 %v8892_v4 }
0x72a9   :  { %8499 = vmatprep.subr.bf16.mxu1 %v10940_v7 }
0x72ac   :  { %8501 = vmatpush1.bf16.msra.mxu1 %v10956_v30  ;;  %v11214_v30 = vld [vmem:[%s11359_s12] sm:$0xff] }
0x72ad   :  { %8503 = vmatprep.subr.bf16.mxu1 %v10959_v15 }
0x72b0   :  { %8505 = vmatpush1.bf16.msra.mxu1 %v10974_v57 }
0x72b1   :  { %8507 = vmatprep.subr.bf16.mxu1 %v10977_v31 }
0x72b4   :  { %8509 = vmatpush1.bf16.msra.mxu1 %v10986_v22 }
0x72b5   :  { %8511 = vmatprep.subr.bf16.mxu1 %v11001_v29 }
0x72b8   :  { %8513 = vmatpush1.bf16.msra.mxu1 %v11009_v18 }
0x72b9   :  { %8546 = vmatprep.subr.bf16.mxu1 %v8890_v0 }
0x737a   :  { %v5799_v16 = vpop.f32.mrb[50].mxu1 }
0x737b   :  { %v5801_v28 = vpop.f32.mrb[51].mxu1  ;;  %v5800_v15 = vadd.f32 %v5799_v16, %v11214_v30 }
0x737c   :  { %v5802_v7 = vadd.f32 %v5801_v28, %v11207_v6 }
0x737d   :  { %v6389_v57 = vmul.f32 -1.442695, %v5800_v15 }
0x737e   :  { %5811 = vrot.lane.b32.xlu1 %v5802_v7, %s8894_s19 }
0x737f   :  { %8837 = vpow2.f32 %v6389_v57 }
0x7389   :  { %v8838_v31 = vpop.eup %8837 }
0x738a   :  { %v5807_v22 = vadd.f32 1.0, %v8838_v31 }
0x738c   :  { %8839 = vrcp.f32 %v5807_v22 }
0x7396   :  { %v8840_v29 = vpop.eup %8839 }
0x7397   :  { %v5817_v40 = vsub.f32 1.0, %v8840_v29  ;;  %v5823_v35 = vmul.f32 %v8840_v29, %v10908_v36  ;;  %v11271_v36 = vld [vmem:[%s11361_s14] sm:$0xff] }
0x73f0   :  { %v5812_v18 = vpop.permute.xlu1 %5811 }
0x73f1   :  { %v5814_v32 = vmul.f32 %v8840_v29, %v5812_v18 }
0x73f3   :  { %v5815_v25 = vadd.f32 %v5814_v32, %v5802_v7 }
0x73f5   :  { %8841 = vtanh.f32 %v5815_v25 }
0x73ff   :  { %v8842_v21 = vpop.eup %8841 }
0x7400   :  { %5819 = vrot.lane.b32.xlu0 %v8842_v21, %s8894_s19 }
0x7472   :  { %v5820_v12 = vpop.permute.xlu0 %5819 }
0x7473   :  { %v5822_v16 = vmul.f32 %v5820_v12, %v5817_v40 }
0x7475   :  { %v11247_v28 = vadd.f32 %v5823_v35, %v5822_v16  ;;  %v4136_v35 = vsub.f32 %v10376_v27, %v10379_v38 }
0x7477   :  { %5835 = vrot.lane.b32.xlu1 %v11247_v28, %s8894_s19  ;;  %v4137_v16 = vmul.f32 1.442695, %v4136_v35 }
0x74e9   :  { %v5836_v7 = vpop.permute.xlu1 %5835 }
0x74ea   :  { %7593 = vmatmul.mubr.msk.f32.vlgmr.msra.gmra.mrb[52].mxu0 %vm1755_vm4, %v5836_v7  ;;  %v4846_v7 = vsub.f32 %v10795_v50, %v10798_v55 }
0x74eb   :  { %8517 = vmatpush1.bf16.msra.mxu0 %v11058_v37  ;;  %6152 = vmatprep.mubr.f32.mxu0 %v8892_v4 }
0x74ec   :  { %8519 = vmatprep.subr.bf16.mxu0 %v11060_v45 }
0x74ef   :  { %8521 = vmatpush1.bf16.msra.mxu0 %v11076_v56 }
0x74f0   :  { %8523 = vmatprep.subr.bf16.mxu0 %v11079_v19 }
0x74f3   :  { %8525 = vmatpush1.bf16.msra.mxu0 %v11094_v5 }
0x74f4   :  { %8527 = vmatprep.subr.bf16.mxu0 %v11098_v46 }
0x74f7   :  { %8529 = vmatpush1.bf16.msra.mxu0 %v11113_v52 }
0x74f8   :  { %8531 = vmatprep.subr.bf16.mxu0 %v11116_v61 }
0x74fb   :  { %8533 = vmatpush1.bf16.msra.mxu0 %v11131_v39 }
0x74fc   :  { %8535 = vmatprep.subr.bf16.mxu0 %v11134_v47 }
0x74ff   :  { %8537 = vmatpush1.bf16.msra.mxu0 %v11149_v14 }
0x7500   :  { %8539 = vmatprep.subr.bf16.mxu0 %v11152_v49 }
0x7503   :  { %8541 = vmatpush1.bf16.msra.mxu0 %v11167_v13 }
0x7504   :  { %8543 = vmatprep.subr.bf16.mxu0 %v11170_v2 }
0x7507   :  { %8545 = vmatpush1.bf16.msra.mxu0 %v11179_v8 }
0x75bd   :  { %v5905_v41 = vpop.f32.mrb[52].mxu0 }
0x75be   :  { %v11274_v37 = vadd.f32 %v5905_v41, %v11271_v36  ;;  %v7594_v45 = vpop.f32.mrb[53].mxu0  ;;  %v4847_v41 = vmul.f32 1.442695, %v4846_v7 }
0x75c0   :  { %5909 = vmax.xlane.f32.xlu0 %v11274_v37 }
0x75d6   :  { %5928 = vrot.lane.b32.xlu0 %v11187_v43, %s8898_s26 }
0x764d   :  { %v11279_v56 = vpop.xlane.xlu0 %5909 }
0x764e   :  { %vm5921_vm8 = vcmp.eq.f32.partialorder %v11274_v37, %v11279_v56 }
0x764f   :  { %v5922_v19 = vsel %vm5921_vm8, %v10001_v24, 128.0 }
0x7650   :  { %5923 = vmin.xlane.f32.xlu1 %v5922_v19 }
0x7651   :  { %v5929_v46 = vpop.permute.xlu0 %5928 }
0x76dd   :  { %v5924_v5 = vpop.xlane.xlu1 %5923 }
0x76de   :  { %vm5925_vm9 = vcmp.eq.f32.partialorder %v10001_v24, %v5924_v5 }
0x76df   :  { %v6392_v52 = vsel %vm5925_vm9, 1.0, %v8892_v4 }
0x76e0   :  { %v5931_v61 = vsel %vm65_vm1, %v6392_v52, %v5929_v46 }
0x76e1   :  { %6393 = vmatmul.mubr.msk.f32.vlgmr.msra.gmra.mrb[52].mxu1 %vm3462_vm7, %v5931_v61 }
0x76e2   :  { %8548 = vmatpush3.bf16.msra.mxu1 %v8483_v11  ;;  %7611 = vmatprep.mubr.msk.f32.mxu1 %vm8891_vm0, %v8892_v4 }
0x76e3   :  { %8549 = vmatprep.subr.bf16.mxu1 %v8890_v0 }
0x76e6   :  { %8551 = vmatpush3.bf16.msra.mxu1 %v8486_v23 }
0x76e7   :  { %8552 = vmatprep.subr.bf16.mxu1 %v8890_v0 }
0x76ea   :  { %8554 = vmatpush3.bf16.msra.mxu1 %v8489_v53 }
0x76eb   :  { %8555 = vmatprep.subr.bf16.mxu1 %v8890_v0 }
0x76ee   :  { %8557 = vmatpush3.bf16.msra.mxu1 %v8492_v51 }
0x77b4   :  { %v6023_v24 = vpop.f32.mrb[52].mxu1 }
0x77b5   :  { %v6025_v39 = vpop.f32.mrb[53].mxu1  ;;  %v6024_v14 = vadd.f32 %v6023_v24, %v11032_v1 }
0x77b6   :  { %v6026_v47 = vadd.f32 %v6025_v39, %v11025_v54 }
0x77b7   :  { %v6394_v49 = vmul.f32 -1.442695, %v6024_v14 }
0x77b8   :  { %6035 = vrot.lane.b32.xlu1 %v6026_v47, %s8894_s19 }
0x77b9   :  { %8843 = vpow2.f32 %v6394_v49 }
0x77c3   :  { %v8844_v4 = vpop.eup %8843 }
0x77c4   :  { %v6031_v13 = vadd.f32 1.0, %v8844_v4 }
0x77c6   :  { %8845 = vrcp.f32 %v6031_v13 }
0x77d0   :  { %v8846_v2 = vpop.eup %8845 }
0x77d1   :  { %v6041_v31 = vsub.f32 1.0, %v8846_v2  ;;  %v6047_v54 = vmul.f32 %v8846_v2, %v11187_v43 }
0x782a   :  { %v6036_v8 = vpop.permute.xlu1 %6035 }
0x782b   :  { %v6038_v15 = vmul.f32 %v8846_v2, %v6036_v8  ;;  %v4491_v8 = vsub.f32 %v10423_v26, %v10509_v17 }
0x782d   :  { %v6039_v57 = vadd.f32 %v6038_v15, %v6026_v47  ;;  %v4492_v15 = vmul.f32 1.442695, %v4491_v8 }
0x782f   :  { %8847 = vtanh.f32 %v6039_v57  ;;  %v5201_v57 = vsub.f32 %v10868_v59, %v10873_v62 }
0x7839   :  { %v8848_v0 = vpop.eup %8847 }
0x783a   :  { %6043 = vrot.lane.b32.xlu0 %v8848_v0, %s8894_s19  ;;  %v5202_v0 = vmul.f32 1.442695, %v5201_v57 }
0x78ac   :  { %v6044_v22 = vpop.permute.xlu0 %6043 }
0x78ad   :  { %v6046_v29 = vmul.f32 %v6044_v22, %v6041_v31  ;;  %v5911_v31 = vsub.f32 %v11274_v37, %v11279_v56 }
0x78af   :  { %v6048_v18 = vadd.f32 %v6047_v54, %v6046_v29  ;;  %v5912_v22 = vmul.f32 1.442695, %v5911_v31 }
0x78b1   :  { %6050 = vrot.lane.b32.xlu1 %v6048_v18, %s8894_s19 }
0x7923   :  { %v6051_v1 = vpop.permute.xlu1 %6050 }
0x7924   :  { %v6053_v32 = vsel %vm1755_vm4, %v6051_v1, %v11247_v28 }
0x7925   :  { %6153 = vmatmul.mubr.f32.vlgmr.msra.gmra.mrb[54].mxu0 %v6053_v32 }
0x79f8   :  { %v6154_v25 = vpop.f32.mrb[54].mxu0 }
0x79f9   :  { %v6156_v42 = vpop.f32.mrb[55].mxu0  ;;  %v6155_v34 = vadd.f32 %v6154_v25, %v11214_v30  ;;  %v3782_v30 = vsub.f32 %v10303_v3, %v10308_v10 }
0x79fa   :  { %v6157_v44 = vadd.f32 %v6156_v42, %v11207_v6 }
0x79fb   :  { %v6395_v11 = vmul.f32 -1.442695, %v6155_v34  ;;  %v3783_v12 = vmul.f32 1.442695, %v3782_v30 }
0x79fc   :  { %6166 = vrot.lane.b32.xlu0 %v6157_v44, %s8894_s19 }
0x79fd   :  { %8849 = vpow2.f32 %v6395_v11 }
0x7a07   :  { %v8850_v43 = vpop.eup %8849 }
0x7a08   :  { %v6162_v20 = vadd.f32 1.0, %v8850_v43 }
0x7a0a   :  { %8851 = vrcp.f32 %v6162_v20 }
0x7a14   :  { %v8852_v23 = vpop.eup %8851 }
0x7a15   :  { %v6172_v33 = vsub.f32 1.0, %v8852_v23  ;;  %v6178_v6 = vmul.f32 %v8852_v23, %v11247_v28  ;;  %v5556_v28 = vsub.f32 %v10915_v60, %v10990_v63 }
0x7a17   :  { %v5557_v45 = vmul.f32 1.442695, %v5556_v28 }
0x7a6e   :  { %v6167_v58 = vpop.permute.xlu0 %6166 }
0x7a6f   :  { %v6169_v9 = vmul.f32 %v8852_v23, %v6167_v58 }
0x7a71   :  { %v6170_v53 = vadd.f32 %v6169_v9, %v6157_v44 }
0x7a73   :  { %8853 = vtanh.f32 %v6170_v53 }
0x7a74   :  { %8855 = vpow2.f32 %v3783_v12 }
0x7a75   :  { %8857 = vpow2.f32 %v4137_v16 }
0x7a76   :  { %8859 = vpow2.f32 %v4847_v41 }
0x7a77   :  { %8861 = vpow2.f32 %v5557_v45 }
0x7a7d   :  { %v8854_v21 = vpop.eup %8853 }
0x7a7e   :  { %6174 = vrot.lane.b32.xlu1 %v8854_v21, %s8894_s19  ;;  %v8856_v19 = vpop.eup %8855 }
0x7a7f   :  { %v8858_v3 = vpop.eup %8857 }
0x7a80   :  { %v8860_v10 = vpop.eup %8859 }
0x7a81   :  { %v8862_v27 = vpop.eup %8861 }
0x7af0   :  { %v6175_v48 = vpop.permute.xlu1 %6174 }
0x7af1   :  { %v6177_v51 = vmul.f32 %v6175_v48, %v6172_v33 }
0x7af3   :  { %v6179_v40 = vadd.f32 %v6178_v6, %v6177_v51 }
0x7af5   :  { %6190 = vrot.lane.b32.xlu0 %v6179_v40, %s8894_s19 }
0x7b14   :  { %3785 = vadd.xlane.f32.xlu0 %v8856_v19 }
0x7b18   :  { %4139 = vadd.xlane.f32.xlu0 %v8858_v3 }
0x7b1c   :  { %4849 = vadd.xlane.f32.xlu0 %v8860_v10 }
0x7b20   :  { %5559 = vadd.xlane.f32.xlu0 %v8862_v27 }
0x7b67   :  { %v6191_v38 = vpop.permute.xlu0 %6190 }
0x7b68   :  { %7612 = vmatmul.mubr.msk.f32.vlgmr.msra.gmra.mrb[54].mxu1 %vm1755_vm4, %v6191_v38 }
0x7ba1   :  { %v3786_v50 = vpop.xlane.xlu0 %3785 }
0x7ba2   :  { %8863 = vlog2.f32 %v3786_v50 }
0x7ba5   :  { %v4140_v55 = vpop.xlane.xlu0 %4139 }
0x7ba6   :  { %8865 = vlog2.f32 %v4140_v55 }
0x7ba9   :  { %v4850_v5 = vpop.xlane.xlu0 %4849 }
0x7baa   :  { %8867 = vlog2.f32 %v4850_v5 }
0x7bac   :  { %v8864_v60 = vpop.eup %8863 }
0x7bad   :  { %v3788_v63 = vmul.f32 0.6931472, %v8864_v60  ;;  %v5560_v46 = vpop.xlane.xlu0 %5559 }
0x7bae   :  { %8869 = vlog2.f32 %v5560_v46 }
0x7baf   :  { %v3789_v52 = vsub.f32 %v3782_v30, %v3788_v63  ;;  %8871 = vpow2.f32 %v4492_v15 }
0x7bb0   :  { %v8866_v61 = vpop.eup %8865  ;;  %8873 = vpow2.f32 %v5202_v0 }
0x7bb1   :  { %3790 = vst [vmem:[%s11362_s15] sm:$0xff] %v3789_v52  ;;  %v4142_v24 = vmul.f32 0.6931472, %v8866_v61  ;;  %8875 = vpow2.f32 %v5912_v22 }
0x7bb3   :  { %v4143_v39 = vsub.f32 %v4136_v35, %v4142_v24 }
0x7bb4   :  { %v8868_v47 = vpop.eup %8867 }
0x7bb5   :  { %6361 = vst [vmem:[%s11362_s15 + $0x8] sm:$0xff] %v4143_v39  ;;  %v4852_v14 = vmul.f32 0.6931472, %v8868_v47 }
0x7bb7   :  { %v4853_v49 = vsub.f32 %v4846_v7, %v4852_v14 }
0x7bb8   :  { %v8870_v4 = vpop.eup %8869 }
0x7bb9   :  { %6373 = vst [vmem:[%s11362_s15 + $0x18] sm:$0xff] %v4853_v49  ;;  %v5562_v13 = vmul.f32 0.6931472, %v8870_v4  ;;  %v8872_v1 = vpop.eup %8871 }
0x7bba   :  { %v8874_v26 = vpop.eup %8873 }
0x7bbb   :  { %v5563_v2 = vsub.f32 %v5556_v28, %v5562_v13  ;;  %v8876_v17 = vpop.eup %8875 }
0x7bbd   :  { %6385 = vst [vmem:[%s11362_s15 + $0x28] sm:$0xff] %v5563_v2 }
0x7c3b   :  { %v6260_v54 = vpop.f32.mrb[54].mxu1 }
0x7c3c   :  { %v6261_v29 = vadd.f32 %v6260_v54, %v11271_v36  ;;  %v7613_v18 = vpop.f32.mrb[55].mxu1 }
0x7c3e   :  { %6264 = vmax.xlane.f32.xlu1 %v6261_v29 }
0x7c42   :  { %4494 = vadd.xlane.f32.xlu1 %v8872_v1 }
0x7c46   :  { %5204 = vadd.xlane.f32.xlu1 %v8874_v26 }
0x7c4a   :  { %5914 = vadd.xlane.f32.xlu1 %v8876_v17 }
0x7ccb   :  { %v6265_v59 = vpop.xlane.xlu1 %6264 }
0x7ccc   :  { %v6266_v62 = vsub.f32 %v6261_v29, %v6265_v59 }
0x7cce   :  { %v6267_v32 = vmul.f32 1.442695, %v6266_v62 }
0x7ccf   :  { %v4495_v25 = vpop.xlane.xlu1 %4494 }
0x7cd0   :  { %8877 = vpow2.f32 %v6267_v32 }
0x7cd1   :  { %8879 = vlog2.f32 %v4495_v25 }
0x7cd3   :  { %v5205_v37 = vpop.xlane.xlu1 %5204 }
0x7cd4   :  { %8881 = vlog2.f32 %v5205_v37 }
0x7cd7   :  { %v5915_v56 = vpop.xlane.xlu1 %5914 }
0x7cd8   :  { %8883 = vlog2.f32 %v5915_v56 }
0x7cda   :  { %v8878_v36 = vpop.eup %8877 }
0x7cdb   :  { %v8880_v42 = vpop.eup %8879  ;;  %6269 = vadd.xlane.f32.xlu0 %v8878_v36 }
0x7cdc   :  { %v4497_v44 = vmul.f32 0.6931472, %v8880_v42 }
0x7cde   :  { %v8882_v34 = vpop.eup %8881  ;;  %v4498_v11 = vsub.f32 %v4491_v8, %v4497_v44 }
0x7cdf   :  { %v5207_v43 = vmul.f32 0.6931472, %v8882_v34 }
0x7ce0   :  { %6367 = vst [vmem:[%s11362_s15 + $0x10] sm:$0xff] %v4498_v11 }
0x7ce1   :  { %v5208_v20 = vsub.f32 %v5201_v57, %v5207_v43 }
0x7ce2   :  { %v8884_v23 = vpop.eup %8883 }
0x7ce3   :  { %6379 = vst [vmem:[%s11362_s15 + $0x20] sm:$0xff] %v5208_v20  ;;  %v5917_v58 = vmul.f32 0.6931472, %v8884_v23 }
0x7ce5   :  { %v5918_v9 = vsub.f32 %v5911_v31, %v5917_v58 }
0x7ce7   :  { %6391 = vst [vmem:[%s11362_s15 + $0x30] sm:$0xff] %v5918_v9 }
0x7d68   :  { %v6270_v53 = vpop.xlane.xlu0 %6269 }
0x7d69   :  { %8885 = vlog2.f32 %v6270_v53 }
0x7d73   :  { %v8886_v21 = vpop.eup %8885 }
0x7d74   :  { %v6272_v33 = vmul.f32 0.6931472, %v8886_v21 }
0x7d76   :  { %v6273_v48 = vsub.f32 %v6266_v62, %v6272_v33 }
0x7d78   :  { %6397 = vst [vmem:[%s11362_s15 + $0x38] sm:$0xff] %v6273_v48 }

</bundles_post_ra>
